<compile_context>
chip_gen: v7x
topology: tpu7x:2x2x1
jax: 0.10.0
libtpu: 0.0.40
codegen_flags: <defaults>
</compile_context>

<pallas_src>
import jax
import jax.numpy as jnp
from jax import lax
from jax.experimental import pallas as pl
from jax.experimental.pallas import tpu as pltpu

LN_EPS = 1e-5


def _ru128(n):
    return -(-n // 128) * 128


def _pack_offsets(d, f):
    """Lane offsets of the [x | xp | mean | max] segments in the packed H."""
    off_xp = _ru128(d)
    off_mean = off_xp + _ru128(f)
    off_max = off_mean + _ru128(2 * f)
    k_pad = off_max + _ru128(2 * f)
    return off_xp, off_mean, off_max, k_pad


def _layer_norm(h, w, b):
    mu = jnp.mean(h, axis=-1, keepdims=True)
    var = jnp.mean((h - mu) ** 2, axis=-1, keepdims=True)
    return (h - mu) * lax.rsqrt(var + LN_EPS) * w + b


def node_network_kernel(
    # inputs
    x_intt_ref, x_mvtx_ref, start_col_ref, end_col_ref, start_row_ref, end_row_ref,
    w_in_i_ref, w_in_m_ref, small_ref, w_out_i_ref, w_out_m_ref,
    # outputs (VMEM-resident across the layer grid axis -> carried node state)
    h_intt_ref, h_mvtx_ref,
    # scratch (topology caches + packed transform_out operand)
    oh_s_scr, oh_e_scr, oh_sT_scr, oh_eT_scr, inv_i_scr, inv_m_scr,
    hcat_i_scr, hcat_m_scr,
):
    layer = pl.program_id(0)

    ni, out = h_intt_ref.shape
    nm = h_mvtx_ref.shape[0]
    ne = start_col_ref.shape[0]
    d = x_intt_ref.shape[1]
    f = w_in_i_ref.shape[1]            # feature_dim = 2 * out_dim
    f2 = 2 * f
    off_xp, off_mean, off_max, _ = _pack_offsets(d, f)

    # ---- layer 0: seed carried node state + cache topology-static tensors ----
    @pl.when(layer == 0)
    def _():
        h_intt_ref[...] = x_intt_ref[...]
        h_mvtx_ref[...] = x_mvtx_ref[...]
        s_col = start_col_ref[...]                        # [E, 1]
        e_col = end_col_ref[...]
        s_row = start_row_ref[...]                        # [1, E]
        e_row = end_row_ref[...]
        oh_s = (lax.broadcasted_iota(jnp.int32, (ne, ni), 1) == s_col).astype(jnp.float32)
        oh_e = (lax.broadcasted_iota(jnp.int32, (ne, nm), 1) == e_col).astype(jnp.float32)
        oh_sT = (lax.broadcasted_iota(jnp.int32, (ni, ne), 0) == s_row).astype(jnp.float32)
        oh_eT = (lax.broadcasted_iota(jnp.int32, (nm, ne), 0) == e_row).astype(jnp.float32)
        oh_s_scr[...] = oh_s.astype(jnp.bfloat16)         # gather orientation  [E, N]
        oh_e_scr[...] = oh_e.astype(jnp.bfloat16)
        oh_sT_scr[...] = oh_sT.astype(jnp.bfloat16)       # pooling orientation [N, E]
        oh_eT_scr[...] = oh_eT.astype(jnp.bfloat16)
        cnt_i = jnp.sum(oh_sT, axis=-1, keepdims=True)    # exact edge counts
        cnt_m = jnp.sum(oh_eT, axis=-1, keepdims=True)
        inv_i_scr[...] = 1.0 / jnp.maximum(cnt_i, 1.0)    # exact (scatter_mean parity)
        inv_m_scr[...] = 1.0 / jnp.maximum(cnt_m, 1.0)
        hcat_i_scr[...] = jnp.zeros_like(hcat_i_scr)      # zero pad lanes once
        hcat_m_scr[...] = jnp.zeros_like(hcat_m_scr)

    x_i = h_intt_ref[...]                                 # [NI, D]
    x_m = h_mvtx_ref[...]                                 # [NM, D]
    start_col = start_col_ref[...]                        # [E, 1]
    end_col = end_col_ref[...]                            # [E, 1]

    # ---- packed small per-layer parameters: one (8, 2f) sublane tile ----
    small = small_ref[...]
    b_in_i = small[0:1, 0:f]
    b_in_m = small[0:1, f:f2]
    ws_cat = small[1:2, :]                                # aggregator_score weight [1, 2f]
    b_out_i = small[2:3, 0:out]
    b_out_m = small[2:3, out:2 * out]
    ln_w_i = small[2:3, 2 * out:3 * out]
    ln_w_m = small[2:3, 3 * out:4 * out]
    ln_b_i = small[3:4, 0:out]
    ln_b_m = small[3:4, out:2 * out]
    b_score = small[4:5, 0:1]

    # ---- transform_in (Linear, no activation) ----
    xp_i = jnp.dot(x_i, w_in_i_ref[...], preferred_element_type=jnp.float32) + b_in_i
    xp_m = jnp.dot(x_m, w_in_m_ref[...], preferred_element_type=jnp.float32) + b_in_m

    # ---- gather onto edges (bf16 MXU) + lane-concat to a single [E, 2f] ----
    xp_s = jnp.dot(oh_s_scr[...], xp_i.astype(jnp.bfloat16),
                   preferred_element_type=jnp.float32)    # xp_intt[start], [E, f]
    xp_e = jnp.dot(oh_e_scr[...], xp_m.astype(jnp.bfloat16),
                   preferred_element_type=jnp.float32)    # xp_mvtx[end],  [E, f]
    xp_cat = jnp.concatenate([xp_s, xp_e], axis=-1)       # [E, 2f] (full vregs)

    # ---- aggregator score exp(-|Linear(xp_cat)|) via XLU lane reduce ----
    score = jnp.sum(xp_cat * ws_cat, axis=-1, keepdims=True) + b_score
    edges = xp_cat * jnp.exp(-jnp.abs(score))             # [E, 2f]

    # ---- scatter_mean: cached [N, E] one-hots, bf16 MXU, exact reciprocal ----
    edges_bf = edges.astype(jnp.bfloat16)
    mean_i = jnp.dot(oh_sT_scr[...], edges_bf,
                     preferred_element_type=jnp.float32) * inv_i_scr[...]   # [NI, 2f]
    mean_m = jnp.dot(oh_eT_scr[...], edges_bf,
                     preferred_element_type=jnp.float32) * inv_m_scr[...]   # [NM, 2f]

    # ---- scatter_max into zero-initialized `out` (matches the reference) ----
    # Register-resident, unrolled in groups of 8 nodes (full (8, 2f) tiles).
    # TODO(synk): switch the group loop to lax.fori_loop(unroll=True) / edge
    # tiling once node or edge counts grow beyond a few hundred.
    def scatter_max(idx_col, n_rows):
        groups = []
        for g in range(n_rows // 8):
            rows = []
            for r in range(8):
                mask = idx_col == (g * 8 + r)             # [E, 1]
                rows.append(jnp.max(jnp.where(mask, edges, 0.0), axis=0, keepdims=True))
            groups.append(jnp.concatenate(rows, axis=0))
        return jnp.maximum(jnp.concatenate(groups, axis=0), 0.0)   # [N, 2f]

    max_i = scatter_max(start_col, ni)
    max_m = scatter_max(end_col, nm)

    # ---- transform_out: ONE MXU pass over 128-lane-aligned packed H ----
    def transform_out(hcat_scr, x, xp, mean_cat, max_cat, w_out_ref, b_out):
        hcat_scr[:, 0:d] = x
        hcat_scr[:, off_xp:off_xp + f] = xp
        hcat_scr[:, off_mean:off_mean + f2] = mean_cat
        hcat_scr[:, off_max:off_max + f2] = max_cat
        h = jnp.dot(hcat_scr[...], w_out_ref[...],
                    preferred_element_type=jnp.float32) + b_out
        return jnp.maximum(h, 0.0)                        # ReLU

    h_i = transform_out(hcat_i_scr, x_i, xp_i, mean_i, max_i, w_out_i_ref, b_out_i)
    h_m = transform_out(hcat_m_scr, x_m, xp_m, mean_m, max_m, w_out_m_ref, b_out_m)

    # TODO(synk): the reference wires gnn.norm.LayerNorm into gnn.Sequential without a
    # signature (ill-defined: x_mvtx would be passed as `batch`); here we apply per-node
    # LayerNorm(output_dim) independently to each of the two outputs.
    h_intt_ref[...] = _layer_norm(h_i, ln_w_i, ln_b_i)
    h_mvtx_ref[...] = _layer_norm(h_m, ln_w_m, ln_b_m)


def make_node_network_call(n_layers, n_i, n_m, ne, d, out_dim):
    assert n_i % 8 == 0 and n_m % 8 == 0, "node counts must be padded to multiples of 8"
    f = 2 * out_dim
    _, _, _, k_pad = _pack_offsets(d, f)

    def full(shape):
        n = len(shape)
        return pl.BlockSpec(shape, lambda l: (0,) * n)

    def per_layer(shape):
        n = len(shape)
        return pl.BlockSpec((None,) + shape, lambda l: (l,) + (0,) * n)

    # Per-generation VMEM headroom (v7x: 64 MiB, v5e/v6e: 128 MiB).
    try:
        cap = int(pltpu.get_tpu_info().vmem_capacity_bytes)
    except Exception:
        cap = 64 * 1024 * 1024
    vmem_limit = int(min(cap * 3 // 4, 100 * 1024 * 1024))

    return pl.pallas_call(
        node_network_kernel,
        out_shape=(jax.ShapeDtypeStruct((n_i, out_dim), jnp.float32),
                   jax.ShapeDtypeStruct((n_m, out_dim), jnp.float32)),
        grid=(n_layers,),
        in_specs=[
            full((n_i, d)), full((n_m, d)),
            full((ne, 1)), full((ne, 1)), full((1, ne)), full((1, ne)),
            per_layer((d, f)), per_layer((d, f)), per_layer((8, 2 * f)),
            per_layer((k_pad, out_dim)), per_layer((k_pad, out_dim)),
        ],
        out_specs=(full((n_i, out_dim)), full((n_m, out_dim))),
        scratch_shapes=[
            pltpu.VMEM((ne, n_i), jnp.bfloat16), pltpu.VMEM((ne, n_m), jnp.bfloat16),
            pltpu.VMEM((n_i, ne), jnp.bfloat16), pltpu.VMEM((n_m, ne), jnp.bfloat16),
            pltpu.VMEM((n_i, 1), jnp.float32), pltpu.VMEM((n_m, 1), jnp.float32),
            pltpu.VMEM((n_i, k_pad), jnp.float32), pltpu.VMEM((n_m, k_pad), jnp.float32),
        ],
        input_output_aliases={0: 0, 1: 1},   # node state updated in place (d == out_dim)
        compiler_params=pltpu.CompilerParams(
            # TODO(synk): add a 'parallel' node-tile axis for v7x's second TensorCore
            # and edge-tile the dense one-hots once graphs outgrow VMEM.
            dimension_semantics=("arbitrary",),   # layer axis carries the node state
            vmem_limit_bytes=vmem_limit,
        ),
    )


def init_params(key, d, out_dim, n_layers=3):
    """Deterministic synthetic init, packed/stacked for the fused kernel."""
    f = 2 * out_dim
    off_xp, off_mean, off_max, k_pad = _pack_offsets(d, f)

    def lin(k, fan_in, fan_out):
        bound = 1.0 / (fan_in ** 0.5)
        kw, kb = jax.random.split(k)
        w = jax.random.uniform(kw, (fan_in, fan_out), jnp.float32, -bound, bound)
        b = jax.random.uniform(kb, (fan_out,), jnp.float32, -bound, bound)
        return w, b

    def pack_w_out(w_dense):
        # dense rows ordered [x(d) | xp(f) | mean(2f) | max(2f)] -> 128-aligned segments
        wp = jnp.zeros((k_pad, out_dim), jnp.float32)
        wp = wp.at[0:d, :].set(w_dense[0:d])
        wp = wp.at[off_xp:off_xp + f, :].set(w_dense[d:d + f])
        wp = wp.at[off_mean:off_mean + 2 * f, :].set(w_dense[d + f:d + 3 * f])
        wp = wp.at[off_max:off_max + 2 * f, :].set(w_dense[d + 3 * f:d + 5 * f])
        return wp

    w_in_i_l, w_in_m_l, small_l, w_out_i_l, w_out_m_l = [], [], [], [], []
    for layer in range(n_layers):
        keys = jax.random.split(jax.random.fold_in(key, layer), 5)
        w_in_i, b_in_i = lin(keys[0], d, f)
        w_in_m, b_in_m = lin(keys[1], d, f)
        w_score, b_score = lin(keys[2], 2 * f, 1)
        w_out_i_dense, b_out_i = lin(keys[3], d + 5 * f, out_dim)
        w_out_m_dense, b_out_m = lin(keys[4], d + 5 * f, out_dim)
        ln_w = jnp.ones((out_dim,), jnp.float32)
        ln_b = jnp.zeros((out_dim,), jnp.float32)

        small = jnp.zeros((8, 2 * f), jnp.float32)
        small = small.at[0, 0:f].set(b_in_i)
        small = small.at[0, f:2 * f].set(b_in_m)
        small = small.at[1, :].set(w_score[:, 0])                 # score weight [2f]
        small = small.at[2, 0:out_dim].set(b_out_i)
        small = small.at[2, out_dim:2 * out_dim].set(b_out_m)
        small = small.at[2, 2 * out_dim:3 * out_dim].set(ln_w)    # ln_w_intt
        small = small.at[2, 3 * out_dim:4 * out_dim].set(ln_w)    # ln_w_mvtx
        small = small.at[3, 0:out_dim].set(ln_b)                  # ln_b_intt
        small = small.at[3, out_dim:2 * out_dim].set(ln_b)        # ln_b_mvtx
        small = small.at[4, 0].set(b_score[0])

        w_in_i_l.append(w_in_i)
        w_in_m_l.append(w_in_m)
        small_l.append(small)
        w_out_i_l.append(pack_w_out(w_out_i_dense))
        w_out_m_l.append(pack_w_out(w_out_m_dense))

    return dict(
        w_in_i=jnp.stack(w_in_i_l),    # (L, d, f)
        w_in_m=jnp.stack(w_in_m_l),    # (L, d, f)
        small=jnp.stack(small_l),      # (L, 8, 2f)
        w_out_i=jnp.stack(w_out_i_l),  # (L, k_pad, out)
        w_out_m=jnp.stack(w_out_m_l),  # (L, k_pad, out)
    )


def node_network_forward(x_intt, x_mvtx, edge_index, params, out_dim):
    n_i, d = x_intt.shape
    n_m = x_mvtx.shape[0]
    ne = edge_index.shape[1]
    assert d == out_dim, ("NodeNetwork stacks 3 layers of BipartiteLayer(input_dim, output_dim); "
                          "needs input_dim == output_dim")
    n_layers = params["w_in_i"].shape[0]

    # Pad node counts to multiples of 8 so scatter_max / stores use full tiles.
    n_i_p = -(-n_i // 8) * 8
    n_m_p = -(-n_m // 8) * 8
    x_i = jnp.pad(x_intt, ((0, n_i_p - n_i), (0, 0)))
    x_m = jnp.pad(x_mvtx, ((0, n_m_p - n_m), (0, 0)))
    start = edge_index[0].astype(jnp.int32)
    end = edge_index[1].astype(jnp.int32)
    start_col = start.reshape(ne, 1)
    end_col = end.reshape(ne, 1)
    start_row = start.reshape(1, ne)
    end_row = end.reshape(1, ne)

    call = make_node_network_call(n_layers, n_i_p, n_m_p, ne, d, out_dim)
    h_i, h_m = call(x_i, x_m, start_col, end_col, start_row, end_row,
                    params["w_in_i"], params["w_in_m"], params["small"],
                    params["w_out_i"], params["w_out_m"])
    return h_i[:n_i], h_m[:n_m]


if __name__ == "__main__":
    D = OUT = 32
    N_INTT, N_MVTX, E = 16, 24, 64

    key = jax.random.PRNGKey(0)
    k1, k2, k3, k4, kp = jax.random.split(key, 5)
    x_intt = jax.random.normal(k1, (N_INTT, D), jnp.float32)
    x_mvtx = jax.random.normal(k2, (N_MVTX, D), jnp.float32)
    start = jax.random.randint(k3, (E,), 0, N_INTT, jnp.int32)
    end = jax.random.randint(k4, (E,), 0, N_MVTX, jnp.int32)
    edge_index = jnp.stack([start, end], axis=0)

    params = init_params(kp, D, OUT)
    h_intt, h_mvtx = node_network_forward(x_intt, x_mvtx, edge_index, params, OUT)
    jax.block_until_ready((h_intt, h_mvtx))

    assert h_intt.shape == (N_INTT, OUT) and h_mvtx.shape == (N_MVTX, OUT)
    assert bool(jnp.all(jnp.isfinite(h_intt))) and bool(jnp.all(jnp.isfinite(h_mvtx)))
    print("KERNEL_OK")
</pallas_src>

<mosaic_0001>
module attributes {stable_mosaic.version = 11 : i64} {
  func.func @node_network_kernel(%arg0: i32, %arg1: memref<16x32xf32, #tpu.memory_space<vmem>>, %arg2: memref<24x32xf32, #tpu.memory_space<vmem>>, %arg3: memref<64x1xi32, #tpu.memory_space<vmem>>, %arg4: memref<64x1xi32, #tpu.memory_space<vmem>>, %arg5: memref<1x64xi32, #tpu.memory_space<vmem>>, %arg6: memref<1x64xi32, #tpu.memory_space<vmem>>, %arg7: memref<1x32x64xf32, #tpu.memory_space<vmem>>, %arg8: memref<1x32x64xf32, #tpu.memory_space<vmem>>, %arg9: memref<1x8x128xf32, #tpu.memory_space<vmem>>, %arg10: memref<1x512x32xf32, #tpu.memory_space<vmem>>, %arg11: memref<1x512x32xf32, #tpu.memory_space<vmem>>, %arg12: memref<16x32xf32, #tpu.memory_space<vmem>>, %arg13: memref<24x32xf32, #tpu.memory_space<vmem>>, %arg14: memref<64x16xbf16, #tpu.memory_space<vmem>>, %arg15: memref<64x24xbf16, #tpu.memory_space<vmem>>, %arg16: memref<16x64xbf16, #tpu.memory_space<vmem>>, %arg17: memref<24x64xbf16, #tpu.memory_space<vmem>>, %arg18: memref<16x1xf32, #tpu.memory_space<vmem>>, %arg19: memref<24x1xf32, #tpu.memory_space<vmem>>, %arg20: memref<16x512xf32, #tpu.memory_space<vmem>>, %arg21: memref<24x512xf32, #tpu.memory_space<vmem>>) attributes {dimension_semantics = [#tpu.dimension_semantics<arbitrary>], iteration_bounds = array<i64: 3>, scalar_prefetch = 0 : i64, scratch_operands = 8 : i64, tpu.core_type = #tpu.core_type<tc>, window_params = [{pipeline_mode = #tpu.pipeline_mode<synchronous>, transform_indices = @transform_0, window_bounds = array<i64: 16, 32>}, {pipeline_mode = #tpu.pipeline_mode<synchronous>, transform_indices = @transform_1, window_bounds = array<i64: 24, 32>}, {pipeline_mode = #tpu.pipeline_mode<synchronous>, transform_indices = @transform_2, window_bounds = array<i64: 64, 1>}, {pipeline_mode = #tpu.pipeline_mode<synchronous>, transform_indices = @transform_3, window_bounds = array<i64: 64, 1>}, {pipeline_mode = #tpu.pipeline_mode<synchronous>, transform_indices = @transform_4, window_bounds = array<i64: 1, 64>}, {pipeline_mode = #tpu.pipeline_mode<synchronous>, transform_indices = @transform_5, window_bounds = array<i64: 1, 64>}, {transform_indices = @transform_6, window_bounds = array<i64: 1, 32, 64>}, {transform_indices = @transform_7, window_bounds = array<i64: 1, 32, 64>}, {transform_indices = @transform_8, window_bounds = array<i64: 1, 8, 128>}, {transform_indices = @transform_9, window_bounds = array<i64: 1, 512, 32>}, {transform_indices = @transform_10, window_bounds = array<i64: 1, 512, 32>}, {pipeline_mode = #tpu.pipeline_mode<synchronous>, transform_indices = @transform_11, window_bounds = array<i64: 16, 32>}, {pipeline_mode = #tpu.pipeline_mode<synchronous>, transform_indices = @transform_12, window_bounds = array<i64: 24, 32>}]} {
    %c0_i32 = arith.constant 0 : i32
    %0 = arith.cmpi eq, %arg0, %c0_i32 : i32
    %1 = arith.extui %0 : i1 to i32
    %c0_i32_0 = arith.constant 0 : i32
    %2 = arith.cmpi ne, %1, %c0_i32_0 : i32
    scf.if %2 {
      %c0_176 = arith.constant 0 : index
      %c0_177 = arith.constant 0 : index
      %460 = vector.load %arg1[%c0_176, %c0_177] : memref<16x32xf32, #tpu.memory_space<vmem>>, vector<16x32xf32>
      %c0_178 = arith.constant 0 : index
      %c0_179 = arith.constant 0 : index
      %461 = vector.load %arg12[%c0_178, %c0_179] : memref<16x32xf32, #tpu.memory_space<vmem>>, vector<16x32xf32>
      tpu.vector_store %arg12[%c0_178, %c0_179], %460 {strides = array<i32>} : memref<16x32xf32, #tpu.memory_space<vmem>>, vector<16x32xf32>,
      %c0_180 = arith.constant 0 : index
      %c0_181 = arith.constant 0 : index
      %462 = vector.load %arg2[%c0_180, %c0_181] : memref<24x32xf32, #tpu.memory_space<vmem>>, vector<24x32xf32>
      %c0_182 = arith.constant 0 : index
      %c0_183 = arith.constant 0 : index
      %463 = vector.load %arg13[%c0_182, %c0_183] : memref<24x32xf32, #tpu.memory_space<vmem>>, vector<24x32xf32>
      tpu.vector_store %arg13[%c0_182, %c0_183], %462 {strides = array<i32>} : memref<24x32xf32, #tpu.memory_space<vmem>>, vector<24x32xf32>,
      %c0_184 = arith.constant 0 : index
      %c0_185 = arith.constant 0 : index
      %464 = vector.load %arg3[%c0_184, %c0_185] : memref<64x1xi32, #tpu.memory_space<vmem>>, vector<64x1xi32>
      %c0_186 = arith.constant 0 : index
      %c0_187 = arith.constant 0 : index
      %465 = vector.load %arg4[%c0_186, %c0_187] : memref<64x1xi32, #tpu.memory_space<vmem>>, vector<64x1xi32>
      %c0_188 = arith.constant 0 : index
      %c0_189 = arith.constant 0 : index
      %466 = vector.load %arg5[%c0_188, %c0_189] : memref<1x64xi32, #tpu.memory_space<vmem>>, vector<1x64xi32>
      %c0_190 = arith.constant 0 : index
      %c0_191 = arith.constant 0 : index
      %467 = vector.load %arg6[%c0_190, %c0_191] : memref<1x64xi32, #tpu.memory_space<vmem>>, vector<1x64xi32>
      %468 = tpu.iota {dimensions = array<i32: 1>} : vector<64x16xi32>
      %469 = vector.broadcast %464 : vector<64x1xi32> to vector<64x16xi32>
      %470 = arith.cmpi eq, %468, %469 : vector<64x16xi32>
      %471 = arith.extui %470 : vector<64x16xi1> to vector<64x16xi32>
      %472 = arith.sitofp %471 : vector<64x16xi32> to vector<64x16xf32>
      %473 = tpu.iota {dimensions = array<i32: 1>} : vector<64x24xi32>
      %474 = vector.broadcast %465 : vector<64x1xi32> to vector<64x24xi32>
      %475 = arith.cmpi eq, %473, %474 : vector<64x24xi32>
      %476 = arith.extui %475 : vector<64x24xi1> to vector<64x24xi32>
      %477 = arith.sitofp %476 : vector<64x24xi32> to vector<64x24xf32>
      %478 = tpu.iota {dimensions = array<i32: 0>} : vector<16x64xi32>
      %479 = vector.broadcast %466 : vector<1x64xi32> to vector<16x64xi32>
      %480 = arith.cmpi eq, %478, %479 : vector<16x64xi32>
      %481 = arith.extui %480 : vector<16x64xi1> to vector<16x64xi32>
      %482 = arith.sitofp %481 : vector<16x64xi32> to vector<16x64xf32>
      %483 = tpu.iota {dimensions = array<i32: 0>} : vector<24x64xi32>
      %484 = vector.broadcast %467 : vector<1x64xi32> to vector<24x64xi32>
      %485 = arith.cmpi eq, %483, %484 : vector<24x64xi32>
      %486 = arith.extui %485 : vector<24x64xi1> to vector<24x64xi32>
      %487 = arith.sitofp %486 : vector<24x64xi32> to vector<24x64xf32>
      %488 = arith.truncf %472 : vector<64x16xf32> to vector<64x16xbf16>
      %c0_192 = arith.constant 0 : index
      %c0_193 = arith.constant 0 : index
      %489 = vector.load %arg14[%c0_192, %c0_193] : memref<64x16xbf16, #tpu.memory_space<vmem>>, vector<64x16xbf16>
      tpu.vector_store %arg14[%c0_192, %c0_193], %488 {strides = array<i32>} : memref<64x16xbf16, #tpu.memory_space<vmem>>, vector<64x16xbf16>,
      %490 = arith.truncf %477 : vector<64x24xf32> to vector<64x24xbf16>
      %c0_194 = arith.constant 0 : index
      %c0_195 = arith.constant 0 : index
      %491 = vector.load %arg15[%c0_194, %c0_195] : memref<64x24xbf16, #tpu.memory_space<vmem>>, vector<64x24xbf16>
      tpu.vector_store %arg15[%c0_194, %c0_195], %490 {strides = array<i32>} : memref<64x24xbf16, #tpu.memory_space<vmem>>, vector<64x24xbf16>,
      %492 = arith.truncf %482 : vector<16x64xf32> to vector<16x64xbf16>
      %c0_196 = arith.constant 0 : index
      %c0_197 = arith.constant 0 : index
      %493 = vector.load %arg16[%c0_196, %c0_197] : memref<16x64xbf16, #tpu.memory_space<vmem>>, vector<16x64xbf16>
      tpu.vector_store %arg16[%c0_196, %c0_197], %492 {strides = array<i32>} : memref<16x64xbf16, #tpu.memory_space<vmem>>, vector<16x64xbf16>,
      %494 = arith.truncf %487 : vector<24x64xf32> to vector<24x64xbf16>
      %c0_198 = arith.constant 0 : index
      %c0_199 = arith.constant 0 : index
      %495 = vector.load %arg17[%c0_198, %c0_199] : memref<24x64xbf16, #tpu.memory_space<vmem>>, vector<24x64xbf16>
      tpu.vector_store %arg17[%c0_198, %c0_199], %494 {strides = array<i32>} : memref<24x64xbf16, #tpu.memory_space<vmem>>, vector<24x64xbf16>,
      %cst_200 = arith.constant dense<0.000000e+00> : vector<16xf32>
      %496 = vector.multi_reduction <add>, %482, %cst_200 [1] : vector<16x64xf32> to vector<16xf32>
      %497 = vector.shape_cast %496 : vector<16xf32> to vector<16x1xf32>
      %cst_201 = arith.constant dense<0.000000e+00> : vector<24xf32>
      %498 = vector.multi_reduction <add>, %487, %cst_201 [1] : vector<24x64xf32> to vector<24xf32>
      %499 = vector.shape_cast %498 : vector<24xf32> to vector<24x1xf32>
      %cst_202 = arith.constant 1.000000e+00 : f32
      %500 = vector.broadcast %cst_202 : f32 to vector<16x1xf32>
      %501 = arith.maximumf %497, %500 : vector<16x1xf32>
      %cst_203 = arith.constant 1.000000e+00 : f32
      %502 = vector.broadcast %cst_203 : f32 to vector<16x1xf32>
      %503 = arith.divf %502, %501 : vector<16x1xf32>
      %c0_204 = arith.constant 0 : index
      %c0_205 = arith.constant 0 : index
      %504 = vector.load %arg18[%c0_204, %c0_205] : memref<16x1xf32, #tpu.memory_space<vmem>>, vector<16x1xf32>
      tpu.vector_store %arg18[%c0_204, %c0_205], %503 {strides = array<i32>} : memref<16x1xf32, #tpu.memory_space<vmem>>, vector<16x1xf32>,
      %cst_206 = arith.constant 1.000000e+00 : f32
      %505 = vector.broadcast %cst_206 : f32 to vector<24x1xf32>
      %506 = arith.maximumf %499, %505 : vector<24x1xf32>
      %cst_207 = arith.constant 1.000000e+00 : f32
      %507 = vector.broadcast %cst_207 : f32 to vector<24x1xf32>
      %508 = arith.divf %507, %506 : vector<24x1xf32>
      %c0_208 = arith.constant 0 : index
      %c0_209 = arith.constant 0 : index
      %509 = vector.load %arg19[%c0_208, %c0_209] : memref<24x1xf32, #tpu.memory_space<vmem>>, vector<24x1xf32>
      tpu.vector_store %arg19[%c0_208, %c0_209], %508 {strides = array<i32>} : memref<24x1xf32, #tpu.memory_space<vmem>>, vector<24x1xf32>,
      %cst_210 = arith.constant 0.000000e+00 : f32
      %510 = vector.broadcast %cst_210 : f32 to vector<16x512xf32>
      %c0_211 = arith.constant 0 : index
      %c0_212 = arith.constant 0 : index
      %511 = vector.load %arg20[%c0_211, %c0_212] : memref<16x512xf32, #tpu.memory_space<vmem>>, vector<16x512xf32>
      tpu.vector_store %arg20[%c0_211, %c0_212], %510 {strides = array<i32>} : memref<16x512xf32, #tpu.memory_space<vmem>>, vector<16x512xf32>,
      %cst_213 = arith.constant 0.000000e+00 : f32
      %512 = vector.broadcast %cst_213 : f32 to vector<24x512xf32>
      %c0_214 = arith.constant 0 : index
      %c0_215 = arith.constant 0 : index
      %513 = vector.load %arg21[%c0_214, %c0_215] : memref<24x512xf32, #tpu.memory_space<vmem>>, vector<24x512xf32>
      tpu.vector_store %arg21[%c0_214, %c0_215], %512 {strides = array<i32>} : memref<24x512xf32, #tpu.memory_space<vmem>>, vector<24x512xf32>,
    } else {
    }
    %c0 = arith.constant 0 : index
    %c0_1 = arith.constant 0 : index
    %3 = vector.load %arg12[%c0, %c0_1] : memref<16x32xf32, #tpu.memory_space<vmem>>, vector<16x32xf32>
    %c0_2 = arith.constant 0 : index
    %c0_3 = arith.constant 0 : index
    %4 = vector.load %arg13[%c0_2, %c0_3] : memref<24x32xf32, #tpu.memory_space<vmem>>, vector<24x32xf32>
    %c0_4 = arith.constant 0 : index
    %c0_5 = arith.constant 0 : index
    %5 = vector.load %arg3[%c0_4, %c0_5] : memref<64x1xi32, #tpu.memory_space<vmem>>, vector<64x1xi32>
    %c0_6 = arith.constant 0 : index
    %c0_7 = arith.constant 0 : index
    %6 = vector.load %arg4[%c0_6, %c0_7] : memref<64x1xi32, #tpu.memory_space<vmem>>, vector<64x1xi32>
    %c0_8 = arith.constant 0 : index
    %c0_9 = arith.constant 0 : index
    %c0_10 = arith.constant 0 : index
    %7 = vector.load %arg9[%c0_8, %c0_9, %c0_10] : memref<1x8x128xf32, #tpu.memory_space<vmem>>, vector<1x8x128xf32>
    %8 = vector.shape_cast %7 : vector<1x8x128xf32> to vector<8x128xf32>
    %9 = vector.extract_strided_slice %8 {offsets = [0, 0], sizes = [1, 64], strides = [1, 1]} : vector<8x128xf32> to vector<1x64xf32>
    %10 = vector.extract_strided_slice %8 {offsets = [0, 64], sizes = [1, 64], strides = [1, 1]} : vector<8x128xf32> to vector<1x64xf32>
    %11 = vector.extract_strided_slice %8 {offsets = [1, 0], sizes = [1, 128], strides = [1, 1]} : vector<8x128xf32> to vector<1x128xf32>
    %12 = vector.extract_strided_slice %8 {offsets = [2, 0], sizes = [1, 32], strides = [1, 1]} : vector<8x128xf32> to vector<1x32xf32>
    %13 = vector.extract_strided_slice %8 {offsets = [2, 32], sizes = [1, 32], strides = [1, 1]} : vector<8x128xf32> to vector<1x32xf32>
    %14 = vector.extract_strided_slice %8 {offsets = [2, 64], sizes = [1, 32], strides = [1, 1]} : vector<8x128xf32> to vector<1x32xf32>
    %15 = vector.extract_strided_slice %8 {offsets = [2, 96], sizes = [1, 32], strides = [1, 1]} : vector<8x128xf32> to vector<1x32xf32>
    %16 = vector.extract_strided_slice %8 {offsets = [3, 0], sizes = [1, 32], strides = [1, 1]} : vector<8x128xf32> to vector<1x32xf32>
    %17 = vector.extract_strided_slice %8 {offsets = [3, 32], sizes = [1, 32], strides = [1, 1]} : vector<8x128xf32> to vector<1x32xf32>
    %18 = vector.extract_strided_slice %8 {offsets = [4, 0], sizes = [1, 1], strides = [1, 1]} : vector<8x128xf32> to vector<1x1xf32>
    %c0_11 = arith.constant 0 : index
    %c0_12 = arith.constant 0 : index
    %c0_13 = arith.constant 0 : index
    %19 = vector.load %arg7[%c0_11, %c0_12, %c0_13] : memref<1x32x64xf32, #tpu.memory_space<vmem>>, vector<1x32x64xf32>
    %20 = vector.shape_cast %19 : vector<1x32x64xf32> to vector<32x64xf32>
    %cst = arith.constant dense<0.000000e+00> : vector<16x64xf32>
    %21 = tpu.matmul %3, %20, %cst {dimension_numbers = #tpu.dot_dimension_numbers<[1], [0], [0], [1], [0, 0, 1, 1], [], []>} : vector<16x32xf32>, vector<32x64xf32>, vector<16x64xf32> -> vector<16x64xf32>
    %22 = vector.broadcast %9 : vector<1x64xf32> to vector<16x64xf32>
    %23 = arith.addf %21, %22 : vector<16x64xf32>
    %c0_14 = arith.constant 0 : index
    %c0_15 = arith.constant 0 : index
    %c0_16 = arith.constant 0 : index
    %24 = vector.load %arg8[%c0_14, %c0_15, %c0_16] : memref<1x32x64xf32, #tpu.memory_space<vmem>>, vector<1x32x64xf32>
    %25 = vector.shape_cast %24 : vector<1x32x64xf32> to vector<32x64xf32>
    %cst_17 = arith.constant dense<0.000000e+00> : vector<24x64xf32>
    %26 = tpu.matmul %4, %25, %cst_17 {dimension_numbers = #tpu.dot_dimension_numbers<[1], [0], [0], [1], [0, 0, 1, 1], [], []>} : vector<24x32xf32>, vector<32x64xf32>, vector<24x64xf32> -> vector<24x64xf32>
    %27 = vector.broadcast %10 : vector<1x64xf32> to vector<24x64xf32>
    %28 = arith.addf %26, %27 : vector<24x64xf32>
    %c0_18 = arith.constant 0 : index
    %c0_19 = arith.constant 0 : index
    %29 = vector.load %arg14[%c0_18, %c0_19] : memref<64x16xbf16, #tpu.memory_space<vmem>>, vector<64x16xbf16>
    %30 = arith.truncf %23 : vector<16x64xf32> to vector<16x64xbf16>
    %cst_20 = arith.constant dense<0.000000e+00> : vector<64x64xf32>
    %31 = tpu.matmul %29, %30, %cst_20 {dimension_numbers = #tpu.dot_dimension_numbers<[1], [0], [0], [1], [0, 0, 1, 1], [], []>} : vector<64x16xbf16>, vector<16x64xbf16>, vector<64x64xf32> -> vector<64x64xf32>
    %c0_21 = arith.constant 0 : index
    %c0_22 = arith.constant 0 : index
    %32 = vector.load %arg15[%c0_21, %c0_22] : memref<64x24xbf16, #tpu.memory_space<vmem>>, vector<64x24xbf16>
    %33 = arith.truncf %28 : vector<24x64xf32> to vector<24x64xbf16>
    %cst_23 = arith.constant dense<0.000000e+00> : vector<64x64xf32>
    %34 = tpu.matmul %32, %33, %cst_23 {dimension_numbers = #tpu.dot_dimension_numbers<[1], [0], [0], [1], [0, 0, 1, 1], [], []>} : vector<64x24xbf16>, vector<24x64xbf16>, vector<64x64xf32> -> vector<64x64xf32>
    %35 = tpu.concatenate %31, %34 in 1 : vector<64x64xf32>, vector<64x64xf32> -> vector<64x128xf32>
    %36 = vector.broadcast %11 : vector<1x128xf32> to vector<64x128xf32>
    %37 = arith.mulf %35, %36 : vector<64x128xf32>
    %cst_24 = arith.constant dense<0.000000e+00> : vector<64xf32>
    %38 = vector.multi_reduction <add>, %37, %cst_24 [1] : vector<64x128xf32> to vector<64xf32>
    %39 = vector.shape_cast %38 : vector<64xf32> to vector<64x1xf32>
    %40 = vector.broadcast %18 : vector<1x1xf32> to vector<64x1xf32>
    %41 = arith.addf %39, %40 : vector<64x1xf32>
    %42 = math.absf %41 : vector<64x1xf32>
    %cst_25 = arith.constant 0.000000e+00 : f32
    %43 = vector.broadcast %cst_25 : f32 to vector<64x1xf32>
    %44 = arith.subf %43, %42 : vector<64x1xf32>
    %45 = math.exp %44 : vector<64x1xf32>
    %46 = vector.broadcast %45 : vector<64x1xf32> to vector<64x128xf32>
    %47 = arith.mulf %35, %46 : vector<64x128xf32>
    %48 = arith.truncf %47 : vector<64x128xf32> to vector<64x128xbf16>
    %c0_26 = arith.constant 0 : index
    %c0_27 = arith.constant 0 : index
    %49 = vector.load %arg16[%c0_26, %c0_27] : memref<16x64xbf16, #tpu.memory_space<vmem>>, vector<16x64xbf16>
    %cst_28 = arith.constant dense<0.000000e+00> : vector<16x128xf32>
    %50 = tpu.matmul %49, %48, %cst_28 {dimension_numbers = #tpu.dot_dimension_numbers<[1], [0], [0], [1], [0, 0, 1, 1], [], []>} : vector<16x64xbf16>, vector<64x128xbf16>, vector<16x128xf32> -> vector<16x128xf32>
    %c0_29 = arith.constant 0 : index
    %c0_30 = arith.constant 0 : index
    %51 = vector.load %arg18[%c0_29, %c0_30] : memref<16x1xf32, #tpu.memory_space<vmem>>, vector<16x1xf32>
    %52 = vector.broadcast %51 : vector<16x1xf32> to vector<16x128xf32>
    %53 = arith.mulf %50, %52 : vector<16x128xf32>
    %c0_31 = arith.constant 0 : index
    %c0_32 = arith.constant 0 : index
    %54 = vector.load %arg17[%c0_31, %c0_32] : memref<24x64xbf16, #tpu.memory_space<vmem>>, vector<24x64xbf16>
    %cst_33 = arith.constant dense<0.000000e+00> : vector<24x128xf32>
    %55 = tpu.matmul %54, %48, %cst_33 {dimension_numbers = #tpu.dot_dimension_numbers<[1], [0], [0], [1], [0, 0, 1, 1], [], []>} : vector<24x64xbf16>, vector<64x128xbf16>, vector<24x128xf32> -> vector<24x128xf32>
    %c0_34 = arith.constant 0 : index
    %c0_35 = arith.constant 0 : index
    %56 = vector.load %arg19[%c0_34, %c0_35] : memref<24x1xf32, #tpu.memory_space<vmem>>, vector<24x1xf32>
    %57 = vector.broadcast %56 : vector<24x1xf32> to vector<24x128xf32>
    %58 = arith.mulf %55, %57 : vector<24x128xf32>
    %c0_i32_36 = arith.constant 0 : i32
    %59 = vector.broadcast %c0_i32_36 : i32 to vector<64x1xi32>
    %60 = arith.cmpi eq, %5, %59 : vector<64x1xi32>
    %cst_37 = arith.constant 0.000000e+00 : f32
    %61 = vector.shape_cast %60 : vector<64x1xi1> to vector<64x1xi1>
    %62 = vector.broadcast %61 : vector<64x1xi1> to vector<64x128xi1>
    %63 = vector.broadcast %cst_37 : f32 to vector<64x128xf32>
    %64 = arith.select %62, %47, %63 : vector<64x128xi1>, vector<64x128xf32>
    %cst_38 = arith.constant dense<0xFF800000> : vector<128xf32>
    %65 = vector.multi_reduction <maximumf>, %64, %cst_38 [0] : vector<64x128xf32> to vector<128xf32>
    %66 = vector.shape_cast %65 : vector<128xf32> to vector<1x128xf32>
    %c1_i32 = arith.constant 1 : i32
    %67 = vector.broadcast %c1_i32 : i32 to vector<64x1xi32>
    %68 = arith.cmpi eq, %5, %67 : vector<64x1xi32>
    %cst_39 = arith.constant 0.000000e+00 : f32
    %69 = vector.shape_cast %68 : vector<64x1xi1> to vector<64x1xi1>
    %70 = vector.broadcast %69 : vector<64x1xi1> to vector<64x128xi1>
    %71 = vector.broadcast %cst_39 : f32 to vector<64x128xf32>
    %72 = arith.select %70, %47, %71 : vector<64x128xi1>, vector<64x128xf32>
    %cst_40 = arith.constant dense<0xFF800000> : vector<128xf32>
    %73 = vector.multi_reduction <maximumf>, %72, %cst_40 [0] : vector<64x128xf32> to vector<128xf32>
    %74 = vector.shape_cast %73 : vector<128xf32> to vector<1x128xf32>
    %c2_i32 = arith.constant 2 : i32
    %75 = vector.broadcast %c2_i32 : i32 to vector<64x1xi32>
    %76 = arith.cmpi eq, %5, %75 : vector<64x1xi32>
    %cst_41 = arith.constant 0.000000e+00 : f32
    %77 = vector.shape_cast %76 : vector<64x1xi1> to vector<64x1xi1>
    %78 = vector.broadcast %77 : vector<64x1xi1> to vector<64x128xi1>
    %79 = vector.broadcast %cst_41 : f32 to vector<64x128xf32>
    %80 = arith.select %78, %47, %79 : vector<64x128xi1>, vector<64x128xf32>
    %cst_42 = arith.constant dense<0xFF800000> : vector<128xf32>
    %81 = vector.multi_reduction <maximumf>, %80, %cst_42 [0] : vector<64x128xf32> to vector<128xf32>
    %82 = vector.shape_cast %81 : vector<128xf32> to vector<1x128xf32>
    %c3_i32 = arith.constant 3 : i32
    %83 = vector.broadcast %c3_i32 : i32 to vector<64x1xi32>
    %84 = arith.cmpi eq, %5, %83 : vector<64x1xi32>
    %cst_43 = arith.constant 0.000000e+00 : f32
    %85 = vector.shape_cast %84 : vector<64x1xi1> to vector<64x1xi1>
    %86 = vector.broadcast %85 : vector<64x1xi1> to vector<64x128xi1>
    %87 = vector.broadcast %cst_43 : f32 to vector<64x128xf32>
    %88 = arith.select %86, %47, %87 : vector<64x128xi1>, vector<64x128xf32>
    %cst_44 = arith.constant dense<0xFF800000> : vector<128xf32>
    %89 = vector.multi_reduction <maximumf>, %88, %cst_44 [0] : vector<64x128xf32> to vector<128xf32>
    %90 = vector.shape_cast %89 : vector<128xf32> to vector<1x128xf32>
    %c4_i32 = arith.constant 4 : i32
    %91 = vector.broadcast %c4_i32 : i32 to vector<64x1xi32>
    %92 = arith.cmpi eq, %5, %91 : vector<64x1xi32>
    %cst_45 = arith.constant 0.000000e+00 : f32
    %93 = vector.shape_cast %92 : vector<64x1xi1> to vector<64x1xi1>
    %94 = vector.broadcast %93 : vector<64x1xi1> to vector<64x128xi1>
    %95 = vector.broadcast %cst_45 : f32 to vector<64x128xf32>
    %96 = arith.select %94, %47, %95 : vector<64x128xi1>, vector<64x128xf32>
    %cst_46 = arith.constant dense<0xFF800000> : vector<128xf32>
    %97 = vector.multi_reduction <maximumf>, %96, %cst_46 [0] : vector<64x128xf32> to vector<128xf32>
    %98 = vector.shape_cast %97 : vector<128xf32> to vector<1x128xf32>
    %c5_i32 = arith.constant 5 : i32
    %99 = vector.broadcast %c5_i32 : i32 to vector<64x1xi32>
    %100 = arith.cmpi eq, %5, %99 : vector<64x1xi32>
    %cst_47 = arith.constant 0.000000e+00 : f32
    %101 = vector.shape_cast %100 : vector<64x1xi1> to vector<64x1xi1>
    %102 = vector.broadcast %101 : vector<64x1xi1> to vector<64x128xi1>
    %103 = vector.broadcast %cst_47 : f32 to vector<64x128xf32>
    %104 = arith.select %102, %47, %103 : vector<64x128xi1>, vector<64x128xf32>
    %cst_48 = arith.constant dense<0xFF800000> : vector<128xf32>
    %105 = vector.multi_reduction <maximumf>, %104, %cst_48 [0] : vector<64x128xf32> to vector<128xf32>
    %106 = vector.shape_cast %105 : vector<128xf32> to vector<1x128xf32>
    %c6_i32 = arith.constant 6 : i32
    %107 = vector.broadcast %c6_i32 : i32 to vector<64x1xi32>
    %108 = arith.cmpi eq, %5, %107 : vector<64x1xi32>
    %cst_49 = arith.constant 0.000000e+00 : f32
    %109 = vector.shape_cast %108 : vector<64x1xi1> to vector<64x1xi1>
    %110 = vector.broadcast %109 : vector<64x1xi1> to vector<64x128xi1>
    %111 = vector.broadcast %cst_49 : f32 to vector<64x128xf32>
    %112 = arith.select %110, %47, %111 : vector<64x128xi1>, vector<64x128xf32>
    %cst_50 = arith.constant dense<0xFF800000> : vector<128xf32>
    %113 = vector.multi_reduction <maximumf>, %112, %cst_50 [0] : vector<64x128xf32> to vector<128xf32>
    %114 = vector.shape_cast %113 : vector<128xf32> to vector<1x128xf32>
    %c7_i32 = arith.constant 7 : i32
    %115 = vector.broadcast %c7_i32 : i32 to vector<64x1xi32>
    %116 = arith.cmpi eq, %5, %115 : vector<64x1xi32>
    %cst_51 = arith.constant 0.000000e+00 : f32
    %117 = vector.shape_cast %116 : vector<64x1xi1> to vector<64x1xi1>
    %118 = vector.broadcast %117 : vector<64x1xi1> to vector<64x128xi1>
    %119 = vector.broadcast %cst_51 : f32 to vector<64x128xf32>
    %120 = arith.select %118, %47, %119 : vector<64x128xi1>, vector<64x128xf32>
    %cst_52 = arith.constant dense<0xFF800000> : vector<128xf32>
    %121 = vector.multi_reduction <maximumf>, %120, %cst_52 [0] : vector<64x128xf32> to vector<128xf32>
    %122 = vector.shape_cast %121 : vector<128xf32> to vector<1x128xf32>
    %123 = tpu.concatenate %66, %74, %82, %90, %98, %106, %114, %122 in 0 : vector<1x128xf32>, vector<1x128xf32>, vector<1x128xf32>, vector<1x128xf32>, vector<1x128xf32>, vector<1x128xf32>, vector<1x128xf32>, vector<1x128xf32> -> vector<8x128xf32>
    %c8_i32 = arith.constant 8 : i32
    %124 = vector.broadcast %c8_i32 : i32 to vector<64x1xi32>
    %125 = arith.cmpi eq, %5, %124 : vector<64x1xi32>
    %cst_53 = arith.constant 0.000000e+00 : f32
    %126 = vector.shape_cast %125 : vector<64x1xi1> to vector<64x1xi1>
    %127 = vector.broadcast %126 : vector<64x1xi1> to vector<64x128xi1>
    %128 = vector.broadcast %cst_53 : f32 to vector<64x128xf32>
    %129 = arith.select %127, %47, %128 : vector<64x128xi1>, vector<64x128xf32>
    %cst_54 = arith.constant dense<0xFF800000> : vector<128xf32>
    %130 = vector.multi_reduction <maximumf>, %129, %cst_54 [0] : vector<64x128xf32> to vector<128xf32>
    %131 = vector.shape_cast %130 : vector<128xf32> to vector<1x128xf32>
    %c9_i32 = arith.constant 9 : i32
    %132 = vector.broadcast %c9_i32 : i32 to vector<64x1xi32>
    %133 = arith.cmpi eq, %5, %132 : vector<64x1xi32>
    %cst_55 = arith.constant 0.000000e+00 : f32
    %134 = vector.shape_cast %133 : vector<64x1xi1> to vector<64x1xi1>
    %135 = vector.broadcast %134 : vector<64x1xi1> to vector<64x128xi1>
    %136 = vector.broadcast %cst_55 : f32 to vector<64x128xf32>
    %137 = arith.select %135, %47, %136 : vector<64x128xi1>, vector<64x128xf32>
    %cst_56 = arith.constant dense<0xFF800000> : vector<128xf32>
    %138 = vector.multi_reduction <maximumf>, %137, %cst_56 [0] : vector<64x128xf32> to vector<128xf32>
    %139 = vector.shape_cast %138 : vector<128xf32> to vector<1x128xf32>
    %c10_i32 = arith.constant 10 : i32
    %140 = vector.broadcast %c10_i32 : i32 to vector<64x1xi32>
    %141 = arith.cmpi eq, %5, %140 : vector<64x1xi32>
    %cst_57 = arith.constant 0.000000e+00 : f32
    %142 = vector.shape_cast %141 : vector<64x1xi1> to vector<64x1xi1>
    %143 = vector.broadcast %142 : vector<64x1xi1> to vector<64x128xi1>
    %144 = vector.broadcast %cst_57 : f32 to vector<64x128xf32>
    %145 = arith.select %143, %47, %144 : vector<64x128xi1>, vector<64x128xf32>
    %cst_58 = arith.constant dense<0xFF800000> : vector<128xf32>
    %146 = vector.multi_reduction <maximumf>, %145, %cst_58 [0] : vector<64x128xf32> to vector<128xf32>
    %147 = vector.shape_cast %146 : vector<128xf32> to vector<1x128xf32>
    %c11_i32 = arith.constant 11 : i32
    %148 = vector.broadcast %c11_i32 : i32 to vector<64x1xi32>
    %149 = arith.cmpi eq, %5, %148 : vector<64x1xi32>
    %cst_59 = arith.constant 0.000000e+00 : f32
    %150 = vector.shape_cast %149 : vector<64x1xi1> to vector<64x1xi1>
    %151 = vector.broadcast %150 : vector<64x1xi1> to vector<64x128xi1>
    %152 = vector.broadcast %cst_59 : f32 to vector<64x128xf32>
    %153 = arith.select %151, %47, %152 : vector<64x128xi1>, vector<64x128xf32>
    %cst_60 = arith.constant dense<0xFF800000> : vector<128xf32>
    %154 = vector.multi_reduction <maximumf>, %153, %cst_60 [0] : vector<64x128xf32> to vector<128xf32>
    %155 = vector.shape_cast %154 : vector<128xf32> to vector<1x128xf32>
    %c12_i32 = arith.constant 12 : i32
    %156 = vector.broadcast %c12_i32 : i32 to vector<64x1xi32>
    %157 = arith.cmpi eq, %5, %156 : vector<64x1xi32>
    %cst_61 = arith.constant 0.000000e+00 : f32
    %158 = vector.shape_cast %157 : vector<64x1xi1> to vector<64x1xi1>
    %159 = vector.broadcast %158 : vector<64x1xi1> to vector<64x128xi1>
    %160 = vector.broadcast %cst_61 : f32 to vector<64x128xf32>
    %161 = arith.select %159, %47, %160 : vector<64x128xi1>, vector<64x128xf32>
    %cst_62 = arith.constant dense<0xFF800000> : vector<128xf32>
    %162 = vector.multi_reduction <maximumf>, %161, %cst_62 [0] : vector<64x128xf32> to vector<128xf32>
    %163 = vector.shape_cast %162 : vector<128xf32> to vector<1x128xf32>
    %c13_i32 = arith.constant 13 : i32
    %164 = vector.broadcast %c13_i32 : i32 to vector<64x1xi32>
    %165 = arith.cmpi eq, %5, %164 : vector<64x1xi32>
    %cst_63 = arith.constant 0.000000e+00 : f32
    %166 = vector.shape_cast %165 : vector<64x1xi1> to vector<64x1xi1>
    %167 = vector.broadcast %166 : vector<64x1xi1> to vector<64x128xi1>
    %168 = vector.broadcast %cst_63 : f32 to vector<64x128xf32>
    %169 = arith.select %167, %47, %168 : vector<64x128xi1>, vector<64x128xf32>
    %cst_64 = arith.constant dense<0xFF800000> : vector<128xf32>
    %170 = vector.multi_reduction <maximumf>, %169, %cst_64 [0] : vector<64x128xf32> to vector<128xf32>
    %171 = vector.shape_cast %170 : vector<128xf32> to vector<1x128xf32>
    %c14_i32 = arith.constant 14 : i32
    %172 = vector.broadcast %c14_i32 : i32 to vector<64x1xi32>
    %173 = arith.cmpi eq, %5, %172 : vector<64x1xi32>
    %cst_65 = arith.constant 0.000000e+00 : f32
    %174 = vector.shape_cast %173 : vector<64x1xi1> to vector<64x1xi1>
    %175 = vector.broadcast %174 : vector<64x1xi1> to vector<64x128xi1>
    %176 = vector.broadcast %cst_65 : f32 to vector<64x128xf32>
    %177 = arith.select %175, %47, %176 : vector<64x128xi1>, vector<64x128xf32>
    %cst_66 = arith.constant dense<0xFF800000> : vector<128xf32>
    %178 = vector.multi_reduction <maximumf>, %177, %cst_66 [0] : vector<64x128xf32> to vector<128xf32>
    %179 = vector.shape_cast %178 : vector<128xf32> to vector<1x128xf32>
    %c15_i32 = arith.constant 15 : i32
    %180 = vector.broadcast %c15_i32 : i32 to vector<64x1xi32>
    %181 = arith.cmpi eq, %5, %180 : vector<64x1xi32>
    %cst_67 = arith.constant 0.000000e+00 : f32
    %182 = vector.shape_cast %181 : vector<64x1xi1> to vector<64x1xi1>
    %183 = vector.broadcast %182 : vector<64x1xi1> to vector<64x128xi1>
    %184 = vector.broadcast %cst_67 : f32 to vector<64x128xf32>
    %185 = arith.select %183, %47, %184 : vector<64x128xi1>, vector<64x128xf32>
    %cst_68 = arith.constant dense<0xFF800000> : vector<128xf32>
    %186 = vector.multi_reduction <maximumf>, %185, %cst_68 [0] : vector<64x128xf32> to vector<128xf32>
    %187 = vector.shape_cast %186 : vector<128xf32> to vector<1x128xf32>
    %188 = tpu.concatenate %131, %139, %147, %155, %163, %171, %179, %187 in 0 : vector<1x128xf32>, vector<1x128xf32>, vector<1x128xf32>, vector<1x128xf32>, vector<1x128xf32>, vector<1x128xf32>, vector<1x128xf32>, vector<1x128xf32> -> vector<8x128xf32>
    %189 = tpu.concatenate %123, %188 in 0 : vector<8x128xf32>, vector<8x128xf32> -> vector<16x128xf32>
    %cst_69 = arith.constant 0.000000e+00 : f32
    %190 = vector.broadcast %cst_69 : f32 to vector<16x128xf32>
    %191 = arith.maximumf %189, %190 : vector<16x128xf32>
    %c0_i32_70 = arith.constant 0 : i32
    %192 = vector.broadcast %c0_i32_70 : i32 to vector<64x1xi32>
    %193 = arith.cmpi eq, %6, %192 : vector<64x1xi32>
    %cst_71 = arith.constant 0.000000e+00 : f32
    %194 = vector.shape_cast %193 : vector<64x1xi1> to vector<64x1xi1>
    %195 = vector.broadcast %194 : vector<64x1xi1> to vector<64x128xi1>
    %196 = vector.broadcast %cst_71 : f32 to vector<64x128xf32>
    %197 = arith.select %195, %47, %196 : vector<64x128xi1>, vector<64x128xf32>
    %cst_72 = arith.constant dense<0xFF800000> : vector<128xf32>
    %198 = vector.multi_reduction <maximumf>, %197, %cst_72 [0] : vector<64x128xf32> to vector<128xf32>
    %199 = vector.shape_cast %198 : vector<128xf32> to vector<1x128xf32>
    %c1_i32_73 = arith.constant 1 : i32
    %200 = vector.broadcast %c1_i32_73 : i32 to vector<64x1xi32>
    %201 = arith.cmpi eq, %6, %200 : vector<64x1xi32>
    %cst_74 = arith.constant 0.000000e+00 : f32
    %202 = vector.shape_cast %201 : vector<64x1xi1> to vector<64x1xi1>
    %203 = vector.broadcast %202 : vector<64x1xi1> to vector<64x128xi1>
    %204 = vector.broadcast %cst_74 : f32 to vector<64x128xf32>
    %205 = arith.select %203, %47, %204 : vector<64x128xi1>, vector<64x128xf32>
    %cst_75 = arith.constant dense<0xFF800000> : vector<128xf32>
    %206 = vector.multi_reduction <maximumf>, %205, %cst_75 [0] : vector<64x128xf32> to vector<128xf32>
    %207 = vector.shape_cast %206 : vector<128xf32> to vector<1x128xf32>
    %c2_i32_76 = arith.constant 2 : i32
    %208 = vector.broadcast %c2_i32_76 : i32 to vector<64x1xi32>
    %209 = arith.cmpi eq, %6, %208 : vector<64x1xi32>
    %cst_77 = arith.constant 0.000000e+00 : f32
    %210 = vector.shape_cast %209 : vector<64x1xi1> to vector<64x1xi1>
    %211 = vector.broadcast %210 : vector<64x1xi1> to vector<64x128xi1>
    %212 = vector.broadcast %cst_77 : f32 to vector<64x128xf32>
    %213 = arith.select %211, %47, %212 : vector<64x128xi1>, vector<64x128xf32>
    %cst_78 = arith.constant dense<0xFF800000> : vector<128xf32>
    %214 = vector.multi_reduction <maximumf>, %213, %cst_78 [0] : vector<64x128xf32> to vector<128xf32>
    %215 = vector.shape_cast %214 : vector<128xf32> to vector<1x128xf32>
    %c3_i32_79 = arith.constant 3 : i32
    %216 = vector.broadcast %c3_i32_79 : i32 to vector<64x1xi32>
    %217 = arith.cmpi eq, %6, %216 : vector<64x1xi32>
    %cst_80 = arith.constant 0.000000e+00 : f32
    %218 = vector.shape_cast %217 : vector<64x1xi1> to vector<64x1xi1>
    %219 = vector.broadcast %218 : vector<64x1xi1> to vector<64x128xi1>
    %220 = vector.broadcast %cst_80 : f32 to vector<64x128xf32>
    %221 = arith.select %219, %47, %220 : vector<64x128xi1>, vector<64x128xf32>
    %cst_81 = arith.constant dense<0xFF800000> : vector<128xf32>
    %222 = vector.multi_reduction <maximumf>, %221, %cst_81 [0] : vector<64x128xf32> to vector<128xf32>
    %223 = vector.shape_cast %222 : vector<128xf32> to vector<1x128xf32>
    %c4_i32_82 = arith.constant 4 : i32
    %224 = vector.broadcast %c4_i32_82 : i32 to vector<64x1xi32>
    %225 = arith.cmpi eq, %6, %224 : vector<64x1xi32>
    %cst_83 = arith.constant 0.000000e+00 : f32
    %226 = vector.shape_cast %225 : vector<64x1xi1> to vector<64x1xi1>
    %227 = vector.broadcast %226 : vector<64x1xi1> to vector<64x128xi1>
    %228 = vector.broadcast %cst_83 : f32 to vector<64x128xf32>
    %229 = arith.select %227, %47, %228 : vector<64x128xi1>, vector<64x128xf32>
    %cst_84 = arith.constant dense<0xFF800000> : vector<128xf32>
    %230 = vector.multi_reduction <maximumf>, %229, %cst_84 [0] : vector<64x128xf32> to vector<128xf32>
    %231 = vector.shape_cast %230 : vector<128xf32> to vector<1x128xf32>
    %c5_i32_85 = arith.constant 5 : i32
    %232 = vector.broadcast %c5_i32_85 : i32 to vector<64x1xi32>
    %233 = arith.cmpi eq, %6, %232 : vector<64x1xi32>
    %cst_86 = arith.constant 0.000000e+00 : f32
    %234 = vector.shape_cast %233 : vector<64x1xi1> to vector<64x1xi1>
    %235 = vector.broadcast %234 : vector<64x1xi1> to vector<64x128xi1>
    %236 = vector.broadcast %cst_86 : f32 to vector<64x128xf32>
    %237 = arith.select %235, %47, %236 : vector<64x128xi1>, vector<64x128xf32>
    %cst_87 = arith.constant dense<0xFF800000> : vector<128xf32>
    %238 = vector.multi_reduction <maximumf>, %237, %cst_87 [0] : vector<64x128xf32> to vector<128xf32>
    %239 = vector.shape_cast %238 : vector<128xf32> to vector<1x128xf32>
    %c6_i32_88 = arith.constant 6 : i32
    %240 = vector.broadcast %c6_i32_88 : i32 to vector<64x1xi32>
    %241 = arith.cmpi eq, %6, %240 : vector<64x1xi32>
    %cst_89 = arith.constant 0.000000e+00 : f32
    %242 = vector.shape_cast %241 : vector<64x1xi1> to vector<64x1xi1>
    %243 = vector.broadcast %242 : vector<64x1xi1> to vector<64x128xi1>
    %244 = vector.broadcast %cst_89 : f32 to vector<64x128xf32>
    %245 = arith.select %243, %47, %244 : vector<64x128xi1>, vector<64x128xf32>
    %cst_90 = arith.constant dense<0xFF800000> : vector<128xf32>
    %246 = vector.multi_reduction <maximumf>, %245, %cst_90 [0] : vector<64x128xf32> to vector<128xf32>
    %247 = vector.shape_cast %246 : vector<128xf32> to vector<1x128xf32>
    %c7_i32_91 = arith.constant 7 : i32
    %248 = vector.broadcast %c7_i32_91 : i32 to vector<64x1xi32>
    %249 = arith.cmpi eq, %6, %248 : vector<64x1xi32>
    %cst_92 = arith.constant 0.000000e+00 : f32
    %250 = vector.shape_cast %249 : vector<64x1xi1> to vector<64x1xi1>
    %251 = vector.broadcast %250 : vector<64x1xi1> to vector<64x128xi1>
    %252 = vector.broadcast %cst_92 : f32 to vector<64x128xf32>
    %253 = arith.select %251, %47, %252 : vector<64x128xi1>, vector<64x128xf32>
    %cst_93 = arith.constant dense<0xFF800000> : vector<128xf32>
    %254 = vector.multi_reduction <maximumf>, %253, %cst_93 [0] : vector<64x128xf32> to vector<128xf32>
    %255 = vector.shape_cast %254 : vector<128xf32> to vector<1x128xf32>
    %256 = tpu.concatenate %199, %207, %215, %223, %231, %239, %247, %255 in 0 : vector<1x128xf32>, vector<1x128xf32>, vector<1x128xf32>, vector<1x128xf32>, vector<1x128xf32>, vector<1x128xf32>, vector<1x128xf32>, vector<1x128xf32> -> vector<8x128xf32>
    %c8_i32_94 = arith.constant 8 : i32
    %257 = vector.broadcast %c8_i32_94 : i32 to vector<64x1xi32>
    %258 = arith.cmpi eq, %6, %257 : vector<64x1xi32>
    %cst_95 = arith.constant 0.000000e+00 : f32
    %259 = vector.shape_cast %258 : vector<64x1xi1> to vector<64x1xi1>
    %260 = vector.broadcast %259 : vector<64x1xi1> to vector<64x128xi1>
    %261 = vector.broadcast %cst_95 : f32 to vector<64x128xf32>
    %262 = arith.select %260, %47, %261 : vector<64x128xi1>, vector<64x128xf32>
    %cst_96 = arith.constant dense<0xFF800000> : vector<128xf32>
    %263 = vector.multi_reduction <maximumf>, %262, %cst_96 [0] : vector<64x128xf32> to vector<128xf32>
    %264 = vector.shape_cast %263 : vector<128xf32> to vector<1x128xf32>
    %c9_i32_97 = arith.constant 9 : i32
    %265 = vector.broadcast %c9_i32_97 : i32 to vector<64x1xi32>
    %266 = arith.cmpi eq, %6, %265 : vector<64x1xi32>
    %cst_98 = arith.constant 0.000000e+00 : f32
    %267 = vector.shape_cast %266 : vector<64x1xi1> to vector<64x1xi1>
    %268 = vector.broadcast %267 : vector<64x1xi1> to vector<64x128xi1>
    %269 = vector.broadcast %cst_98 : f32 to vector<64x128xf32>
    %270 = arith.select %268, %47, %269 : vector<64x128xi1>, vector<64x128xf32>
    %cst_99 = arith.constant dense<0xFF800000> : vector<128xf32>
    %271 = vector.multi_reduction <maximumf>, %270, %cst_99 [0] : vector<64x128xf32> to vector<128xf32>
    %272 = vector.shape_cast %271 : vector<128xf32> to vector<1x128xf32>
    %c10_i32_100 = arith.constant 10 : i32
    %273 = vector.broadcast %c10_i32_100 : i32 to vector<64x1xi32>
    %274 = arith.cmpi eq, %6, %273 : vector<64x1xi32>
    %cst_101 = arith.constant 0.000000e+00 : f32
    %275 = vector.shape_cast %274 : vector<64x1xi1> to vector<64x1xi1>
    %276 = vector.broadcast %275 : vector<64x1xi1> to vector<64x128xi1>
    %277 = vector.broadcast %cst_101 : f32 to vector<64x128xf32>
    %278 = arith.select %276, %47, %277 : vector<64x128xi1>, vector<64x128xf32>
    %cst_102 = arith.constant dense<0xFF800000> : vector<128xf32>
    %279 = vector.multi_reduction <maximumf>, %278, %cst_102 [0] : vector<64x128xf32> to vector<128xf32>
    %280 = vector.shape_cast %279 : vector<128xf32> to vector<1x128xf32>
    %c11_i32_103 = arith.constant 11 : i32
    %281 = vector.broadcast %c11_i32_103 : i32 to vector<64x1xi32>
    %282 = arith.cmpi eq, %6, %281 : vector<64x1xi32>
    %cst_104 = arith.constant 0.000000e+00 : f32
    %283 = vector.shape_cast %282 : vector<64x1xi1> to vector<64x1xi1>
    %284 = vector.broadcast %283 : vector<64x1xi1> to vector<64x128xi1>
    %285 = vector.broadcast %cst_104 : f32 to vector<64x128xf32>
    %286 = arith.select %284, %47, %285 : vector<64x128xi1>, vector<64x128xf32>
    %cst_105 = arith.constant dense<0xFF800000> : vector<128xf32>
    %287 = vector.multi_reduction <maximumf>, %286, %cst_105 [0] : vector<64x128xf32> to vector<128xf32>
    %288 = vector.shape_cast %287 : vector<128xf32> to vector<1x128xf32>
    %c12_i32_106 = arith.constant 12 : i32
    %289 = vector.broadcast %c12_i32_106 : i32 to vector<64x1xi32>
    %290 = arith.cmpi eq, %6, %289 : vector<64x1xi32>
    %cst_107 = arith.constant 0.000000e+00 : f32
    %291 = vector.shape_cast %290 : vector<64x1xi1> to vector<64x1xi1>
    %292 = vector.broadcast %291 : vector<64x1xi1> to vector<64x128xi1>
    %293 = vector.broadcast %cst_107 : f32 to vector<64x128xf32>
    %294 = arith.select %292, %47, %293 : vector<64x128xi1>, vector<64x128xf32>
    %cst_108 = arith.constant dense<0xFF800000> : vector<128xf32>
    %295 = vector.multi_reduction <maximumf>, %294, %cst_108 [0] : vector<64x128xf32> to vector<128xf32>
    %296 = vector.shape_cast %295 : vector<128xf32> to vector<1x128xf32>
    %c13_i32_109 = arith.constant 13 : i32
    %297 = vector.broadcast %c13_i32_109 : i32 to vector<64x1xi32>
    %298 = arith.cmpi eq, %6, %297 : vector<64x1xi32>
    %cst_110 = arith.constant 0.000000e+00 : f32
    %299 = vector.shape_cast %298 : vector<64x1xi1> to vector<64x1xi1>
    %300 = vector.broadcast %299 : vector<64x1xi1> to vector<64x128xi1>
    %301 = vector.broadcast %cst_110 : f32 to vector<64x128xf32>
    %302 = arith.select %300, %47, %301 : vector<64x128xi1>, vector<64x128xf32>
    %cst_111 = arith.constant dense<0xFF800000> : vector<128xf32>
    %303 = vector.multi_reduction <maximumf>, %302, %cst_111 [0] : vector<64x128xf32> to vector<128xf32>
    %304 = vector.shape_cast %303 : vector<128xf32> to vector<1x128xf32>
    %c14_i32_112 = arith.constant 14 : i32
    %305 = vector.broadcast %c14_i32_112 : i32 to vector<64x1xi32>
    %306 = arith.cmpi eq, %6, %305 : vector<64x1xi32>
    %cst_113 = arith.constant 0.000000e+00 : f32
    %307 = vector.shape_cast %306 : vector<64x1xi1> to vector<64x1xi1>
    %308 = vector.broadcast %307 : vector<64x1xi1> to vector<64x128xi1>
    %309 = vector.broadcast %cst_113 : f32 to vector<64x128xf32>
    %310 = arith.select %308, %47, %309 : vector<64x128xi1>, vector<64x128xf32>
    %cst_114 = arith.constant dense<0xFF800000> : vector<128xf32>
    %311 = vector.multi_reduction <maximumf>, %310, %cst_114 [0] : vector<64x128xf32> to vector<128xf32>
    %312 = vector.shape_cast %311 : vector<128xf32> to vector<1x128xf32>
    %c15_i32_115 = arith.constant 15 : i32
    %313 = vector.broadcast %c15_i32_115 : i32 to vector<64x1xi32>
    %314 = arith.cmpi eq, %6, %313 : vector<64x1xi32>
    %cst_116 = arith.constant 0.000000e+00 : f32
    %315 = vector.shape_cast %314 : vector<64x1xi1> to vector<64x1xi1>
    %316 = vector.broadcast %315 : vector<64x1xi1> to vector<64x128xi1>
    %317 = vector.broadcast %cst_116 : f32 to vector<64x128xf32>
    %318 = arith.select %316, %47, %317 : vector<64x128xi1>, vector<64x128xf32>
    %cst_117 = arith.constant dense<0xFF800000> : vector<128xf32>
    %319 = vector.multi_reduction <maximumf>, %318, %cst_117 [0] : vector<64x128xf32> to vector<128xf32>
    %320 = vector.shape_cast %319 : vector<128xf32> to vector<1x128xf32>
    %321 = tpu.concatenate %264, %272, %280, %288, %296, %304, %312, %320 in 0 : vector<1x128xf32>, vector<1x128xf32>, vector<1x128xf32>, vector<1x128xf32>, vector<1x128xf32>, vector<1x128xf32>, vector<1x128xf32>, vector<1x128xf32> -> vector<8x128xf32>
    %c16_i32 = arith.constant 16 : i32
    %322 = vector.broadcast %c16_i32 : i32 to vector<64x1xi32>
    %323 = arith.cmpi eq, %6, %322 : vector<64x1xi32>
    %cst_118 = arith.constant 0.000000e+00 : f32
    %324 = vector.shape_cast %323 : vector<64x1xi1> to vector<64x1xi1>
    %325 = vector.broadcast %324 : vector<64x1xi1> to vector<64x128xi1>
    %326 = vector.broadcast %cst_118 : f32 to vector<64x128xf32>
    %327 = arith.select %325, %47, %326 : vector<64x128xi1>, vector<64x128xf32>
    %cst_119 = arith.constant dense<0xFF800000> : vector<128xf32>
    %328 = vector.multi_reduction <maximumf>, %327, %cst_119 [0] : vector<64x128xf32> to vector<128xf32>
    %329 = vector.shape_cast %328 : vector<128xf32> to vector<1x128xf32>
    %c17_i32 = arith.constant 17 : i32
    %330 = vector.broadcast %c17_i32 : i32 to vector<64x1xi32>
    %331 = arith.cmpi eq, %6, %330 : vector<64x1xi32>
    %cst_120 = arith.constant 0.000000e+00 : f32
    %332 = vector.shape_cast %331 : vector<64x1xi1> to vector<64x1xi1>
    %333 = vector.broadcast %332 : vector<64x1xi1> to vector<64x128xi1>
    %334 = vector.broadcast %cst_120 : f32 to vector<64x128xf32>
    %335 = arith.select %333, %47, %334 : vector<64x128xi1>, vector<64x128xf32>
    %cst_121 = arith.constant dense<0xFF800000> : vector<128xf32>
    %336 = vector.multi_reduction <maximumf>, %335, %cst_121 [0] : vector<64x128xf32> to vector<128xf32>
    %337 = vector.shape_cast %336 : vector<128xf32> to vector<1x128xf32>
    %c18_i32 = arith.constant 18 : i32
    %338 = vector.broadcast %c18_i32 : i32 to vector<64x1xi32>
    %339 = arith.cmpi eq, %6, %338 : vector<64x1xi32>
    %cst_122 = arith.constant 0.000000e+00 : f32
    %340 = vector.shape_cast %339 : vector<64x1xi1> to vector<64x1xi1>
    %341 = vector.broadcast %340 : vector<64x1xi1> to vector<64x128xi1>
    %342 = vector.broadcast %cst_122 : f32 to vector<64x128xf32>
    %343 = arith.select %341, %47, %342 : vector<64x128xi1>, vector<64x128xf32>
    %cst_123 = arith.constant dense<0xFF800000> : vector<128xf32>
    %344 = vector.multi_reduction <maximumf>, %343, %cst_123 [0] : vector<64x128xf32> to vector<128xf32>
    %345 = vector.shape_cast %344 : vector<128xf32> to vector<1x128xf32>
    %c19_i32 = arith.constant 19 : i32
    %346 = vector.broadcast %c19_i32 : i32 to vector<64x1xi32>
    %347 = arith.cmpi eq, %6, %346 : vector<64x1xi32>
    %cst_124 = arith.constant 0.000000e+00 : f32
    %348 = vector.shape_cast %347 : vector<64x1xi1> to vector<64x1xi1>
    %349 = vector.broadcast %348 : vector<64x1xi1> to vector<64x128xi1>
    %350 = vector.broadcast %cst_124 : f32 to vector<64x128xf32>
    %351 = arith.select %349, %47, %350 : vector<64x128xi1>, vector<64x128xf32>
    %cst_125 = arith.constant dense<0xFF800000> : vector<128xf32>
    %352 = vector.multi_reduction <maximumf>, %351, %cst_125 [0] : vector<64x128xf32> to vector<128xf32>
    %353 = vector.shape_cast %352 : vector<128xf32> to vector<1x128xf32>
    %c20_i32 = arith.constant 20 : i32
    %354 = vector.broadcast %c20_i32 : i32 to vector<64x1xi32>
    %355 = arith.cmpi eq, %6, %354 : vector<64x1xi32>
    %cst_126 = arith.constant 0.000000e+00 : f32
    %356 = vector.shape_cast %355 : vector<64x1xi1> to vector<64x1xi1>
    %357 = vector.broadcast %356 : vector<64x1xi1> to vector<64x128xi1>
    %358 = vector.broadcast %cst_126 : f32 to vector<64x128xf32>
    %359 = arith.select %357, %47, %358 : vector<64x128xi1>, vector<64x128xf32>
    %cst_127 = arith.constant dense<0xFF800000> : vector<128xf32>
    %360 = vector.multi_reduction <maximumf>, %359, %cst_127 [0] : vector<64x128xf32> to vector<128xf32>
    %361 = vector.shape_cast %360 : vector<128xf32> to vector<1x128xf32>
    %c21_i32 = arith.constant 21 : i32
    %362 = vector.broadcast %c21_i32 : i32 to vector<64x1xi32>
    %363 = arith.cmpi eq, %6, %362 : vector<64x1xi32>
    %cst_128 = arith.constant 0.000000e+00 : f32
    %364 = vector.shape_cast %363 : vector<64x1xi1> to vector<64x1xi1>
    %365 = vector.broadcast %364 : vector<64x1xi1> to vector<64x128xi1>
    %366 = vector.broadcast %cst_128 : f32 to vector<64x128xf32>
    %367 = arith.select %365, %47, %366 : vector<64x128xi1>, vector<64x128xf32>
    %cst_129 = arith.constant dense<0xFF800000> : vector<128xf32>
    %368 = vector.multi_reduction <maximumf>, %367, %cst_129 [0] : vector<64x128xf32> to vector<128xf32>
    %369 = vector.shape_cast %368 : vector<128xf32> to vector<1x128xf32>
    %c22_i32 = arith.constant 22 : i32
    %370 = vector.broadcast %c22_i32 : i32 to vector<64x1xi32>
    %371 = arith.cmpi eq, %6, %370 : vector<64x1xi32>
    %cst_130 = arith.constant 0.000000e+00 : f32
    %372 = vector.shape_cast %371 : vector<64x1xi1> to vector<64x1xi1>
    %373 = vector.broadcast %372 : vector<64x1xi1> to vector<64x128xi1>
    %374 = vector.broadcast %cst_130 : f32 to vector<64x128xf32>
    %375 = arith.select %373, %47, %374 : vector<64x128xi1>, vector<64x128xf32>
    %cst_131 = arith.constant dense<0xFF800000> : vector<128xf32>
    %376 = vector.multi_reduction <maximumf>, %375, %cst_131 [0] : vector<64x128xf32> to vector<128xf32>
    %377 = vector.shape_cast %376 : vector<128xf32> to vector<1x128xf32>
    %c23_i32 = arith.constant 23 : i32
    %378 = vector.broadcast %c23_i32 : i32 to vector<64x1xi32>
    %379 = arith.cmpi eq, %6, %378 : vector<64x1xi32>
    %cst_132 = arith.constant 0.000000e+00 : f32
    %380 = vector.shape_cast %379 : vector<64x1xi1> to vector<64x1xi1>
    %381 = vector.broadcast %380 : vector<64x1xi1> to vector<64x128xi1>
    %382 = vector.broadcast %cst_132 : f32 to vector<64x128xf32>
    %383 = arith.select %381, %47, %382 : vector<64x128xi1>, vector<64x128xf32>
    %cst_133 = arith.constant dense<0xFF800000> : vector<128xf32>
    %384 = vector.multi_reduction <maximumf>, %383, %cst_133 [0] : vector<64x128xf32> to vector<128xf32>
    %385 = vector.shape_cast %384 : vector<128xf32> to vector<1x128xf32>
    %386 = tpu.concatenate %329, %337, %345, %353, %361, %369, %377, %385 in 0 : vector<1x128xf32>, vector<1x128xf32>, vector<1x128xf32>, vector<1x128xf32>, vector<1x128xf32>, vector<1x128xf32>, vector<1x128xf32>, vector<1x128xf32> -> vector<8x128xf32>
    %387 = tpu.concatenate %256, %321, %386 in 0 : vector<8x128xf32>, vector<8x128xf32>, vector<8x128xf32> -> vector<24x128xf32>
    %cst_134 = arith.constant 0.000000e+00 : f32
    %388 = vector.broadcast %cst_134 : f32 to vector<24x128xf32>
    %389 = arith.maximumf %387, %388 : vector<24x128xf32>
    %c0_135 = arith.constant 0 : index
    %c0_136 = arith.constant 0 : index
    %390 = vector.load %arg20[%c0_135, %c0_136] : memref<16x512xf32, #tpu.memory_space<vmem>>, vector<16x32xf32>
    tpu.vector_store %arg20[%c0_135, %c0_136], %3 {strides = array<i32>} : memref<16x512xf32, #tpu.memory_space<vmem>>, vector<16x32xf32>,
    %c0_137 = arith.constant 0 : index
    %c128 = arith.constant 128 : index
    %391 = vector.load %arg20[%c0_137, %c128] : memref<16x512xf32, #tpu.memory_space<vmem>>, vector<16x64xf32>
    tpu.vector_store %arg20[%c0_137, %c128], %23 {strides = array<i32>} : memref<16x512xf32, #tpu.memory_space<vmem>>, vector<16x64xf32>,
    %c0_138 = arith.constant 0 : index
    %c256 = arith.constant 256 : index
    %392 = vector.load %arg20[%c0_138, %c256] : memref<16x512xf32, #tpu.memory_space<vmem>>, vector<16x128xf32>
    tpu.vector_store %arg20[%c0_138, %c256], %53 {strides = array<i32>} : memref<16x512xf32, #tpu.memory_space<vmem>>, vector<16x128xf32>,
    %c0_139 = arith.constant 0 : index
    %c384 = arith.constant 384 : index
    %393 = vector.load %arg20[%c0_139, %c384] : memref<16x512xf32, #tpu.memory_space<vmem>>, vector<16x128xf32>
    tpu.vector_store %arg20[%c0_139, %c384], %191 {strides = array<i32>} : memref<16x512xf32, #tpu.memory_space<vmem>>, vector<16x128xf32>,
    %c0_140 = arith.constant 0 : index
    %c0_141 = arith.constant 0 : index
    %394 = vector.load %arg20[%c0_140, %c0_141] : memref<16x512xf32, #tpu.memory_space<vmem>>, vector<16x512xf32>
    %c0_142 = arith.constant 0 : index
    %c0_143 = arith.constant 0 : index
    %c0_144 = arith.constant 0 : index
    %395 = vector.load %arg10[%c0_142, %c0_143, %c0_144] : memref<1x512x32xf32, #tpu.memory_space<vmem>>, vector<1x512x32xf32>
    %396 = vector.shape_cast %395 : vector<1x512x32xf32> to vector<512x32xf32>
    %cst_145 = arith.constant dense<0.000000e+00> : vector<16x32xf32>
    %397 = tpu.matmul %394, %396, %cst_145 {dimension_numbers = #tpu.dot_dimension_numbers<[1], [0], [0], [1], [0, 0, 1, 1], [], []>} : vector<16x512xf32>, vector<512x32xf32>, vector<16x32xf32> -> vector<16x32xf32>
    %398 = vector.broadcast %12 : vector<1x32xf32> to vector<16x32xf32>
    %399 = arith.addf %397, %398 : vector<16x32xf32>
    %cst_146 = arith.constant 0.000000e+00 : f32
    %400 = vector.broadcast %cst_146 : f32 to vector<16x32xf32>
    %401 = arith.maximumf %399, %400 : vector<16x32xf32>
    %c0_147 = arith.constant 0 : index
    %c0_148 = arith.constant 0 : index
    %402 = vector.load %arg21[%c0_147, %c0_148] : memref<24x512xf32, #tpu.memory_space<vmem>>, vector<24x32xf32>
    tpu.vector_store %arg21[%c0_147, %c0_148], %4 {strides = array<i32>} : memref<24x512xf32, #tpu.memory_space<vmem>>, vector<24x32xf32>,
    %c0_149 = arith.constant 0 : index
    %c128_150 = arith.constant 128 : index
    %403 = vector.load %arg21[%c0_149, %c128_150] : memref<24x512xf32, #tpu.memory_space<vmem>>, vector<24x64xf32>
    tpu.vector_store %arg21[%c0_149, %c128_150], %28 {strides = array<i32>} : memref<24x512xf32, #tpu.memory_space<vmem>>, vector<24x64xf32>,
    %c0_151 = arith.constant 0 : index
    %c256_152 = arith.constant 256 : index
    %404 = vector.load %arg21[%c0_151, %c256_152] : memref<24x512xf32, #tpu.memory_space<vmem>>, vector<24x128xf32>
    tpu.vector_store %arg21[%c0_151, %c256_152], %58 {strides = array<i32>} : memref<24x512xf32, #tpu.memory_space<vmem>>, vector<24x128xf32>,
    %c0_153 = arith.constant 0 : index
    %c384_154 = arith.constant 384 : index
    %405 = vector.load %arg21[%c0_153, %c384_154] : memref<24x512xf32, #tpu.memory_space<vmem>>, vector<24x128xf32>
    tpu.vector_store %arg21[%c0_153, %c384_154], %389 {strides = array<i32>} : memref<24x512xf32, #tpu.memory_space<vmem>>, vector<24x128xf32>,
    %c0_155 = arith.constant 0 : index
    %c0_156 = arith.constant 0 : index
    %406 = vector.load %arg21[%c0_155, %c0_156] : memref<24x512xf32, #tpu.memory_space<vmem>>, vector<24x512xf32>
    %c0_157 = arith.constant 0 : index
    %c0_158 = arith.constant 0 : index
    %c0_159 = arith.constant 0 : index
    %407 = vector.load %arg11[%c0_157, %c0_158, %c0_159] : memref<1x512x32xf32, #tpu.memory_space<vmem>>, vector<1x512x32xf32>
    %408 = vector.shape_cast %407 : vector<1x512x32xf32> to vector<512x32xf32>
    %cst_160 = arith.constant dense<0.000000e+00> : vector<24x32xf32>
    %409 = tpu.matmul %406, %408, %cst_160 {dimension_numbers = #tpu.dot_dimension_numbers<[1], [0], [0], [1], [0, 0, 1, 1], [], []>} : vector<24x512xf32>, vector<512x32xf32>, vector<24x32xf32> -> vector<24x32xf32>
    %410 = vector.broadcast %13 : vector<1x32xf32> to vector<24x32xf32>
    %411 = arith.addf %409, %410 : vector<24x32xf32>
    %cst_161 = arith.constant 0.000000e+00 : f32
    %412 = vector.broadcast %cst_161 : f32 to vector<24x32xf32>
    %413 = arith.maximumf %411, %412 : vector<24x32xf32>
    %cst_162 = arith.constant dense<0.000000e+00> : vector<16xf32>
    %414 = vector.multi_reduction <add>, %401, %cst_162 [1] : vector<16x32xf32> to vector<16xf32>
    %415 = vector.shape_cast %414 : vector<16xf32> to vector<16x1xf32>
    %cst_163 = arith.constant 3.200000e+01 : f32
    %416 = vector.broadcast %cst_163 : f32 to vector<16x1xf32>
    %417 = arith.divf %415, %416 : vector<16x1xf32>
    %418 = vector.broadcast %417 : vector<16x1xf32> to vector<16x32xf32>
    %419 = arith.subf %401, %418 : vector<16x32xf32>
    %420 = arith.mulf %419, %419 : vector<16x32xf32>
    %cst_164 = arith.constant dense<0.000000e+00> : vector<16xf32>
    %421 = vector.multi_reduction <add>, %420, %cst_164 [1] : vector<16x32xf32> to vector<16xf32>
    %422 = vector.shape_cast %421 : vector<16xf32> to vector<16x1xf32>
    %cst_165 = arith.constant 3.200000e+01 : f32
    %423 = vector.broadcast %cst_165 : f32 to vector<16x1xf32>
    %424 = arith.divf %422, %423 : vector<16x1xf32>
    %425 = vector.broadcast %417 : vector<16x1xf32> to vector<16x32xf32>
    %426 = arith.subf %401, %425 : vector<16x32xf32>
    %cst_166 = arith.constant 9.99999974E-6 : f32
    %427 = vector.broadcast %cst_166 : f32 to vector<16x1xf32>
    %428 = arith.addf %424, %427 : vector<16x1xf32>
    %429 = math.rsqrt %428 : vector<16x1xf32>
    %430 = vector.broadcast %429 : vector<16x1xf32> to vector<16x32xf32>
    %431 = arith.mulf %426, %430 : vector<16x32xf32>
    %432 = vector.broadcast %14 : vector<1x32xf32> to vector<16x32xf32>
    %433 = arith.mulf %431, %432 : vector<16x32xf32>
    %434 = vector.broadcast %16 : vector<1x32xf32> to vector<16x32xf32>
    %435 = arith.addf %433, %434 : vector<16x32xf32>
    %c0_167 = arith.constant 0 : index
    %c0_168 = arith.constant 0 : index
    %436 = vector.load %arg12[%c0_167, %c0_168] : memref<16x32xf32, #tpu.memory_space<vmem>>, vector<16x32xf32>
    tpu.vector_store %arg12[%c0_167, %c0_168], %435 {strides = array<i32>} : memref<16x32xf32, #tpu.memory_space<vmem>>, vector<16x32xf32>,
    %cst_169 = arith.constant dense<0.000000e+00> : vector<24xf32>
    %437 = vector.multi_reduction <add>, %413, %cst_169 [1] : vector<24x32xf32> to vector<24xf32>
    %438 = vector.shape_cast %437 : vector<24xf32> to vector<24x1xf32>
    %cst_170 = arith.constant 3.200000e+01 : f32
    %439 = vector.broadcast %cst_170 : f32 to vector<24x1xf32>
    %440 = arith.divf %438, %439 : vector<24x1xf32>
    %441 = vector.broadcast %440 : vector<24x1xf32> to vector<24x32xf32>
    %442 = arith.subf %413, %441 : vector<24x32xf32>
    %443 = arith.mulf %442, %442 : vector<24x32xf32>
    %cst_171 = arith.constant dense<0.000000e+00> : vector<24xf32>
    %444 = vector.multi_reduction <add>, %443, %cst_171 [1] : vector<24x32xf32> to vector<24xf32>
    %445 = vector.shape_cast %444 : vector<24xf32> to vector<24x1xf32>
    %cst_172 = arith.constant 3.200000e+01 : f32
    %446 = vector.broadcast %cst_172 : f32 to vector<24x1xf32>
    %447 = arith.divf %445, %446 : vector<24x1xf32>
    %448 = vector.broadcast %440 : vector<24x1xf32> to vector<24x32xf32>
    %449 = arith.subf %413, %448 : vector<24x32xf32>
    %cst_173 = arith.constant 9.99999974E-6 : f32
    %450 = vector.broadcast %cst_173 : f32 to vector<24x1xf32>
    %451 = arith.addf %447, %450 : vector<24x1xf32>
    %452 = math.rsqrt %451 : vector<24x1xf32>
    %453 = vector.broadcast %452 : vector<24x1xf32> to vector<24x32xf32>
    %454 = arith.mulf %449, %453 : vector<24x32xf32>
    %455 = vector.broadcast %15 : vector<1x32xf32> to vector<24x32xf32>
    %456 = arith.mulf %454, %455 : vector<24x32xf32>
    %457 = vector.broadcast %17 : vector<1x32xf32> to vector<24x32xf32>
    %458 = arith.addf %456, %457 : vector<24x32xf32>
    %c0_174 = arith.constant 0 : index
    %c0_175 = arith.constant 0 : index
    %459 = vector.load %arg13[%c0_174, %c0_175] : memref<24x32xf32, #tpu.memory_space<vmem>>, vector<24x32xf32>
    tpu.vector_store %arg13[%c0_174, %c0_175], %458 {strides = array<i32>} : memref<24x32xf32, #tpu.memory_space<vmem>>, vector<24x32xf32>,
    return
  }
  func.func @transform_0(%arg0: i32) -> (i32, i32) {
    %c0_i32 = arith.constant 0 : i32
    %c0_i32_0 = arith.constant 0 : i32
    %c0_i32_1 = arith.constant 0 : i32
    return %c0_i32, %c0_i32_0 : i32, i32
  }
  func.func @transform_1(%arg0: i32) -> (i32, i32) {
    %c0_i32 = arith.constant 0 : i32
    %c0_i32_0 = arith.constant 0 : i32
    %c0_i32_1 = arith.constant 0 : i32
    return %c0_i32, %c0_i32_0 : i32, i32
  }
  func.func @transform_2(%arg0: i32) -> (i32, i32) {
    %c0_i32 = arith.constant 0 : i32
    %c0_i32_0 = arith.constant 0 : i32
    %c0_i32_1 = arith.constant 0 : i32
    return %c0_i32, %c0_i32_0 : i32, i32
  }
  func.func @transform_3(%arg0: i32) -> (i32, i32) {
    %c0_i32 = arith.constant 0 : i32
    %c0_i32_0 = arith.constant 0 : i32
    %c0_i32_1 = arith.constant 0 : i32
    return %c0_i32, %c0_i32_0 : i32, i32
  }
  func.func @transform_4(%arg0: i32) -> (i32, i32) {
    %c0_i32 = arith.constant 0 : i32
    %c0_i32_0 = arith.constant 0 : i32
    %c0_i32_1 = arith.constant 0 : i32
    return %c0_i32, %c0_i32_0 : i32, i32
  }
  func.func @transform_5(%arg0: i32) -> (i32, i32) {
    %c0_i32 = arith.constant 0 : i32
    %c0_i32_0 = arith.constant 0 : i32
    %c0_i32_1 = arith.constant 0 : i32
    return %c0_i32, %c0_i32_0 : i32, i32
  }
  func.func @transform_6(%arg0: i32) -> (i32, i32, i32) {
    %c0_i32 = arith.constant 0 : i32
    %c0_i32_0 = arith.constant 0 : i32
    %c0_i32_1 = arith.constant 0 : i32
    return %arg0, %c0_i32, %c0_i32_0 : i32, i32, i32
  }
  func.func @transform_7(%arg0: i32) -> (i32, i32, i32) {
    %c0_i32 = arith.constant 0 : i32
    %c0_i32_0 = arith.constant 0 : i32
    %c0_i32_1 = arith.constant 0 : i32
    return %arg0, %c0_i32, %c0_i32_0 : i32, i32, i32
  }
  func.func @transform_8(%arg0: i32) -> (i32, i32, i32) {
    %c0_i32 = arith.constant 0 : i32
    %c0_i32_0 = arith.constant 0 : i32
    %c0_i32_1 = arith.constant 0 : i32
    return %arg0, %c0_i32, %c0_i32_0 : i32, i32, i32
  }
  func.func @transform_9(%arg0: i32) -> (i32, i32, i32) {
    %c0_i32 = arith.constant 0 : i32
    %c0_i32_0 = arith.constant 0 : i32
    %c0_i32_1 = arith.constant 0 : i32
    return %arg0, %c0_i32, %c0_i32_0 : i32, i32, i32
  }
  func.func @transform_10(%arg0: i32) -> (i32, i32, i32) {
    %c0_i32 = arith.constant 0 : i32
    %c0_i32_0 = arith.constant 0 : i32
    %c0_i32_1 = arith.constant 0 : i32
    return %arg0, %c0_i32, %c0_i32_0 : i32, i32, i32
  }
  func.func @transform_11(%arg0: i32) -> (i32, i32) {
    %c0_i32 = arith.constant 0 : i32
    %c0_i32_0 = arith.constant 0 : i32
    %c0_i32_1 = arith.constant 0 : i32
    return %c0_i32, %c0_i32_0 : i32, i32
  }
  func.func @transform_12(%arg0: i32) -> (i32, i32) {
    %c0_i32 = arith.constant 0 : i32
    %c0_i32_0 = arith.constant 0 : i32
    %c0_i32_1 = arith.constant 0 : i32
    return %c0_i32, %c0_i32_0 : i32, i32
  }
}

</mosaic_0001>

<bundles_post_ra>
// kernel: tpu_custom_call.1
= control target key start
LH: loop header
LB: loop body
LE: loop exit
PB: predicated region body
PF: predicated region fallthrough
CT: control target
= control target key end

     0   :  { %s10601_s0 = inlined_call_operand.hbm [shape: f32[16,32], index: 0, kind: input, shape index: {}, may-alias: {0,11}]   ;;  %s10602_s1 = inlined_call_operand.hbm [shape: f32[24,32], index: 1, kind: input, shape index: {}, may-alias: {1,12}]   ;;  %s10603_s2 = inlined_call_operand.vmem [shape: s32[64,1], index: 2, kind: input, shape index: {}]   ;;  %s10604_s3 = inlined_call_operand.vmem [shape: s32[64,1], index: 3, kind: input, shape index: {}]   ;;  %s10605_s4 = inlined_call_operand.vmem [shape: s32[1,64], index: 4, kind: input, shape index: {}]   ;;  %s10606_s5 = inlined_call_operand.vmem [shape: s32[1,64], index: 5, kind: input, shape index: {}]   ;;  %s10607_s6 = inlined_call_operand.vmem [shape: f32[3,32,64], index: 6, kind: input, shape index: {}]   ;;  %s10608_s7 = inlined_call_operand.vmem [shape: f32[3,32,64], index: 7, kind: input, shape index: {}]   ;;  %s10609_s8 = inlined_call_operand.vmem [shape: f32[3,8,128], index: 8, kind: input, shape index: {}]   ;;  %s10610_s9 = inlined_call_operand.vmem [shape: f32[3,512,32], index: 9, kind: input, shape index: {}]   ;;  %s10611_s10 = inlined_call_operand.vmem [shape: f32[3,512,32], index: 10, kind: input, shape index: {}]   ;;  %s10612_s11 = inlined_call_operand.hbm [shape: f32[16,32], index: 11, kind: output, shape index: {0}, may-alias: {0,11}]   ;;  %s10613_s12 = inlined_call_operand.hbm [shape: f32[24,32], index: 12, kind: output, shape index: {1}, may-alias: {1,12}]  }
   0x1   :  { %11002 = sst [smem:[#allocation262_spill]] %s10601_s0 }
   0x2   :  { %18 = vsyncpa [#allocation11], 0 }
   0x3   :  { %19 = vsyncpa [#allocation14], 0 }
   0x4   :  { %20 = vsyncpa [#allocation12], 0 }
   0x5   :  { %21 = vsyncpa [#allocation17], 0  ;;  %s5802_s21 = smov 0  }
   0x6 LB: > { %s5808_s22 = sadd.s32 4294967295, %s5718_s21   ;;  %p4984_p0 = scmp.ge.s32.totalorder %s5718_s21, 1  ;;  %s5718_s21 = sphi %s5802_s21, %s27_s21  }
   0x7   : > { %p330_p1 = scmp.lt.s32.totalorder %s5718_s21, 4  ;;  %s5720_s23 = smov [#allocation10]  }
   0x8   : > { %s342_s24 = sshll.u32 %s5720_s23, 4  ;;  %p10614_p4 = scmp.eq.s32.totalorder %s5808_s22, 0  ;;  %s343_s24 = int_to_ptr.vmem [resolvable:$true] %s342_s24 }
   0x9   : > { %p5813_p3 = pnand %p4984_p0, %p330_p1  ;;  %s5721_s26 = smov [#allocation13]  }
   0xa   : > { %s355_s27 = sshll.u32 %s5721_s26, 4  ;;  %s11005_s0 = sld [smem:[#allocation262_spill]]  ;;  %s5826_s27 = int_to_ptr.vmem [resolvable:$true] %s355_s27 }
   0xb   : > { %s11003_s25 = scalar_select %p5813_p3, 1, 0 }
   0xc   : > { %p5484_p5 = pneg %p5813_p3 }
   0xe   : > { %p5822_p6 = pnand %p10614_p4, %p5484_p5 }
  0x10   : > { %s5588_s13 = scalar_lea.hbm %s11005_s0, 256  ;;  %p5590_p8 = pneg %p5822_p6 }
  0x11   : > { %p5589_p7 = scmp.ne.s32.totalorder %s11005_s0, %s5588_s13  ;;  %p5595_p11 = scmp.lt.u32.totalorder %s5588_s13, %s11005_s0 }
  0x13   : > { %p5591_p9 = pnand %p5590_p8, %p5589_p7 }
  0x15   : > { %p5592_p10 = pneg %p5591_p9 }
  0x17   : > { %p5597_p12 = pnand %p5595_p11, %p5592_p10 }
  0x19   : > { %5600 = shalt.err (!%p5597_p12)
}
  0x1a   : > { %s5601_s18 = scalar_lea.vmem %s343_s24, 256  ;;  %p5609_p5 = scmp.lt.s32.totalorder %s343_s24, %s343_s24 }
  0x1b   : > { %p5602_p13 = scmp.ne.s32.totalorder %s343_s24, %s5601_s18  ;;  %p5610_p2 = scmp.lt.s32.totalorder %s5601_s18, %s5601_s18 }
  0x1d   : > { %p5604_p0 = pnand %p5602_p13, %p5590_p8  ;;  %p5611_p4 = por %p5610_p2, %p5609_p5 }
  0x1f   : > { %p5605_p1 = pneg %p5604_p0 }
  0x21   : > { %p5612_p3 = pnand %p5611_p4, %p5605_p1 }
  0x23   : > { %5615 = shalt.err (!%p5612_p3)
}
  0x24   : > { %s5722_s19 = smov 128   ;;  %s5723_s20 = smov 8  }
  0x25   : > { %5487 = dma.hbm_to_vmem [thread:$0]  (!%p5822_p6), %s11005_s0, 256, %s343_s24, [#allocation11], %s5722_s19, %s5722_s19, %s5723_s20  }
  0x26   : > { %s5616_s13 = scalar_lea.hbm %s10602_s1, 384 }
  0x27   : > { %p5617_p7 = scmp.ne.s32.totalorder %s10602_s1, %s5616_s13  ;;  %p5623_p4 = scmp.lt.u32.totalorder %s5616_s13, %s10602_s1 }
  0x29   : > { %p5619_p2 = pnand %p5617_p7, %p5590_p8 }
  0x2b   : > { %p5620_p3 = pneg %p5619_p2 }
  0x2d   : > { %p5625_p9 = pnand %p5623_p4, %p5620_p3 }
  0x2f   : > { %5628 = shalt.err (!%p5625_p9)
}
  0x30   : > { %s5629_s24 = scalar_lea.vmem %s5826_s27, 384  ;;  %p5637_p13 = scmp.lt.s32.totalorder %s5826_s27, %s5826_s27 }
  0x31   : > { %p5630_p10 = scmp.ne.s32.totalorder %s5826_s27, %s5629_s24  ;;  %p5638_p0 = scmp.lt.s32.totalorder %s5629_s24, %s5629_s24 }
  0x33   : > { %p5632_p11 = pnand %p5630_p10, %p5590_p8  ;;  %p5639_p1 = por %p5638_p0, %p5637_p13 }
  0x35   : > { %p5633_p12 = pneg %p5632_p11 }
  0x37   : > { %p5640_p5 = pnand %p5639_p1, %p5633_p12 }
  0x39   : > { %5643 = shalt.err (!%p5640_p5)
}
  0x3a   : > { %5490 = dma.hbm_to_vmem [thread:$0]  (!%p5822_p6), %s10602_s1, 384, %s5826_s27, [#allocation14], %s5722_s19, %s5722_s19, %s5723_s20  }
  0x3b   : > { %p11006_p7 = scmp.ne.s32.totalorder %s11003_s25, 0 }
  0x3d   : > { %422 = sbr.rel (%p11006_p7) target bundleno = 2246 (0x8c6), region = 64 }
  0x44   : > { %p11007_p2 = scmp.eq.s32.totalorder %s5808_s22, 0 }
  0x46   : > { %5701 = dma.done.wait (%p11007_p2), [#allocation11], 256   ;;  %p11008_p8 = pmov %p11007_p2 }
  0x47   : > { %p11009_p3 = pmov %p11007_p2 }
  0x48   : > { %5703 = vsyncadd (%p11008_p8), [#allocation11], 4294967040 }
  0x49   : > { %5705 = dma.done.wait (%p11009_p3), [#allocation14], 384   ;;  %p11010_p4 = pmov %p11007_p2 }
  0x4a   : > { %p482_p9 = scmp.lt.s32.totalorder %s5808_s22, 2  ;;  %p11011_p6 = scmp.ne.s32.totalorder %s5808_s22, 0 }
  0x4b   : > { %5707 = vsyncadd (%p11010_p4), [#allocation14], 4294966912  ;;  %v540_v0 = vlaneseq (!%p11011_p6)  ;;  %v5004_v1 = vld [vmem:[%s10606_s5] ss:$0 sm:$0xff] (!%p11011_p6)  ;;  %v5724_v2 = vmov (!%p11011_p6), 0.0   ;;  %v5725_v5 = vmov (!%p11011_p6), 0  }
  0x4c   : > { %s483_s28 = scalar_select %p482_p9, %s5808_s22, 2 }
  0x4d   : > { %510 = sbr.rel (%p11011_p6) target bundleno = 281 (0x119), region = 76  ;;  %739 = vst [vmem:[#allocation8] sm:$0xff] (!%p11011_p6), %v5724_v2  ;;  %740 = vst [vmem:[#allocation8 + $0x8] sm:$0xff] (!%p11011_p6), %v5724_v2  ;;  %v5001_v3 = vld [vmem:[%s10605_s4] ss:$0 sm:$0xff] (!%p11011_p6)  ;;  %v607_v4 = vshrl.u32 (!%p11011_p6), %v540_v0, 7  ;;  %5524 = vset.pattern.permute.xlu1 (!%p11011_p6), %v5725_v5  ;;  %5525 = vset.pattern.permute.xlu0 (!%p11011_p6), %v5725_v5 }
  0x4e   : > { %s5051_s27 = sshll.u32 %s483_s28, 5  ;;  %s4995_s19 = sshll.u32 %s483_s28, 3  ;;  %743 = vst [vmem:[#allocation8 + $0x20] sm:$0xff] (!%p11011_p6), %v5724_v2  ;;  %744 = vst [vmem:[#allocation8 + $0x28] sm:$0xff] (!%p11011_p6), %v5724_v2  ;;  %vm684_vm0 = vcmask (!%p11011_p6), 523264   ;;  %vm699_vm3 = vcmask (!%p11011_p6), 519168  }
  0x4f   : > { %s5890_s26 = scalar_lea.vmem %s10607_s6, %s5051_s27  ;;  %s5895_s13 = scalar_lea.vmem %s10608_s7, %s5051_s27  ;;  %746 = vst [vmem:[#allocation8 + $0x38] sm:$0xff] (!%p11011_p6), %v5724_v2  ;;  %747 = vst [vmem:[#allocation9] sm:$0xff] (!%p11011_p6), %v5724_v2  ;;  %vm624_vm1 = vcmp.eq.s32.totalorder (!%p11011_p6), %v607_v4, %v5004_v1  ;;  %vm613_vm2 = vcmp.eq.s32.totalorder (!%p11011_p6), %v607_v4, %v5001_v3  ;;  %v608_v6 = vadd.s32 (!%p11011_p6), 8, %v607_v4  ;;  %v619_v7 = vadd.s32 (!%p11011_p6), 16, %v607_v4  ;;  %v522_v22 = vld [vmem:[%s10603_s2] sm:$0xff] (!%p11011_p6)  ;;  %v524_v23 = vld [vmem:[%s10603_s2 + $0x10] sm:$0xff] (!%p11011_p6) }
  0x50   : > { %s5900_s16 = scalar_lea.vmem %s10609_s8, %s4995_s19  ;;  %s5053_s17 = sshll.u32 %s483_s28, 9  ;;  %748 = vst [vmem:[#allocation9 + $0x8] sm:$0xff] (!%p11011_p6), %v5724_v2  ;;  %750 = vst [vmem:[#allocation9 + $0x18] sm:$0xff] (!%p11011_p6), %v5724_v2  ;;  %v5005_v8 = vsel (!%p11011_p6), %vm624_vm1, 1.0, %v5724_v2  ;;  %v5002_v9 = vsel (!%p11011_p6), %vm613_vm2, 1.0, %v5724_v2  ;;  %v525_v24 = vld [vmem:[%s10603_s2 + $0x18] sm:$0xff] (!%p11011_p6) }
  0x51   : > { %s5905_s23 = scalar_lea.vmem %s10610_s9, %s5053_s17  ;;  %s5910_s20 = scalar_lea.vmem %s10611_s10, %s5053_s17  ;;  %751 = vst [vmem:[#allocation9 + $0x20] sm:$0xff] (!%p11011_p6), %v5724_v2  ;;  %752 = vst [vmem:[#allocation9 + $0x28] sm:$0xff] (!%p11011_p6), %v5724_v2  ;;  %v709_v10 = vsel (!%p11011_p6), %vm684_vm0, %v5005_v8, 0.0  ;;  %v5055_v11 = vpack.c.bf16 (!%p11011_p6), %v5005_v8, %v5005_v8  ;;  %v703_v12 = vsel (!%p11011_p6), %vm684_vm0, %v5002_v9, 0.0  ;;  %vm625_vm4 = vcmp.eq.s32.totalorder (!%p11011_p6), %v608_v6, %v5004_v1  ;;  %v523_v25 = vld [vmem:[%s10603_s2 + $0x8] sm:$0xff] (!%p11011_p6)  ;;  %v526_v26 = vld [vmem:[%s10603_s2 + $0x20] sm:$0xff] (!%p11011_p6) }
  0x52   : > { %755 = vst [vmem:[#allocation9 + $0x40] sm:$0xff] (!%p11011_p6), %v5724_v2  ;;  %756 = vst [vmem:[#allocation9 + $0x48] sm:$0xff] (!%p11011_p6), %v5724_v2  ;;  %710 = vadd.xlane.f32.xlu1 (!%p11011_p6), %v709_v10  ;;  %704 = vadd.xlane.f32.xlu0 (!%p11011_p6), %v703_v12  ;;  %v5006_v13 = vsel (!%p11011_p6), %vm625_vm4, 1.0, %v5724_v2  ;;  %vm614_vm5 = vcmp.eq.s32.totalorder (!%p11011_p6), %v608_v6, %v5001_v3  ;;  %vm626_vm6 = vcmp.eq.s32.totalorder (!%p11011_p6), %v619_v7, %v5004_v1  ;;  %v532_v27 = vld [vmem:[%s10604_s3 + $0x10] sm:$0xff] (!%p11011_p6)  ;;  %v527_v28 = vld [vmem:[%s10603_s2 + $0x28] sm:$0xff] (!%p11011_p6)  ;;  %vm513_vm7 = vcmask (!%p11011_p6), 261120  }
  0x53   : > { %700 = vst.msk [vmem:[#allocation5] sm:$0xf] (!%p11011_p6), %vm699_vm3, %v5055_v11  ;;  %v5056_v14 = vpack.c.bf16 (!%p11011_p6), %v5006_v13, %v5006_v13  ;;  %v712_v15 = vsel (!%p11011_p6), %vm684_vm0, %v5006_v13, 0.0  ;;  %v5003_v16 = vsel (!%p11011_p6), %vm614_vm5, 1.0, %v5724_v2  ;;  %v5007_v17 = vsel (!%p11011_p6), %vm626_vm6, 1.0, %v5724_v2  ;;  %v534_v29 = vld [vmem:[%s10604_s3 + $0x20] sm:$0xff] (!%p11011_p6) }
  0x54   : > { %v706_v18 = vsel %vm684_vm0, %v5003_v16, 0.0  ;;  %v683_v19 = vpack.c.bf16 %v5003_v16, %v5002_v9  ;;  %v5057_v20 = vpack.c.bf16 %v5007_v17, %v5007_v17  ;;  %v715_v21 = vsel %vm684_vm0, %v5007_v17, 0.0  ;;  %v528_v30 = vld [vmem:[%s10603_s2 + $0x30] sm:$0xff]  ;;  %v529_v32 = vld [vmem:[%s10603_s2 + $0x38] sm:$0xff]  ;;  %v530_v33 = vld [vmem:[%s10604_s3] sm:$0xff] }
  0x55   : > { %701 = vst.msk [vmem:[#allocation5 + $0x4] sm:$0xf] %vm699_vm3, %v5056_v14  ;;  %v536_v31 = vld [vmem:[%s10604_s3 + $0x30] sm:$0xff]  ;;  %v531_v34 = vld [vmem:[%s10604_s3 + $0x8] sm:$0xff]  ;;  %v533_v35 = vld [vmem:[%s10604_s3 + $0x18] sm:$0xff]  ;;  %v5996_v54 = vand.u32 127, %v540_v0 }
  0x56   : > { %713 = vadd.xlane.f32.xlu1 %v712_v15  ;;  %707 = vadd.xlane.f32.xlu0 %v706_v18  ;;  %685 = vst.msk [vmem:[#allocation4] sm:$0xff] %vm684_vm0, %v683_v19  ;;  %v535_v36 = vld [vmem:[%s10604_s3 + $0x28] sm:$0xff]  ;;  %v537_v37 = vld [vmem:[%s10604_s3 + $0x38] sm:$0xff]  ;;  %vm724_vm8 = vcmask 7168   ;;  %vm653_vm11 = vcmask 130048   ;;  %vm678_vm4 = vcmask 195584  }
  0x57   : > { %702 = vst.msk [vmem:[#allocation5 + $0x8] sm:$0xf] %vm699_vm3, %v5057_v20  ;;  %v511_v38 = vld [vmem:[#allocation10] sm:$0xff]  ;;  %v512_v39 = vld [vmem:[#allocation10 + $0x8] sm:$0xff]  ;;  %v516_v40 = vld [vmem:[#allocation13] sm:$0xff] }
  0x58   : > { %514 = vst.msk [vmem:[#allocation15] sm:$0xff] %vm513_vm7, %v511_v38  ;;  %515 = vst.msk [vmem:[#allocation15 + $0x8] sm:$0xff] %vm513_vm7, %v512_v39  ;;  %v517_v41 = vld [vmem:[#allocation13 + $0x8] sm:$0xff]  ;;  %v518_v42 = vld [vmem:[#allocation13 + $0x10] sm:$0xff] }
  0x59   : > { %519 = vst.msk [vmem:[#allocation16] sm:$0xff] %vm513_vm7, %v516_v40  ;;  %520 = vst.msk [vmem:[#allocation16 + $0x8] sm:$0xff] %vm513_vm7, %v517_v41 }
  0x5a   : > { %716 = vadd.xlane.f32.xlu0 %v715_v21  ;;  %521 = vst.msk [vmem:[#allocation16 + $0x10] sm:$0xff] %vm513_vm7, %v518_v42 }
  0x67   : > { %543 = vperm.xlu1 %5524, %v522_v22  }
  0x6b   : > { %549 = vperm.xlu1 %5524, %v524_v23  }
  0x6f   : > { %552 = vperm.xlu1 %5524, %v525_v24  }
  0x70   : > { %546 = vperm.xlu0 %5525, %v523_v25  }
  0x73   : > { %555 = vperm.xlu1 %5524, %v526_v26  }
  0x74   : > { %581 = vperm.xlu0 %5525, %v532_v27  }
  0x77   : > { %558 = vperm.xlu1 %5524, %v527_v28  }
  0x78   : > { %587 = vperm.xlu0 %5525, %v534_v29  }
  0x7b   : > { %561 = vperm.xlu1 %5524, %v528_v30  }
  0x7c   : > { %593 = vperm.xlu0 %5525, %v536_v31  }
  0x7f   : > { %564 = vperm.xlu1 %5524, %v529_v32  }
  0x83   : > { %575 = vperm.xlu1 %5524, %v530_v33  }
  0x87   : > { %578 = vperm.xlu1 %5524, %v531_v34  }
  0x8b   : > { %584 = vperm.xlu1 %5524, %v533_v35  }
  0x8f   : > { %590 = vperm.xlu1 %5524, %v535_v36  }
  0x93   : > { %596 = vperm.xlu1 %5524, %v537_v37  }
  0xdf   : > { %v711_v43 = vpop.xlane.xlu1 %710  ;;  %v705_v44 = vpop.xlane.xlu0 %704 }
  0xe0   : > { %v727_v45 = vmax.f32 %v711_v43, 1.0  ;;  %v718_v46 = vmax.f32 %v705_v44, 1.0 }
  0xe2   : > { %5526 = vrcp.f32 %v727_v45 }
  0xe3   : > { %v714_v47 = vpop.xlane.xlu1 %713  ;;  %5528 = vrcp.f32 %v718_v46  ;;  %v708_v48 = vpop.xlane.xlu0 %707 }
  0xe4   : > { %v728_v49 = vmax.f32 %v714_v47, 1.0  ;;  %v719_v50 = vmax.f32 %v708_v48, 1.0 }
  0xe6   : > { %5530 = vrcp.f32 %v728_v49 }
  0xe7   : > { %5532 = vrcp.f32 %v719_v50  ;;  %v544_v51 = vpop.permute.xlu1 %543  ;;  %v717_v52 = vpop.xlane.xlu0 %716 }
  0xe8   : > { %v729_v53 = vmax.f32 %v717_v52, 1.0  ;;  %vm566_vm9 = vcmp.eq.s32.totalorder %v5996_v54, %v544_v51 }
  0xe9   : > { %v5008_v62 = vsel %vm566_vm9, 1.0, %v5724_v2 }
  0xea   : > { %5534 = vrcp.f32 %v729_v53 }
  0xeb   : > { %v550_v55 = vpop.permute.xlu1 %549 }
  0xec   : > { %v5527_v56 = vpop.eup %5526  ;;  %vm568_vm10 = vcmp.eq.s32.totalorder %v5996_v54, %v550_v55 }
  0xed   : > { %v5529_v57 = vpop.eup %5528  ;;  %736 = vst.msk [vmem:[#allocation7] sm:$0xff] %vm724_vm8, %v5527_v56  ;;  %v5010_v63 = vsel %vm568_vm10, 1.0, %v5724_v2 }
  0xee   : > { %725 = vst.msk [vmem:[#allocation6] sm:$0xff] %vm724_vm8, %v5529_v57 }
  0xef   : > { %v547_v58 = vpop.permute.xlu0 %546  ;;  %v553_v59 = vpop.permute.xlu1 %552 }
  0xf0   : > { %v5531_v60 = vpop.eup %5530  ;;  %vm567_vm12 = vcmp.eq.s32.totalorder %v5996_v54, %v547_v58  ;;  %vm569_vm13 = vcmp.eq.s32.totalorder %v5996_v54, %v553_v59 }
  0xf1   : > { %v5533_v61 = vpop.eup %5532  ;;  %737 = vst.msk [vmem:[#allocation7 + $0x8] sm:$0xff] %vm724_vm8, %v5531_v60  ;;  %v5009_v0 = vsel %vm567_vm12, 1.0, %v5724_v2  ;;  %v5011_v1 = vsel %vm569_vm13, 1.0, %v5724_v2 }
  0xf2   : > { %726 = vst.msk [vmem:[#allocation6 + $0x8] sm:$0xff] %vm724_vm8, %v5533_v61  ;;  %v649_v3 = vpack.c.bf16 %v5009_v0, %v5008_v62  ;;  %v650_v4 = vpack.c.bf16 %v5011_v1, %v5010_v63 }
  0xf3   : > { %v556_v5 = vpop.permute.xlu1 %555  ;;  %v582_v16 = vpop.permute.xlu0 %581 }
  0xf4   : > { %v5535_v6 = vpop.eup %5534  ;;  %654 = vst.msk [vmem:[#allocation2] sm:$0xff] %vm653_vm11, %v649_v3  ;;  %655 = vst.msk [vmem:[#allocation2 + $0x8] sm:$0xff] %vm653_vm11, %v650_v4  ;;  %vm570_vm14 = vcmp.eq.s32.totalorder %v5996_v54, %v556_v5  ;;  %vm600_vm5 = vcmp.eq.s32.totalorder %v5996_v54, %v582_v16 }
  0xf5   : > { %738 = vst.msk [vmem:[#allocation7 + $0x10] sm:$0xff] %vm724_vm8, %v5535_v6  ;;  %v5012_v8 = vsel %vm570_vm14, 1.0, %v5724_v2  ;;  %v5018_v24 = vsel %vm600_vm5, 1.0, %v5724_v2 }
  0xf7   : > { %v559_v7 = vpop.permute.xlu1 %558  ;;  %v588_v19 = vpop.permute.xlu0 %587 }
  0xf8   : > { %vm571_vm15 = vcmp.eq.s32.totalorder %v5996_v54, %v559_v7  ;;  %vm602_vm7 = vcmp.eq.s32.totalorder %v5996_v54, %v588_v19 }
  0xf9   : > { %v5013_v9 = vsel %vm571_vm15, 1.0, %v5724_v2  ;;  %v5020_v29 = vsel %vm602_vm7, 1.0, %v5724_v2 }
  0xfa   : > { %v651_v10 = vpack.c.bf16 %v5013_v9, %v5012_v8 }
  0xfb   : > { %v562_v11 = vpop.permute.xlu1 %561  ;;  %v594_v27 = vpop.permute.xlu0 %593 }
  0xfc   : > { %656 = vst.msk [vmem:[#allocation2 + $0x10] sm:$0xff] %vm653_vm11, %v651_v10  ;;  %vm572_vm0 = vcmp.eq.s32.totalorder %v5996_v54, %v562_v11  ;;  %vm604_vm9 = vcmp.eq.s32.totalorder %v5996_v54, %v594_v27 }
  0xfd   : > { %v5014_v13 = vsel %vm572_vm0, 1.0, %v5724_v2  ;;  %v5022_v33 = vsel %vm604_vm9, 1.0, %v5724_v2 }
  0xff   : > { %v565_v12 = vpop.permute.xlu1 %564 }
 0x100   : > { %vm573_vm1 = vcmp.eq.s32.totalorder %v5996_v54, %v565_v12 }
 0x101   : > { %v5015_v14 = vsel %vm573_vm1, 1.0, %v5724_v2 }
 0x102   : > { %v652_v15 = vpack.c.bf16 %v5015_v14, %v5014_v13 }
 0x103   : > { %v576_v17 = vpop.permute.xlu1 %575 }
 0x104   : > { %657 = vst.msk [vmem:[#allocation2 + $0x18] sm:$0xff] %vm653_vm11, %v652_v15  ;;  %vm598_vm2 = vcmp.eq.s32.totalorder %v5996_v54, %v576_v17 }
 0x105   : > { %v5016_v20 = vsel %vm598_vm2, 1.0, %v5724_v2 }
 0x107   : > { %v579_v18 = vpop.permute.xlu1 %578 }
 0x108   : > { %vm599_vm3 = vcmp.eq.s32.totalorder %v5996_v54, %v579_v18 }
 0x109   : > { %v5017_v21 = vsel %vm599_vm3, 1.0, %v5724_v2 }
 0x10a   : > { %v674_v22 = vpack.c.bf16 %v5017_v21, %v5016_v20 }
 0x10b   : > { %v585_v23 = vpop.permute.xlu1 %584 }
 0x10c   : > { %679 = vst.msk [vmem:[#allocation3] sm:$0xff] %vm678_vm4, %v674_v22  ;;  %vm601_vm6 = vcmp.eq.s32.totalorder %v5996_v54, %v585_v23 }
 0x10d   : > { %v5019_v25 = vsel %vm601_vm6, 1.0, %v5724_v2 }
 0x10e   : > { %v675_v26 = vpack.c.bf16 %v5019_v25, %v5018_v24 }
 0x10f   : > { %v591_v28 = vpop.permute.xlu1 %590 }
 0x110   : > { %680 = vst.msk [vmem:[#allocation3 + $0x8] sm:$0xff] %vm678_vm4, %v675_v26  ;;  %vm603_vm8 = vcmp.eq.s32.totalorder %v5996_v54, %v591_v28 }
 0x111   : > { %v5021_v30 = vsel %vm603_vm8, 1.0, %v5724_v2 }
 0x112   : > { %v676_v31 = vpack.c.bf16 %v5021_v30, %v5020_v29 }
 0x113   : > { %v597_v32 = vpop.permute.xlu1 %596 }
 0x114   : > { %681 = vst.msk [vmem:[#allocation3 + $0x10] sm:$0xff] %vm678_vm4, %v676_v31  ;;  %vm605_vm10 = vcmp.eq.s32.totalorder %v5996_v54, %v597_v32 }
 0x115   : > { %v5023_v34 = vsel %vm605_vm10, 1.0, %v5724_v2 }
 0x116   : > { %v677_v35 = vpack.c.bf16 %v5023_v34, %v5022_v33 }
 0x118   : > { %682 = vst.msk [vmem:[#allocation3 + $0x18] sm:$0xff] %vm678_vm4, %v677_v35 }
 0x119 PF: > { %v1350_v36 = vld [vmem:[#allocation6 + $0x8] sm:$0xff]  ;;  %v1349_v37 = vld [vmem:[#allocation6] sm:$0xff]  ;;  %v785_v39 = vlaneseq  ;;  %v10650_v40 = vmov 0   ;;  %v872_v41 = vld [vmem:[%s5895_s13 + $0x8] sm:$0xff]  ;;  %v5727_v46 = vmov 0.0|0.0   ;;  %vm5728_vm11 = vmmov 0  }
 0x11a   : > { %v871_v38 = vld [vmem:[%s5895_s13] sm:$0xff]  ;;  %5537 = vset.pattern.permute.xlu0 %v10650_v40  ;;  %5536 = vset.pattern.permute.xlu1 %v10650_v40  ;;  %v1429_v42 = vld [vmem:[#allocation7 + $0x8] sm:$0xff]  ;;  %v874_v44 = vld [vmem:[%s5895_s13 + $0x18] sm:$0xff]  ;;  %v10616_v48 = vmov 0.0   ;;  %vm10791_vm12 = vcmask 261120   ;;  %s5730_s15 = smov 64  }
 0x11b   : > { %1358 = vperm.xlu0 %5537, %v1350_v36   ;;  %1353 = vperm.xlu1 %5536, %v1349_v37   ;;  %v5334_v2 = vpack.c.bf16 %v872_v41, %v871_v38  ;;  %v873_v43 = vld [vmem:[%s5895_s13 + $0x10] sm:$0xff]  ;;  %v6049_v45 = vshrl.u32 %v785_v39, 7  ;;  %v1428_v47 = vld [vmem:[#allocation7] sm:$0xff]  ;;  %v762_v53 = vld [vmem:[#allocation16 + $0x8] sm:$0xff]  ;;  %p5495_p10 = scmp.eq.s32.totalorder %s5808_s22, 2 }
 0x11c   : > { %5333 = vmatprep.subr.bf16.mxu1 %v5727_v46  ;;  %5270 = vmatprep.mubr.msk.f32.mxu1 %vm5728_vm11, %v10616_v48  ;;  %v780_v49 = vld [vmem:[%s5900_s16] sm:$0xff]  ;;  %v761_v50 = vld [vmem:[#allocation16] sm:$0xff]  ;;  %v5337_v51 = vpack.c.bf16 %v874_v44, %v873_v43  ;;  %v6059_v54 = vld [vmem:[%s10603_s2 + $0x8] sm:$0xff]  ;;  %4492 = vst.msk [vmem:[#allocation9 + $0x20] sm:$0xff] %vm10791_vm12, %v762_v53 }
 0x11d   : > { %11012 = vst [vmem:[#allocation22_spill] sm:$0xff] %v6049_v45  ;;  %5335 = vmatpush3.bf16.msra.mxu1 %v5334_v2  ;;  %v787_v52 = vsub.s32 0, %v6049_v45  ;;  %4491 = vst.msk [vmem:[#allocation9] sm:$0xff] %vm10791_vm12, %v761_v50  ;;  %v6064_v55 = vld [vmem:[%s10603_s2] sm:$0xff]  ;;  %v1430_v58 = vld [vmem:[#allocation7 + $0x10] sm:$0xff]  ;;  %vm1450_vm13 = vcmp.eq.s32.totalorder %v6059_v54, 0 }
 0x11e   : > { %5336 = vmatprep.subr.bf16.mxu1 %v5727_v46  ;;  %v763_v56 = vld [vmem:[#allocation16 + $0x10] sm:$0xff]  ;;  %vm1449_vm14 = vcmp.eq.s32.totalorder %v6064_v55, 0  ;;  %v6075_v59 = vld [vmem:[%s10603_s2 + $0x18] sm:$0xff]  ;;  %v6080_v60 = vld [vmem:[%s10603_s2 + $0x10] sm:$0xff]  ;;  %v1458_v63 = vsel %vm1450_vm13, 1, %v10650_v40  ;;  %vm1519_vm5 = vcmp.eq.s32.totalorder %v6059_v54, 1 }
 0x11f   : > { %1438 = vperm.xlu0 %5537, %v1429_v42   ;;  %1433 = vperm.xlu1 %5536, %v1428_v47   ;;  %v6067_v57 = vrot.slane %v780_v49, %v787_v52  ;;  %4493 = vst.msk [vmem:[#allocation9 + $0x40] sm:$0xff] %vm10791_vm12, %v763_v56  ;;  %v759_v61 = vld [vmem:[#allocation15] sm:$0xff]  ;;  %v6085_v62 = vld [vmem:[#allocation15 + $0x8] sm:$0xff]  ;;  %v1457_v0 = vsel %vm1449_vm14, 1, %v10650_v40  ;;  %vm1452_vm15 = vcmp.eq.s32.totalorder %v6075_v59, 0  ;;  %vm1451_vm0 = vcmp.eq.s32.totalorder %v6080_v60, 0 }
 0x120   : > { %4255 = vst.msk [vmem:[#allocation8] sm:$0xff] %vm10791_vm12, %v759_v61  ;;  %5259 = vmatprep.mubr.msk.f32.mxu0 %vm10791_vm12, %v759_v61  ;;  %4256 = vst.msk [vmem:[#allocation8 + $0x20] sm:$0xff] %vm10791_vm12, %v6085_v62  ;;  %v6100_v1 = vld [vmem:[%s10603_s2 + $0x28] sm:$0xff]  ;;  %v6105_v3 = vld [vmem:[%s10603_s2 + $0x20] sm:$0xff]  ;;  %v1460_v4 = vsel %vm1452_vm15, 1, %v10650_v40  ;;  %v1459_v5 = vsel %vm1451_vm0, 1, %v10650_v40 }
 0x121   : > { %5338 = vmatpush3.bf16.msra.mxu1 %v5337_v51  ;;  %vm1454_vm1 = vcmp.eq.s32.totalorder %v6100_v1, 0  ;;  %vm1453_vm2 = vcmp.eq.s32.totalorder %v6105_v3, 0  ;;  %v6117_v6 = vld [vmem:[%s10603_s2 + $0x38] sm:$0xff]  ;;  %v6122_v7 = vld [vmem:[%s10603_s2 + $0x30] sm:$0xff]  ;;  %vm1518_vm6 = vcmp.eq.s32.totalorder %v6064_v55, 1  ;;  %v1527_v12 = vsel %vm1519_vm5, 1, %v10650_v40 }
 0x122   : > { %v1462_v8 = vsel %vm1454_vm1, 1, %v10650_v40  ;;  %v1461_v9 = vsel %vm1453_vm2, 1, %v10650_v40  ;;  %vm1456_vm3 = vcmp.eq.s32.totalorder %v6117_v6, 0  ;;  %vm1455_vm4 = vcmp.eq.s32.totalorder %v6122_v7, 0  ;;  %v781_v14 = vld [vmem:[%s5890_s26] sm:$0xff]  ;;  %v782_v15 = vld [vmem:[%s5890_s26 + $0x8] sm:$0xff] }
 0x123   : > { %1443 = vperm.xlu1 %5536, %v1430_v58   ;;  %876 = vrot.lane.b32.xlu0 %v6067_v57, %s5730_s15  ;;  %v1464_v10 = vsel %vm1456_vm3, 1, %v10650_v40  ;;  %v1463_v11 = vsel %vm1455_vm4, 1, %v10650_v40  ;;  %v1526_v13 = vsel %vm1518_vm6, 1, %v10650_v40  ;;  %vm1521_vm7 = vcmp.eq.s32.totalorder %v6075_v59, 1  ;;  %v783_v18 = vld [vmem:[%s5890_s26 + $0x10] sm:$0xff]  ;;  %v784_v19 = vld [vmem:[%s5890_s26 + $0x18] sm:$0xff] }
 0x124   : > { %5271 = vmatmul.mubr.msk.f32.vlgmr.msra.gmra.mrb[0].mxu1 %vm10791_vm12, %v761_v50  ;;  %vm1520_vm8 = vcmp.eq.s32.totalorder %v6080_v60, 1  ;;  %v1529_v16 = vsel %vm1521_vm7, 1, %v10650_v40  ;;  %vm1523_vm9 = vcmp.eq.s32.totalorder %v6100_v1, 1  ;;  %vm1522_vm10 = vcmp.eq.s32.totalorder %v6105_v3, 1 }
 0x125   : > { %5273 = vmatprep.mubr.msk.f32.mxu1 %vm5728_vm11, %v10616_v48  ;;  %v1528_v17 = vsel %vm1520_vm8, 1, %v10650_v40  ;;  %v5325_v20 = vpack.c.bf16 %v782_v15, %v781_v14  ;;  %v5329_v21 = vpack.c.bf16 %v784_v19, %v783_v18  ;;  %v1531_v22 = vsel %vm1523_vm9, 1, %v10650_v40 }
 0x126   : > { %v1530_v23 = vsel %vm1522_vm10, 1, %v10650_v40  ;;  %vm1525_vm13 = vcmp.eq.s32.totalorder %v6117_v6, 1  ;;  %vm1524_vm14 = vcmp.eq.s32.totalorder %v6122_v7, 1  ;;  %vm1588_vm15 = vcmp.eq.s32.totalorder %v6059_v54, 2 }
 0x127   : > { %1469 = vperm.xlu1 %5536, %v1458_v63   ;;  %1466 = vperm.xlu0 %5537, %v1457_v0   ;;  %v1533_v24 = vsel %vm1525_vm13, 1, %v10650_v40  ;;  %v1532_v25 = vsel %vm1524_vm14, 1, %v10650_v40  ;;  %vm1587_vm0 = vcmp.eq.s32.totalorder %v6064_v55, 2  ;;  %v1596_v26 = vsel %vm1588_vm15, 1, %v10650_v40 }
 0x128   : > { %5274 = vmatmul.mubr.msk.f32.gmra.mrb[2].mxu1 %vm10791_vm12, %v762_v53  ;;  %5326 = vmatprep.subr.bf16.mxu0 %v5325_v20  ;;  %v1595_v27 = vsel %vm1587_vm0, 1, %v10650_v40  ;;  %vm1590_vm1 = vcmp.eq.s32.totalorder %v6075_v59, 2  ;;  %vm1589_vm2 = vcmp.eq.s32.totalorder %v6080_v60, 2  ;;  %vm1592_vm3 = vcmp.eq.s32.totalorder %v6100_v1, 2 }
 0x129   : > { %5276 = vmatprep.mubr.msk.f32.mxu1 %vm5728_vm11, %v10616_v48  ;;  %5328 = vmatpush3.bf16.msra.mxu0 %v5325_v20  ;;  %v1598_v28 = vsel %vm1590_vm1, 1, %v10650_v40  ;;  %v1597_v29 = vsel %vm1589_vm2, 1, %v10650_v40  ;;  %vm1591_vm4 = vcmp.eq.s32.totalorder %v6105_v3, 2  ;;  %v1600_v30 = vsel %vm1592_vm3, 1, %v10650_v40  ;;  %v968_v48 = vld [vmem:[#allocation2] sm:$0xff] }
 0x12a   : > { %5330 = vmatprep.subr.bf16.mxu0 %v5329_v21  ;;  %v1599_v31 = vsel %vm1591_vm4, 1, %v10650_v40  ;;  %vm1594_vm5 = vcmp.eq.s32.totalorder %v6117_v6, 2  ;;  %vm1593_vm6 = vcmp.eq.s32.totalorder %v6122_v7, 2  ;;  %vm1657_vm7 = vcmp.eq.s32.totalorder %v6059_v54, 3 }
 0x12b   : > { %1475 = vperm.xlu1 %5536, %v1460_v4   ;;  %1472 = vperm.xlu0 %5537, %v1459_v5   ;;  %v1602_v32 = vsel %vm1594_vm5, 1, %v10650_v40  ;;  %v1601_v33 = vsel %vm1593_vm6, 1, %v10650_v40  ;;  %vm1656_vm8 = vcmp.eq.s32.totalorder %v6064_v55, 3  ;;  %v1665_v34 = vsel %vm1657_vm7, 1, %v10650_v40 }
 0x12c   : > { %5277 = vmatmul.mubr.msk.f32.gmra.mrb[4].mxu1 %vm10791_vm12, %v763_v56  ;;  %v1664_v35 = vsel %vm1656_vm8, 1, %v10650_v40  ;;  %vm1659_vm9 = vcmp.eq.s32.totalorder %v6075_v59, 3  ;;  %vm1658_vm10 = vcmp.eq.s32.totalorder %v6080_v60, 3  ;;  %vm1661_vm13 = vcmp.eq.s32.totalorder %v6100_v1, 3 }
 0x12d   : > { %5332 = vmatpush3.bf16.msra.mxu0 %v5329_v21  ;;  %v1667_v36 = vsel %vm1659_vm9, 1, %v10650_v40  ;;  %v1666_v37 = vsel %vm1658_vm10, 1, %v10650_v40  ;;  %vm1660_vm14 = vcmp.eq.s32.totalorder %v6105_v3, 3  ;;  %v1669_v38 = vsel %vm1661_vm13, 1, %v10650_v40 }
 0x12e   : > { %v1668_v39 = vsel %vm1660_vm14, 1, %v10650_v40  ;;  %vm1663_vm15 = vcmp.eq.s32.totalorder %v6117_v6, 3  ;;  %vm1662_vm0 = vcmp.eq.s32.totalorder %v6122_v7, 3  ;;  %vm1726_vm1 = vcmp.eq.s32.totalorder %v6059_v54, 4 }
 0x12f   : > { %1481 = vperm.xlu1 %5536, %v1462_v8   ;;  %1478 = vperm.xlu0 %5537, %v1461_v9   ;;  %v1671_v41 = vsel %vm1663_vm15, 1, %v10650_v40  ;;  %v1670_v2 = vsel %vm1662_vm0, 1, %v10650_v40  ;;  %vm1725_vm2 = vcmp.eq.s32.totalorder %v6064_v55, 4  ;;  %v1734_v42 = vsel %vm1726_vm1, 1, %v10650_v40  ;;  %v1051_v8 = vld [vmem:[#allocation3] sm:$0xff] }
 0x130   : > { %5260 = vmatmul.mubr.msk.f32.vlgmr.msra.gmra.mrb[0].mxu0 %vm10791_vm12, %v6085_v62  ;;  %v1733_v43 = vsel %vm1725_vm2, 1, %v10650_v40  ;;  %vm1728_vm3 = vcmp.eq.s32.totalorder %v6075_v59, 4  ;;  %vm1727_vm4 = vcmp.eq.s32.totalorder %v6080_v60, 4  ;;  %vm1730_vm5 = vcmp.eq.s32.totalorder %v6100_v1, 4 }
 0x131   : > { %v1736_v44 = vsel %vm1728_vm3, 1, %v10650_v40  ;;  %v1735_v46 = vsel %vm1727_vm4, 1, %v10650_v40  ;;  %vm1729_vm6 = vcmp.eq.s32.totalorder %v6105_v3, 4  ;;  %v1738_v47 = vsel %vm1730_vm5, 1, %v10650_v40 }
 0x132   : > { %v1737_v49 = vsel %vm1729_vm6, 1, %v10650_v40  ;;  %vm1732_vm7 = vcmp.eq.s32.totalorder %v6117_v6, 4  ;;  %vm1731_vm8 = vcmp.eq.s32.totalorder %v6122_v7, 4  ;;  %vm1795_vm9 = vcmp.eq.s32.totalorder %v6059_v54, 5 }
 0x133   : > { %1487 = vperm.xlu1 %5536, %v1464_v10   ;;  %1484 = vperm.xlu0 %5537, %v1463_v11   ;;  %v1740_v50 = vsel %vm1732_vm7, 1, %v10650_v40  ;;  %v1739_v51 = vsel %vm1731_vm8, 1, %v10650_v40  ;;  %vm1794_vm10 = vcmp.eq.s32.totalorder %v6064_v55, 5  ;;  %v1803_v52 = vsel %vm1795_vm9, 1, %v10650_v40 }
 0x134   : > { %v1802_v53 = vsel %vm1794_vm10, 1, %v10650_v40  ;;  %vm1797_vm13 = vcmp.eq.s32.totalorder %v6075_v59, 5  ;;  %vm1796_vm14 = vcmp.eq.s32.totalorder %v6080_v60, 5  ;;  %vm1799_vm15 = vcmp.eq.s32.totalorder %v6100_v1, 5 }
 0x135   : > { %v1805_v56 = vsel %vm1797_vm13, 1, %v10650_v40  ;;  %v1804_v58 = vsel %vm1796_vm14, 1, %v10650_v40  ;;  %vm1798_vm0 = vcmp.eq.s32.totalorder %v6105_v3, 5  ;;  %v1807_v61 = vsel %vm1799_vm15, 1, %v10650_v40 }
 0x136   : > { %v1806_v62 = vsel %vm1798_vm0, 1, %v10650_v40  ;;  %vm1801_vm1 = vcmp.eq.s32.totalorder %v6117_v6, 5  ;;  %vm1800_vm2 = vcmp.eq.s32.totalorder %v6122_v7, 5  ;;  %vm1864_vm3 = vcmp.eq.s32.totalorder %v6059_v54, 6 }
 0x137   : > { %1538 = vperm.xlu1 %5536, %v1527_v12   ;;  %1535 = vperm.xlu0 %5537, %v1526_v13   ;;  %v1809_v63 = vsel %vm1801_vm1, 1, %v10650_v40  ;;  %v1808_v0 = vsel %vm1800_vm2, 1, %v10650_v40  ;;  %vm1863_vm4 = vcmp.eq.s32.totalorder %v6064_v55, 6  ;;  %v1872_v4 = vsel %vm1864_vm3, 1, %v10650_v40 }
 0x138   : > { %v1871_v5 = vsel %vm1863_vm4, 1, %v10650_v40  ;;  %vm1866_vm5 = vcmp.eq.s32.totalorder %v6075_v59, 6  ;;  %vm1865_vm6 = vcmp.eq.s32.totalorder %v6080_v60, 6  ;;  %vm1057_vm7 = vcmask 195584  }
 0x139   : > { %v1874_v9 = vsel %vm1866_vm5, 1, %v10650_v40  ;;  %v1873_v10 = vsel %vm1865_vm6, 1, %v10650_v40  ;;  %5293 = vmatprep.mubr.msk.bf16.mxu1 %vm1057_vm7, %v1051_v8  ;;  %vm1868_vm8 = vcmp.eq.s32.totalorder %v6100_v1, 6  ;;  %vm1867_vm9 = vcmp.eq.s32.totalorder %v6105_v3, 6 }
 0x13a   : > { %v1876_v11 = vsel %vm1868_vm8, 1, %v10650_v40  ;;  %v1875_v12 = vsel %vm1867_vm9, 1, %v10650_v40  ;;  %vm1870_vm10 = vcmp.eq.s32.totalorder %v6117_v6, 6  ;;  %vm1869_vm13 = vcmp.eq.s32.totalorder %v6122_v7, 6 }
 0x13b   : > { %1544 = vperm.xlu1 %5536, %v1529_v16   ;;  %1541 = vperm.xlu0 %5537, %v1528_v17   ;;  %v1878_v13 = vsel %vm1870_vm10, 1, %v10650_v40  ;;  %v1877_v14 = vsel %vm1869_vm13, 1, %v10650_v40  ;;  %vm1933_vm14 = vcmp.eq.s32.totalorder %v6059_v54, 7  ;;  %vm1932_vm15 = vcmp.eq.s32.totalorder %v6064_v55, 7 }
 0x13c   : > { %v1941_v15 = vsel %vm1933_vm14, 1, %v10650_v40  ;;  %v1940_v16 = vsel %vm1932_vm15, 1, %v10650_v40  ;;  %vm1935_vm0 = vcmp.eq.s32.totalorder %v6075_v59, 7  ;;  %vm1934_vm1 = vcmp.eq.s32.totalorder %v6080_v60, 7 }
 0x13d   : > { %v1943_v17 = vsel %vm1935_vm0, 1, %v10650_v40  ;;  %v1942_v18 = vsel %vm1934_vm1, 1, %v10650_v40  ;;  %vm1937_vm2 = vcmp.eq.s32.totalorder %v6100_v1, 7  ;;  %vm1936_vm3 = vcmp.eq.s32.totalorder %v6105_v3, 7 }
 0x13e   : > { %v1945_v21 = vsel %vm1937_vm2, 1, %v10650_v40  ;;  %vm1939_vm4 = vcmp.eq.s32.totalorder %v6117_v6, 7  ;;  %vm1938_vm5 = vcmp.eq.s32.totalorder %v6122_v7, 7  ;;  %vm2015_vm6 = vcmp.eq.s32.totalorder %v6059_v54, 8 }
 0x13f   : > { %1550 = vperm.xlu1 %5536, %v1531_v22   ;;  %1547 = vperm.xlu0 %5537, %v1530_v23   ;;  %v1944_v22 = vsel %vm1936_vm3, 1, %v10650_v40  ;;  %vm2014_vm8 = vcmp.eq.s32.totalorder %v6064_v55, 8  ;;  %vm2017_vm9 = vcmp.eq.s32.totalorder %v6075_v59, 8  ;;  %vm2016_vm10 = vcmp.eq.s32.totalorder %v6080_v60, 8 }
 0x140   : > { %vm2019_vm13 = vcmp.eq.s32.totalorder %v6100_v1, 8  ;;  %vm2018_vm14 = vcmp.eq.s32.totalorder %v6105_v3, 8  ;;  %vm2021_vm15 = vcmp.eq.s32.totalorder %v6117_v6, 8  ;;  %vm2020_vm0 = vcmp.eq.s32.totalorder %v6122_v7, 8 }
 0x141   : > { %vm2084_vm1 = vcmp.eq.s32.totalorder %v6059_v54, 9  ;;  %vm2083_vm2 = vcmp.eq.s32.totalorder %v6064_v55, 9  ;;  %vm2086_vm3 = vcmp.eq.s32.totalorder %v6075_v59, 9 }
 0x143   : > { %1556 = vperm.xlu1 %5536, %v1533_v24   ;;  %1553 = vperm.xlu0 %5537, %v1532_v25   ;;  %v1947_v25 = vsel %vm1939_vm4, 1, %v10650_v40  ;;  %vm2085_vm4 = vcmp.eq.s32.totalorder %v6080_v60, 9 }
 0x147   : > { %1607 = vperm.xlu1 %5536, %v1596_v26   ;;  %1604 = vperm.xlu0 %5537, %v1595_v27   ;;  %v1946_v26 = vsel %vm1938_vm5, 1, %v10650_v40  ;;  %vm2088_vm5 = vcmp.eq.s32.totalorder %v6100_v1, 9 }
 0x14b   : > { %1613 = vperm.xlu1 %5536, %v1598_v28   ;;  %1610 = vperm.xlu0 %5537, %v1597_v29   ;;  %v2023_v29 = vsel %vm2015_vm6, 1, %v10650_v40  ;;  %vm2087_vm6 = vcmp.eq.s32.totalorder %v6105_v3, 9 }
 0x14f   : > { %1619 = vperm.xlu1 %5536, %v1600_v30   ;;  %1616 = vperm.xlu0 %5537, %v1599_v31   ;;  %v2022_v30 = vsel %vm2014_vm8, 1, %v10650_v40  ;;  %vm2090_vm8 = vcmp.eq.s32.totalorder %v6117_v6, 9 }
 0x153   : > { %1625 = vperm.xlu1 %5536, %v1602_v32   ;;  %1622 = vperm.xlu0 %5537, %v1601_v33   ;;  %v2025_v33 = vsel %vm2017_vm9, 1, %v10650_v40  ;;  %vm2089_vm9 = vcmp.eq.s32.totalorder %v6122_v7, 9 }
 0x157   : > { %1676 = vperm.xlu1 %5536, %v1665_v34   ;;  %1673 = vperm.xlu0 %5537, %v1664_v35   ;;  %v2024_v34 = vsel %vm2016_vm10, 1, %v10650_v40  ;;  %vm2153_vm10 = vcmp.eq.s32.totalorder %v6059_v54, 10 }
 0x15b   : > { %1682 = vperm.xlu1 %5536, %v1667_v36   ;;  %1679 = vperm.xlu0 %5537, %v1666_v37   ;;  %v2027_v37 = vsel %vm2019_vm13, 1, %v10650_v40  ;;  %vm2152_vm13 = vcmp.eq.s32.totalorder %v6064_v55, 10 }
 0x15f   : > { %1688 = vperm.xlu1 %5536, %v1669_v38   ;;  %1685 = vperm.xlu0 %5537, %v1668_v39   ;;  %v2026_v38 = vsel %vm2018_vm14, 1, %v10650_v40  ;;  %vm2155_vm14 = vcmp.eq.s32.totalorder %v6075_v59, 10 }
 0x163   : > { %1694 = vperm.xlu1 %5536, %v1671_v41   ;;  %1691 = vperm.xlu0 %5537, %v1670_v2   ;;  %v2029_v2 = vsel %vm2021_vm15, 1, %v10650_v40  ;;  %vm2154_vm15 = vcmp.eq.s32.totalorder %v6080_v60, 10 }
 0x167   : > { %1745 = vperm.xlu1 %5536, %v1734_v42   ;;  %1742 = vperm.xlu0 %5537, %v1733_v43   ;;  %v2028_v42 = vsel %vm2020_vm0, 1, %v10650_v40  ;;  %vm2157_vm0 = vcmp.eq.s32.totalorder %v6100_v1, 10 }
 0x16b   : > { %1751 = vperm.xlu1 %5536, %v1736_v44   ;;  %1748 = vperm.xlu0 %5537, %v1735_v46   ;;  %v2092_v46 = vsel %vm2084_vm1, 1, %v10650_v40  ;;  %vm2156_vm1 = vcmp.eq.s32.totalorder %v6105_v3, 10 }
 0x16f   : > { %1757 = vperm.xlu1 %5536, %v1738_v47   ;;  %1754 = vperm.xlu0 %5537, %v1737_v49   ;;  %v2091_v47 = vsel %vm2083_vm2, 1, %v10650_v40  ;;  %vm2159_vm2 = vcmp.eq.s32.totalorder %v6117_v6, 10 }
 0x173   : > { %1763 = vperm.xlu1 %5536, %v1740_v50   ;;  %1760 = vperm.xlu0 %5537, %v1739_v51   ;;  %v2094_v51 = vsel %vm2086_vm3, 1, %v10650_v40  ;;  %vm2158_vm3 = vcmp.eq.s32.totalorder %v6122_v7, 10 }
 0x177   : > { %1814 = vperm.xlu1 %5536, %v1803_v52   ;;  %1811 = vperm.xlu0 %5537, %v1802_v53   ;;  %v2093_v52 = vsel %vm2085_vm4, 1, %v10650_v40  ;;  %vm2222_vm4 = vcmp.eq.s32.totalorder %v6059_v54, 11 }
 0x17b   : > { %1820 = vperm.xlu1 %5536, %v1805_v56   ;;  %1817 = vperm.xlu0 %5537, %v1804_v58   ;;  %v2096_v58 = vsel %vm2088_vm5, 1, %v10650_v40  ;;  %vm2221_vm5 = vcmp.eq.s32.totalorder %v6064_v55, 11 }
 0x17f   : > { %1826 = vperm.xlu1 %5536, %v1807_v61   ;;  %1823 = vperm.xlu0 %5537, %v1806_v62   ;;  %v2095_v61 = vsel %vm2087_vm6, 1, %v10650_v40  ;;  %vm2224_vm6 = vcmp.eq.s32.totalorder %v6075_v59, 11 }
 0x183   : > { %1832 = vperm.xlu1 %5536, %v1809_v63   ;;  %1829 = vperm.xlu0 %5537, %v1808_v0   ;;  %v2098_v0 = vsel %vm2090_vm8, 1, %v10650_v40  ;;  %vm2223_vm8 = vcmp.eq.s32.totalorder %v6080_v60, 11 }
 0x187   : > { %1883 = vperm.xlu1 %5536, %v1872_v4   ;;  %1880 = vperm.xlu0 %5537, %v1871_v5   ;;  %v2097_v4 = vsel %vm2089_vm9, 1, %v10650_v40  ;;  %vm2226_vm9 = vcmp.eq.s32.totalorder %v6100_v1, 11 }
 0x18b   : > { %1889 = vperm.xlu1 %5536, %v1874_v9   ;;  %1886 = vperm.xlu0 %5537, %v1873_v10   ;;  %v2161_v9 = vsel %vm2153_vm10, 1, %v10650_v40  ;;  %v2160_v10 = vsel %vm2152_vm13, 1, %v10650_v40  ;;  %vm2225_vm10 = vcmp.eq.s32.totalorder %v6105_v3, 11  ;;  %vm2228_vm13 = vcmp.eq.s32.totalorder %v6117_v6, 11 }
 0x18f   : > { %1895 = vperm.xlu1 %5536, %v1876_v11   ;;  %1892 = vperm.xlu0 %5537, %v1875_v12  }
 0x193   : > { %1901 = vperm.xlu1 %5536, %v1878_v13   ;;  %1898 = vperm.xlu0 %5537, %v1877_v14   ;;  %v2163_v13 = vsel %vm2155_vm14, 1, %v10650_v40  ;;  %v2162_v14 = vsel %vm2154_vm15, 1, %v10650_v40  ;;  %vm2227_vm14 = vcmp.eq.s32.totalorder %v6122_v7, 11  ;;  %vm2291_vm15 = vcmp.eq.s32.totalorder %v6059_v54, 12 }
 0x197   : > { %1952 = vperm.xlu1 %5536, %v1941_v15   ;;  %1949 = vperm.xlu0 %5537, %v1940_v16  }
 0x19a   : > { %v6244_v19 = vpop.permute.xlu0 %1358  ;;  %v6246_v20 = vpop.permute.xlu1 %1353 }
 0x19b   : > { %11013 = vst [vmem:[#allocation23_spill] sm:$0xff] %v6244_v19  ;;  %11014 = vst [vmem:[#allocation24_spill] sm:$0xff] %v6246_v20  ;;  %1958 = vperm.xlu1 %5536, %v1943_v17   ;;  %1955 = vperm.xlu0 %5537, %v1942_v18   ;;  %v2165_v17 = vsel %vm2157_vm0, 1, %v10650_v40  ;;  %v2164_v18 = vsel %vm2156_vm1, 1, %v10650_v40  ;;  %vm2290_vm0 = vcmp.eq.s32.totalorder %v6064_v55, 12  ;;  %vm2293_vm1 = vcmp.eq.s32.totalorder %v6075_v59, 12 }
 0x19e   : > { %v6252_v23 = vpop.permute.xlu0 %1438  ;;  %v6254_v24 = vpop.permute.xlu1 %1433 }
 0x19f   : > { %11015 = vst [vmem:[#allocation25_spill] sm:$0xff] %v6252_v23  ;;  %11016 = vst [vmem:[#allocation26_spill] sm:$0xff] %v6254_v24  ;;  %1964 = vperm.xlu1 %5536, %v1945_v21   ;;  %1961 = vperm.xlu0 %5537, %v1944_v22  }
 0x1a2   : > { %v6260_v27 = vpop.permute.xlu1 %1443  ;;  %v6262_v28 = vpop.permute.xlu0 %876 }
 0x1a3   : > { %11017 = vst [vmem:[#allocation27_spill] sm:$0xff] %v6260_v27  ;;  %1970 = vperm.xlu1 %5536, %v1947_v25   ;;  %1967 = vperm.xlu0 %5537, %v1946_v26   ;;  %v2167_v25 = vsel %vm2159_vm2, 1, %v10650_v40  ;;  %v2166_v26 = vsel %vm2158_vm3, 1, %v10650_v40  ;;  %vm2292_vm2 = vcmp.eq.s32.totalorder %v6080_v60, 12  ;;  %vm2295_vm3 = vcmp.eq.s32.totalorder %v6100_v1, 12 }
 0x1a6   : > { %v6268_v31 = vpop.permute.xlu1 %1469  ;;  %v6270_v32 = vpop.permute.xlu0 %1466 }
 0x1a7   : > { %11018 = vst [vmem:[#allocation28_spill] sm:$0xff] %v6268_v31  ;;  %2034 = vperm.xlu1 %5536, %v2023_v29   ;;  %2031 = vperm.xlu0 %5537, %v2022_v30  }
 0x1aa   : > { %v6276_v35 = vpop.permute.xlu1 %1475  ;;  %v6278_v36 = vpop.permute.xlu0 %1472 }
 0x1ab   : > { %11019 = vst [vmem:[#allocation29_spill] sm:$0xff] %v6276_v35  ;;  %2040 = vperm.xlu1 %5536, %v2025_v33   ;;  %2037 = vperm.xlu0 %5537, %v2024_v34   ;;  %v2230_v33 = vsel %vm2222_vm4, 1, %v10650_v40  ;;  %v2229_v34 = vsel %vm2221_vm5, 1, %v10650_v40  ;;  %vm2294_vm4 = vcmp.eq.s32.totalorder %v6105_v3, 12  ;;  %vm2297_vm5 = vcmp.eq.s32.totalorder %v6117_v6, 12 }
 0x1ae   : > { %v6284_v39 = vpop.permute.xlu1 %1481  ;;  %v6286_v41 = vpop.permute.xlu0 %1478 }
 0x1af   : > { %11020 = vst [vmem:[#allocation30_spill] sm:$0xff] %v6284_v39  ;;  %11021 = vst [vmem:[#allocation31_spill] sm:$0xff] %v6286_v41  ;;  %2046 = vperm.xlu1 %5536, %v2027_v37   ;;  %2043 = vperm.xlu0 %5537, %v2026_v38  }
 0x1b2   : > { %v6292_v43 = vpop.permute.xlu1 %1487  ;;  %v6294_v44 = vpop.permute.xlu0 %1484 }
 0x1b3   : > { %11022 = vst [vmem:[#allocation32_spill] sm:$0xff] %v6292_v43  ;;  %11023 = vst [vmem:[#allocation33_spill] sm:$0xff] %v6294_v44  ;;  %2052 = vperm.xlu1 %5536, %v2029_v2   ;;  %2049 = vperm.xlu0 %5537, %v2028_v42   ;;  %v2232_v2 = vsel %vm2224_vm6, 1, %v10650_v40  ;;  %v2231_v42 = vsel %vm2223_vm8, 1, %v10650_v40  ;;  %vm2296_vm6 = vcmp.eq.s32.totalorder %v6122_v7, 12  ;;  %vm2360_vm8 = vcmp.eq.s32.totalorder %v6059_v54, 13 }
 0x1b6   : > { %v6300_v49 = vpop.permute.xlu1 %1538  ;;  %v6302_v50 = vpop.permute.xlu0 %1535 }
 0x1b7   : > { %11024 = vst [vmem:[#allocation34_spill] sm:$0xff] %v6300_v49  ;;  %2103 = vperm.xlu1 %5536, %v2092_v46   ;;  %2100 = vperm.xlu0 %5537, %v2091_v47  }
 0x1ba   : > { %v6308_v53 = vpop.permute.xlu1 %1544  ;;  %v6310_v56 = vpop.permute.xlu0 %1541 }
 0x1bb   : > { %11025 = vst [vmem:[#allocation35_spill] sm:$0xff] %v6308_v53  ;;  %2109 = vperm.xlu1 %5536, %v2094_v51   ;;  %2106 = vperm.xlu0 %5537, %v2093_v52   ;;  %v2234_v51 = vsel %vm2226_vm9, 1, %v10650_v40  ;;  %v2233_v52 = vsel %vm2225_vm10, 1, %v10650_v40  ;;  %vm2359_vm9 = vcmp.eq.s32.totalorder %v6064_v55, 13  ;;  %vm2362_vm10 = vcmp.eq.s32.totalorder %v6075_v59, 13 }
 0x1bc   : > { %v2370_v24 = vsel %vm2362_vm10, 1, %v10650_v40  ;;  %vm2433_vm10 = vcmp.eq.s32.totalorder %v6100_v1, 14 }
 0x1be   : > { %v6316_v62 = vpop.permute.xlu1 %1550  ;;  %v6318_v63 = vpop.permute.xlu0 %1547 }
 0x1bf   : > { %11026 = vst [vmem:[#allocation36_spill] sm:$0xff] %v6316_v62  ;;  %11027 = vst [vmem:[#allocation37_spill] sm:$0xff] %v6318_v63  ;;  %2115 = vperm.xlu1 %5536, %v2096_v58   ;;  %2112 = vperm.xlu0 %5537, %v2095_v61  }
 0x1c2   : > { %v6324_v5 = vpop.permute.xlu1 %1556  ;;  %v6326_v8 = vpop.permute.xlu0 %1553 }
 0x1c3   : > { %11028 = vst [vmem:[#allocation38_spill] sm:$0xff] %v6324_v5  ;;  %11029 = vst [vmem:[#allocation39_spill] sm:$0xff] %v6326_v8  ;;  %2121 = vperm.xlu1 %5536, %v2098_v0   ;;  %2118 = vperm.xlu0 %5537, %v2097_v4   ;;  %v2236_v0 = vsel %vm2228_vm13, 1, %v10650_v40  ;;  %v2235_v4 = vsel %vm2227_vm14, 1, %v10650_v40  ;;  %vm2361_vm13 = vcmp.eq.s32.totalorder %v6080_v60, 13  ;;  %vm973_vm14 = vcmask 130048  }
 0x1c4   : > { %v2369_v19 = vsel %vm2361_vm13, 1, %v10650_v40  ;;  %5281 = vmatprep.mubr.msk.bf16.mxu0 %vm973_vm14, %v968_v48  ;;  %vm2432_vm13 = vcmp.eq.s32.totalorder %v6105_v3, 14 }
 0x1c6   : > { %v6332_v11 = vpop.permute.xlu1 %1607  ;;  %v6334_v12 = vpop.permute.xlu0 %1604 }
 0x1c7   : > { %11030 = vst [vmem:[#allocation40_spill] sm:$0xff] %v6332_v11  ;;  %2172 = vperm.xlu1 %5536, %v2161_v9   ;;  %2169 = vperm.xlu0 %5537, %v2160_v10  }
 0x1ca   : > { %v6340_v15 = vpop.permute.xlu1 %1613  ;;  %v6342_v16 = vpop.permute.xlu0 %1610 }
 0x1cb   : > { %11031 = vst [vmem:[#allocation41_spill] sm:$0xff] %v6340_v15  ;;  %2178 = vperm.xlu1 %5536, %v2163_v13   ;;  %2175 = vperm.xlu0 %5537, %v2162_v14   ;;  %v2299_v13 = vsel %vm2291_vm15, 1, %v10650_v40  ;;  %v2298_v14 = vsel %vm2290_vm0, 1, %v10650_v40  ;;  %vm10793_vm15 = vcmask 523264   ;;  %vm2364_vm0 = vcmp.eq.s32.totalorder %v6100_v1, 13 }
 0x1ce   : > { %v6348_v21 = vpop.permute.xlu1 %1619  ;;  %v6350_v22 = vpop.permute.xlu0 %1616 }
 0x1cf   : > { %11032 = vst [vmem:[#allocation42_spill] sm:$0xff] %v6348_v21  ;;  %11033 = vst [vmem:[#allocation43_spill] sm:$0xff] %v6350_v22  ;;  %2184 = vperm.xlu1 %5536, %v2165_v17   ;;  %2181 = vperm.xlu0 %5537, %v2164_v18  }
 0x1d2   : > { %v6356_v29 = vpop.permute.xlu1 %1625  ;;  %v6358_v30 = vpop.permute.xlu0 %1622 }
 0x1d3   : > { %11034 = vst [vmem:[#allocation44_spill] sm:$0xff] %v6356_v29  ;;  %11035 = vst [vmem:[#allocation45_spill] sm:$0xff] %v6358_v30  ;;  %2190 = vperm.xlu1 %5536, %v2167_v25   ;;  %2187 = vperm.xlu0 %5537, %v2166_v26   ;;  %v2301_v25 = vsel %vm2293_vm1, 1, %v10650_v40  ;;  %v2300_v26 = vsel %vm2292_vm2, 1, %v10650_v40  ;;  %vm2363_vm1 = vcmp.eq.s32.totalorder %v6105_v3, 13  ;;  %vm2366_vm2 = vcmp.eq.s32.totalorder %v6117_v6, 13 }
 0x1d4   : > { %v2371_v48 = vsel %vm2363_vm1, 1, %v10650_v40  ;;  %vm2434_vm1 = vcmp.eq.s32.totalorder %v6122_v7, 14 }
 0x1d6   : > { %v6364_v37 = vpop.permute.xlu1 %1676  ;;  %v6366_v38 = vpop.permute.xlu0 %1673 }
 0x1d7   : > { %11036 = vst [vmem:[#allocation46_spill] sm:$0xff] %v6364_v37  ;;  %2241 = vperm.xlu1 %5536, %v2230_v33   ;;  %2238 = vperm.xlu0 %5537, %v2229_v34  }
 0x1da   : > { %v6372_v46 = vpop.permute.xlu1 %1682  ;;  %v6374_v47 = vpop.permute.xlu0 %1679 }
 0x1db   : > { %11037 = vst [vmem:[#allocation47_spill] sm:$0xff] %v6372_v46  ;;  %2247 = vperm.xlu1 %5536, %v2232_v2   ;;  %2244 = vperm.xlu0 %5537, %v2231_v42   ;;  %v2303_v2 = vsel %vm2295_vm3, 1, %v10650_v40  ;;  %v2302_v42 = vsel %vm2294_vm4, 1, %v10650_v40  ;;  %vm2365_vm3 = vcmp.eq.s32.totalorder %v6122_v7, 13  ;;  %vm10792_vm4 = vcmask 1043456  }
 0x1de   : > { %v6380_v58 = vpop.permute.xlu1 %1688  ;;  %v6382_v61 = vpop.permute.xlu0 %1685 }
 0x1df   : > { %11038 = vst [vmem:[#allocation48_spill] sm:$0xff] %v6380_v58  ;;  %11039 = vst [vmem:[#allocation49_spill] sm:$0xff] %v6382_v61  ;;  %2253 = vperm.xlu1 %5536, %v2234_v51   ;;  %2250 = vperm.xlu0 %5537, %v2233_v52  }
 0x1e2   : > { %v6388_v9 = vpop.permute.xlu1 %1694  ;;  %v6390_v10 = vpop.permute.xlu0 %1691 }
 0x1e3   : > { %11040 = vst [vmem:[#allocation50_spill] sm:$0xff] %v6388_v9  ;;  %11041 = vst [vmem:[#allocation51_spill] sm:$0xff] %v6390_v10  ;;  %2259 = vperm.xlu1 %5536, %v2236_v0   ;;  %2256 = vperm.xlu0 %5537, %v2235_v4   ;;  %v2305_v0 = vsel %vm2297_vm5, 1, %v10650_v40  ;;  %v2304_v4 = vsel %vm2296_vm6, 1, %v10650_v40  ;;  %vm2429_vm5 = vcmp.eq.s32.totalorder %v6059_v54, 14  ;;  %vm2428_vm6 = vcmp.eq.s32.totalorder %v6064_v55, 14 }
 0x1e6   : > { %v6396_v17 = vpop.permute.xlu1 %1745  ;;  %v6398_v18 = vpop.permute.xlu0 %1742 }
 0x1e7   : > { %11042 = vst [vmem:[#allocation52_spill] sm:$0xff] %v6396_v17  ;;  %2310 = vperm.xlu1 %5536, %v2299_v13   ;;  %2307 = vperm.xlu0 %5537, %v2298_v14  }
 0x1ea   : > { %v6404_v33 = vpop.permute.xlu1 %1751  ;;  %v6406_v34 = vpop.permute.xlu0 %1748 }
 0x1eb   : > { %11043 = vst [vmem:[#allocation53_spill] sm:$0xff] %v6404_v33  ;;  %2316 = vperm.xlu1 %5536, %v2301_v25   ;;  %2313 = vperm.xlu0 %5537, %v2300_v26   ;;  %v2368_v25 = vsel %vm2360_vm8, 1, %v10650_v40  ;;  %v2367_v26 = vsel %vm2359_vm9, 1, %v10650_v40  ;;  %vm2431_vm8 = vcmp.eq.s32.totalorder %v6075_v59, 14  ;;  %vm2430_vm9 = vcmp.eq.s32.totalorder %v6080_v60, 14 }
 0x1ee   : > { %v6412_v51 = vpop.permute.xlu1 %1757  ;;  %v6414_v52 = vpop.permute.xlu0 %1754 }
 0x1ef   : > { %11044 = vst [vmem:[#allocation54_spill] sm:$0xff] %v6412_v51  ;;  %11045 = vst [vmem:[#allocation55_spill] sm:$0xff] %v6414_v52  ;;  %2322 = vperm.xlu1 %5536, %v2303_v2   ;;  %2319 = vperm.xlu0 %5537, %v2302_v42  }
 0x1f2   : > { %v6420_v13 = vpop.permute.xlu1 %1763  ;;  %v6422_v14 = vpop.permute.xlu0 %1760 }
 0x1f3   : > { %11046 = vst [vmem:[#allocation56_spill] sm:$0xff] %v6420_v13  ;;  %11047 = vst [vmem:[#allocation57_spill] sm:$0xff] %v6422_v14  ;;  %2328 = vperm.xlu1 %5536, %v2305_v0   ;;  %2325 = vperm.xlu0 %5537, %v2304_v4   ;;  %v6571_v13 = vld [vmem:[%s10604_s3 + $0x38] sm:$0xff] }
 0x1f6   : > { %v6428_v2 = vpop.permute.xlu1 %1814  ;;  %v6430_v42 = vpop.permute.xlu0 %1811 }
 0x1f7   : > { %11048 = vst [vmem:[#allocation58_spill] sm:$0xff] %v6428_v2  ;;  %v954_v23 = vpop.f32.mrb[0].mxu1  ;;  %2379 = vperm.xlu1 %5536, %v2368_v25   ;;  %2376 = vperm.xlu0 %5537, %v2367_v26  }
 0x1f8   : > { %v955_v0 = vadd.f32 %v954_v23, %v6262_v28  ;;  %v5272_v4 = vpop.f32.mrb[1].mxu1 }
 0x1f9   : > { %v2372_v4 = vsel %vm2364_vm0, 1, %v10650_v40  ;;  %vm2435_vm0 = vcmp.eq.s32.totalorder %v6117_v6, 14 }
 0x1fa   : > { %4494 = vst.msk [vmem:[#allocation9 + $0x8] sm:$0xff] %vm10793_vm15, %v955_v0  ;;  %v6439_v27 = vpop.permute.xlu1 %1820  ;;  %v6441_v20 = vpop.permute.xlu0 %1817 }
 0x1fb   : > { %11049 = vst [vmem:[#allocation59_spill] sm:$0xff] %v6439_v27  ;;  %v959_v25 = vpop.f32.mrb[2].mxu1  ;;  %2385 = vperm.xlu1 %5536, %v2370_v24   ;;  %2382 = vperm.xlu0 %5537, %v2369_v19  }
 0x1fc   : > { %v960_v23 = vadd.f32 %v959_v25, %v6262_v28  ;;  %v5275_v26 = vpop.f32.mrb[3].mxu1  ;;  %v2374_v25 = vsel %vm2366_vm2, 1, %v10650_v40  ;;  %vm2498_vm2 = vcmp.eq.s32.totalorder %v6059_v54, 15 }
 0x1fd   : > { %v2373_v26 = vsel %vm2365_vm3, 1, %v10650_v40  ;;  %vm2497_vm3 = vcmp.eq.s32.totalorder %v6064_v55, 15 }
 0x1fe   : > { %v1055_v51 = vpack.c.bf16 %v960_v23, %v955_v0  ;;  %4495 = vst.msk [vmem:[#allocation9 + $0x28] sm:$0xff] %vm10793_vm15, %v960_v23  ;;  %v6449_v21 = vpop.permute.xlu1 %1826  ;;  %v6454_v62 = vpop.permute.xlu0 %1823  ;;  %v2436_v23 = vsel %vm2428_vm6, 1, %v10650_v40  ;;  %vm2502_vm6 = vcmp.eq.s32.totalorder %v6100_v1, 15 }
 0x1ff   : > { %v964_v58 = vpop.f32.mrb[4].mxu1  ;;  %2391 = vperm.xlu1 %5536, %v2372_v4   ;;  %2388 = vperm.xlu0 %5537, %v2371_v48   ;;  %11050 = vst [vmem:[#allocation60_spill] sm:$0xff] %v6449_v21  ;;  %11051 = vst [vmem:[#allocation61_spill] sm:$0xff] %v6454_v62  ;;  %v1053_v48 = vld [vmem:[#allocation3 + $0x10] sm:$0xff]  ;;  %v2506_v21 = vsel %vm2498_vm2, 1, %v10650_v40 }
 0x200   : > { %v965_v19 = vadd.f32 %v964_v58, %v6262_v28  ;;  %5289 = vmatprep.subr.bf16.mxu1 %v1055_v51  ;;  %v5278_v24 = vpop.f32.mrb[5].mxu1  ;;  %v2437_v58 = vsel %vm2429_vm5, 1, %v10650_v40  ;;  %vm2499_vm5 = vcmp.eq.s32.totalorder %v6080_v60, 15 }
 0x201   : > { %5290 = vmatpush3.bf16.msra.mxu1 %v1055_v51  ;;  %v1052_v51 = vld [vmem:[#allocation3 + $0x8] sm:$0xff]  ;;  %v2439_v24 = vsel %vm2431_vm8, 1, %v10650_v40  ;;  %vm2501_vm8 = vcmp.eq.s32.totalorder %v6105_v3, 15  ;;  %v6522_v3 = vld [vmem:[%s10604_s3] sm:$0xff] }
 0x202   : > { %v1056_v0 = vpack.c.bf16 %v965_v19, %v965_v19  ;;  %4496 = vst.msk [vmem:[#allocation9 + $0x48] sm:$0xff] %vm10793_vm15, %v965_v19  ;;  %v6465_v4 = vpop.permute.xlu1 %1832  ;;  %v6467_v19 = vpop.permute.xlu0 %1829 }
 0x203   : > { %2397 = vperm.xlu1 %5536, %v2374_v25   ;;  %2394 = vperm.xlu0 %5537, %v2373_v26   ;;  %11052 = vst [vmem:[#allocation62_spill] sm:$0xff] %v6465_v4  ;;  %11053 = vst [vmem:[#allocation63_spill] sm:$0xff] %v6467_v19  ;;  %v2438_v25 = vsel %vm2430_vm9, 1, %v10650_v40  ;;  %vm2504_vm9 = vcmp.eq.s32.totalorder %v6117_v6, 15  ;;  %v970_v6 = vld [vmem:[#allocation2 + $0x10] sm:$0xff] }
 0x204   : > { %5467 = vmatprep.subr.msk.bf16.mxu1 %vm10792_vm4, %v1056_v0  ;;  %v1072_v28 = vsel %vm10792_vm4, %v1056_v0, 0  ;;  %v2441_v0 = vsel %vm2433_vm10, 1, %v10650_v40  ;;  %vm2503_vm10 = vcmp.eq.s32.totalorder %v6122_v7, 15  ;;  %v2512_v7 = vsel %vm2504_vm9, 1, %v10650_v40 }
 0x205   : > { %5292 = vmatpush3.bf16.msra.mxu1 %v1072_v28  ;;  %v2440_v28 = vsel %vm2432_vm13, 1, %v10650_v40  ;;  %vm1765_vm4 = vcmp.eq.s32.totalorder %v6398_v18, 1 }
 0x206   : > { %v6475_v26 = vpop.permute.xlu1 %1883 }
 0x207   : > { %2448 = vperm.xlu1 %5536, %v2437_v58   ;;  %2445 = vperm.xlu0 %5537, %v2436_v23   ;;  %11054 = vst [vmem:[#allocation64_spill] sm:$0xff] %v6475_v26  ;;  %v6479_v58 = vpop.permute.xlu0 %1880  ;;  %v1054_v23 = vld [vmem:[#allocation3 + $0x18] sm:$0xff] }
 0x208   : > { %5294 = vmatmul.mubr.msk.bf16.vlgmr.msra.gmra.mrb[8].mxu1 %vm1057_vm7, %v1052_v51  ;;  %v2443_v51 = vsel %vm2435_vm0, 1, %v10650_v40  ;;  %vm2575_vm0 = vcmp.eq.s32.totalorder %v6522_v3, 0 }
 0x209   : > { %5297 = vmatprep.mubr.msk.bf16.mxu1 %vm1057_vm7, %v1053_v48  ;;  %v2442_v48 = vsel %vm2434_vm1, 1, %v10650_v40 }
 0x20b   : > { %2454 = vperm.xlu1 %5536, %v2439_v24   ;;  %2451 = vperm.xlu0 %5537, %v2438_v25   ;;  %v6488_v24 = vpop.permute.xlu1 %1889  ;;  %v6490_v25 = vpop.permute.xlu0 %1886 }
 0x20c   : > { %11055 = vst [vmem:[#allocation65_spill] sm:$0xff] %v6488_v24 }
 0x20f   : > { %2460 = vperm.xlu1 %5536, %v2441_v0   ;;  %2457 = vperm.xlu0 %5537, %v2440_v28   ;;  %v2505_v0 = vsel %vm2497_vm3, 1, %v10650_v40  ;;  %v5261_v28 = vpop.f32.mrb[0].mxu0  ;;  %v6496_v54 = vpop.permute.xlu1 %1895 }
 0x210   : > { %5298 = vmatmul.mubr.msk.bf16.gmra.mrb[12].mxu1 %vm1057_vm7, %v1054_v23  ;;  %vm2500_vm7 = vcmp.eq.s32.totalorder %v6075_v59, 15  ;;  %11056 = vst [vmem:[#allocation66_spill] sm:$0xff] %v6496_v54  ;;  %v2507_v23 = vsel %vm2499_vm5, 1, %v10650_v40  ;;  %v6501_v39 = vpop.permute.xlu0 %1892  ;;  %v6554_v54 = vld [vmem:[%s10604_s3 + $0x28] sm:$0xff] }
 0x211   : > { %v2508_v55 = vsel %vm2500_vm7, 1, %v10650_v40  ;;  %11057 = vst [vmem:[#allocation67_spill] sm:$0xff] %v6501_v39  ;;  %vm2580_vm3 = vcmp.eq.s32.totalorder %v6554_v54, 0 }
 0x213   : > { %2466 = vperm.xlu1 %5536, %v2443_v51   ;;  %2463 = vperm.xlu0 %5537, %v2442_v48   ;;  %v868_v51 = vadd.f32 %v5261_v28, %v6067_v57  ;;  %v862_v48 = vpop.f32.mrb[1].mxu0  ;;  %v6512_v1 = vpop.permute.xlu1 %1901  ;;  %v969_v28 = vld [vmem:[#allocation2 + $0x8] sm:$0xff] }
 0x214   : > { %v863_v59 = vadd.f32 %v862_v48, %v6067_v57  ;;  %11058 = vst [vmem:[#allocation68_spill] sm:$0xff] %v6512_v1  ;;  %v6517_v57 = vld [vmem:[%s10604_s3 + $0x8] sm:$0xff]  ;;  %v6535_v48 = vld [vmem:[%s10604_s3 + $0x18] sm:$0xff] }
 0x215   : > { %4258 = vst.msk [vmem:[#allocation8 + $0x28] sm:$0xff] %vm10793_vm15, %v868_v51  ;;  %vm2576_vm13 = vcmp.eq.s32.totalorder %v6517_v57, 0  ;;  %vm2578_vm1 = vcmp.eq.s32.totalorder %v6535_v48, 0 }
 0x216   : > { %v972_v60 = vpack.c.bf16 %v868_v51, %v863_v59  ;;  %4257 = vst.msk [vmem:[#allocation8 + $0x8] sm:$0xff] %vm10793_vm15, %v863_v59  ;;  %v11060_v51 = vmov 0.0   ;;  %v6540_v59 = vld [vmem:[%s10604_s3 + $0x10] sm:$0xff] }
 0x217   : > { %2517 = vperm.xlu1 %5536, %v2506_v21   ;;  %2514 = vperm.xlu0 %5537, %v2505_v0   ;;  %v2510_v21 = vsel %vm2502_vm6, 1, %v10650_v40  ;;  %v2509_v0 = vsel %vm2501_vm8, 1, %v10650_v40  ;;  %vm2577_vm2 = vcmp.eq.s32.totalorder %v6540_v59, 0  ;;  %vm2644_vm6 = vcmp.eq.s32.totalorder %v6522_v3, 1 }
 0x218   : > { %5279 = vmatprep.subr.bf16.mxu0 %v972_v60  ;;  %v2585_v1 = vsel %vm2577_vm2, 1, %v10650_v40  ;;  %vm2647_vm8 = vcmp.eq.s32.totalorder %v6535_v48, 1  ;;  %vm2646_vm9 = vcmp.eq.s32.totalorder %v6540_v59, 1  ;;  %vm2714_vm2 = vcmp.eq.s32.totalorder %v6517_v57, 2 }
 0x219   : > { %5280 = vmatpush3.bf16.msra.mxu0 %v972_v60  ;;  %v6543_v60 = vpop.permute.xlu1 %1952  ;;  %v2722_v52 = vsel %vm2714_vm2, 1, %v10650_v40 }
 0x21a   : > { %5301 = vmatprep.subr.bf16.mxu0 %v11060_v51  ;;  %11061 = vst [vmem:[#allocation70_spill] sm:$0xff] %v6543_v60 }
 0x21b   : > { %2523 = vperm.xlu1 %5536, %v2508_v55   ;;  %2520 = vperm.xlu0 %5537, %v2507_v23   ;;  %v6524_v55 = vpop.permute.xlu0 %1898  ;;  %v2511_v23 = vsel %vm2503_vm10, 1, %v10650_v40  ;;  %vm2649_vm10 = vcmp.eq.s32.totalorder %v6554_v54, 1 }
 0x21c   : > { %11059 = vst [vmem:[#allocation69_spill] sm:$0xff] %v6524_v55  ;;  %5282 = vmatmul.mubr.msk.bf16.vlgmr.msra.gmra.mrb[4].mxu0 %vm973_vm14, %v969_v28 }
 0x21d   : > { %5285 = vmatprep.mubr.msk.bf16.mxu0 %vm973_vm14, %v970_v6  ;;  %v6559_v6 = vld [vmem:[%s10604_s3 + $0x20] sm:$0xff]  ;;  %v6566_v4 = vpop.permute.xlu1 %1958 }
 0x21e   : > { %vm2579_vm7 = vcmp.eq.s32.totalorder %v6559_v6, 0  ;;  %11062 = vst [vmem:[#allocation71_spill] sm:$0xff] %v6566_v4  ;;  %vm2786_vm2 = vcmp.eq.s32.totalorder %v6559_v6, 3 }
 0x21f   : > { %2529 = vperm.xlu1 %5536, %v2510_v21   ;;  %2526 = vperm.xlu0 %5537, %v2509_v0   ;;  %v2584_v21 = vsel %vm2576_vm13, 1, %v10650_v40  ;;  %v2583_v0 = vsel %vm2575_vm0, 1, %v10650_v40  ;;  %v6547_v28 = vpop.permute.xlu0 %1949  ;;  %v2587_v9 = vsel %vm2579_vm7, 1, %v10650_v40  ;;  %vm2648_vm13 = vcmp.eq.s32.totalorder %v6559_v6, 1 }
 0x220   : > { %vm2651_vm0 = vcmp.eq.s32.totalorder %v6571_v13, 1  ;;  %vm2716_vm7 = vcmp.eq.s32.totalorder %v6535_v48, 2 }
 0x221   : > { %v6586_v29 = vpop.permute.xlu1 %1964 }
 0x222   : > { %11063 = vst [vmem:[#allocation72_spill] sm:$0xff] %v6586_v29  ;;  %v2655_v29 = vsel %vm2647_vm8, 1, %v10650_v40 }
 0x223   : > { %2535 = vperm.xlu1 %5536, %v2512_v7   ;;  %2532 = vperm.xlu0 %5537, %v2511_v23   ;;  %v971_v7 = vld [vmem:[#allocation2 + $0x18] sm:$0xff]  ;;  %v2586_v23 = vsel %vm2578_vm1, 1, %v10650_v40 }
 0x224   : > { %5286 = vmatmul.mubr.msk.bf16.gmra.mrb[8].mxu0 %vm973_vm14, %v971_v7  ;;  %v2588_v7 = vsel %vm2580_vm3, 1, %v10650_v40  ;;  %vm2582_vm14 = vcmp.eq.s32.totalorder %v6571_v13, 0  ;;  %vm2713_vm3 = vcmp.eq.s32.totalorder %v6522_v3, 2 }
 0x225   : > { %5309 = vmatprep.mubr.msk.bf16.mxu0 %vm5728_vm11, %v11060_v51  ;;  %v2590_v5 = vsel %vm2582_vm14, 1, %v10650_v40  ;;  %vm2645_vm11 = vcmp.eq.s32.totalorder %v6517_v57, 1  ;;  %v2721_v61 = vsel %vm2713_vm3, 1, %v10650_v40  ;;  %vm2715_vm14 = vcmp.eq.s32.totalorder %v6540_v59, 2 }
 0x226   : > { %v2723_v22 = vsel %vm2715_vm14, 1, %v10650_v40  ;;  %vm2789_vm3 = vcmp.eq.s32.totalorder %v6571_v13, 3  ;;  %vm2852_vm14 = vcmp.eq.s32.totalorder %v6517_v57, 4 }
 0x227   : > { %2595 = vperm.xlu1 %5536, %v2584_v21   ;;  %2592 = vperm.xlu0 %5537, %v2583_v0   ;;  %v6576_v21 = vld [vmem:[%s10604_s3 + $0x30] sm:$0xff]  ;;  %v6580_v0 = vpop.permute.xlu0 %1955 }
 0x228   : > { %vm2581_vm5 = vcmp.eq.s32.totalorder %v6576_v21, 0  ;;  %vm2650_vm1 = vcmp.eq.s32.totalorder %v6576_v21, 1  ;;  %vm2719_vm8 = vcmp.eq.s32.totalorder %v6576_v21, 2 }
 0x229   : > { %v2589_v43 = vsel %vm2581_vm5, 1, %v10650_v40  ;;  %vm2718_vm5 = vcmp.eq.s32.totalorder %v6554_v54, 2 }
 0x22b   : > { %2601 = vperm.xlu1 %5536, %v2586_v23   ;;  %2598 = vperm.xlu0 %5537, %v2585_v1   ;;  %v6590_v39 = vpop.permute.xlu0 %1961  ;;  %v2653_v1 = vsel %vm2645_vm11, 1, %v10650_v40  ;;  %v2652_v23 = vsel %vm2644_vm6, 1, %v10650_v40  ;;  %vm2717_vm11 = vcmp.eq.s32.totalorder %v6559_v6, 2  ;;  %vm2720_vm6 = vcmp.eq.s32.totalorder %v6571_v13, 2 }
 0x22c   : > { %11064 = vst [vmem:[#allocation73_spill] sm:$0xff] %v6590_v39  ;;  %v2654_v39 = vsel %vm2646_vm9, 1, %v10650_v40  ;;  %vm2783_vm9 = vcmp.eq.s32.totalorder %v6517_v57, 3 }
 0x22f   : > { %2607 = vperm.xlu1 %5536, %v2588_v7   ;;  %2604 = vperm.xlu0 %5537, %v2587_v9   ;;  %v6598_v9 = vpop.permute.xlu1 %1970  ;;  %v6600_v7 = vpop.permute.xlu0 %1967 }
 0x230   : > { %11065 = vst [vmem:[#allocation74_spill] sm:$0xff] %v6598_v9  ;;  %11066 = vst [vmem:[#allocation75_spill] sm:$0xff] %v6600_v7  ;;  %v2656_v9 = vsel %vm2648_vm13, 1, %v10650_v40  ;;  %vm2785_vm13 = vcmp.eq.s32.totalorder %v6535_v48, 3 }
 0x233   : > { %2613 = vperm.xlu1 %5536, %v2590_v5   ;;  %2610 = vperm.xlu0 %5537, %v2589_v43   ;;  %v6606_v43 = vpop.permute.xlu1 %2034  ;;  %v2657_v5 = vsel %vm2649_vm10, 1, %v10650_v40  ;;  %v6610_v62 = vpop.permute.xlu0 %2031  ;;  %vm2782_vm10 = vcmp.eq.s32.totalorder %v6522_v3, 3 }
 0x234   : > { %11067 = vst [vmem:[#allocation76_spill] sm:$0xff] %v6606_v43 }
 0x237   : > { %2664 = vperm.xlu1 %5536, %v2653_v1   ;;  %2661 = vperm.xlu0 %5537, %v2652_v23   ;;  %v2659_v1 = vsel %vm2651_vm0, 1, %v10650_v40  ;;  %v2658_v23 = vsel %vm2650_vm1, 1, %v10650_v40  ;;  %vm2784_vm0 = vcmp.eq.s32.totalorder %v6540_v59, 3  ;;  %vm2787_vm1 = vcmp.eq.s32.totalorder %v6554_v54, 3 }
 0x23b   : > { %2670 = vperm.xlu1 %5536, %v2655_v29   ;;  %2667 = vperm.xlu0 %5537, %v2654_v39   ;;  %v6618_v39 = vpop.permute.xlu1 %2040  ;;  %v6620_v29 = vpop.permute.xlu0 %2037 }
 0x23c   : > { %11068 = vst [vmem:[#allocation77_spill] sm:$0xff] %v6618_v39 }
 0x23f   : > { %2676 = vperm.xlu1 %5536, %v2657_v5   ;;  %2673 = vperm.xlu0 %5537, %v2656_v9   ;;  %v6626_v9 = vpop.permute.xlu1 %2046  ;;  %v2724_v5 = vsel %vm2716_vm7, 1, %v10650_v40  ;;  %v6630_v63 = vpop.permute.xlu0 %2043  ;;  %vm2788_vm7 = vcmp.eq.s32.totalorder %v6576_v21, 3 }
 0x240   : > { %11069 = vst [vmem:[#allocation78_spill] sm:$0xff] %v6626_v9  ;;  %11070 = vst [vmem:[#allocation79_spill] sm:$0xff] %v6630_v63  ;;  %v2728_v9 = vsel %vm2720_vm6, 1, %v10650_v40  ;;  %v2727_v63 = vsel %vm2719_vm8, 1, %v10650_v40  ;;  %vm2853_vm6 = vcmp.eq.s32.totalorder %v6540_v59, 4  ;;  %vm2856_vm8 = vcmp.eq.s32.totalorder %v6554_v54, 4 }
 0x243   : > { %2682 = vperm.xlu1 %5536, %v2659_v1   ;;  %2679 = vperm.xlu0 %5537, %v2658_v23   ;;  %v2726_v1 = vsel %vm2718_vm5, 1, %v10650_v40  ;;  %v2725_v23 = vsel %vm2717_vm11, 1, %v10650_v40  ;;  %vm2851_vm5 = vcmp.eq.s32.totalorder %v6522_v3, 4  ;;  %vm2854_vm11 = vcmp.eq.s32.totalorder %v6535_v48, 4 }
 0x247   : > { %2733 = vperm.xlu1 %5536, %v2722_v52   ;;  %2730 = vperm.xlu0 %5537, %v2721_v61   ;;  %v6638_v61 = vpop.permute.xlu1 %2052  ;;  %v6640_v52 = vpop.permute.xlu0 %2049 }
 0x248   : > { %11071 = vst [vmem:[#allocation80_spill] sm:$0xff] %v6638_v61  ;;  %11072 = vst [vmem:[#allocation81_spill] sm:$0xff] %v6640_v52  ;;  %v2790_v61 = vsel %vm2782_vm10, 1, %v10650_v40  ;;  %vm2858_vm10 = vcmp.eq.s32.totalorder %v6571_v13, 4 }
 0x24b   : > { %2739 = vperm.xlu1 %5536, %v2724_v5   ;;  %2736 = vperm.xlu0 %5537, %v2723_v22   ;;  %v6646_v22 = vpop.permute.xlu1 %2103  ;;  %v2791_v5 = vsel %vm2783_vm9, 1, %v10650_v40  ;;  %v6650_v41 = vpop.permute.xlu0 %2100  ;;  %vm2855_vm9 = vcmp.eq.s32.totalorder %v6559_v6, 4 }
 0x24c   : > { %11073 = vst [vmem:[#allocation82_spill] sm:$0xff] %v6646_v22 }
 0x24f   : > { %2745 = vperm.xlu1 %5536, %v2726_v1   ;;  %2742 = vperm.xlu0 %5537, %v2725_v23   ;;  %v2793_v1 = vsel %vm2785_vm13, 1, %v10650_v40  ;;  %v2792_v23 = vsel %vm2784_vm0, 1, %v10650_v40  ;;  %vm2857_vm13 = vcmp.eq.s32.totalorder %v6576_v21, 4  ;;  %vm2921_vm0 = vcmp.eq.s32.totalorder %v6517_v57, 5 }
 0x253   : > { %2751 = vperm.xlu1 %5536, %v2728_v9   ;;  %2748 = vperm.xlu0 %5537, %v2727_v63   ;;  %v6656_v9 = vpop.permute.xlu1 %2109  ;;  %v6658_v63 = vpop.permute.xlu0 %2106 }
 0x254   : > { %11074 = vst [vmem:[#allocation83_spill] sm:$0xff] %v6656_v9 }
 0x257   : > { %2802 = vperm.xlu1 %5536, %v2791_v5   ;;  %2799 = vperm.xlu0 %5537, %v2790_v61   ;;  %v6660_v52 = vpop.permute.xlu1 %2115  ;;  %v6662_v7 = vpop.permute.xlu0 %2112 }
 0x258   : > { %11075 = vst [vmem:[#allocation84_spill] sm:$0xff] %v6660_v52  ;;  %11076 = vst [vmem:[#allocation85_spill] sm:$0xff] %v6662_v7 }
 0x25b   : > { %2808 = vperm.xlu1 %5536, %v2793_v1   ;;  %2805 = vperm.xlu0 %5537, %v2792_v23   ;;  %v6664_v55 = vpop.permute.xlu1 %2121  ;;  %v6666_v19 = vpop.permute.xlu0 %2118 }
 0x25c   : > { %11077 = vst [vmem:[#allocation86_spill] sm:$0xff] %v6664_v55  ;;  %11078 = vst [vmem:[#allocation87_spill] sm:$0xff] %v6666_v19 }
 0x25f   : > { %v6668_v5 = vpop.permute.xlu1 %2172  ;;  %v6670_v61 = vpop.permute.xlu0 %2169 }
 0x260   : > { %11079 = vst [vmem:[#allocation88_spill] sm:$0xff] %v6668_v5 }
 0x263   : > { %v6672_v14 = vpop.permute.xlu1 %2178  ;;  %v6674_v40 = vpop.permute.xlu0 %2175 }
 0x264   : > { %11080 = vst [vmem:[#allocation89_spill] sm:$0xff] %v6672_v14 }
 0x267   : > { %v6676_v10 = vpop.permute.xlu1 %2184  ;;  %v6678_v1 = vpop.permute.xlu0 %2181 }
 0x268   : > { %11081 = vst [vmem:[#allocation90_spill] sm:$0xff] %v6676_v10  ;;  %11082 = vst [vmem:[#allocation91_spill] sm:$0xff] %v6678_v1 }
 0x26b   : > { %v6680_v23 = vpop.permute.xlu1 %2190  ;;  %v6682_v52 = vpop.permute.xlu0 %2187 }
 0x26c   : > { %11083 = vst [vmem:[#allocation92_spill] sm:$0xff] %v6680_v23  ;;  %11084 = vst [vmem:[#allocation93_spill] sm:$0xff] %v6682_v52 }
 0x26f   : > { %v6684_v7 = vpop.permute.xlu1 %2241  ;;  %v6686_v55 = vpop.permute.xlu0 %2238 }
 0x270   : > { %11085 = vst [vmem:[#allocation94_spill] sm:$0xff] %v6684_v7 }
 0x273   : > { %v6688_v19 = vpop.permute.xlu1 %2247  ;;  %v6690_v30 = vpop.permute.xlu0 %2244 }
 0x274   : > { %11086 = vst [vmem:[#allocation95_spill] sm:$0xff] %v6688_v19 }
 0x277   : > { %v6692_v8 = vpop.permute.xlu1 %2253  ;;  %v6694_v44 = vpop.permute.xlu0 %2250 }
 0x278   : > { %11087 = vst [vmem:[#allocation96_spill] sm:$0xff] %v6692_v8  ;;  %11088 = vst [vmem:[#allocation97_spill] sm:$0xff] %v6694_v44 }
 0x27b   : > { %v6696_v5 = vpop.permute.xlu1 %2259  ;;  %v6698_v10 = vpop.permute.xlu0 %2256 }
 0x27c   : > { %11089 = vst [vmem:[#allocation98_spill] sm:$0xff] %v6696_v5  ;;  %11090 = vst [vmem:[#allocation99_spill] sm:$0xff] %v6698_v10 }
 0x27f   : > { %v6700_v1 = vpop.permute.xlu1 %2310  ;;  %v6702_v23 = vpop.permute.xlu0 %2307 }
 0x280   : > { %11091 = vst [vmem:[#allocation100_spill] sm:$0xff] %v6700_v1  ;;  %11092 = vst [vmem:[#allocation101_spill] sm:$0xff] %v6702_v23 }
 0x283   : > { %v6704_v52 = vpop.permute.xlu1 %2316  ;;  %v6706_v7 = vpop.permute.xlu0 %2313 }
 0x284   : > { %11093 = vst [vmem:[#allocation102_spill] sm:$0xff] %v6704_v52 }
 0x287   : > { %v6708_v22 = vpop.permute.xlu1 %2322  ;;  %v6710_v43 = vpop.permute.xlu0 %2319 }
 0x288   : > { %11094 = vst [vmem:[#allocation103_spill] sm:$0xff] %v6708_v22  ;;  %11095 = vst [vmem:[#allocation104_spill] sm:$0xff] %v6710_v43 }
 0x28b   : > { %v6712_v60 = vpop.permute.xlu1 %2328  ;;  %v6714_v8 = vpop.permute.xlu0 %2325 }
 0x28c   : > { %11096 = vst [vmem:[#allocation105_spill] sm:$0xff] %v6712_v60  ;;  %11097 = vst [vmem:[#allocation106_spill] sm:$0xff] %v6714_v8 }
 0x28f   : > { %v6716_v44 = vpop.permute.xlu1 %2379  ;;  %v6718_v5 = vpop.permute.xlu0 %2376 }
 0x290   : > { %11098 = vst [vmem:[#allocation107_spill] sm:$0xff] %v6716_v44  ;;  %11099 = vst [vmem:[#allocation108_spill] sm:$0xff] %v6718_v5 }
 0x293   : > { %v6720_v10 = vpop.permute.xlu1 %2385  ;;  %v6722_v1 = vpop.permute.xlu0 %2382 }
 0x294   : > { %11100 = vst [vmem:[#allocation109_spill] sm:$0xff] %v6720_v10 }
 0x297   : > { %v6724_v51 = vpop.permute.xlu1 %2391  ;;  %v6726_v26 = vpop.permute.xlu0 %2388 }
 0x298   : > { %11101 = vst [vmem:[#allocation110_spill] sm:$0xff] %v6724_v51  ;;  %11102 = vst [vmem:[#allocation111_spill] sm:$0xff] %v6726_v26 }
 0x29b   : > { %v6728_v2 = vpop.permute.xlu1 %2397  ;;  %v6730_v22 = vpop.permute.xlu0 %2394 }
 0x29c   : > { %11103 = vst [vmem:[#allocation112_spill] sm:$0xff] %v6728_v2  ;;  %11104 = vst [vmem:[#allocation113_spill] sm:$0xff] %v6730_v22 }
 0x29f   : > { %v6732_v43 = vpop.permute.xlu1 %2448  ;;  %v6734_v60 = vpop.permute.xlu0 %2445 }
 0x2a0   : > { %11105 = vst [vmem:[#allocation114_spill] sm:$0xff] %v6732_v43  ;;  %11106 = vst [vmem:[#allocation115_spill] sm:$0xff] %v6734_v60 }
 0x2a3   : > { %v6736_v8 = vpop.permute.xlu1 %2454  ;;  %v6738_v44 = vpop.permute.xlu0 %2451 }
 0x2a4   : > { %11107 = vst [vmem:[#allocation116_spill] sm:$0xff] %v6736_v8 }
 0x2a7   : > { %v6740_v17 = vpop.permute.xlu1 %2460  ;;  %v6742_v37 = vpop.permute.xlu0 %2457 }
 0x2a8   : > { %11108 = vst [vmem:[#allocation117_spill] sm:$0xff] %v6740_v17  ;;  %11109 = vst [vmem:[#allocation118_spill] sm:$0xff] %v6742_v37 }
 0x2ab   : > { %v6746_v26 = vpop.permute.xlu1 %2466  ;;  %v6748_v43 = vpop.permute.xlu0 %2463 }
 0x2ac   : > { %11110 = vst [vmem:[#allocation119_spill] sm:$0xff] %v6746_v26  ;;  %11111 = vst [vmem:[#allocation120_spill] sm:$0xff] %v6748_v43 }
 0x2af   : > { %v6752_v17 = vpop.permute.xlu1 %2517 }
 0x2b0   : > { %11112 = vst [vmem:[#allocation121_spill] sm:$0xff] %v6752_v17 }
 0x2b3   : > { %v6762_v26 = vpop.permute.xlu1 %2523 }
 0x2b4   : > { %11115 = vst [vmem:[#allocation123_spill] sm:$0xff] %v6762_v26 }
 0x2b7   : > { %v6773_v17 = vpop.permute.xlu1 %2529 }
 0x2b8   : > { %11116 = vst [vmem:[#allocation124_spill] sm:$0xff] %v6773_v17 }
 0x2db   : > { %v5295_v11 = vpop.f32.mrb[8].mxu1 }
 0x2dc   : > { %1151 = vrot.lane.b32.xlu1 %v5295_v11, %s5730_s15  ;;  %v1108_v51 = vpop.f32.mrb[9].mxu1  ;;  %v6755_v11 = vpop.permute.xlu0 %2514 }
 0x2dd   : > { %1147 = vrot.lane.b32.xlu0 %v1108_v51, %s5730_s15  ;;  %v5296_v2 = vpop.f32.mrb[10].mxu1  ;;  %11113 = vst [vmem:[#allocation122_spill] sm:$0xff] %v6755_v11 }
 0x2de   : > { %v1111_v22 = vpop.f32.mrb[11].mxu1 }
 0x2e0   : > { %1149 = vrot.lane.b32.xlu1 %v1111_v22, %s5730_s15  ;;  %v11114_v22 = vmov 0  }
 0x2e1   : > { %1153 = vrot.lane.b32.xlu0 %v5296_v2, %s5730_s15  ;;  %v2795_v2 = vsel %vm2787_vm1, 1, %v11114_v22  ;;  %v2794_v43 = vsel %vm2786_vm2, 1, %v11114_v22  ;;  %v2860_v26 = vsel %vm2852_vm14, 1, %v11114_v22  ;;  %v2862_v8 = vsel %vm2854_vm11, 1, %v11114_v22 }
 0x2e2   : > { %v2861_v10 = vsel %vm2853_vm6, 1, %v11114_v22  ;;  %v2864_v52 = vsel %vm2856_vm8, 1, %v11114_v22  ;;  %v2866_v14 = vsel %vm2858_vm10, 1, %v11114_v22  ;;  %vm2920_vm1 = vcmp.eq.s32.totalorder %v6522_v3, 5 }
 0x2e3   : > { %v5299_v49 = vpop.f32.mrb[12].mxu1  ;;  %vm2923_vm2 = vcmp.eq.s32.totalorder %v6535_v48, 5  ;;  %vm2990_vm14 = vcmp.eq.s32.totalorder %v6517_v57, 6  ;;  %vm2992_vm11 = vcmp.eq.s32.totalorder %v6535_v48, 6  ;;  %vm2924_vm6 = vcmp.eq.s32.totalorder %v6559_v6, 5 }
 0x2e4   : > { %1159 = vrot.lane.b32.xlu1 %v5299_v49, %s5730_s15  ;;  %v1124_v37 = vpop.f32.mrb[13].mxu1  ;;  %v6766_v49 = vpop.permute.xlu0 %2520  ;;  %vm2994_vm8 = vcmp.eq.s32.totalorder %v6554_v54, 6  ;;  %vm2996_vm10 = vcmp.eq.s32.totalorder %v6571_v13, 6 }
 0x2e5   : > { %v5300_v31 = vpop.f32.mrb[14].mxu1 }
 0x2e6   : > { %1161 = vrot.lane.b32.xlu0 %v5300_v31, %s5730_s15  ;;  %v1127_v51 = vpop.f32.mrb[15].mxu1  ;;  %v2797_v31 = vsel %vm2789_vm3, 1, %v11114_v22  ;;  %vm2925_vm3 = vcmp.eq.s32.totalorder %v6554_v54, 5 }
 0x2e8   : > { %1155 = vrot.lane.b32.xlu1 %v1124_v37, %s5730_s15  ;;  %v2796_v37 = vsel %vm2788_vm7, 1, %v11114_v22  ;;  %vm2927_vm7 = vcmp.eq.s32.totalorder %v6571_v13, 5 }
 0x2ea   : > { %1157 = vrot.lane.b32.xlu0 %v1127_v51, %s5730_s15  ;;  %v6776_v51 = vpop.permute.xlu0 %2526 }
 0x2eb   : > { %11117 = vst [vmem:[#allocation125_spill] sm:$0xff] %v6776_v51 }
 0x2ec   : > { %2814 = vperm.xlu1 %5536, %v2795_v2   ;;  %v2859_v2 = vsel %vm2851_vm5, 1, %v11114_v22  ;;  %vm2922_vm5 = vcmp.eq.s32.totalorder %v6540_v59, 5 }
 0x2ee   : > { %2811 = vperm.xlu0 %5537, %v2794_v43  }
 0x2ef   : > { %v6782_v43 = vpop.f32.mrb[4].mxu0 }
 0x2f0   : > { %2820 = vperm.xlu1 %5536, %v2797_v31   ;;  %v6785_v17 = vpop.f32.mrb[5].mxu0  ;;  %v6787_v31 = vpop.permute.xlu1 %2535 }
 0x2f1   : > { %11118 = vst [vmem:[#allocation126_spill] sm:$0xff] %v6787_v31  ;;  %v6790_v51 = vpop.f32.mrb[6].mxu0 }
 0x2f2   : > { %2817 = vperm.xlu0 %5537, %v2796_v37   ;;  %v6792_v37 = vpop.permute.xlu0 %2532 }
 0x2f3   : > { %11119 = vst [vmem:[#allocation127_spill] sm:$0xff] %v6792_v37 }
 0x2f4   : > { %2871 = vperm.xlu1 %5536, %v2860_v26   ;;  %v6795_v26 = vpop.f32.mrb[7].mxu0  ;;  %v6801_v31 = vpop.permute.xlu1 %2595 }
 0x2f5   : > { %11120 = vst [vmem:[#allocation128_spill] sm:$0xff] %v6801_v31 }
 0x2f6   : > { %2868 = vperm.xlu0 %5537, %v2859_v2   ;;  %v2863_v2 = vsel %vm2855_vm9, 1, %v11114_v22  ;;  %v6804_v19 = vpop.permute.xlu0 %2592  ;;  %vm2926_vm9 = vcmp.eq.s32.totalorder %v6576_v21, 5 }
 0x2f7   : > { %v5287_v37 = vpop.f32.mrb[8].mxu0  ;;  %11121 = vst [vmem:[#allocation129_spill] sm:$0xff] %v6804_v19 }
 0x2f8   : > { %2877 = vperm.xlu1 %5536, %v2862_v8   ;;  %v6807_v8 = vpop.f32.mrb[9].mxu0  ;;  %v6817_v39 = vpop.permute.xlu1 %2601 }
 0x2f9   : > { %v6812_v9 = vpop.f32.mrb[10].mxu0  ;;  %11122 = vst [vmem:[#allocation130_spill] sm:$0xff] %v6817_v39 }
 0x2fa   : > { %2874 = vperm.xlu0 %5537, %v2861_v10   ;;  %v2865_v10 = vsel %vm2857_vm13, 1, %v11114_v22  ;;  %v6815_v31 = vpop.f32.mrb[11].mxu0  ;;  %v6819_v4 = vpop.permute.xlu0 %2598  ;;  %vm2989_vm13 = vcmp.eq.s32.totalorder %v6522_v3, 6 }
 0x2fc   : > { %2883 = vperm.xlu1 %5536, %v2864_v52   ;;  %v2929_v52 = vsel %vm2921_vm0, 1, %v11114_v22  ;;  %v6822_v24 = vpop.permute.xlu1 %2607  ;;  %vm2991_vm0 = vcmp.eq.s32.totalorder %v6540_v59, 6 }
 0x2fd   : > { %11123 = vst [vmem:[#allocation131_spill] sm:$0xff] %v6822_v24 }
 0x2fe   : > { %2880 = vperm.xlu0 %5537, %v2863_v2   ;;  %v2928_v2 = vsel %vm2920_vm1, 1, %v11114_v22  ;;  %vm2993_vm1 = vcmp.eq.s32.totalorder %v6559_v6, 6 }
 0x300   : > { %2889 = vperm.xlu1 %5536, %v2866_v14   ;;  %v6824_v14 = vpop.permute.xlu0 %2604  ;;  %v6826_v27 = vpop.permute.xlu1 %2613 }
 0x301   : > { %11124 = vst [vmem:[#allocation132_spill] sm:$0xff] %v6824_v14  ;;  %11125 = vst [vmem:[#allocation133_spill] sm:$0xff] %v6826_v27 }
 0x302   : > { %2886 = vperm.xlu0 %5537, %v2865_v10  }
 0x304   : > { %2940 = vperm.xlu1 %5536, %v2929_v52   ;;  %v6828_v33 = vpop.permute.xlu0 %2610  ;;  %v6830_v46 = vpop.permute.xlu1 %2664 }
 0x305   : > { %11126 = vst [vmem:[#allocation134_spill] sm:$0xff] %v6828_v33  ;;  %11127 = vst [vmem:[#allocation135_spill] sm:$0xff] %v6830_v46 }
 0x306   : > { %2937 = vperm.xlu0 %5537, %v2928_v2  }
 0x308   : > { %v6832_v15 = vpop.permute.xlu0 %2661  ;;  %v6834_v39 = vpop.permute.xlu1 %2670 }
 0x309   : > { %11128 = vst [vmem:[#allocation136_spill] sm:$0xff] %v6832_v15  ;;  %11129 = vst [vmem:[#allocation137_spill] sm:$0xff] %v6834_v39 }
 0x30c   : > { %v6836_v10 = vpop.permute.xlu0 %2667  ;;  %v6838_v53 = vpop.permute.xlu1 %2676 }
 0x30d   : > { %11130 = vst [vmem:[#allocation138_spill] sm:$0xff] %v6838_v53 }
 0x310   : > { %v6840_v52 = vpop.permute.xlu0 %2673  ;;  %v6842_v2 = vpop.permute.xlu1 %2682 }
 0x311   : > { %11131 = vst [vmem:[#allocation139_spill] sm:$0xff] %v6840_v52  ;;  %11132 = vst [vmem:[#allocation140_spill] sm:$0xff] %v6842_v2 }
 0x314   : > { %v6844_v24 = vpop.permute.xlu0 %2679  ;;  %v6846_v27 = vpop.permute.xlu1 %2733 }
 0x315   : > { %11133 = vst [vmem:[#allocation141_spill] sm:$0xff] %v6844_v24  ;;  %11134 = vst [vmem:[#allocation142_spill] sm:$0xff] %v6846_v27  ;;  %v1182_v24 = vsub.s32 1, %v6049_v45 }
 0x318   : > { %v6848_v14 = vpop.permute.xlu0 %2730  ;;  %v6850_v33 = vpop.permute.xlu1 %2739 }
 0x319   : > { %11135 = vst [vmem:[#allocation143_spill] sm:$0xff] %v6848_v14  ;;  %11136 = vst [vmem:[#allocation144_spill] sm:$0xff] %v6850_v33  ;;  %v6872_v33 = vld [vmem:[%s5900_s16] sm:$0xff] }
 0x31c   : > { %v6852_v46 = vpop.permute.xlu0 %2736  ;;  %v6854_v39 = vpop.permute.xlu1 %2745 }
 0x31d   : > { %11137 = vst [vmem:[#allocation145_spill] sm:$0xff] %v6854_v39  ;;  %v6875_v39 = vrot.slane %v6872_v33, %v1182_v24 }
 0x320   : > { %v6856_v35 = vpop.permute.xlu0 %2742  ;;  %v6858_v53 = vpop.permute.xlu1 %2751 }
 0x321   : > { %11138 = vst [vmem:[#allocation146_spill] sm:$0xff] %v6856_v35  ;;  %11139 = vst [vmem:[#allocation147_spill] sm:$0xff] %v6858_v53 }
 0x324   : > { %v6860_v52 = vpop.permute.xlu0 %2748  ;;  %v6862_v15 = vpop.permute.xlu1 %2802 }
 0x325   : > { %11140 = vst [vmem:[#allocation148_spill] sm:$0xff] %v6860_v52  ;;  %11141 = vst [vmem:[#allocation149_spill] sm:$0xff] %v6862_v15 }
 0x328   : > { %v6864_v2 = vpop.permute.xlu0 %2799  ;;  %v6867_v27 = vpop.permute.xlu1 %2808 }
 0x329   : > { %11142 = vst [vmem:[#allocation150_spill] sm:$0xff] %v6864_v2  ;;  %11143 = vst [vmem:[#allocation151_spill] sm:$0xff] %v6867_v27 }
 0x32c   : > { %v6869_v14 = vpop.permute.xlu0 %2805 }
 0x34e   : > { %v1152_v35 = vpop.permute.xlu1 %1151 }
 0x34f   : > { %v6879_v53 = vsel %vm10793_vm15, %v6782_v43, %v1152_v35  ;;  %v1148_v52 = vpop.permute.xlu0 %1147 }
 0x350   : > { %v1186_v15 = vmul.f32 %v6875_v39, %v6879_v53  ;;  %v6885_v2 = vsel %vm10793_vm15, %v6785_v17, %v1148_v52 }
 0x351   : > { %v1184_v27 = vmul.f32 %v6875_v39, %v6885_v2 }
 0x352   : > { %v1150_v19 = vpop.permute.xlu1 %1149  ;;  %1196 = vadd.xlane.f32.xlu0 %v1186_v15 }
 0x353   : > { %v6891_v24 = vsel %vm10793_vm15, %v6795_v26, %v1150_v19  ;;  %v1154_v11 = vpop.permute.xlu0 %1153  ;;  %1192 = vadd.xlane.f32.xlu1 %v1184_v27 }
 0x354   : > { %11144 = vst [vmem:[#allocation152_spill] sm:$0xff] %v6891_v24  ;;  %v1185_v35 = vmul.f32 %v6875_v39, %v6891_v24  ;;  %v6897_v43 = vsel %vm10793_vm15, %v6790_v51, %v1154_v11  ;;  %v2931_v51 = vsel %vm2923_vm2, 1, %v11114_v22  ;;  %vm2995_vm2 = vcmp.eq.s32.totalorder %v6576_v21, 6 }
 0x355   : > { %11145 = vst [vmem:[#allocation153_spill] sm:$0xff] %v6897_v43  ;;  %v1187_v17 = vmul.f32 %v6875_v39, %v6897_v43 }
 0x356   : > { %v1160_v52 = vpop.permute.xlu1 %1159  ;;  %1194 = vadd.xlane.f32.xlu0 %v1185_v35  ;;  %v2935_v35 = vsel %vm2927_vm7, 1, %v11114_v22  ;;  %vm3060_vm7 = vcmp.eq.s32.totalorder %v6540_v59, 7 }
 0x357   : > { %v6902_v15 = vsel %vm10793_vm15, %v5287_v37, %v1160_v52  ;;  %1198 = vadd.xlane.f32.xlu1 %v1187_v17  ;;  %v2933_v37 = vsel %vm2925_vm3, 1, %v11114_v22  ;;  %v2930_v17 = vsel %vm2922_vm5, 1, %v11114_v22  ;;  %v3000_v52 = vsel %vm2992_vm11, 1, %v11114_v22 }
 0x358   : > { %11146 = vst [vmem:[#allocation154_spill] sm:$0xff] %v6902_v15  ;;  %v1190_v19 = vmul.f32 %v6875_v39, %v6902_v15  ;;  %vm3058_vm3 = vcmp.eq.s32.totalorder %v6522_v3, 7  ;;  %vm3064_vm5 = vcmp.eq.s32.totalorder %v6576_v21, 7  ;;  %vm3134_vm11 = vcmp.eq.s32.totalorder %v6522_v3, 8 }
 0x35a   : > { %v1156_v27 = vpop.permute.xlu1 %1155  ;;  %1204 = vadd.xlane.f32.xlu0 %v1190_v19  ;;  %v2932_v19 = vsel %vm2924_vm6, 1, %v11114_v22  ;;  %vm3136_vm6 = vcmp.eq.s32.totalorder %v6540_v59, 8 }
 0x35b   : > { %v6908_v26 = vsel %vm10793_vm15, %v6807_v8, %v1156_v27  ;;  %v2998_v8 = vsel %vm2990_vm14, 1, %v11114_v22  ;;  %v3002_v27 = vsel %vm2994_vm8, 1, %v11114_v22  ;;  %vm3062_vm14 = vcmp.eq.s32.totalorder %v6559_v6, 7 }
 0x35c   : > { %11147 = vst [vmem:[#allocation155_spill] sm:$0xff] %v6908_v26  ;;  %v1188_v11 = vmul.f32 %v6875_v39, %v6908_v26  ;;  %vm3059_vm8 = vcmp.eq.s32.totalorder %v6517_v57, 7 }
 0x35e   : > { %1200 = vadd.xlane.f32.xlu0 %v1188_v11  ;;  %v2934_v11 = vsel %vm2926_vm9, 1, %v11114_v22  ;;  %vm3061_vm9 = vcmp.eq.s32.totalorder %v6535_v48, 7 }
 0x368   : > { %2946 = vperm.xlu1 %5536, %v2931_v51   ;;  %v3004_v51 = vsel %vm2996_vm10, 1, %v11114_v22  ;;  %vm3063_vm10 = vcmp.eq.s32.totalorder %v6554_v54, 7 }
 0x36c   : > { %2952 = vperm.xlu1 %5536, %v2933_v37   ;;  %v2997_v37 = vsel %vm2989_vm13, 1, %v11114_v22  ;;  %vm3065_vm13 = vcmp.eq.s32.totalorder %v6571_v13, 7 }
 0x370   : > { %2958 = vperm.xlu1 %5536, %v2935_v35   ;;  %v2999_v35 = vsel %vm2991_vm0, 1, %v11114_v22  ;;  %vm3135_vm0 = vcmp.eq.s32.totalorder %v6517_v57, 8 }
 0x374   : > { %3009 = vperm.xlu1 %5536, %v2998_v8   ;;  %2943 = vperm.xlu0 %5537, %v2930_v17   ;;  %v3001_v8 = vsel %vm2993_vm1, 1, %v11114_v22  ;;  %v3003_v17 = vsel %vm2995_vm2, 1, %v11114_v22  ;;  %vm3137_vm1 = vcmp.eq.s32.totalorder %v6535_v48, 8  ;;  %vm3139_vm2 = vcmp.eq.s32.totalorder %v6554_v54, 8 }
 0x378   : > { %3015 = vperm.xlu1 %5536, %v3000_v52   ;;  %2949 = vperm.xlu0 %5537, %v2932_v19   ;;  %v3066_v52 = vsel %vm3058_vm3, 1, %v11114_v22  ;;  %v3068_v19 = vsel %vm3060_vm7, 1, %v11114_v22  ;;  %vm3138_vm3 = vcmp.eq.s32.totalorder %v6559_v6, 8  ;;  %vm3141_vm7 = vcmp.eq.s32.totalorder %v6571_v13, 8 }
 0x379   : > { %v3149_v54 = vsel %vm3141_vm7, 1, %v11114_v22  ;;  %vm3347_vm7 = vcmp.eq.s32.totalorder %v6576_v21, 11 }
 0x37c   : > { %3021 = vperm.xlu1 %5536, %v3002_v27   ;;  %2955 = vperm.xlu0 %5537, %v2934_v11   ;;  %v3070_v27 = vsel %vm3062_vm14, 1, %v11114_v22  ;;  %v3072_v11 = vsel %vm3064_vm5, 1, %v11114_v22  ;;  %vm3140_vm14 = vcmp.eq.s32.totalorder %v6576_v21, 8  ;;  %vm3203_vm5 = vcmp.eq.s32.totalorder %v6522_v3, 9 }
 0x380   : > { %3027 = vperm.xlu1 %5536, %v3004_v51   ;;  %3006 = vperm.xlu0 %5537, %v2997_v37   ;;  %v1162_v51 = vpop.permute.xlu0 %1161  ;;  %v3142_v37 = vsel %vm3134_vm11, 1, %v11114_v22  ;;  %vm3205_vm11 = vcmp.eq.s32.totalorder %v6540_v59, 9 }
 0x384   : > { %3012 = vperm.xlu0 %5537, %v2999_v35   ;;  %v6953_v35 = vsel %vm10793_vm15, %v6812_v9, %v1162_v51  ;;  %v3067_v9 = vsel %vm3059_vm8, 1, %v11114_v22  ;;  %v6969_v51 = vpop.permute.xlu1 %2814  ;;  %vm3209_vm8 = vcmp.eq.s32.totalorder %v6576_v21, 9 }
 0x385   : > { %11148 = vst [vmem:[#allocation156_spill] sm:$0xff] %v6953_v35  ;;  %11151 = vst [vmem:[#allocation159_spill] sm:$0xff] %v6969_v51 }
 0x388   : > { %3018 = vperm.xlu0 %5537, %v3001_v8   ;;  %v3144_v8 = vsel %vm3136_vm6, 1, %v11114_v22  ;;  %vm3207_vm6 = vcmp.eq.s32.totalorder %v6559_v6, 9 }
 0x38c   : > { %3024 = vperm.xlu0 %5537, %v3003_v17   ;;  %v1158_v17 = vpop.permute.xlu0 %1157 }
 0x390   : > { %3075 = vperm.xlu0 %5537, %v3066_v52   ;;  %v1191_v52 = vmul.f32 %v6875_v39, %v6953_v35 }
 0x394   : > { %3081 = vperm.xlu0 %5537, %v3068_v19   ;;  %v6960_v19 = vsel %vm10793_vm15, %v6815_v31, %v1158_v17  ;;  %v3069_v31 = vsel %vm3061_vm9, 1, %v11114_v22  ;;  %v3073_v17 = vsel %vm3065_vm13, 1, %v11114_v22  ;;  %vm3272_vm9 = vcmp.eq.s32.totalorder %v6522_v3, 10 }
 0x395   : > { %11149 = vst [vmem:[#allocation157_spill] sm:$0xff] %v6960_v19  ;;  %vm3276_vm13 = vcmp.eq.s32.totalorder %v6559_v6, 10 }
 0x398   : > { %3087 = vperm.xlu0 %5537, %v3070_v27   ;;  %v1189_v27 = vmul.f32 %v6875_v39, %v6960_v19  ;;  %v6975_v39 = vpop.permute.xlu1 %2820 }
 0x399   : > { %11153 = vst [vmem:[#allocation161_spill] sm:$0xff] %v6975_v39 }
 0x39c   : > { %3093 = vperm.xlu0 %5537, %v3072_v11   ;;  %v6966_v11 = vpop.permute.xlu0 %2811 }
 0x39d   : > { %11150 = vst [vmem:[#allocation158_spill] sm:$0xff] %v6966_v11 }
 0x3a0   : > { %3151 = vperm.xlu0 %5537, %v3142_v37   ;;  %v6973_v37 = vpop.permute.xlu0 %2817 }
 0x3a1   : > { %11152 = vst [vmem:[#allocation160_spill] sm:$0xff] %v6973_v37 }
 0x3a4   : > { %3157 = vperm.xlu0 %5537, %v3144_v8   ;;  %1206 = vadd.xlane.f32.xlu1 %v1191_v52  ;;  %v3071_v8 = vsel %vm3063_vm10, 1, %v11114_v22  ;;  %v6980_v52 = vpop.permute.xlu0 %2868  ;;  %vm3274_vm10 = vcmp.eq.s32.totalorder %v6540_v59, 10 }
 0x3a5   : > { %11154 = vst [vmem:[#allocation162_spill] sm:$0xff] %v6980_v52 }
 0x3a8   : > { %1202 = vadd.xlane.f32.xlu1 %v1189_v27  ;;  %v6983_v27 = vpop.permute.xlu1 %2871 }
 0x3a9   : > { %11155 = vst [vmem:[#allocation163_spill] sm:$0xff] %v6983_v27 }
 0x3ac   : > { %v6989_v19 = vpop.permute.xlu1 %2877 }
 0x3ad   : > { %11156 = vst [vmem:[#allocation164_spill] sm:$0xff] %v6989_v19 }
 0x3b0   : > { %v6994_v35 = vpop.permute.xlu1 %2883 }
 0x3b1   : > { %11158 = vst [vmem:[#allocation166_spill] sm:$0xff] %v6994_v35 }
 0x3b4   : > { %v6998_v39 = vpop.permute.xlu1 %2889 }
 0x3b5   : > { %11160 = vst [vmem:[#allocation168_spill] sm:$0xff] %v6998_v39 }
 0x3b9   : > { %3078 = vperm.xlu1 %5536, %v3067_v9   ;;  %v3143_v9 = vsel %vm3135_vm0, 1, %v11114_v22  ;;  %vm3278_vm0 = vcmp.eq.s32.totalorder %v6576_v21, 10 }
 0x3bd   : > { %3084 = vperm.xlu1 %5536, %v3069_v31   ;;  %v6987_v31 = vpop.permute.xlu0 %2874 }
 0x3c1   : > { %3090 = vperm.xlu1 %5536, %v3071_v8   ;;  %v3145_v8 = vsel %vm3137_vm1, 1, %v11114_v22  ;;  %v6992_v51 = vpop.permute.xlu0 %2880  ;;  %vm3341_vm1 = vcmp.eq.s32.totalorder %v6522_v3, 11 }
 0x3c2   : > { %11157 = vst [vmem:[#allocation165_spill] sm:$0xff] %v6992_v51 }
 0x3c5   : > { %3096 = vperm.xlu1 %5536, %v3073_v17   ;;  %v6996_v57 = vpop.permute.xlu0 %2886  ;;  %v1210_v17 = vsub.s32 4, %v6049_v45 }
 0x3c6   : > { %11159 = vst [vmem:[#allocation167_spill] sm:$0xff] %v6996_v57 }
 0x3c7   : > { %v7004_v48 = vrot.slane %v6872_v33, %v1210_v17 }
 0x3c9   : > { %3154 = vperm.xlu1 %5536, %v3143_v9   ;;  %v7001_v26 = vpop.permute.xlu0 %2937  ;;  %v7006_v9 = vpop.permute.xlu1 %2940 }
 0x3ca   : > { %11161 = vst [vmem:[#allocation169_spill] sm:$0xff] %v7001_v26  ;;  %11162 = vst [vmem:[#allocation170_spill] sm:$0xff] %v7006_v9 }
 0x3cd   : > { %3160 = vperm.xlu1 %5536, %v3145_v8  }
 0x3df   : > { %v1197_v11 = vpop.xlane.xlu0 %1196 }
 0x3e0   : > { %v1214_v8 = vadd.f32 %v7004_v48, %v1197_v11  ;;  %v1193_v15 = vpop.xlane.xlu1 %1192 }
 0x3e1   : > { %v1212_v51 = vadd.f32 %v7004_v48, %v1193_v15 }
 0x3e2   : > { %v1222_v35 = vand.u32 2147483647, %v1214_v8 }
 0x3e3   : > { %v1220_v37 = vand.u32 2147483647, %v1212_v51  ;;  %v1195_v57 = vpop.xlane.xlu0 %1194 }
 0x3e4   : > { %v1230_v27 = vsub.f32 0.0, %v1222_v35  ;;  %v1199_v39 = vpop.xlane.xlu1 %1198  ;;  %v1213_v17 = vadd.f32 %v7004_v48, %v1195_v57  ;;  %v3146_v57 = vsel %vm3138_vm3, 1, %v11114_v22  ;;  %vm3345_vm3 = vcmp.eq.s32.totalorder %v6559_v6, 11 }
 0x3e5   : > { %v1228_v19 = vsub.f32 0.0, %v1220_v37  ;;  %v1215_v45 = vadd.f32 %v7004_v48, %v1199_v39 }
 0x3e6   : > { %v1240_v43 = vmul.f32 1.442695, %v1230_v27  ;;  %v1221_v26 = vand.u32 2147483647, %v1213_v17  ;;  %v3211_v17 = vsel %vm3203_vm5, 1, %v11114_v22  ;;  %vm3412_vm5 = vcmp.eq.s32.totalorder %v6540_v59, 12 }
 0x3e7   : > { %v1236_v24 = vmul.f32 1.442695, %v1228_v19  ;;  %v1205_v33 = vpop.xlane.xlu0 %1204  ;;  %v1223_v9 = vand.u32 2147483647, %v1215_v45 }
 0x3e8   : > { %5540 = vpow2.f32 %v1240_v43  ;;  %v1218_v11 = vadd.f32 %v7004_v48, %v1205_v33  ;;  %v1229_v52 = vsub.f32 0.0, %v1221_v26  ;;  %v3148_v33 = vsel %vm3140_vm14, 1, %v11114_v22 }
 0x3e9   : > { %5542 = vpow2.f32 %v1236_v24  ;;  %v1231_v15 = vsub.f32 0.0, %v1223_v9  ;;  %v3147_v24 = vsel %vm3139_vm2, 1, %v11114_v22  ;;  %vm3343_vm2 = vcmp.eq.s32.totalorder %v6540_v59, 11 }
 0x3ea   : > { %v1226_v51 = vand.u32 2147483647, %v1218_v11  ;;  %v1238_v45 = vmul.f32 1.442695, %v1229_v52  ;;  %v3213_v11 = vsel %vm3205_vm11, 1, %v11114_v22  ;;  %vm3410_vm14 = vcmp.eq.s32.totalorder %v6522_v3, 12 }
 0x3eb   : > { %v1201_v8 = vpop.xlane.xlu0 %1200  ;;  %v1242_v37 = vmul.f32 1.442695, %v1231_v15  ;;  %vm3414_vm11 = vcmp.eq.s32.totalorder %v6559_v6, 12 }
 0x3ec   : > { %v1216_v35 = vadd.f32 %v7004_v48, %v1201_v8  ;;  %v1234_v19 = vsub.f32 0.0, %v1226_v51  ;;  %v3215_v51 = vsel %vm3207_vm6, 1, %v11114_v22  ;;  %vm3416_vm6 = vcmp.eq.s32.totalorder %v6576_v21, 12 }
 0x3ed   : > { %5544 = vpow2.f32 %v1242_v37  ;;  %v7029_v37 = vpop.permute.xlu1 %2946 }
 0x3ee   : > { %v1224_v27 = vand.u32 2147483647, %v1216_v35  ;;  %v1248_v26 = vmul.f32 1.442695, %v1234_v19  ;;  %5546 = vpow2.f32 %v1238_v45  ;;  %11163 = vst [vmem:[#allocation171_spill] sm:$0xff] %v7029_v37  ;;  %v3280_v19 = vsel %vm3272_vm9, 1, %v11114_v22 }
 0x3f0   : > { %v1232_v9 = vsub.f32 0.0, %v1224_v27  ;;  %5548 = vpow2.f32 %v1248_v26 }
 0x3f1   : > { %v7035_v27 = vpop.permute.xlu1 %2952 }
 0x3f2   : > { %v5541_v39 = vpop.eup %5540  ;;  %v1244_v52 = vmul.f32 1.442695, %v1232_v9  ;;  %11164 = vst [vmem:[#allocation172_spill] sm:$0xff] %v7035_v27  ;;  %v3349_v9 = vsel %vm3341_vm1, 1, %v11114_v22  ;;  %v7140_v27 = vld [vmem:[%s10604_s3 + $0x38] sm:$0xff] }
 0x3f3   : > { %v5543_v43 = vpop.eup %5542  ;;  %1264 = vperm.xlu1 %5536, %v5541_v39   ;;  %v3217_v39 = vsel %vm3209_vm8, 1, %v11114_v22 }
 0x3f4   : > { %1254 = vperm.xlu0 %5537, %v5543_v43   ;;  %5550 = vpow2.f32 %v1244_v52  ;;  %v3282_v43 = vsel %vm3274_vm10, 1, %v11114_v22  ;;  %v3353_v52 = vsel %vm3345_vm3, 1, %v11114_v22 }
 0x3f5   : > { %v7039_v45 = vpop.permute.xlu1 %2958 }
 0x3f6   : > { %11165 = vst [vmem:[#allocation173_spill] sm:$0xff] %v7039_v45  ;;  %v7150_v45 = vld [vmem:[%s10604_s3 + $0x30] sm:$0xff] }
 0x3f7   : > { %3166 = vperm.xlu1 %5536, %v3147_v24   ;;  %v5545_v13 = vpop.eup %5544  ;;  %v3284_v24 = vsel %vm3276_vm13, 1, %v11114_v22  ;;  %vm3485_vm13 = vcmp.eq.s32.totalorder %v6576_v21, 13  ;;  %v7118_v21 = vld [vmem:[%s10604_s3 + $0x18] sm:$0xff] }
 0x3f8   : > { %3163 = vperm.xlu0 %5537, %v3146_v57   ;;  %v5547_v15 = vpop.eup %5546  ;;  %v3286_v57 = vsel %vm3278_vm0, 1, %v11114_v22 }
 0x3f9   : > { %v7045_v26 = vpop.permute.xlu1 %3009 }
 0x3fa   : > { %v5549_v8 = vpop.eup %5548  ;;  %11166 = vst [vmem:[#allocation174_spill] sm:$0xff] %v7045_v26 }
 0x3fb   : > { %3172 = vperm.xlu1 %5536, %v3149_v54  }
 0x3fc   : > { %3169 = vperm.xlu0 %5537, %v3148_v33   ;;  %v3351_v33 = vsel %vm3343_vm2, 1, %v11114_v22  ;;  %vm3206_vm2 = vcmp.eq.s32.totalorder %v7118_v21, 9 }
 0x3fd   : > { %v7049_v54 = vpop.permute.xlu1 %3015 }
 0x3fe   : > { %v5551_v35 = vpop.eup %5550  ;;  %11167 = vst [vmem:[#allocation175_spill] sm:$0xff] %v7049_v54 }
 0x3ff   : > { %1269 = vperm.xlu1 %5536, %v5545_v13  }
 0x400   : > { %3220 = vperm.xlu0 %5537, %v3211_v17   ;;  %v7055_v17 = vpop.permute.xlu0 %2943 }
 0x401   : > { %v7057_v13 = vpop.permute.xlu1 %3021 }
 0x402   : > { %11168 = vst [vmem:[#allocation176_spill] sm:$0xff] %v7057_v13 }
 0x403   : > { %1259 = vperm.xlu1 %5536, %v5547_v15  }
 0x404   : > { %3226 = vperm.xlu0 %5537, %v3213_v11   ;;  %v3355_v11 = vsel %vm3347_vm7, 1, %v11114_v22  ;;  %v7061_v15 = vpop.permute.xlu0 %2949 }
 0x405   : > { %11169 = vst [vmem:[#allocation177_spill] sm:$0xff] %v7061_v15 }
 0x407   : > { %1284 = vperm.xlu1 %5536, %v5549_v8   ;;  %v7063_v8 = vpop.permute.xlu1 %3027 }
 0x408   : > { %3232 = vperm.xlu0 %5537, %v3215_v51   ;;  %11170 = vst [vmem:[#allocation178_spill] sm:$0xff] %v7063_v8  ;;  %v3418_v51 = vsel %vm3410_vm14, 1, %v11114_v22 }
 0x40b   : > { %1274 = vperm.xlu1 %5536, %v5551_v35  }
 0x40c   : > { %3238 = vperm.xlu0 %5537, %v3217_v39   ;;  %v3420_v39 = vsel %vm3412_vm5, 1, %v11114_v22  ;;  %vm3210_vm5 = vcmp.eq.s32.totalorder %v7140_v27, 9 }
 0x410   : > { %3289 = vperm.xlu0 %5537, %v3280_v19  }
 0x414   : > { %3295 = vperm.xlu0 %5537, %v3282_v43   ;;  %v7070_v43 = vpop.permute.xlu0 %2955 }
 0x415   : > { %11171 = vst [vmem:[#allocation179_spill] sm:$0xff] %v7070_v43 }
 0x418   : > { %3301 = vperm.xlu0 %5537, %v3284_v24  }
 0x41c   : > { %3307 = vperm.xlu0 %5537, %v3286_v57   ;;  %v3422_v57 = vsel %vm3414_vm11, 1, %v11114_v22  ;;  %vm3699_vm11 = vcmp.eq.s32.totalorder %v7150_v45, 16 }
 0x420   : > { %3358 = vperm.xlu0 %5537, %v3349_v9  }
 0x424   : > { %3364 = vperm.xlu0 %5537, %v3351_v33  }
 0x428   : > { %3370 = vperm.xlu0 %5537, %v3353_v52  }
 0x42c   : > { %3376 = vperm.xlu0 %5537, %v3355_v11   ;;  %v7075_v11 = vpop.permute.xlu0 %3006 }
 0x42d   : > { %11172 = vst [vmem:[#allocation180_spill] sm:$0xff] %v7075_v11 }
 0x430   : > { %3427 = vperm.xlu0 %5537, %v3418_v51   ;;  %v3424_v51 = vsel %vm3416_vm6, 1, %v11114_v22 }
 0x431   : > { %v1207_v35 = vpop.xlane.xlu1 %1206 }
 0x432   : > { %v1219_v19 = vadd.f32 %v7004_v48, %v1207_v35  ;;  %v7081_v35 = vld [vmem:[%s10604_s3] sm:$0xff] }
 0x433   : > { %vm3479_vm8 = vcmp.eq.s32.totalorder %v7081_v35, 13  ;;  %vm3693_vm1 = vcmp.eq.s32.totalorder %v7081_v35, 16 }
 0x434   : > { %v1227_v3 = vand.u32 2147483647, %v1219_v19  ;;  %3433 = vperm.xlu0 %5537, %v3420_v39   ;;  %v7088_v19 = vld [vmem:[%s10604_s3 + $0x10] sm:$0xff] }
 0x435   : > { %v1203_v24 = vpop.xlane.xlu1 %1202  ;;  %vm3481_vm9 = vcmp.eq.s32.totalorder %v7088_v19, 13  ;;  %vm3695_vm3 = vcmp.eq.s32.totalorder %v7088_v19, 16 }
 0x436   : > { %v1235_v9 = vsub.f32 0.0, %v1227_v3  ;;  %v1217_v33 = vadd.f32 %v7004_v48, %v1203_v24  ;;  %v3487_v48 = vsel %vm3479_vm8, 1, %v11114_v22  ;;  %v7091_v3 = vpop.permute.xlu0 %3012  ;;  %v3489_v24 = vsel %vm3481_vm9, 1, %v11114_v22 }
 0x437   : > { %vm3762_vm8 = vcmp.eq.s32.totalorder %v7081_v35, 17  ;;  %vm3275_vm9 = vcmp.eq.s32.totalorder %v7118_v21, 10 }
 0x438   : > { %v1250_v59 = vmul.f32 1.442695, %v1235_v9  ;;  %v1225_v52 = vand.u32 2147483647, %v1217_v33  ;;  %3439 = vperm.xlu0 %5537, %v3422_v57   ;;  %v7097_v57 = vld [vmem:[%s10604_s3 + $0x20] sm:$0xff]  ;;  %v3770_v43 = vsel %vm3762_vm8, 1, %v11114_v22 }
 0x439   : > { %vm3483_vm10 = vcmp.eq.s32.totalorder %v7097_v57, 13  ;;  %vm3697_vm14 = vcmp.eq.s32.totalorder %v7097_v57, 16  ;;  %vm3348_vm8 = vcmp.eq.s32.totalorder %v7140_v27, 11 }
 0x43a   : > { %5552 = vpow2.f32 %v1250_v59  ;;  %v1233_v6 = vsub.f32 0.0, %v1225_v52  ;;  %v7100_v33 = vpop.permute.xlu0 %3018  ;;  %v3491_v59 = vsel %vm3483_vm10, 1, %v11114_v22  ;;  %v7107_v52 = vld [vmem:[%s10604_s3 + $0x8] sm:$0xff]  ;;  %vm3764_vm10 = vcmp.eq.s32.totalorder %v7088_v19, 17 }
 0x43b   : > { %11173 = vst [vmem:[#allocation181_spill] sm:$0xff] %v7100_v33  ;;  %vm3204_vm0 = vcmp.eq.s32.totalorder %v7107_v52, 9  ;;  %vm3273_vm6 = vcmp.eq.s32.totalorder %v7107_v52, 10 }
 0x43c   : > { %v1246_v39 = vmul.f32 1.442695, %v1233_v6  ;;  %3445 = vperm.xlu0 %5537, %v3424_v51   ;;  %v3493_v6 = vsel %vm3485_vm13, 1, %v11114_v22 }
 0x43e   : > { %5554 = vpow2.f32 %v1246_v39  ;;  %v3212_v39 = vsel %vm3204_vm0, 1, %v11114_v22  ;;  %vm3766_vm0 = vcmp.eq.s32.totalorder %v7097_v57, 17 }
 0x440   : > { %3496 = vperm.xlu0 %5537, %v3487_v48   ;;  %v7113_v48 = vpop.permute.xlu0 %3024 }
 0x441   : > { %11174 = vst [vmem:[#allocation182_spill] sm:$0xff] %v7113_v48 }
 0x444   : > { %v5553_v9 = vpop.eup %5552  ;;  %3502 = vperm.xlu0 %5537, %v3489_v24   ;;  %v3701_v24 = vsel %vm3693_vm1, 1, %v11114_v22  ;;  %v7132_v13 = vpop.permute.xlu0 %3075  ;;  %vm3279_vm1 = vcmp.eq.s32.totalorder %v7140_v27, 10 }
 0x445   : > { %1289 = vperm.xlu1 %5536, %v5553_v9   ;;  %v3214_v9 = vsel %vm3206_vm2, 1, %v11114_v22  ;;  %11176 = vst [vmem:[#allocation184_spill] sm:$0xff] %v7132_v13  ;;  %vm3768_vm2 = vcmp.eq.s32.totalorder %v7150_v45, 17 }
 0x448   : > { %v5555_v51 = vpop.eup %5554  ;;  %3508 = vperm.xlu0 %5537, %v3491_v59   ;;  %v7127_v59 = vld [vmem:[%s10604_s3 + $0x28] sm:$0xff]  ;;  %v7153_v33 = vpop.permute.xlu0 %3081 }
 0x449   : > { %1279 = vperm.xlu1 %5536, %v5555_v51   ;;  %vm3208_vm7 = vcmp.eq.s32.totalorder %v7127_v59, 9  ;;  %v7130_v51 = vpop.permute.xlu1 %3078  ;;  %vm3277_vm13 = vcmp.eq.s32.totalorder %v7127_v59, 10  ;;  %vm3553_vm12 = vcmp.eq.s32.totalorder %v7127_v59, 14 }
 0x44a   : > { %11175 = vst [vmem:[#allocation183_spill] sm:$0xff] %v7130_v51  ;;  %v3283_v51 = vsel %vm3275_vm9, 1, %v11114_v22  ;;  %vm3554_vm9 = vcmp.eq.s32.totalorder %v7150_v45, 14 }
 0x44c   : > { %3514 = vperm.xlu0 %5537, %v3493_v6   ;;  %v3703_v6 = vsel %vm3695_vm3, 1, %v11114_v22  ;;  %v7162_v48 = vpop.permute.xlu0 %3087  ;;  %vm3342_vm3 = vcmp.eq.s32.totalorder %v7107_v52, 11 }
 0x44d   : > { %3223 = vperm.xlu1 %5536, %v3212_v39   ;;  %v3216_v39 = vsel %vm3208_vm7, 1, %v11114_v22  ;;  %v7144_v8 = vpop.permute.xlu1 %3084  ;;  %11179 = vst [vmem:[#allocation187_spill] sm:$0xff] %v7162_v48  ;;  %v3287_v48 = vsel %vm3279_vm1, 1, %v11114_v22  ;;  %vm3548_vm7 = vcmp.eq.s32.totalorder %v7081_v35, 14  ;;  %vm3833_vm1 = vcmp.eq.s32.totalorder %v7088_v19, 18 }
 0x44e   : > { %11177 = vst [vmem:[#allocation185_spill] sm:$0xff] %v7144_v8 }
 0x450   : > { %3710 = vperm.xlu0 %5537, %v3701_v24   ;;  %v3705_v24 = vsel %vm3697_vm14, 1, %v11114_v22  ;;  %vm3344_vm14 = vcmp.eq.s32.totalorder %v7118_v21, 11 }
 0x451   : > { %3229 = vperm.xlu1 %5536, %v3214_v9   ;;  %v3218_v9 = vsel %vm3210_vm5, 1, %v11114_v22  ;;  %v7160_v15 = vpop.permute.xlu1 %3090  ;;  %vm3550_vm5 = vcmp.eq.s32.totalorder %v7088_v19, 14 }
 0x452   : > { %11178 = vst [vmem:[#allocation186_spill] sm:$0xff] %v7160_v15  ;;  %v3285_v15 = vsel %vm3277_vm13, 1, %v11114_v22  ;;  %vm3831_vm13 = vcmp.eq.s32.totalorder %v7081_v35, 18 }
 0x453   : > { %v3839_v54 = vsel %vm3831_vm13, 1, %v11114_v22  ;;  %vm3486_vm13 = vcmp.eq.s32.totalorder %v7140_v27, 13 }
 0x454   : > { %3716 = vperm.xlu0 %5537, %v3703_v6   ;;  %v3707_v6 = vsel %vm3699_vm11, 1, %v11114_v22  ;;  %vm3346_vm11 = vcmp.eq.s32.totalorder %v7127_v59, 11 }
 0x455   : > { %3235 = vperm.xlu1 %5536, %v3216_v39   ;;  %v3281_v39 = vsel %vm3273_vm6, 1, %v11114_v22  ;;  %v3354_v26 = vsel %vm3346_vm11, 1, %v11114_v22  ;;  %vm3552_vm6 = vcmp.eq.s32.totalorder %v7097_v57, 14  ;;  %vm3617_vm11 = vcmp.eq.s32.totalorder %v7081_v35, 15 }
 0x458   : > { %3722 = vperm.xlu0 %5537, %v3705_v24   ;;  %v3772_v24 = vsel %vm3764_vm10, 1, %v11114_v22  ;;  %vm3411_vm10 = vcmp.eq.s32.totalorder %v7107_v52, 12 }
 0x459   : > { %3241 = vperm.xlu1 %5536, %v3218_v9   ;;  %v7169_v9 = vpop.permute.xlu1 %3096  ;;  %v3419_v8 = vsel %vm3411_vm10, 1, %v11114_v22  ;;  %vm3621_vm10 = vcmp.eq.s32.totalorder %v7097_v57, 15 }
 0x45a   : > { %11180 = vst [vmem:[#allocation188_spill] sm:$0xff] %v7169_v9  ;;  %v3776_v9 = vsel %vm3768_vm2, 1, %v11114_v22  ;;  %vm3415_vm2 = vcmp.eq.s32.totalorder %v7127_v59, 12 }
 0x45b   : > { %v7222_v13 = vsel %vm3415_vm2, 1, %v11114_v22  ;;  %vm3900_vm2 = vcmp.eq.s32.totalorder %v7081_v35, 19 }
 0x45c   : > { %3728 = vperm.xlu0 %5537, %v3707_v6   ;;  %v7173_v6 = vpop.permute.xlu0 %3093 }
 0x45d   : > { %3292 = vperm.xlu1 %5536, %v3281_v39   ;;  %11181 = vst [vmem:[#allocation189_spill] sm:$0xff] %v7173_v6  ;;  %v3774_v39 = vsel %vm3766_vm0, 1, %v11114_v22  ;;  %v3350_v6 = vsel %vm3342_vm3, 1, %v11114_v22  ;;  %vm3413_vm0 = vcmp.eq.s32.totalorder %v7118_v21, 12  ;;  %vm3835_vm3 = vcmp.eq.s32.totalorder %v7097_v57, 18 }
 0x45e   : > { %v7216_v37 = vsel %vm3413_vm0, 1, %v11114_v22  ;;  %vm3623_vm0 = vcmp.eq.s32.totalorder %v7150_v45, 15 }
 0x460   : > { %3779 = vperm.xlu0 %5537, %v3770_v43   ;;  %v7180_v43 = vpop.permute.xlu1 %3154 }
 0x461   : > { %3298 = vperm.xlu1 %5536, %v3283_v51   ;;  %11182 = vst [vmem:[#allocation190_spill] sm:$0xff] %v7180_v43  ;;  %v7182_v51 = vpop.permute.xlu0 %3151  ;;  %v3558_v43 = vsel %vm3550_vm5, 1, %v11114_v22  ;;  %vm3480_vm5 = vcmp.eq.s32.totalorder %v7107_v52, 13 }
 0x462   : > { %11183 = vst [vmem:[#allocation191_spill] sm:$0xff] %v7182_v51  ;;  %v7219_v51 = vsel %vm3833_vm1, 1, %v11114_v22  ;;  %vm3694_vm1 = vcmp.eq.s32.totalorder %v7107_v52, 16 }
 0x464   : > { %3785 = vperm.xlu0 %5537, %v3772_v24   ;;  %v7191_v24 = vpop.permute.xlu1 %3160 }
 0x465   : > { %3304 = vperm.xlu1 %5536, %v3285_v15   ;;  %v3556_v15 = vsel %vm3548_vm7, 1, %v11114_v22  ;;  %11184 = vst [vmem:[#allocation192_spill] sm:$0xff] %v7191_v24  ;;  %v3562_v24 = vsel %vm3554_vm9, 1, %v11114_v22  ;;  %vm3417_vm7 = vcmp.eq.s32.totalorder %v7140_v27, 12  ;;  %vm3484_vm9 = vcmp.eq.s32.totalorder %v7127_v59, 13 }
 0x466   : > { %v7248_v11 = vsel %vm3417_vm7, 1, %v11114_v22  ;;  %vm3902_vm7 = vcmp.eq.s32.totalorder %v7088_v19, 19 }
 0x467   : > { %11188 = vst [vmem:[#allocation196_spill] sm:$0xff] %v7248_v11  ;;  %v7270_v11 = vsel %vm3484_vm9, 1, %v11114_v22  ;;  %vm3969_vm9 = vcmp.eq.s32.totalorder %v7081_v35, 20 }
 0x468   : > { %3791 = vperm.xlu0 %5537, %v3774_v39   ;;  %v7194_v39 = vpop.permute.xlu0 %3157 }
 0x469   : > { %3310 = vperm.xlu1 %5536, %v3287_v48   ;;  %v3352_v48 = vsel %vm3344_vm14, 1, %v11114_v22  ;;  %vm3837_vm14 = vcmp.eq.s32.totalorder %v7150_v45, 18  ;;  %vm3176_vm15 = vcmp.eq.s32.totalorder %v7194_v39, 1 }
 0x46c   : > { %3797 = vperm.xlu0 %5537, %v3776_v9  }
 0x46d   : > { %3361 = vperm.xlu1 %5536, %v3350_v6  }
 0x470   : > { %3565 = vperm.xlu0 %5537, %v3556_v15   ;;  %v3560_v15 = vsel %vm3552_vm6, 1, %v11114_v22  ;;  %vm3482_vm6 = vcmp.eq.s32.totalorder %v7118_v21, 13 }
 0x471   : > { %3367 = vperm.xlu1 %5536, %v3352_v48   ;;  %v3356_v48 = vsel %vm3348_vm8, 1, %v11114_v22  ;;  %vm3619_vm8 = vcmp.eq.s32.totalorder %v7088_v19, 15  ;;  %v7264_v60 = vsel %vm3482_vm6, 1, %v11114_v22  ;;  %vm3906_vm6 = vcmp.eq.s32.totalorder %v7150_v45, 19 }
 0x472   : > { %v7202_v9 = vpop.permute.xlu1 %1264  ;;  %v7267_v5 = vsel %vm3619_vm8, 1, %v11114_v22  ;;  %vm3763_vm8 = vcmp.eq.s32.totalorder %v7107_v52, 17 }
 0x473   : > { %v7208_v6 = vpop.permute.xlu0 %1254 }
 0x474   : > { %3571 = vperm.xlu0 %5537, %v3558_v43  }
 0x475   : > { %3373 = vperm.xlu1 %5536, %v3354_v26  }
 0x476   : > { %v7234_v43 = vpop.permute.xlu1 %3166 }
 0x477   : > { %v7228_v26 = vpop.permute.xlu0 %3163  ;;  %11186 = vst [vmem:[#allocation194_spill] sm:$0xff] %v7234_v43  ;;  %v7258_v43 = vsel %vm3480_vm5, 1, %v11114_v22  ;;  %vm3904_vm5 = vcmp.eq.s32.totalorder %v7097_v57, 19 }
 0x478   : > { %11185 = vst [vmem:[#allocation193_spill] sm:$0xff] %v7228_v26  ;;  %3577 = vperm.xlu0 %5537, %v3560_v15   ;;  %v7243_v26 = vsel %vm3835_vm3, 1, %v11114_v22  ;;  %v7253_v15 = vsel %vm3837_vm14, 1, %v11114_v22  ;;  %11190 = vst [vmem:[#allocation198_spill] sm:$0xff] %v7258_v43  ;;  %v7281_v43 = vsel %vm3623_vm0, 1, %v11114_v22  ;;  %vm3696_vm3 = vcmp.eq.s32.totalorder %v7118_v21, 16 }
 0x479   : > { %3379 = vperm.xlu1 %5536, %v3356_v48   ;;  %11187 = vst [vmem:[#allocation195_spill] sm:$0xff] %v7243_v26  ;;  %11189 = vst [vmem:[#allocation197_spill] sm:$0xff] %v7253_v15  ;;  %v7261_v48 = vsel %vm3617_vm11, 1, %v11114_v22  ;;  %v7275_v15 = vsel %vm3621_vm10, 1, %v11114_v22  ;;  %v7278_v26 = vsel %vm3486_vm13, 1, %v11114_v22  ;;  %vm3698_vm14 = vcmp.eq.s32.totalorder %v7127_v59, 16 }
 0x47a   : > { %11191 = vst [vmem:[#allocation199_spill] sm:$0xff] %v7261_v48  ;;  %11193 = vst [vmem:[#allocation201_spill] sm:$0xff] %v7281_v43  ;;  %v7284_v48 = vsel %vm3694_vm1, 1, %v11114_v22  ;;  %vm3700_vm11 = vcmp.eq.s32.totalorder %v7140_v27, 16  ;;  %vm3765_vm10 = vcmp.eq.s32.totalorder %v7118_v21, 17  ;;  %vm3971_vm13 = vcmp.eq.s32.totalorder %v7088_v19, 20 }
 0x47b   : > { %v7272_v23 = vpop.permute.xlu0 %3169  ;;  %11194 = vst [vmem:[#allocation202_spill] sm:$0xff] %v7284_v48  ;;  %vm3767_vm0 = vcmp.eq.s32.totalorder %v7127_v59, 17  ;;  %vm1491_vm1 = vcmp.eq.s32.totalorder %v6278_v36, 1  ;;  %v7319_v48 = vsel %vm3902_vm7, 1, %v11114_v22  ;;  %v7324_v43 = vsel %vm3698_vm14, 1, %v11114_v22  ;;  %v11229_v36 = vld [vmem:[#allocation101_spill] sm:$0xff] }
 0x47c   : > { %11192 = vst [vmem:[#allocation200_spill] sm:$0xff] %v7272_v23  ;;  %3583 = vperm.xlu0 %5537, %v3562_v24   ;;  %v7294_v23 = vpop.permute.xlu1 %3172  ;;  %v7309_v24 = vsel %vm3900_vm2, 1, %v11114_v22  ;;  %11198 = vst [vmem:[#allocation206_spill] sm:$0xff] %v7319_v48  ;;  %v7338_v48 = vsel %vm3700_vm11, 1, %v11114_v22  ;;  %vm3549_vm14 = vcmp.eq.s32.totalorder %v7107_v52, 14  ;;  %vm3555_vm11 = vcmp.eq.s32.totalorder %v7140_v27, 14 }
 0x47d   : > { %3430 = vperm.xlu1 %5536, %v3419_v8   ;;  %11195 = vst [vmem:[#allocation203_spill] sm:$0xff] %v7294_v23  ;;  %11196 = vst [vmem:[#allocation204_spill] sm:$0xff] %v7309_v24  ;;  %v7314_v23 = vsel %vm3696_vm3, 1, %v11114_v22  ;;  %v7348_v24 = vsel %vm3763_vm8, 1, %v11114_v22  ;;  %vm3551_vm8 = vcmp.eq.s32.totalorder %v7118_v21, 14  ;;  %vm4040_vm3 = vcmp.eq.s32.totalorder %v7088_v19, 21 }
 0x47e   : > { %11197 = vst [vmem:[#allocation205_spill] sm:$0xff] %v7314_v23  ;;  %11199 = vst [vmem:[#allocation207_spill] sm:$0xff] %v7324_v43  ;;  %v7333_v23 = vsel %vm3904_vm5, 1, %v11114_v22  ;;  %v7343_v43 = vsel %vm3906_vm6, 1, %v11114_v22  ;;  %vm3769_vm5 = vcmp.eq.s32.totalorder %v7140_v27, 17  ;;  %vm4042_vm6 = vcmp.eq.s32.totalorder %v7097_v57, 21 }
 0x47f   : > { %v7304_v8 = vpop.permute.xlu0 %3220  ;;  %11200 = vst [vmem:[#allocation208_spill] sm:$0xff] %v7338_v48  ;;  %11201 = vst [vmem:[#allocation209_spill] sm:$0xff] %v7343_v43  ;;  %v7363_v43 = vsel %vm3765_vm10, 1, %v11114_v22  ;;  %v7373_v48 = vsel %vm3767_vm0, 1, %v11114_v22  ;;  %vm3973_vm10 = vcmp.eq.s32.totalorder %v7097_v57, 20  ;;  %vm4044_vm2 = vcmp.eq.s32.totalorder %v7150_v45, 21 }
 0x480   : > { %3848 = vperm.xlu0 %5537, %v3839_v54   ;;  %11202 = vst [vmem:[#allocation210_spill] sm:$0xff] %v7348_v24  ;;  %v7358_v54 = vsel %vm3969_vm9, 1, %v11114_v22  ;;  %11204 = vst [vmem:[#allocation212_spill] sm:$0xff] %v7363_v43  ;;  %v7368_v24 = vsel %vm3971_vm13, 1, %v11114_v22  ;;  %vm3975_vm13 = vcmp.eq.s32.totalorder %v7150_v45, 20  ;;  %vm4038_vm9 = vcmp.eq.s32.totalorder %v7081_v35, 21 }
 0x481   : > { %3436 = vperm.xlu1 %5536, %v7216_v37   ;;  %11203 = vst [vmem:[#allocation211_spill] sm:$0xff] %v7358_v54  ;;  %11205 = vst [vmem:[#allocation213_spill] sm:$0xff] %v7368_v24  ;;  %v7400_v24 = vpop.permute.xlu1 %1269  ;;  %vm3100_vm0 = vcmp.eq.s32.totalorder %v7153_v33, 1  ;;  %v7429_v43 = vsel %vm3549_vm14, 1, %v11114_v22  ;;  %vm1627_vm7 = vcmp.eq.s32.totalorder %v6334_v12, 1  ;;  %v7447_v52 = vsel %vm4040_vm3, 1, %v11114_v22 }
 0x482   : > { %11206 = vst [vmem:[#allocation214_spill] sm:$0xff] %v7373_v48  ;;  %v7398_v48 = vmul.f32 %v7202_v9, %v6879_v53  ;;  %v7414_v53 = vsel %vm3973_vm10, 1, %v11114_v22  ;;  %v7424_v9 = vsel %vm3975_vm13, 1, %v11114_v22  ;;  %11211 = vst [vmem:[#allocation219_spill] sm:$0xff] %v7429_v43  ;;  %vm1696_vm10 = vcmp.eq.s32.totalorder %v6366_v38, 1  ;;  %v11301_v33 = vld [vmem:[#allocation83_spill] sm:$0xff] }
 0x483   : > { %v7387_v37 = vpop.permute.xlu0 %3226  ;;  %11208 = vst [vmem:[#allocation216_spill] sm:$0xff] %v7414_v53  ;;  %11210 = vst [vmem:[#allocation218_spill] sm:$0xff] %v7424_v9  ;;  %v7442_v9 = vsel %vm3551_vm8, 1, %v11114_v22  ;;  %v7452_v43 = vsel %vm3553_vm12, 1, %v11114_v22  ;;  %vm1834_vm14 = vcmp.eq.s32.totalorder %v6430_v42, 1  ;;  %vm2054_vm13 = vcmp.eq.s32.totalorder %v6610_v62, 1 }
 0x484   : > { %11207 = vst [vmem:[#allocation215_spill] sm:$0xff] %v7398_v48  ;;  %3854 = vperm.xlu0 %5537, %v7219_v51   ;;  %v7419_v51 = vsel %vm3769_vm5, 1, %v11114_v22  ;;  %11213 = vst [vmem:[#allocation221_spill] sm:$0xff] %v7442_v9  ;;  %vm1903_vm5 = vcmp.eq.s32.totalorder %v6479_v58, 1  ;;  %v7460_v35 = vmul.f32 %v7208_v6, %v6885_v2  ;;  %v7467_v21 = vsel %vm4042_vm6, 1, %v11114_v22  ;;  %v11228_v6 = vld [vmem:[#allocation195_spill] sm:$0xff] }
 0x485   : > { %3442 = vperm.xlu1 %5536, %v7222_v13   ;;  %11209 = vst [vmem:[#allocation217_spill] sm:$0xff] %v7419_v51  ;;  %v7437_v13 = vsel %vm4038_vm9, 1, %v11114_v22  ;;  %11214 = vst [vmem:[#allocation222_spill] sm:$0xff] %v7447_v52  ;;  %vm1972_vm9 = vcmp.eq.s32.totalorder %v6547_v28, 1  ;;  %v7472_v59 = vsel %vm3555_vm11, 1, %v11114_v22  ;;  %v7485_v2 = vsel %vm1491_vm1, %v7398_v48, 0.0 }
 0x486   : > { %11212 = vst [vmem:[#allocation220_spill] sm:$0xff] %v7437_v13  ;;  %11215 = vst [vmem:[#allocation223_spill] sm:$0xff] %v7452_v43  ;;  %v7477_v43 = vsel %vm4044_vm2, 1, %v11114_v22  ;;  %vm11222_vm11 = vcmp.eq.s32.totalorder %v6310_v56, 1  ;;  %vm11224_vm2 = vcmp.eq.s32.totalorder %v6342_v16, 1  ;;  %vm11226_vm6 = vcmp.eq.s32.totalorder %v6374_v47, 1  ;;  %v1260_v13 = vpop.permute.xlu1 %1259 }
 0x487   : > { %11216 = vst [vmem:[#allocation224_spill] sm:$0xff] %v7460_v35  ;;  %v7462_v19 = vpop.permute.xlu0 %3232  ;;  %11218 = vst [vmem:[#allocation226_spill] sm:$0xff] %v7467_v21  ;;  %v7490_v27 = vsel %vm11222_vm11, %v7398_v48, 0.0  ;;  %v7495_v45 = vsel %vm11224_vm2, %v7398_v48, 0.0  ;;  %v7500_v57 = vsel %vm11226_vm6, %v7398_v48, 0.0  ;;  %vm11232_vm11 = vcmp.eq.s32.totalorder %v6406_v34, 1 }
 0x488   : > { %11217 = vst [vmem:[#allocation225_spill] sm:$0xff] %v7462_v19  ;;  %11219 = vst [vmem:[#allocation227_spill] sm:$0xff] %v7472_v59  ;;  %3860 = vperm.xlu0 %5537, %v11228_v6   ;;  %v11231_v59 = vld [vmem:[#allocation115_spill] sm:$0xff]  ;;  %v7509_v56 = vsel %vm11232_vm11, %v7398_v48, 0.0  ;;  %vm11234_vm2 = vcmp.eq.s32.totalorder %v6441_v20, 1  ;;  %vm11236_vm6 = vcmp.eq.s32.totalorder %v6490_v25, 1 }
 0x489   : > { %11220 = vst [vmem:[#allocation228_spill] sm:$0xff] %v7477_v43  ;;  %11221 = vst [vmem:[#allocation229_spill] sm:$0xff] %v7485_v2  ;;  %v11230_v43 = vld [vmem:[#allocation108_spill] sm:$0xff]  ;;  %v7514_v16 = vsel %vm11234_vm2, %v7398_v48, 0.0  ;;  %v7519_v47 = vsel %vm11236_vm6, %v7398_v48, 0.0  ;;  %vm11238_vm8 = vcmp.eq.s32.totalorder %v6580_v0, 1 }
 0x48a   : > { %11223 = vst [vmem:[#allocation230_spill] sm:$0xff] %v7490_v27  ;;  %11225 = vst [vmem:[#allocation231_spill] sm:$0xff] %v7495_v45  ;;  %v7524_v6 = vsel %vm11238_vm8, %v7398_v48, 0.0  ;;  %v11240_v21 = vld [vmem:[#allocation196_spill] sm:$0xff]  ;;  %v11241_v34 = vld [vmem:[#allocation122_spill] sm:$0xff]  ;;  %vm11244_vm2 = vcmp.eq.s32.totalorder %v6620_v29, 1 }
 0x48b   : > { %11227 = vst [vmem:[#allocation232_spill] sm:$0xff] %v7500_v57  ;;  %11233 = vst [vmem:[#allocation195_spill] sm:$0xff] %v7509_v56  ;;  %3448 = vperm.xlu1 %5536, %v11240_v21   ;;  %v11242_v52 = vld [vmem:[#allocation129_spill] sm:$0xff]  ;;  %v11243_v9 = vld [vmem:[#allocation136_spill] sm:$0xff]  ;;  %v7533_v20 = vsel %vm11244_vm2, %v7398_v48, 0.0  ;;  %vm11246_vm6 = vcmp.eq.s32.totalorder %v6658_v63, 1  ;;  %v7574_v19 = vpop.permute.xlu0 %3238 }
 0x48c   : > { %11235 = vst [vmem:[#allocation101_spill] sm:$0xff] %v7514_v16  ;;  %11237 = vst [vmem:[#allocation108_spill] sm:$0xff] %v7519_v47  ;;  %v7538_v25 = vsel %vm11246_vm6, %v7398_v48, 0.0  ;;  %vm11248_vm8 = vcmp.eq.s32.totalorder %v6674_v40, 1  ;;  %vm11250_vm3 = vcmp.eq.s32.totalorder %v6690_v30, 1  ;;  %v11252_v22 = vld [vmem:[#allocation143_spill] sm:$0xff] }
 0x48d   : > { %11239 = vst [vmem:[#allocation115_spill] sm:$0xff] %v7524_v6  ;;  %11245 = vst [vmem:[#allocation196_spill] sm:$0xff] %v7533_v20  ;;  %v7543_v0 = vsel %vm11248_vm8, %v7398_v48, 0.0  ;;  %v7548_v21 = vsel %vm11250_vm3, %v7398_v48, 0.0  ;;  %v11253_v29 = vld [vmem:[#allocation150_spill] sm:$0xff]  ;;  %v11255_v63 = vld [vmem:[#allocation169_spill] sm:$0xff] }
 0x48e   : > { %11247 = vst [vmem:[#allocation122_spill] sm:$0xff] %v7538_v25  ;;  %11249 = vst [vmem:[#allocation129_spill] sm:$0xff] %v7543_v0  ;;  %v11254_v51 = vld [vmem:[#allocation162_spill] sm:$0xff]  ;;  %vm11256_vm12 = vcmp.eq.s32.totalorder %v6706_v7, 1  ;;  %vm11258_vm8 = vcmp.eq.s32.totalorder %v6722_v1, 1  ;;  %vm11260_vm3 = vcmp.eq.s32.totalorder %v6738_v44, 1 }
 0x48f   : > { %11251 = vst [vmem:[#allocation136_spill] sm:$0xff] %v7548_v21  ;;  %v7557_v40 = vsel %vm11256_vm12, %v7398_v48, 0.0  ;;  %v7562_v30 = vsel %vm11258_vm8, %v7398_v48, 0.0  ;;  %v7567_v53 = vsel %vm11260_vm3, %v7398_v48, 0.0  ;;  %vm11262_vm11 = vcmp.eq.s32.totalorder %v6766_v49, 1  ;;  %11264 = vst [vmem:[#allocation233_spill] sm:$0xff] %v7574_v19 }
 0x490   : > { %11257 = vst [vmem:[#allocation143_spill] sm:$0xff] %v7557_v40  ;;  %11259 = vst [vmem:[#allocation150_spill] sm:$0xff] %v7562_v30  ;;  %v7572_v54 = vsel %vm11262_vm11, %v7398_v48, 0.0  ;;  %v11265_v7 = vld [vmem:[#allocation180_spill] sm:$0xff]  ;;  %v11267_v21 = vld [vmem:[#allocation191_spill] sm:$0xff]  ;;  %vm11268_vm8 = vcmp.eq.s32.totalorder %v6819_v4, 1 }
 0x491   : > { %11261 = vst [vmem:[#allocation162_spill] sm:$0xff] %v7567_v53  ;;  %11263 = vst [vmem:[#allocation169_spill] sm:$0xff] %v7572_v54  ;;  %v11266_v40 = vld [vmem:[#allocation184_spill] sm:$0xff]  ;;  %v7582_v1 = vsel %vm11268_vm8, %v7398_v48, 0.0  ;;  %vm11270_vm3 = vcmp.eq.s32.totalorder %v6836_v10, 1  ;;  %vm11272_vm11 = vcmp.eq.s32.totalorder %v6852_v46, 1 }
 0x492   : > { %11269 = vst [vmem:[#allocation180_spill] sm:$0xff] %v7582_v1  ;;  %v7587_v44 = vsel %vm11270_vm3, %v7398_v48, 0.0  ;;  %v7592_v49 = vsel %vm11272_vm11, %v7398_v48, 0.0  ;;  %vm11274_vm6 = vcmp.eq.s32.totalorder %v6869_v14, 1  ;;  %v11276_v54 = vld [vmem:[#allocation197_spill] sm:$0xff]  ;;  %v11278_v1 = vld [vmem:[#allocation35_spill] sm:$0xff] }
 0x493   : > { %11271 = vst [vmem:[#allocation184_spill] sm:$0xff] %v7587_v44  ;;  %11273 = vst [vmem:[#allocation191_spill] sm:$0xff] %v7592_v49  ;;  %v7597_v19 = vsel %vm11274_vm6, %v7398_v48, 0.0  ;;  %3866 = vperm.xlu0 %5537, %v11276_v54   ;;  %v11277_v4 = vld [vmem:[#allocation29_spill] sm:$0xff]  ;;  %v11280_v10 = vld [vmem:[#allocation47_spill] sm:$0xff]  ;;  %vm11281_vm1 = vcmp.eq.s32.totalorder %v6987_v31, 1 }
 0x494   : > { %11275 = vst [vmem:[#allocation234_spill] sm:$0xff] %v7597_v19  ;;  %vm1492_vm8 = vcmp.eq.s32.totalorder %v11277_v4, 1  ;;  %v11279_v53 = vld [vmem:[#allocation41_spill] sm:$0xff]  ;;  %v7607_v46 = vsel %vm11281_vm1, %v7398_v48, 0.0  ;;  %vm11283_vm11 = vcmp.eq.s32.totalorder %v7055_v17, 1  ;;  %vm11285_vm6 = vcmp.eq.s32.totalorder %v7091_v3, 1 }
 0x495   : > { %11282 = vst [vmem:[#allocation197_spill] sm:$0xff] %v7607_v46  ;;  %v7612_v14 = vsel %vm11283_vm11, %v7398_v48, 0.0  ;;  %v7617_v54 = vsel %vm11285_vm6, %v7398_v48, 0.0  ;;  %v11287_v19 = vld [vmem:[#allocation152_spill] sm:$0xff]  ;;  %v11289_v44 = vld [vmem:[#allocation198_spill] sm:$0xff]  ;;  %v11290_v30 = vld [vmem:[#allocation53_spill] sm:$0xff] }
 0x496   : > { %11284 = vst [vmem:[#allocation29_spill] sm:$0xff] %v7612_v14  ;;  %11286 = vst [vmem:[#allocation35_spill] sm:$0xff] %v7617_v54  ;;  %v7620_v49 = vmul.f32 %v1260_v13, %v11287_v19  ;;  %3499 = vperm.xlu1 %5536, %v11289_v44   ;;  %vm1768_vm3 = vcmp.eq.s32.totalorder %v11290_v30, 1  ;;  %v11291_v31 = vld [vmem:[#allocation59_spill] sm:$0xff]  ;;  %v11292_v46 = vld [vmem:[#allocation65_spill] sm:$0xff]  ;;  %v7630_v17 = vsel %vm3100_vm0, %v7398_v48, 0.0 }
 0x497   : > { %v11293_v0 = vld [vmem:[#allocation71_spill] sm:$0xff]  ;;  %11294 = vst [vmem:[#allocation47_spill] sm:$0xff] %v7630_v17  ;;  %v7635_v3 = vsel %vm3176_vm15, %v7398_v48, 0.0  ;;  %vm11296_vm11 = vcmp.eq.s32.totalorder %v6270_v32, 1  ;;  %vm11298_vm6 = vcmp.eq.s32.totalorder %v6302_v50, 1  ;;  %v11300_v44 = vld [vmem:[#allocation77_spill] sm:$0xff] }
 0x498   : > { %11288 = vst [vmem:[#allocation41_spill] sm:$0xff] %v7620_v49  ;;  %11295 = vst [vmem:[#allocation152_spill] sm:$0xff] %v7635_v3  ;;  %v7640_v13 = vsel %vm11296_vm11, %v7460_v35, 0.0  ;;  %v7645_v19 = vsel %vm11298_vm6, %v7460_v35, 0.0  ;;  %vm2057_vm2 = vcmp.eq.s32.totalorder %v11300_v44, 1  ;;  %vm2126_vm0 = vcmp.eq.s32.totalorder %v11301_v33, 1  ;;  %v7670_v3 = vpop.permute.xlu0 %3289 }
 0x499   : > { %11297 = vst [vmem:[#allocation198_spill] sm:$0xff] %v7640_v13  ;;  %11299 = vst [vmem:[#allocation53_spill] sm:$0xff] %v7645_v19  ;;  %v11302_v17 = vld [vmem:[#allocation89_spill] sm:$0xff]  ;;  %v11303_v54 = vld [vmem:[#allocation95_spill] sm:$0xff]  ;;  %v7654_v39 = vsel %vm1627_vm7, %v7460_v35, 0.0  ;;  %v7659_v32 = vsel %vm1696_vm10, %v7460_v35, 0.0 }
 0x49a   : > { %vm2195_vm12 = vcmp.eq.s32.totalorder %v11302_v17, 1  ;;  %vm2264_vm1 = vcmp.eq.s32.totalorder %v11303_v54, 1  ;;  %11304 = vst [vmem:[#allocation59_spill] sm:$0xff] %v7654_v39  ;;  %11305 = vst [vmem:[#allocation65_spill] sm:$0xff] %v7659_v32  ;;  %v7664_v50 = vsel %vm1765_vm4, %v7460_v35, 0.0  ;;  %v11307_v19 = vld [vmem:[#allocation153_spill] sm:$0xff]  ;;  %3505 = vperm.xlu1 %5536, %v7264_v60  }
 0x49b   : > { %11306 = vst [vmem:[#allocation71_spill] sm:$0xff] %v7664_v50  ;;  %v7668_v13 = vmul.f32 %v7400_v24, %v11307_v19  ;;  %11309 = vst [vmem:[#allocation83_spill] sm:$0xff] %v7670_v3  ;;  %v11310_v14 = vld [vmem:[#allocation102_spill] sm:$0xff]  ;;  %v11311_v12 = vld [vmem:[#allocation109_spill] sm:$0xff]  ;;  %v7679_v18 = vsel %vm1834_vm14, %v7460_v35, 0.0  ;;  %v7684_v24 = vsel %vm1903_vm5, %v7460_v35, 0.0 }
 0x49c   : > { %vm2333_vm15 = vcmp.eq.s32.totalorder %v11310_v14, 1  ;;  %vm2402_vm7 = vcmp.eq.s32.totalorder %v11311_v12, 1  ;;  %v11312_v39 = vld [vmem:[#allocation116_spill] sm:$0xff]  ;;  %v11313_v38 = vld [vmem:[#allocation123_spill] sm:$0xff]  ;;  %11314 = vst [vmem:[#allocation89_spill] sm:$0xff] %v7679_v18  ;;  %11315 = vst [vmem:[#allocation95_spill] sm:$0xff] %v7684_v24 }
 0x49d   : > { %11308 = vst [vmem:[#allocation77_spill] sm:$0xff] %v7668_v13  ;;  %v7689_v19 = vsel %vm1972_vm9, %v7460_v35, 0.0  ;;  %v7694_v50 = vsel %vm2054_vm13, %v7460_v35, 0.0  ;;  %v11318_v32 = vld [vmem:[#allocation199_spill] sm:$0xff]  ;;  %v11319_v42 = vld [vmem:[#allocation130_spill] sm:$0xff]  ;;  %v11320_v18 = vld [vmem:[#allocation137_spill] sm:$0xff] }
 0x49e   : > { %11316 = vst [vmem:[#allocation153_spill] sm:$0xff] %v7689_v19  ;;  %11317 = vst [vmem:[#allocation102_spill] sm:$0xff] %v7694_v50  ;;  %3634 = vperm.xlu0 %5537, %v11318_v32   ;;  %v11321_v3 = vld [vmem:[#allocation144_spill] sm:$0xff]  ;;  %v11322_v58 = vld [vmem:[#allocation151_spill] sm:$0xff]  ;;  %vm11323_vm10 = vcmp.eq.s32.totalorder %v6650_v41, 1  ;;  %vm11325_vm9 = vcmp.eq.s32.totalorder %v6670_v61, 1  ;;  %v1300_v50 = vpack.c.bf16 %v7620_v49, %v7460_v35  ;;  %3511 = vperm.xlu1 %5536, %v7270_v11  }
 0x49f   : > { %v7704_v28 = vsel %vm11323_vm10, %v7460_v35, 0.0  ;;  %v7709_v62 = vsel %vm11325_vm9, %v7460_v35, 0.0  ;;  %vm11327_vm13 = vcmp.eq.s32.totalorder %v6686_v55, 1  ;;  %v11329_v19 = vld [vmem:[#allocation164_spill] sm:$0xff]  ;;  %v11330_v41 = vld [vmem:[#allocation171_spill] sm:$0xff]  ;;  %v11332_v24 = vld [vmem:[#allocation185_spill] sm:$0xff] }
 0x4a0   : > { %11324 = vst [vmem:[#allocation109_spill] sm:$0xff] %v7704_v28  ;;  %11326 = vst [vmem:[#allocation116_spill] sm:$0xff] %v7709_v62  ;;  %v7714_v32 = vsel %vm11327_vm13, %v7460_v35, 0.0  ;;  %v11331_v28 = vld [vmem:[#allocation175_spill] sm:$0xff]  ;;  %vm11333_vm9 = vcmp.eq.s32.totalorder %v11229_v36, 1  ;;  %vm11335_vm13 = vcmp.eq.s32.totalorder %v11230_v43, 1  ;;  %5302 = vmatpush3.bf16.msra.mxu0 %v1300_v50  ;;  %5313 = vmatprep.subr.bf16.mxu1 %v1300_v50 }
 0x4a1   : > { %11328 = vst [vmem:[#allocation123_spill] sm:$0xff] %v7714_v32  ;;  %v7726_v61 = vsel %vm11333_vm9, %v7460_v35, 0.0  ;;  %v7731_v55 = vsel %vm11335_vm13, %v7460_v35, 0.0  ;;  %vm11337_vm4 = vcmp.eq.s32.totalorder %v11231_v59, 1  ;;  %vm3243_vm10 = vcmp.eq.s32.totalorder %v7304_v8, 1  ;;  %v11339_v32 = vld [vmem:[#allocation28_spill] sm:$0xff]  ;;  %5314 = vmatpush3.bf16.msra.mxu1 %v1300_v50 }
 0x4a2   : > { %11334 = vst [vmem:[#allocation199_spill] sm:$0xff] %v7726_v61  ;;  %11336 = vst [vmem:[#allocation130_spill] sm:$0xff] %v7731_v55  ;;  %v7736_v60 = vsel %vm11337_vm4, %v7460_v35, 0.0  ;;  %v11340_v62 = vld [vmem:[#allocation34_spill] sm:$0xff]  ;;  %v11341_v25 = vld [vmem:[#allocation40_spill] sm:$0xff]  ;;  %vm11343_vm11 = vcmp.eq.s32.totalorder %v11241_v34, 1  ;;  %v1301_v55 = vpack.c.bf16 %v7668_v13, %v7398_v48  ;;  %v7760_v61 = vpop.permute.xlu0 %3295  ;;  %3640 = vperm.xlu0 %5537, %v7267_v5   ;;  %3517 = vperm.xlu1 %5536, %v7278_v26  }
 0x4a3   : > { %11338 = vst [vmem:[#allocation137_spill] sm:$0xff] %v7736_v60  ;;  %v11342_v36 = vld [vmem:[#allocation192_spill] sm:$0xff]  ;;  %v7746_v43 = vsel %vm11343_vm11, %v7460_v35, 0.0  ;;  %vm11345_vm13 = vcmp.eq.s32.totalorder %v11242_v52, 1  ;;  %vm11347_vm4 = vcmp.eq.s32.totalorder %v11243_v9, 1  ;;  %11349 = vst [vmem:[#allocation171_spill] sm:$0xff] %v7760_v61 }
 0x4a4   : > { %11344 = vst [vmem:[#allocation144_spill] sm:$0xff] %v7746_v43  ;;  %v7751_v59 = vsel %vm11345_vm13, %v7460_v35, 0.0  ;;  %v7756_v60 = vsel %vm11347_vm4, %v7460_v35, 0.0  ;;  %v11350_v34 = vld [vmem:[#allocation46_spill] sm:$0xff]  ;;  %v11351_v43 = vld [vmem:[#allocation52_spill] sm:$0xff]  ;;  %vm11354_vm6 = vcmp.eq.s32.totalorder %v11252_v22, 1  ;;  %5315 = vmatprep.subr.bf16.mxu1 %v1301_v55 }
 0x4a5   : > { %11346 = vst [vmem:[#allocation151_spill] sm:$0xff] %v7751_v59  ;;  %11348 = vst [vmem:[#allocation164_spill] sm:$0xff] %v7756_v60  ;;  %v11352_v20 = vld [vmem:[#allocation58_spill] sm:$0xff]  ;;  %v11353_v52 = vld [vmem:[#allocation64_spill] sm:$0xff]  ;;  %v7769_v9 = vsel %vm11354_vm6, %v7460_v35, 0.0  ;;  %vm11356_vm4 = vcmp.eq.s32.totalorder %v11253_v29, 1  ;;  %5316 = vmatpush3.bf16.msra.mxu1 %v1301_v55 }
 0x4a6   : > { %11355 = vst [vmem:[#allocation175_spill] sm:$0xff] %v7769_v9  ;;  %v7774_v60 = vsel %vm11356_vm4, %v7460_v35, 0.0  ;;  %vm11358_vm9 = vcmp.eq.s32.totalorder %v11254_v51, 1  ;;  %vm11360_vm14 = vcmp.eq.s32.totalorder %v11255_v63, 1  ;;  %v11362_v6 = vmov 0.0   ;;  %v11363_v22 = vld [vmem:[#allocation70_spill] sm:$0xff]  ;;  %3646 = vperm.xlu0 %5537, %v7275_v15  }
 0x4a7   : > { %11357 = vst [vmem:[#allocation185_spill] sm:$0xff] %v7774_v60  ;;  %v7779_v59 = vsel %vm11358_vm9, %v7460_v35, 0.0  ;;  %v7784_v61 = vsel %vm11360_vm14, %v7460_v35, 0.0  ;;  %5303 = vmatprep.subr.bf16.mxu0 %v11362_v6  ;;  %vm1973_vm6 = vcmp.eq.s32.totalorder %v11363_v22, 1  ;;  %v11364_v9 = vld [vmem:[#allocation76_spill] sm:$0xff]  ;;  %v11365_v29 = vld [vmem:[#allocation82_spill] sm:$0xff] }
 0x4a8   : > { %11359 = vst [vmem:[#allocation28_spill] sm:$0xff] %v7779_v59  ;;  %11361 = vst [vmem:[#allocation34_spill] sm:$0xff] %v7784_v61  ;;  %vm2055_vm13 = vcmp.eq.s32.totalorder %v11364_v9, 1  ;;  %vm2124_vm4 = vcmp.eq.s32.totalorder %v11365_v29, 1  ;;  %v11366_v60 = vld [vmem:[#allocation88_spill] sm:$0xff]  ;;  %vm11367_vm9 = vcmp.eq.s32.totalorder %v11265_v7, 1  ;;  %5304 = vmatpush3.bf16.msra.mxu0 %v1301_v55 }
 0x4a9   : > { %v7794_v51 = vsel %vm11367_vm9, %v7460_v35, 0.0  ;;  %vm11369_vm14 = vcmp.eq.s32.totalorder %v11266_v40, 1  ;;  %vm11371_vm11 = vcmp.eq.s32.totalorder %v11267_v21, 1  ;;  %v7809_v61 = vsel %vm3243_vm10, %v7460_v35, 0.0  ;;  %v11374_v7 = vld [vmem:[#allocation94_spill] sm:$0xff]  ;;  %v11376_v40 = vld [vmem:[#allocation107_spill] sm:$0xff]  ;;  %5305 = vmatprep.subr.bf16.mxu0 %v11362_v6 }
 0x4aa   : > { %11368 = vst [vmem:[#allocation40_spill] sm:$0xff] %v7794_v51  ;;  %v7799_v63 = vsel %vm11369_vm14, %v7460_v35, 0.0  ;;  %v7804_v50 = vsel %vm11371_vm11, %v7460_v35, 0.0  ;;  %11373 = vst [vmem:[#allocation52_spill] sm:$0xff] %v7809_v61  ;;  %v11375_v51 = vld [vmem:[#allocation100_spill] sm:$0xff]  ;;  %v7818_v21 = vsel %vm1492_vm8, %v7668_v13, 0.0 }
 0x4ab   : > { %11370 = vst [vmem:[#allocation192_spill] sm:$0xff] %v7799_v63  ;;  %11372 = vst [vmem:[#allocation46_spill] sm:$0xff] %v7804_v50  ;;  %vm11378_vm11 = vcmp.eq.s32.totalorder %v11278_v1, 1  ;;  %vm11379_vm10 = vcmp.eq.s32.totalorder %v11279_v53, 1  ;;  %vm11380_vm5 = vcmp.eq.s32.totalorder %v11280_v10, 1  ;;  %v11382_v4 = vld [vmem:[#allocation114_spill] sm:$0xff] }
 0x4ac   : > { %11377 = vst [vmem:[#allocation58_spill] sm:$0xff] %v7818_v21  ;;  %v7823_v8 = vsel %vm11378_vm11, %v7668_v13, 0.0  ;;  %v7828_v5 = vsel %vm11379_vm10, %v7668_v13, 0.0  ;;  %v7833_v35 = vsel %vm11380_vm5, %v7668_v13, 0.0  ;;  %vm2469_vm8 = vcmp.eq.s32.totalorder %v11382_v4, 1  ;;  %v11383_v21 = vld [vmem:[#allocation121_spill] sm:$0xff] }
 0x4ad   : > { %11381 = vst [vmem:[#allocation64_spill] sm:$0xff] %v7833_v35  ;;  %v11384_v61 = vld [vmem:[#allocation128_spill] sm:$0xff]  ;;  %v7842_v1 = vsel %vm1768_vm3, %v7668_v13, 0.0  ;;  %vm11386_vm11 = vcmp.eq.s32.totalorder %v11291_v31, 1  ;;  %vm11388_vm5 = vcmp.eq.s32.totalorder %v11292_v46, 1  ;;  %vm11390_vm10 = vcmp.eq.s32.totalorder %v11293_v0, 1  ;;  %v7859_v35 = vpop.permute.xlu0 %3301 }
 0x4ae   : > { %11385 = vst [vmem:[#allocation70_spill] sm:$0xff] %v7842_v1  ;;  %v7847_v53 = vsel %vm11386_vm11, %v7668_v13, 0.0  ;;  %v7852_v11 = vsel %vm11388_vm5, %v7668_v13, 0.0  ;;  %v7857_v10 = vsel %vm11390_vm10, %v7668_v13, 0.0  ;;  %v11392_v30 = vld [vmem:[#allocation135_spill] sm:$0xff]  ;;  %v11393_v1 = vld [vmem:[#allocation142_spill] sm:$0xff] }
 0x4af   : > { %11387 = vst [vmem:[#allocation76_spill] sm:$0xff] %v7847_v53  ;;  %11389 = vst [vmem:[#allocation82_spill] sm:$0xff] %v7852_v11  ;;  %vm2685_vm3 = vcmp.eq.s32.totalorder %v11392_v30, 1  ;;  %vm2754_vm9 = vcmp.eq.s32.totalorder %v11393_v1, 1  ;;  %v11394_v31 = vld [vmem:[#allocation149_spill] sm:$0xff]  ;;  %v11395_v53 = vld [vmem:[#allocation163_spill] sm:$0xff] }
 0x4b0   : > { %11391 = vst [vmem:[#allocation88_spill] sm:$0xff] %v7857_v10  ;;  %vm2823_vm11 = vcmp.eq.s32.totalorder %v11394_v31, 1  ;;  %vm2892_vm14 = vcmp.eq.s32.totalorder %v11395_v53, 1  ;;  %v7868_v46 = vsel %vm2057_vm2, %v7668_v13, 0.0  ;;  %v7873_v0 = vsel %vm2126_vm0, %v7668_v13, 0.0  ;;  %v11399_v44 = vld [vmem:[#allocation170_spill] sm:$0xff] }
 0x4b1   : > { %11396 = vst [vmem:[#allocation94_spill] sm:$0xff] %v7868_v46  ;;  %11397 = vst [vmem:[#allocation100_spill] sm:$0xff] %v7873_v0  ;;  %v7878_v10 = vsel %vm2195_vm12, %v7668_v13, 0.0  ;;  %v7883_v11 = vsel %vm2264_vm1, %v7668_v13, 0.0  ;;  %vm2961_vm2 = vcmp.eq.s32.totalorder %v11399_v44, 1  ;;  %v11400_v46 = vld [vmem:[#allocation174_spill] sm:$0xff] }
 0x4b2   : > { %11398 = vst [vmem:[#allocation107_spill] sm:$0xff] %v7883_v11  ;;  %v11401_v33 = vld [vmem:[#allocation183_spill] sm:$0xff]  ;;  %v11402_v0 = vld [vmem:[#allocation190_spill] sm:$0xff]  ;;  %v7893_v17 = vsel %vm2333_vm15, %v7668_v13, 0.0  ;;  %v7898_v54 = vsel %vm2402_vm7, %v7668_v13, 0.0  ;;  %vm11404_vm12 = vcmp.eq.s32.totalorder %v11312_v39, 1 }
 0x4b3   : > { %11403 = vst [vmem:[#allocation114_spill] sm:$0xff] %v7893_v17  ;;  %v7903_v55 = vsel %vm11404_vm12, %v7668_v13, 0.0  ;;  %vm11406_vm1 = vcmp.eq.s32.totalorder %v11313_v38, 1  ;;  %v11408_v14 = vld [vmem:[#allocation33_spill] sm:$0xff]  ;;  %v11409_v17 = vld [vmem:[#allocation39_spill] sm:$0xff]  ;;  %vm11411_vm7 = vcmp.eq.s32.totalorder %v11319_v42, 1 }
 0x4b4   : > { %11405 = vst [vmem:[#allocation121_spill] sm:$0xff] %v7903_v55  ;;  %v7908_v6 = vsel %vm11406_vm1, %v7668_v13, 0.0  ;;  %v11410_v11 = vld [vmem:[#allocation45_spill] sm:$0xff]  ;;  %v7917_v12 = vsel %vm11411_vm7, %v7668_v13, 0.0  ;;  %vm11413_vm12 = vcmp.eq.s32.totalorder %v11320_v18, 1  ;;  %vm11415_vm1 = vcmp.eq.s32.totalorder %v11321_v3, 1 }
 0x4b5   : > { %11407 = vst [vmem:[#allocation128_spill] sm:$0xff] %v7908_v6  ;;  %11412 = vst [vmem:[#allocation135_spill] sm:$0xff] %v7917_v12  ;;  %v7922_v39 = vsel %vm11413_vm12, %v7668_v13, 0.0  ;;  %v7927_v15 = vsel %vm11415_vm1, %v7668_v13, 0.0  ;;  %vm11417_vm10 = vcmp.eq.s32.totalorder %v11322_v58, 1  ;;  %v11419_v42 = vld [vmem:[#allocation51_spill] sm:$0xff] }
 0x4b6   : > { %11414 = vst [vmem:[#allocation142_spill] sm:$0xff] %v7922_v39  ;;  %11416 = vst [vmem:[#allocation149_spill] sm:$0xff] %v7927_v15  ;;  %v7932_v38 = vsel %vm11417_vm10, %v7668_v13, 0.0  ;;  %v11420_v12 = vld [vmem:[#allocation57_spill] sm:$0xff]  ;;  %v11421_v6 = vld [vmem:[#allocation63_spill] sm:$0xff]  ;;  %vm11423_vm5 = vcmp.eq.s32.totalorder %v11329_v19, 1  ;;  %v7959_v15 = vpop.permute.xlu0 %3307 }
 0x4b7   : > { %11418 = vst [vmem:[#allocation163_spill] sm:$0xff] %v7932_v38  ;;  %v11422_v18 = vld [vmem:[#allocation69_spill] sm:$0xff]  ;;  %v7942_v3 = vsel %vm11423_vm5, %v7668_v13, 0.0  ;;  %vm11425_vm1 = vcmp.eq.s32.totalorder %v11330_v41, 1  ;;  %vm11427_vm10 = vcmp.eq.s32.totalorder %v11331_v28, 1  ;;  %vm11429_vm15 = vcmp.eq.s32.totalorder %v11332_v24, 1 }
 0x4b8   : > { %11424 = vst [vmem:[#allocation170_spill] sm:$0xff] %v7942_v3  ;;  %v7947_v58 = vsel %vm11425_vm1, %v7668_v13, 0.0  ;;  %v7952_v26 = vsel %vm11427_vm10, %v7668_v13, 0.0  ;;  %v7957_v38 = vsel %vm11429_vm15, %v7668_v13, 0.0  ;;  %11431 = vst [vmem:[#allocation33_spill] sm:$0xff] %v7959_v15  ;;  %v11432_v19 = vld [vmem:[#allocation75_spill] sm:$0xff] }
 0x4b9   : > { %11426 = vst [vmem:[#allocation174_spill] sm:$0xff] %v7947_v58  ;;  %11428 = vst [vmem:[#allocation183_spill] sm:$0xff] %v7952_v26  ;;  %v11433_v3 = vld [vmem:[#allocation81_spill] sm:$0xff]  ;;  %v11434_v39 = vld [vmem:[#allocation87_spill] sm:$0xff]  ;;  %vm11436_vm7 = vcmp.eq.s32.totalorder %v11342_v36, 1  ;;  %vm11438_vm10 = vcmp.eq.s32.totalorder %v11339_v32, 1  ;;  %v1285_v26 = vpop.permute.xlu1 %1284 }
 0x4ba   : > { %11430 = vst [vmem:[#allocation190_spill] sm:$0xff] %v7957_v38  ;;  %v11435_v41 = vld [vmem:[#allocation93_spill] sm:$0xff]  ;;  %v7968_v28 = vsel %vm11436_vm7, %v7668_v13, 0.0  ;;  %v7973_v24 = vsel %vm11438_vm10, %v7620_v49, 0.0  ;;  %vm11440_vm15 = vcmp.eq.s32.totalorder %v11340_v62, 1  ;;  %vm11442_vm0 = vcmp.eq.s32.totalorder %v11341_v25, 1 }
 0x4bb   : > { %11437 = vst [vmem:[#allocation39_spill] sm:$0xff] %v7968_v28  ;;  %11439 = vst [vmem:[#allocation45_spill] sm:$0xff] %v7973_v24  ;;  %v7978_v15 = vsel %vm11440_vm15, %v7620_v49, 0.0  ;;  %v7983_v38 = vsel %vm11442_vm0, %v7620_v49, 0.0  ;;  %v11444_v58 = vld [vmem:[#allocation99_spill] sm:$0xff]  ;;  %v11445_v36 = vld [vmem:[#allocation106_spill] sm:$0xff] }
 0x4bc   : > { %11441 = vst [vmem:[#allocation51_spill] sm:$0xff] %v7978_v15  ;;  %11443 = vst [vmem:[#allocation57_spill] sm:$0xff] %v7983_v38  ;;  %vm2267_vm1 = vcmp.eq.s32.totalorder %v11444_v58, 1  ;;  %v11446_v13 = vld [vmem:[#allocation113_spill] sm:$0xff]  ;;  %v11447_v32 = vld [vmem:[#allocation120_spill] sm:$0xff]  ;;  %vm11448_vm5 = vcmp.eq.s32.totalorder %v11350_v34, 1 }
 0x4bd   : > { %v7992_v62 = vsel %vm11448_vm5, %v7620_v49, 0.0  ;;  %vm11450_vm15 = vcmp.eq.s32.totalorder %v11351_v43, 1  ;;  %vm11452_vm0 = vcmp.eq.s32.totalorder %v11352_v20, 1  ;;  %vm11454_vm12 = vcmp.eq.s32.totalorder %v11353_v52, 1  ;;  %v11456_v24 = vld [vmem:[#allocation201_spill] sm:$0xff]  ;;  %v11457_v28 = vld [vmem:[#allocation127_spill] sm:$0xff] }
 0x4be   : > { %11449 = vst [vmem:[#allocation63_spill] sm:$0xff] %v7992_v62  ;;  %v7997_v25 = vsel %vm11450_vm15, %v7620_v49, 0.0  ;;  %v8002_v38 = vsel %vm11452_vm0, %v7620_v49, 0.0  ;;  %v8007_v15 = vsel %vm11454_vm12, %v7620_v49, 0.0  ;;  %3652 = vperm.xlu0 %5537, %v11456_v24   ;;  %v5538_v34 = vld [vmem:[#allocation5] sm:$0xff]   ;;  %vm2543_vm5 = vcmp.eq.s32.totalorder %v11457_v28, 1 }
 0x4bf   : > { %11451 = vst [vmem:[#allocation69_spill] sm:$0xff] %v7997_v25  ;;  %11453 = vst [vmem:[#allocation75_spill] sm:$0xff] %v8002_v38  ;;  %v11458_v62 = vld [vmem:[#allocation134_spill] sm:$0xff]  ;;  %v11459_v43 = vld [vmem:[#allocation141_spill] sm:$0xff]  ;;  %v8017_v20 = vsel %vm1973_vm6, %v7620_v49, 0.0  ;;  %v8022_v52 = vsel %vm2055_vm13, %v7620_v49, 0.0 }
 0x4c0   : > { %11455 = vst [vmem:[#allocation81_spill] sm:$0xff] %v8007_v15  ;;  %vm2621_vm10 = vcmp.eq.s32.totalorder %v11458_v62, 1  ;;  %v11460_v25 = vld [vmem:[#allocation148_spill] sm:$0xff]  ;;  %11461 = vst [vmem:[#allocation87_spill] sm:$0xff] %v8017_v20  ;;  %v8027_v24 = vsel %vm2124_vm4, %v7620_v49, 0.0  ;;  %vm11464_vm12 = vcmp.eq.s32.totalorder %v11366_v60, 1 }
 0x4c1   : > { %11462 = vst [vmem:[#allocation93_spill] sm:$0xff] %v8022_v52  ;;  %11463 = vst [vmem:[#allocation99_spill] sm:$0xff] %v8027_v24  ;;  %v8032_v15 = vsel %vm11464_vm12, %v7620_v49, 0.0  ;;  %v11466_v38 = vld [vmem:[#allocation202_spill] sm:$0xff]  ;;  %v11467_v22 = vld [vmem:[#allocation160_spill] sm:$0xff]  ;;  %vm11471_vm15 = vcmp.eq.s32.totalorder %v11374_v7, 1  ;;  %v8057_v52 = vpop.permute.xlu0 %3358 }
 0x4c2   : > { %11465 = vst [vmem:[#allocation106_spill] sm:$0xff] %v8032_v15  ;;  %3713 = vperm.xlu1 %5536, %v11466_v38   ;;  %vm2828_vm6 = vcmp.eq.s32.totalorder %v11467_v22, 1  ;;  %v11468_v20 = vld [vmem:[#allocation167_spill] sm:$0xff]  ;;  %v11470_v9 = vld [vmem:[#allocation182_spill] sm:$0xff]  ;;  %v8042_v29 = vsel %vm11471_vm15, %v7620_v49, 0.0  ;;  %vm11473_vm4 = vcmp.eq.s32.totalorder %v11375_v51, 1 }
 0x4c3   : > { %vm2897_vm0 = vcmp.eq.s32.totalorder %v11468_v20, 1  ;;  %v11469_v55 = vld [vmem:[#allocation179_spill] sm:$0xff]  ;;  %11472 = vst [vmem:[#allocation113_spill] sm:$0xff] %v8042_v29  ;;  %v8047_v60 = vsel %vm11473_vm4, %v7620_v49, 0.0  ;;  %vm11475_vm12 = vcmp.eq.s32.totalorder %v11376_v40, 1  ;;  %v11477_v15 = vld [vmem:[#allocation154_spill] sm:$0xff] }
 0x4c4   : > { %11474 = vst [vmem:[#allocation120_spill] sm:$0xff] %v8047_v60  ;;  %v8052_v38 = vsel %vm11475_vm12, %v7620_v49, 0.0  ;;  %v8055_v24 = vmul.f32 %v1285_v26, %v11477_v15  ;;  %11479 = vst [vmem:[#allocation134_spill] sm:$0xff] %v8057_v52  ;;  %vm11480_vm13 = vcmask 523264   ;;  %v11481_v7 = vld [vmem:[#allocation189_spill] sm:$0xff]  ;;  %v11482_v29 = vld [vmem:[#allocation200_spill] sm:$0xff] }
 0x4c5   : > { %11476 = vst [vmem:[#allocation201_spill] sm:$0xff] %v8052_v38  ;;  %5321 = vmatprep.mubr.msk.bf16.mxu1 %vm11480_vm13, %v5538_v34  ;;  %vm3104_vm15 = vcmp.eq.s32.totalorder %v11481_v7, 1  ;;  %vm3180_vm7 = vcmp.eq.s32.totalorder %v11482_v29, 1  ;;  %v8065_v51 = vsel %vm2469_vm8, %v7620_v49, 0.0  ;;  %vm11484_vm4 = vcmp.eq.s32.totalorder %v11383_v21, 1  ;;  %v11500_v34 = vld [vmem:[#allocation205_spill] sm:$0xff] }
 0x4c6   : > { %11478 = vst [vmem:[#allocation127_spill] sm:$0xff] %v8055_v24  ;;  %11483 = vst [vmem:[#allocation141_spill] sm:$0xff] %v8065_v51  ;;  %v8070_v40 = vsel %vm11484_vm4, %v7620_v49, 0.0  ;;  %vm11486_vm12 = vcmp.eq.s32.totalorder %v11384_v61, 1  ;;  %vm3245_vm13 = vcmp.eq.s32.totalorder %v7387_v37, 1  ;;  %v8081_v26 = vsel %vm2685_vm3, %v7620_v49, 0.0  ;;  %3719 = vperm.xlu1 %5536, %v11500_v34  }
 0x4c7   : > { %11485 = vst [vmem:[#allocation148_spill] sm:$0xff] %v8070_v40  ;;  %v8075_v15 = vsel %vm11486_vm12, %v7620_v49, 0.0  ;;  %11488 = vst [vmem:[#allocation160_spill] sm:$0xff] %v8081_v26  ;;  %v8086_v4 = vsel %vm2754_vm9, %v7620_v49, 0.0  ;;  %v8091_v21 = vsel %vm2823_vm11, %v7620_v49, 0.0  ;;  %v8096_v61 = vsel %vm2892_vm14, %v7620_v49, 0.0  ;;  %v1275_v26 = vpop.permute.xlu1 %1274 }
 0x4c8   : > { %11487 = vst [vmem:[#allocation202_spill] sm:$0xff] %v8075_v15  ;;  %11489 = vst [vmem:[#allocation167_spill] sm:$0xff] %v8086_v4  ;;  %v11492_v37 = vld [vmem:[#allocation204_spill] sm:$0xff]  ;;  %v8102_v30 = vsel %vm2961_vm2, %v7620_v49, 0.0  ;;  %vm11494_vm9 = vcmp.eq.s32.totalorder %v11400_v46, 1  ;;  %vm11496_vm8 = vcmp.eq.s32.totalorder %v11401_v33, 1 }
 0x4c9   : > { %11490 = vst [vmem:[#allocation179_spill] sm:$0xff] %v8091_v21  ;;  %11491 = vst [vmem:[#allocation182_spill] sm:$0xff] %v8096_v61  ;;  %3917 = vperm.xlu0 %5537, %v11492_v37   ;;  %v8107_v1 = vsel %vm11494_vm9, %v7620_v49, 0.0  ;;  %v8112_v31 = vsel %vm11496_vm8, %v7620_v49, 0.0  ;;  %vm11498_vm14 = vcmp.eq.s32.totalorder %v11402_v0, 1  ;;  %v8121_v44 = vsel %vm3245_vm13, %v7398_v48, 0.0  ;;  %v8138_v37 = vpop.permute.xlu0 %3364 }
 0x4ca   : > { %11493 = vst [vmem:[#allocation154_spill] sm:$0xff] %v8102_v30  ;;  %11495 = vst [vmem:[#allocation189_spill] sm:$0xff] %v8107_v1  ;;  %v8117_v53 = vsel %vm11498_vm14, %v7620_v49, 0.0  ;;  %vm11502_vm3 = vcmp.eq.s32.totalorder %v11408_v14, 1  ;;  %vm11504_vm11 = vcmp.eq.s32.totalorder %v11409_v17, 1  ;;  %vm11506_vm2 = vcmp.eq.s32.totalorder %v11410_v11, 1 }
 0x4cb   : > { %11497 = vst [vmem:[#allocation200_spill] sm:$0xff] %v8112_v31  ;;  %11499 = vst [vmem:[#allocation204_spill] sm:$0xff] %v8117_v53  ;;  %v8126_v46 = vsel %vm11502_vm3, %v8055_v24, 0.0  ;;  %v8131_v33 = vsel %vm11504_vm11, %v8055_v24, 0.0  ;;  %v8136_v0 = vsel %vm11506_vm2, %v8055_v24, 0.0  ;;  %vm11509_vm4 = vcmp.eq.s32.totalorder %v11419_v42, 1 }
 0x4cc   : > { %11501 = vst [vmem:[#allocation205_spill] sm:$0xff] %v8121_v44  ;;  %11503 = vst [vmem:[#allocation235_spill] sm:$0xff] %v8126_v46  ;;  %v8143_v34 = vsel %vm11509_vm4, %v8055_v24, 0.0  ;;  %vm11511_vm12 = vcmp.eq.s32.totalorder %v11420_v12, 1  ;;  %vm11513_vm13 = vcmp.eq.s32.totalorder %v11421_v6, 1  ;;  %vm11515_vm9 = vcmp.eq.s32.totalorder %v11422_v18, 1 }
 0x4cd   : > { %11505 = vst [vmem:[#allocation236_spill] sm:$0xff] %v8131_v33  ;;  %11507 = vst [vmem:[#allocation237_spill] sm:$0xff] %v8136_v0  ;;  %v8148_v14 = vsel %vm11511_vm12, %v8055_v24, 0.0  ;;  %v8153_v17 = vsel %vm11513_vm13, %v8055_v24, 0.0  ;;  %v8158_v11 = vsel %vm11515_vm9, %v8055_v24, 0.0  ;;  %vm11517_vm8 = vcmp.eq.s32.totalorder %v11432_v19, 1  ;;  %v8224_v52 = vpop.permute.xlu0 %3370 }
 0x4ce   : > { %11508 = vst [vmem:[#allocation238_spill] sm:$0xff] %v8138_v37  ;;  %11510 = vst [vmem:[#allocation239_spill] sm:$0xff] %v8143_v34  ;;  %v8163_v42 = vsel %vm11517_vm8, %v8055_v24, 0.0  ;;  %vm11519_vm14 = vcmp.eq.s32.totalorder %v11433_v3, 1  ;;  %vm11521_vm3 = vcmp.eq.s32.totalorder %v11434_v39, 1  ;;  %vm11523_vm11 = vcmp.eq.s32.totalorder %v11435_v41, 1 }
 0x4cf   : > { %11512 = vst [vmem:[#allocation240_spill] sm:$0xff] %v8148_v14  ;;  %11514 = vst [vmem:[#allocation241_spill] sm:$0xff] %v8153_v17  ;;  %v8168_v12 = vsel %vm11519_vm14, %v8055_v24, 0.0  ;;  %v8173_v6 = vsel %vm11521_vm3, %v8055_v24, 0.0  ;;  %v8178_v18 = vsel %vm11523_vm11, %v8055_v24, 0.0  ;;  %v11525_v49 = vld [vmem:[#allocation206_spill] sm:$0xff] }
 0x4d0   : > { %11516 = vst [vmem:[#allocation242_spill] sm:$0xff] %v8158_v11  ;;  %11518 = vst [vmem:[#allocation243_spill] sm:$0xff] %v8163_v42  ;;  %3923 = vperm.xlu0 %5537, %v11525_v49   ;;  %v8184_v19 = vsel %vm2267_vm1, %v8055_v24, 0.0  ;;  %vm11527_vm2 = vcmp.eq.s32.totalorder %v11445_v36, 1  ;;  %vm11529_vm4 = vcmp.eq.s32.totalorder %v11446_v13, 1  ;;  %vm11531_vm12 = vcmp.eq.s32.totalorder %v11447_v32, 1 }
 0x4d1   : > { %11520 = vst [vmem:[#allocation244_spill] sm:$0xff] %v8168_v12  ;;  %11522 = vst [vmem:[#allocation245_spill] sm:$0xff] %v8173_v6  ;;  %v8189_v3 = vsel %vm11527_vm2, %v8055_v24, 0.0  ;;  %v8194_v39 = vsel %vm11529_vm4, %v8055_v24, 0.0  ;;  %v8199_v41 = vsel %vm11531_vm12, %v8055_v24, 0.0  ;;  %v11532_v49 = vld [vmem:[#allocation207_spill] sm:$0xff]  ;;  %v8294_v17 = vpop.permute.xlu0 %3376 }
 0x4d2   : > { %11524 = vst [vmem:[#allocation246_spill] sm:$0xff] %v8178_v18  ;;  %11526 = vst [vmem:[#allocation206_spill] sm:$0xff] %v8184_v19  ;;  %3725 = vperm.xlu1 %5536, %v11532_v49   ;;  %v11533_v58 = vld [vmem:[#allocation31_spill] sm:$0xff]  ;;  %v11534_v37 = vld [vmem:[#allocation37_spill] sm:$0xff]  ;;  %v8207_v36 = vsel %vm2543_vm5, %v8055_v24, 0.0  ;;  %v8212_v13 = vsel %vm2621_vm10, %v8055_v24, 0.0 }
 0x4d3   : > { %11528 = vst [vmem:[#allocation247_spill] sm:$0xff] %v8189_v3  ;;  %11530 = vst [vmem:[#allocation248_spill] sm:$0xff] %v8194_v39  ;;  %vm1493_vm1 = vcmp.eq.s32.totalorder %v11533_v58, 1  ;;  %vm1562_vm13 = vcmp.eq.s32.totalorder %v11534_v37, 1  ;;  %vm11537_vm9 = vcmp.eq.s32.totalorder %v11459_v43, 1  ;;  %vm11539_vm8 = vcmp.eq.s32.totalorder %v11460_v25, 1 }
 0x4d4   : > { %11535 = vst [vmem:[#allocation207_spill] sm:$0xff] %v8207_v36  ;;  %11536 = vst [vmem:[#allocation31_spill] sm:$0xff] %v8212_v13  ;;  %v8217_v32 = vsel %vm11537_vm9, %v8055_v24, 0.0  ;;  %v8222_v49 = vsel %vm11539_vm8, %v8055_v24, 0.0  ;;  %v11542_v28 = vld [vmem:[#allocation43_spill] sm:$0xff]  ;;  %v11543_v53 = vld [vmem:[#allocation49_spill] sm:$0xff]  ;;  %3929 = vperm.xlu0 %5537, %v7333_v23  }
 0x4d5   : > { %11538 = vst [vmem:[#allocation37_spill] sm:$0xff] %v8217_v32  ;;  %11540 = vst [vmem:[#allocation249_spill] sm:$0xff] %v8222_v49  ;;  %vm1631_vm5 = vcmp.eq.s32.totalorder %v11542_v28, 1  ;;  %vm1700_vm14 = vcmp.eq.s32.totalorder %v11543_v53, 1  ;;  %v11544_v31 = vld [vmem:[#allocation55_spill] sm:$0xff]  ;;  %v11545_v62 = vld [vmem:[#allocation61_spill] sm:$0xff]  ;;  %v8338_v32 = vpop.permute.xlu0 %3427 }
 0x4d6   : > { %11541 = vst [vmem:[#allocation250_spill] sm:$0xff] %v8224_v52  ;;  %vm1769_vm3 = vcmp.eq.s32.totalorder %v11544_v31, 1  ;;  %vm1838_vm10 = vcmp.eq.s32.totalorder %v11545_v62, 1  ;;  %v8233_v43 = vsel %vm2828_vm6, %v8055_v24, 0.0  ;;  %v8238_v25 = vsel %vm2897_vm0, %v8055_v24, 0.0  ;;  %v11551_v30 = vld [vmem:[#allocation67_spill] sm:$0xff] }
 0x4d7   : > { %11546 = vst [vmem:[#allocation43_spill] sm:$0xff] %v8238_v25  ;;  %vm11547_vm11 = vcmp.eq.s32.totalorder %v11469_v55, 1  ;;  %vm11549_vm2 = vcmp.eq.s32.totalorder %v11470_v9, 1  ;;  %vm1907_vm4 = vcmp.eq.s32.totalorder %v11551_v30, 1  ;;  %v11552_v22 = vld [vmem:[#allocation73_spill] sm:$0xff]  ;;  %v11553_v61 = vld [vmem:[#allocation79_spill] sm:$0xff] }
 0x4d8   : > { %v8243_v52 = vsel %vm11547_vm11, %v8055_v24, 0.0  ;;  %v8248_v1 = vsel %vm11549_vm2, %v8055_v24, 0.0  ;;  %vm1976_vm6 = vcmp.eq.s32.totalorder %v11552_v22, 1  ;;  %vm2058_vm12 = vcmp.eq.s32.totalorder %v11553_v61, 1  ;;  %v11554_v21 = vld [vmem:[#allocation85_spill] sm:$0xff]  ;;  %v11557_v15 = vld [vmem:[#allocation91_spill] sm:$0xff] }
 0x4d9   : > { %11548 = vst [vmem:[#allocation49_spill] sm:$0xff] %v8243_v52  ;;  %11550 = vst [vmem:[#allocation55_spill] sm:$0xff] %v8248_v1  ;;  %vm2127_vm9 = vcmp.eq.s32.totalorder %v11554_v21, 1  ;;  %v8257_v20 = vsel %vm3104_vm15, %v8055_v24, 0.0  ;;  %v8262_v55 = vsel %vm3180_vm7, %v8055_v24, 0.0  ;;  %vm2196_vm0 = vcmp.eq.s32.totalorder %v11557_v15, 1  ;;  %v8419_v39 = vpop.permute.xlu0 %3433 }
 0x4da   : > { %11555 = vst [vmem:[#allocation61_spill] sm:$0xff] %v8257_v20  ;;  %11556 = vst [vmem:[#allocation67_spill] sm:$0xff] %v8262_v55  ;;  %v11558_v40 = vld [vmem:[#allocation97_spill] sm:$0xff]  ;;  %v11559_v7 = vld [vmem:[#allocation104_spill] sm:$0xff] }
 0x4db   : > { %v11560_v51 = vld [vmem:[#allocation111_spill] sm:$0xff]  ;;  %v11561_v38 = vld [vmem:[#allocation208_spill] sm:$0xff]  ;;  %v11562_v60 = vld [vmem:[#allocation118_spill] sm:$0xff]  ;;  %11569 = vst [vmem:[#allocation73_spill] sm:$0xff] %v8294_v17 }
 0x4dc   : > { %3731 = vperm.xlu1 %5536, %v11561_v38   ;;  %v11563_v33 = vld [vmem:[#allocation125_spill] sm:$0xff]  ;;  %v11564_v27 = vld [vmem:[#allocation132_spill] sm:$0xff]  ;;  %v11565_v46 = vld [vmem:[#allocation139_spill] sm:$0xff]  ;;  %11597 = vst [vmem:[#allocation85_spill] sm:$0xff] %v8338_v32 }
 0x4dd   : > { %v11570_v16 = vld [vmem:[#allocation146_spill] sm:$0xff]  ;;  %v11572_v57 = vld [vmem:[#allocation165_spill] sm:$0xff]  ;;  %v11577_v38 = vld [vmem:[#allocation155_spill] sm:$0xff]  ;;  %v8498_v1 = vpop.permute.xlu0 %3439 }
 0x4de   : > { %v11571_v56 = vld [vmem:[#allocation158_spill] sm:$0xff]  ;;  %v11573_v0 = vld [vmem:[#allocation177_spill] sm:$0xff]  ;;  %v8307_v6 = vmul.f32 %v1275_v26, %v11577_v38  ;;  %v11580_v23 = vld [vmem:[#allocation187_spill] sm:$0xff] }
 0x4df   : > { %v11579_v17 = vld [vmem:[#allocation181_spill] sm:$0xff]  ;;  %vm3102_vm11 = vcmp.eq.s32.totalorder %v11580_v23, 1  ;;  %v11583_v47 = vld [vmem:[#allocation150_spill] sm:$0xff]  ;;  %v11588_v38 = vld [vmem:[#allocation180_spill] sm:$0xff]  ;;  %11621 = vst [vmem:[#allocation187_spill] sm:$0xff] %v8419_v39 }
 0x4e0   : > { %11578 = vst [vmem:[#allocation79_spill] sm:$0xff] %v8307_v6  ;;  %vm3033_vm2 = vcmp.eq.s32.totalorder %v11579_v17, 1  ;;  %v11581_v4 = vld [vmem:[#allocation193_spill] sm:$0xff]  ;;  %v11584_v18 = vld [vmem:[#allocation162_spill] sm:$0xff]  ;;  %v11589_v34 = vld [vmem:[#allocation184_spill] sm:$0xff]  ;;  %v8358_v29 = vsel %vm1631_vm5, %v8307_v6, 0.0 }
 0x4e1   : > { %vm3178_vm15 = vcmp.eq.s32.totalorder %v11581_v4, 1  ;;  %v11582_v9 = vld [vmem:[#allocation225_spill] sm:$0xff]  ;;  %v11590_v45 = vld [vmem:[#allocation191_spill] sm:$0xff]  ;;  %v11591_v11 = vld [vmem:[#allocation234_spill] sm:$0xff]  ;;  %11602 = vst [vmem:[#allocation111_spill] sm:$0xff] %v8358_v29  ;;  %v8363_v49 = vsel %vm1700_vm14, %v8307_v6, 0.0  ;;  %v8534_v20 = vpop.permute.xlu0 %3445 }
 0x4e2   : > { %vm3247_vm7 = vcmp.eq.s32.totalorder %v11582_v9, 1  ;;  %v11586_v3 = vld [vmem:[#allocation233_spill] sm:$0xff]  ;;  %v11592_v42 = vld [vmem:[#allocation210_spill] sm:$0xff]  ;;  %11603 = vst [vmem:[#allocation208_spill] sm:$0xff] %v8363_v49  ;;  %v8368_v58 = vsel %vm1769_vm3, %v8307_v6, 0.0  ;;  %v8373_v37 = vsel %vm1838_vm10, %v8307_v6, 0.0 }
 0x4e3   : > { %vm3249_vm8 = vcmp.eq.s32.totalorder %v11586_v3, 1  ;;  %v11587_v26 = vld [vmem:[#allocation209_spill] sm:$0xff]  ;;  %3782 = vperm.xlu1 %5536, %v11592_v42   ;;  %v8345_v42 = vsel %vm1493_vm1, %v8307_v6, 0.0  ;;  %11604 = vst [vmem:[#allocation118_spill] sm:$0xff] %v8368_v58  ;;  %11605 = vst [vmem:[#allocation125_spill] sm:$0xff] %v8373_v37  ;;  %v11606_v36 = vld [vmem:[#allocation211_spill] sm:$0xff] }
 0x4e4   : > { %3935 = vperm.xlu0 %5537, %v11587_v26   ;;  %11599 = vst [vmem:[#allocation91_spill] sm:$0xff] %v8345_v42  ;;  %v8350_v26 = vsel %vm1562_vm13, %v8307_v6, 0.0  ;;  %v8353_v14 = vsel %vm3249_vm8, %v8055_v24, 0.0  ;;  %v8379_v28 = vsel %vm1907_vm4, %v8307_v6, 0.0  ;;  %v8384_v53 = vsel %vm1976_vm6, %v8307_v6, 0.0  ;;  %v11620_v15 = vld [vmem:[#allocation171_spill] sm:$0xff] }
 0x4e5   : > { %11600 = vst [vmem:[#allocation97_spill] sm:$0xff] %v8350_v26  ;;  %11601 = vst [vmem:[#allocation104_spill] sm:$0xff] %v8353_v14  ;;  %v8389_v31 = vsel %vm2058_vm12, %v8307_v6, 0.0  ;;  %v8394_v62 = vsel %vm2127_vm9, %v8307_v6, 0.0  ;;  %v8400_v30 = vsel %vm2196_vm0, %v8307_v6, 0.0  ;;  %vm11613_vm1 = vcmp.eq.s32.totalorder %v11558_v40, 1 }
 0x4e6   : > { %11607 = vst [vmem:[#allocation132_spill] sm:$0xff] %v8379_v28  ;;  %11608 = vst [vmem:[#allocation139_spill] sm:$0xff] %v8384_v53  ;;  %v8405_v22 = vsel %vm11613_vm1, %v8307_v6, 0.0  ;;  %vm11615_vm13 = vcmp.eq.s32.totalorder %v11559_v7, 1  ;;  %vm11617_vm5 = vcmp.eq.s32.totalorder %v11560_v51, 1  ;;  %vm3314_vm3 = vcmp.eq.s32.totalorder %v11620_v15, 1 }
 0x4e7   : > { %11609 = vst [vmem:[#allocation146_spill] sm:$0xff] %v8389_v31  ;;  %11610 = vst [vmem:[#allocation158_spill] sm:$0xff] %v8394_v62  ;;  %v8410_v61 = vsel %vm11615_vm13, %v8307_v6, 0.0  ;;  %v8415_v21 = vsel %vm11617_vm5, %v8307_v6, 0.0  ;;  %vm11622_vm10 = vcmp.eq.s32.totalorder %v11562_v60, 1  ;;  %vm11624_vm4 = vcmp.eq.s32.totalorder %v11563_v33, 1 }
 0x4e8   : > { %3986 = vperm.xlu0 %5537, %v11606_v36   ;;  %v11611_v36 = vld [vmem:[#allocation212_spill] sm:$0xff]  ;;  %11612 = vst [vmem:[#allocation165_spill] sm:$0xff] %v8400_v30  ;;  %11614 = vst [vmem:[#allocation177_spill] sm:$0xff] %v8405_v22  ;;  %v8424_v40 = vsel %vm11622_vm10, %v8307_v6, 0.0  ;;  %v8429_v7 = vsel %vm11624_vm4, %v8307_v6, 0.0  ;;  %vm11626_vm6 = vcmp.eq.s32.totalorder %v11564_v27, 1 }
 0x4e9   : > { %3788 = vperm.xlu1 %5536, %v11611_v36   ;;  %11616 = vst [vmem:[#allocation155_spill] sm:$0xff] %v8410_v61  ;;  %11618 = vst [vmem:[#allocation181_spill] sm:$0xff] %v8415_v21  ;;  %v11619_v36 = vld [vmem:[#allocation83_spill] sm:$0xff]  ;;  %v8434_v51 = vsel %vm11626_vm6, %v8307_v6, 0.0  ;;  %vm11628_vm12 = vcmp.eq.s32.totalorder %v11565_v46, 1  ;;  %vm3316_vm9 = vcmp.eq.s32.totalorder %v7859_v35, 1 }
 0x4ea   : > { %vm3312_vm14 = vcmp.eq.s32.totalorder %v11619_v36, 1  ;;  %11623 = vst [vmem:[#allocation193_spill] sm:$0xff] %v8424_v40  ;;  %11625 = vst [vmem:[#allocation225_spill] sm:$0xff] %v8429_v7  ;;  %v8439_v32 = vsel %vm11628_vm12, %v8307_v6, 0.0  ;;  %v8445_v60 = vld [vmem:[%s10604_s3 + $0x8] sm:$0xff]  ;;  %vm11630_vm8 = vcmp.eq.s32.totalorder %v11570_v16, 1  ;;  %v1290_v40 = vpop.permute.xlu1 %1289 }
 0x4eb   : > { %11627 = vst [vmem:[#allocation150_spill] sm:$0xff] %v8434_v51  ;;  %11629 = vst [vmem:[#allocation162_spill] sm:$0xff] %v8439_v32  ;;  %vm3832_vm0 = vcmp.eq.s32.totalorder %v8445_v60, 18  ;;  %v8451_v27 = vsel %vm11630_vm8, %v8307_v6, 0.0  ;;  %vm11632_vm1 = vcmp.eq.s32.totalorder %v11571_v56, 1  ;;  %vm11634_vm13 = vcmp.eq.s32.totalorder %v11572_v57, 1 }
 0x4ec   : > { %11631 = vst [vmem:[#allocation233_spill] sm:$0xff] %v8451_v27  ;;  %v8456_v46 = vsel %vm11632_vm1, %v8307_v6, 0.0  ;;  %v8461_v33 = vsel %vm11634_vm13, %v8307_v6, 0.0  ;;  %vm11636_vm5 = vcmp.eq.s32.totalorder %v11573_v0, 1  ;;  %v11638_v24 = vld [vmem:[#allocation213_spill] sm:$0xff]  ;;  %v8472_v16 = vsel %vm3033_vm2, %v8307_v6, 0.0 }
 0x4ed   : > { %11633 = vst [vmem:[#allocation209_spill] sm:$0xff] %v8456_v46  ;;  %11635 = vst [vmem:[#allocation180_spill] sm:$0xff] %v8461_v33  ;;  %v8466_v39 = vsel %vm11636_vm5, %v8307_v6, 0.0  ;;  %3992 = vperm.xlu0 %5537, %v11638_v24   ;;  %v8477_v56 = vsel %vm3102_vm11, %v8307_v6, 0.0  ;;  %v8482_v57 = vsel %vm3178_vm15, %v8307_v6, 0.0  ;;  %v8487_v0 = vsel %vm3247_vm7, %v8307_v6, 0.0 }
 0x4ee   : > { %11637 = vst [vmem:[#allocation184_spill] sm:$0xff] %v8466_v39  ;;  %11639 = vst [vmem:[#allocation191_spill] sm:$0xff] %v8472_v16  ;;  %v11643_v24 = vld [vmem:[#allocation214_spill] sm:$0xff]  ;;  %v11656_v9 = vld [vmem:[#allocation216_spill] sm:$0xff]  ;;  %v8586_v51 = vsel %vm3314_vm3, %v7398_v48, 0.0  ;;  %v8601_v36 = vsel %vm3316_vm9, %v8307_v6, 0.0  ;;  %v8799_v55 = vpop.permute.xlu1 %1279 }
 0x4ef   : > { %11640 = vst [vmem:[#allocation234_spill] sm:$0xff] %v8477_v56  ;;  %11641 = vst [vmem:[#allocation210_spill] sm:$0xff] %v8482_v57  ;;  %3794 = vperm.xlu1 %5536, %v11643_v24   ;;  %v11661_v31 = vld [vmem:[#allocation217_spill] sm:$0xff]  ;;  %v11670_v32 = vld [vmem:[#allocation218_spill] sm:$0xff]  ;;  %v8603_v56 = vpop.permute.xlu0 %3496  ;;  %v11684_v15 = vmov 0   ;;  %vm3618_vm4 = vcmp.eq.s32.totalorder %v8445_v60, 15 }
 0x4f0   : > { %11642 = vst [vmem:[#allocation211_spill] sm:$0xff] %v8487_v0  ;;  %11647 = vst [vmem:[#allocation212_spill] sm:$0xff] %v8498_v1  ;;  %v8566_v17 = vld [vmem:[%s5905_s23 + $0x80] sm:$0xff]  ;;  %v8569_v49 = vld [vmem:[%s5905_s23 + $0x88] sm:$0xff]  ;;  %vm3970_vm13 = vcmp.eq.s32.totalorder %v8445_v60, 20 }
 0x4f1   : > { %3998 = vperm.xlu0 %5537, %v11656_v9   ;;  %11666 = vst [vmem:[#allocation83_spill] sm:$0xff] %v8534_v20  ;;  %v8556_v9 = vld [vmem:[%s10604_s3 + $0x18] sm:$0xff]  ;;  %11671 = vst [vmem:[#allocation171_spill] sm:$0xff] %v8566_v17  ;;  %v8572_v62 = vld [vmem:[%s5905_s23] sm:$0xff] }
 0x4f2   : > { %vm3834_vm11 = vcmp.eq.s32.totalorder %v8556_v9, 18  ;;  %11672 = vst [vmem:[#allocation213_spill] sm:$0xff] %v8569_v49  ;;  %11673 = vst [vmem:[#allocation214_spill] sm:$0xff] %v8572_v62  ;;  %v11675_v63 = vld [vmem:[#allocation224_spill] sm:$0xff]  ;;  %v11678_v39 = vld [vmem:[#allocation219_spill] sm:$0xff]  ;;  %vm3620_vm12 = vcmp.eq.s32.totalorder %v8556_v9, 15 }
 0x4f3   : > { %3800 = vperm.xlu1 %5536, %v11661_v31   ;;  %v8550_v31 = vld [vmem:[%s10604_s3] sm:$0xff]  ;;  %v8581_v16 = vsel %vm3312_vm14, %v11675_v63, 0.0  ;;  %11677 = vst [vmem:[#allocation217_spill] sm:$0xff] %v8586_v51  ;;  %v8590_v7 = vld [vmem:[%s5905_s23 + $0x8] sm:$0xff]  ;;  %v8593_v61 = vld [vmem:[%s5905_s23 + $0x90] sm:$0xff]  ;;  %v8636_v48 = vsel %vm3834_vm11, 1, %v11684_v15  ;;  %v8701_v29 = vpop.permute.xlu0 %3502 }
 0x4f4   : > { %vm4107_vm15 = vcmp.eq.s32.totalorder %v8550_v31, 22  ;;  %11676 = vst [vmem:[#allocation216_spill] sm:$0xff] %v8581_v16  ;;  %11679 = vst [vmem:[#allocation218_spill] sm:$0xff] %v8590_v7  ;;  %v8596_v57 = vld [vmem:[%s5905_s23 + $0x98] sm:$0xff]  ;;  %v8613_v0 = vld [vmem:[%s10604_s3 + $0x28] sm:$0xff]  ;;  %vm4176_vm6 = vcmp.eq.s32.totalorder %v8550_v31, 23 }
 0x4f5   : > { %4004 = vperm.xlu0 %5537, %v11670_v32   ;;  %v8562_v32 = vld [vmem:[%s10604_s3 + $0x10] sm:$0xff]  ;;  %11680 = vst [vmem:[#allocation219_spill] sm:$0xff] %v8593_v61  ;;  %11681 = vst [vmem:[#allocation251_spill] sm:$0xff] %v8596_v57  ;;  %vm3836_vm2 = vcmp.eq.s32.totalorder %v8613_v0, 18  ;;  %v8619_v35 = vld [vmem:[%s10604_s3 + $0x20] sm:$0xff]  ;;  %v8631_v51 = vsel %vm4107_vm15, 1, %v11684_v15 }
 0x4f6   : > { %vm4109_vm7 = vcmp.eq.s32.totalorder %v8562_v32, 22  ;;  %11682 = vst [vmem:[#allocation252_spill] sm:$0xff] %v8601_v36  ;;  %11683 = vst [vmem:[#allocation253_spill] sm:$0xff] %v8603_v56  ;;  %vm4111_vm14 = vcmp.eq.s32.totalorder %v8619_v35, 22  ;;  %v8623_v20 = vld [vmem:[%s5905_s23 + $0x10] sm:$0xff]  ;;  %v8626_v56 = vld [vmem:[%s5905_s23 + $0x18] sm:$0xff] }
 0x4f7   : > { %3568 = vperm.xlu1 %5536, %v11678_v39   ;;  %v8608_v39 = vsel %vm3832_vm0, 1, %v11684_v15  ;;  %11685 = vst [vmem:[#allocation254_spill] sm:$0xff] %v8623_v20  ;;  %11686 = vst [vmem:[#allocation255_spill] sm:$0xff] %v8626_v56  ;;  %v8641_v63 = vsel %vm4109_vm7, 1, %v11684_v15  ;;  %v8646_v36 = vld [vmem:[%s5905_s23 + $0xa0] sm:$0xff]  ;;  %v8649_v6 = vld [vmem:[%s5905_s23 + $0xa8] sm:$0xff]  ;;  %v8780_v58 = vpop.permute.xlu0 %3508 }
 0x4f8   : > { %11687 = vst [vmem:[#allocation256_spill] sm:$0xff] %v8646_v36  ;;  %11688 = vst [vmem:[#allocation257_spill] sm:$0xff] %v8649_v6  ;;  %v8652_v50 = vld [vmem:[%s5905_s23 + $0x20] sm:$0xff]  ;;  %v8660_v46 = vld [vmem:[%s10604_s3 + $0x38] sm:$0xff]  ;;  %v8683_v7 = vsel %vm3836_vm2, 1, %v11684_v15  ;;  %v8688_v49 = vsel %vm4111_vm14, 1, %v11684_v15 }
 0x4f9   : > { %11689 = vst [vmem:[#allocation258_spill] sm:$0xff] %v8652_v50  ;;  %v11690_v33 = vld [vmem:[#allocation220_spill] sm:$0xff]  ;;  %vm3838_vm3 = vcmp.eq.s32.totalorder %v8660_v46, 18  ;;  %v8666_v16 = vld [vmem:[%s10604_s3 + $0x30] sm:$0xff]  ;;  %v11694_v62 = vld [vmem:[#allocation221_spill] sm:$0xff]  ;;  %vm4178_vm1 = vcmp.eq.s32.totalorder %v8562_v32, 23 }
 0x4fa   : > { %4055 = vperm.xlu0 %5537, %v11690_v33   ;;  %vm4113_vm10 = vcmp.eq.s32.totalorder %v8666_v16, 22  ;;  %v8671_v33 = vld [vmem:[%s5905_s23 + $0x28] sm:$0xff]  ;;  %v8674_v17 = vld [vmem:[%s5905_s23 + $0xb0] sm:$0xff]  ;;  %v8677_v59 = vld [vmem:[%s5905_s23 + $0xb8] sm:$0xff]  ;;  %v8723_v53 = vsel %vm3838_vm3, 1, %v11684_v15  ;;  %v8733_v36 = vsel %vm3618_vm4, 1, %v11684_v15 }
 0x4fb   : > { %11691 = vst [vmem:[#allocation220_spill] sm:$0xff] %v8671_v33  ;;  %11692 = vst [vmem:[#allocation259_spill] sm:$0xff] %v8674_v17  ;;  %3574 = vperm.xlu1 %5536, %v11694_v62   ;;  %v8693_v13 = vld [vmem:[%s5905_s23 + $0x30] sm:$0xff]  ;;  %v8696_v27 = vld [vmem:[%s5905_s23 + $0x38] sm:$0xff]  ;;  %v8728_v21 = vsel %vm4113_vm10, 1, %v11684_v15  ;;  %v8745_v26 = vsel %vm4176_vm6, 1, %v11684_v15 }
 0x4fc   : > { %11693 = vst [vmem:[#allocation260_spill] sm:$0xff] %v8677_v59  ;;  %11695 = vst [vmem:[#allocation221_spill] sm:$0xff] %v8693_v13  ;;  %v11697_v62 = vld [vmem:[#allocation32_spill] sm:$0xff]  ;;  %v11698_v23 = vld [vmem:[#allocation38_spill] sm:$0xff]  ;;  %v8752_v50 = vsel %vm3620_vm12, 1, %v11684_v15  ;;  %v8764_v6 = vsel %vm4178_vm1, 1, %v11684_v15 }
 0x4fd   : > { %11696 = vst [vmem:[#allocation261_spill] sm:$0xff] %v8696_v27  ;;  %vm1496_vm9 = vcmp.eq.s32.totalorder %v11697_v62, 1  ;;  %vm1565_vm0 = vcmp.eq.s32.totalorder %v11698_v23, 1  ;;  %v11699_v30 = vld [vmem:[#allocation44_spill] sm:$0xff]  ;;  %11700 = vst [vmem:[#allocation32_spill] sm:$0xff] %v8701_v29  ;;  %v8714_v37 = vld [vmem:[%s5905_s23 + $0xc8] sm:$0xff] }
 0x4fe   : > { %v8711_v28 = vld [vmem:[%s5905_s23 + $0xc0] sm:$0xff]  ;;  %11702 = vst [vmem:[#allocation44_spill] sm:$0xff] %v8714_v37  ;;  %v11703_v22 = vld [vmem:[#allocation50_spill] sm:$0xff]  ;;  %v11718_v31 = vld [vmem:[#allocation119_spill] sm:$0xff]  ;;  %vm3622_vm12 = vcmp.eq.s32.totalorder %v8613_v0, 15  ;;  %vm4180_vm6 = vcmp.eq.s32.totalorder %v8619_v35, 23 }
 0x4ff   : > { %11701 = vst [vmem:[#allocation38_spill] sm:$0xff] %v8711_v28  ;;  %v11704_v24 = vld [vmem:[#allocation56_spill] sm:$0xff]  ;;  %v11705_v29 = vld [vmem:[#allocation62_spill] sm:$0xff]  ;;  %11707 = vst [vmem:[#allocation50_spill] sm:$0xff] %v8733_v36  ;;  %vm3624_vm14 = vcmp.eq.s32.totalorder %v8660_v46, 15  ;;  %vm4182_vm2 = vcmp.eq.s32.totalorder %v8666_v16, 23 }
 0x500   : > { %v11706_v19 = vld [vmem:[#allocation68_spill] sm:$0xff]  ;;  %v11708_v20 = vld [vmem:[#allocation74_spill] sm:$0xff]  ;;  %11713 = vst [vmem:[#allocation56_spill] sm:$0xff] %v8745_v26  ;;  %11714 = vst [vmem:[#allocation62_spill] sm:$0xff] %v8752_v50  ;;  %vm3901_vm7 = vcmp.eq.s32.totalorder %v8445_v60, 19  ;;  %vm3903_vm3 = vcmp.eq.s32.totalorder %v8556_v9, 19 }
 0x501   : > { %v11709_v56 = vld [vmem:[#allocation80_spill] sm:$0xff]  ;;  %v11710_v61 = vld [vmem:[#allocation86_spill] sm:$0xff]  ;;  %v11716_v14 = vld [vmem:[#allocation105_spill] sm:$0xff]  ;;  %11720 = vst [vmem:[#allocation68_spill] sm:$0xff] %v8764_v6  ;;  %vm3905_vm15 = vcmp.eq.s32.totalorder %v8613_v0, 19  ;;  %vm3907_vm5 = vcmp.eq.s32.totalorder %v8660_v46, 19 }
 0x502   : > { %v11711_v57 = vld [vmem:[#allocation92_spill] sm:$0xff]  ;;  %v11712_v1 = vld [vmem:[#allocation222_spill] sm:$0xff]  ;;  %v11719_v3 = vld [vmem:[#allocation223_spill] sm:$0xff]  ;;  %11727 = vst [vmem:[#allocation86_spill] sm:$0xff] %v8780_v58  ;;  %v8810_v36 = vsel %vm3622_vm12, 1, %v11684_v15  ;;  %vm3972_vm11 = vcmp.eq.s32.totalorder %v8556_v9, 20 }
 0x503   : > { %4061 = vperm.xlu0 %5537, %v11712_v1   ;;  %v11715_v44 = vld [vmem:[#allocation98_spill] sm:$0xff]  ;;  %v11717_v1 = vld [vmem:[#allocation112_spill] sm:$0xff]  ;;  %3580 = vperm.xlu1 %5536, %v11719_v3   ;;  %v11724_v59 = vld [vmem:[#allocation133_spill] sm:$0xff]  ;;  %11739 = vst [vmem:[#allocation105_spill] sm:$0xff] %v8810_v36  ;;  %v8826_v12 = vsel %vm3624_vm14, 1, %v11684_v15  ;;  %v8836_v35 = vsel %vm3901_vm7, 1, %v11684_v15 }
 0x504   : > { %v8770_v13 = vld [vmem:[%s5905_s23 + $0x40] sm:$0xff]  ;;  %v8773_v27 = vld [vmem:[%s5905_s23 + $0x48] sm:$0xff]  ;;  %v11726_v32 = vld [vmem:[#allocation147_spill] sm:$0xff]  ;;  %11742 = vst [vmem:[#allocation119_spill] sm:$0xff] %v8826_v12  ;;  %v8853_v16 = vsel %vm3907_vm5, 1, %v11684_v15  ;;  %v8878_v60 = vsel %vm3972_vm11, 1, %v11684_v15 }
 0x505   : > { %11721 = vst [vmem:[#allocation74_spill] sm:$0xff] %v8770_v13  ;;  %11722 = vst [vmem:[#allocation80_spill] sm:$0xff] %v8773_v27  ;;  %v11723_v17 = vld [vmem:[#allocation126_spill] sm:$0xff]  ;;  %v11725_v3 = vld [vmem:[#allocation140_spill] sm:$0xff]  ;;  %v8838_v13 = vpop.permute.xlu0 %3514  ;;  %vm11756_vm5 = vcmp.eq.s32.totalorder %v11706_v19, 1  ;;  %vm11758_vm11 = vcmp.eq.s32.totalorder %v11708_v20, 1 }
 0x506   : > { %v8783_v52 = vld [vmem:[%s5905_s23 + $0xd0] sm:$0xff]  ;;  %v8786_v33 = vld [vmem:[%s5905_s23 + $0xd8] sm:$0xff]  ;;  %v11730_v28 = vld [vmem:[#allocation161_spill] sm:$0xff]  ;;  %11744 = vst [vmem:[#allocation126_spill] sm:$0xff] %v8836_v35  ;;  %vm11759_vm7 = vcmp.eq.s32.totalorder %v11709_v56, 1  ;;  %vm11761_vm14 = vcmp.eq.s32.totalorder %v11711_v57, 1 }
 0x507   : > { %11728 = vst [vmem:[#allocation92_spill] sm:$0xff] %v8783_v52  ;;  %11729 = vst [vmem:[#allocation222_spill] sm:$0xff] %v8786_v33  ;;  %v11731_v37 = vld [vmem:[#allocation168_spill] sm:$0xff]  ;;  %v11732_v4 = vld [vmem:[#allocation173_spill] sm:$0xff]  ;;  %v8858_v52 = vsel %vm3970_vm13, 1, %v11684_v15  ;;  %vm11753_vm13 = vcmp.eq.s32.totalorder %v11703_v22, 1 }
 0x508   : > { %vm2898_vm10 = vcmp.eq.s32.totalorder %v11731_v37, 1  ;;  %vm2967_vm1 = vcmp.eq.s32.totalorder %v11732_v4, 1  ;;  %v11733_v2 = vld [vmem:[#allocation178_spill] sm:$0xff]  ;;  %v11734_v58 = vld [vmem:[#allocation156_spill] sm:$0xff]  ;;  %v11737_v50 = vld [vmem:[#allocation203_spill] sm:$0xff]  ;;  %11745 = vst [vmem:[#allocation133_spill] sm:$0xff] %v8838_v13  ;;  %v8875_v13 = vpop.permute.xlu1 %3223 }
 0x509   : > { %v8797_v42 = vmul.f32 %v1290_v40, %v11734_v58  ;;  %v11736_v6 = vld [vmem:[#allocation188_spill] sm:$0xff]  ;;  %vm3181_vm4 = vcmp.eq.s32.totalorder %v11737_v50, 1  ;;  %v11738_v26 = vld [vmem:[#allocation226_spill] sm:$0xff]  ;;  %v8817_v40 = vsel %vm4180_vm6, 1, %v11684_v15  ;;  %v11741_v25 = vld [vmem:[#allocation227_spill] sm:$0xff]  ;;  %v8831_v58 = vsel %vm4182_vm2, 1, %v11684_v15  ;;  %v8942_v57 = vpop.permute.xlu0 %3710 }
 0x50a   : > { %vm3105_vm8 = vcmp.eq.s32.totalorder %v11736_v6, 1  ;;  %4067 = vperm.xlu0 %5537, %v11738_v26   ;;  %11740 = vst [vmem:[#allocation112_spill] sm:$0xff] %v8817_v40  ;;  %3586 = vperm.xlu1 %5536, %v11741_v25   ;;  %11743 = vst [vmem:[#allocation223_spill] sm:$0xff] %v8831_v58  ;;  %v8843_v25 = vsel %vm3903_vm3, 1, %v11684_v15  ;;  %v8848_v26 = vsel %vm3905_vm15, 1, %v11684_v15  ;;  %vm11750_vm15 = vcmp.eq.s32.totalorder %v11699_v30, 1 }
 0x50b   : > { %11735 = vst [vmem:[#allocation98_spill] sm:$0xff] %v8797_v42  ;;  %11746 = vst [vmem:[#allocation140_spill] sm:$0xff] %v8843_v25  ;;  %v8863_v9 = vsel %vm1496_vm9, %v8797_v42, 0.0  ;;  %v8868_v0 = vsel %vm1565_vm0, %v8797_v42, 0.0  ;;  %v8873_v46 = vsel %vm11750_vm15, %v8797_v42, 0.0  ;;  %v8883_v62 = vsel %vm11753_vm13, %v8797_v42, 0.0 }
 0x50c   : > { %11747 = vst [vmem:[#allocation147_spill] sm:$0xff] %v8848_v26  ;;  %11748 = vst [vmem:[#allocation161_spill] sm:$0xff] %v8853_v16  ;;  %vm11754_vm9 = vcmp.eq.s32.totalorder %v11704_v24, 1  ;;  %vm11755_vm0 = vcmp.eq.s32.totalorder %v11705_v29, 1  ;;  %v8898_v15 = vsel %vm11756_vm5, %v8797_v42, 0.0  ;;  %v8904_v22 = vsel %vm11758_vm11, %v8797_v42, 0.0 }
 0x50d   : > { %11749 = vst [vmem:[#allocation168_spill] sm:$0xff] %v8858_v52  ;;  %11751 = vst [vmem:[#allocation173_spill] sm:$0xff] %v8875_v13  ;;  %v8888_v23 = vsel %vm11754_vm9, %v8797_v42, 0.0  ;;  %v8893_v30 = vsel %vm11755_vm0, %v8797_v42, 0.0  ;;  %v11757_v13 = vld [vmem:[#allocation228_spill] sm:$0xff]  ;;  %v8909_v24 = vsel %vm11759_vm7, %v8797_v42, 0.0  ;;  %v9010_v52 = vpop.permute.xlu0 %3716 }
 0x50e   : > { %11752 = vst [vmem:[#allocation178_spill] sm:$0xff] %v8878_v60  ;;  %4073 = vperm.xlu0 %5537, %v11757_v13   ;;  %vm11760_vm2 = vcmp.eq.s32.totalorder %v11710_v61, 1  ;;  %v8919_v19 = vsel %vm11761_vm14, %v8797_v42, 0.0  ;;  %3851 = vperm.xlu1 %5536, %v8608_v39   ;;  %vm11762_vm3 = vcmp.eq.s32.totalorder %v11715_v44, 1  ;;  %vm11763_vm6 = vcmp.eq.s32.totalorder %v11716_v14, 1  ;;  %11766 = vst [vmem:[#allocation156_spill] sm:$0xff] %v8942_v57 }
 0x50f   : > { %v8914_v29 = vsel %vm11760_vm2, %v8797_v42, 0.0  ;;  %v8925_v13 = vsel %vm11762_vm3, %v8797_v42, 0.0  ;;  %v8930_v20 = vsel %vm11763_vm6, %v8797_v42, 0.0  ;;  %vm11764_vm12 = vcmp.eq.s32.totalorder %v11717_v1, 1  ;;  %v11774_v4 = vld [vmem:[#allocation58_spill] sm:$0xff]  ;;  %v11775_v6 = vld [vmem:[#allocation64_spill] sm:$0xff] }
 0x510   : > { %v8935_v61 = vsel %vm11764_vm12, %v8797_v42, 0.0  ;;  %vm11765_vm15 = vcmp.eq.s32.totalorder %v11718_v31, 1  ;;  %vm11767_vm13 = vcmp.eq.s32.totalorder %v11723_v17, 1  ;;  %vm11768_vm9 = vcmp.eq.s32.totalorder %v11724_v59, 1  ;;  %v8964_v31 = vpop.permute.xlu1 %3229  ;;  %v11776_v33 = vld [vmem:[#allocation70_spill] sm:$0xff]  ;;  %v11777_v50 = vld [vmem:[#allocation76_spill] sm:$0xff] }
 0x511   : > { %v8940_v56 = vsel %vm11765_vm15, %v8797_v42, 0.0  ;;  %v8947_v44 = vsel %vm11767_vm13, %v8797_v42, 0.0  ;;  %v8952_v14 = vsel %vm11768_vm9, %v8797_v42, 0.0  ;;  %vm11769_vm0 = vcmp.eq.s32.totalorder %v11725_v3, 1  ;;  %11771 = vst [vmem:[#allocation188_spill] sm:$0xff] %v8964_v31  ;;  %11778 = vst [vmem:[#allocation203_spill] sm:$0xff] %v9010_v52 }
 0x512   : > { %v8957_v39 = vsel %vm11769_vm0, %v8797_v42, 0.0  ;;  %vm11770_vm5 = vcmp.eq.s32.totalorder %v11726_v32, 1  ;;  %vm11772_vm11 = vcmp.eq.s32.totalorder %v11730_v28, 1  ;;  %v8974_v59 = vsel %vm2898_vm10, %v8797_v42, 0.0  ;;  %4124 = vperm.xlu0 %5537, %v8631_v51   ;;  %3857 = vperm.xlu1 %5536, %v8636_v48   ;;  %v11802_v52 = vld [vmem:[#allocation72_spill] sm:$0xff]  ;;  %v11813_v35 = vld [vmem:[#allocation90_spill] sm:$0xff] }
 0x513   : > { %v8962_v1 = vsel %vm11770_vm5, %v8797_v42, 0.0  ;;  %v8969_v17 = vsel %vm11772_vm11, %v8797_v42, 0.0  ;;  %v8979_v3 = vsel %vm2967_vm1, %v8797_v42, 0.0  ;;  %vm11773_vm7 = vcmp.eq.s32.totalorder %v11733_v2, 1  ;;  %v11804_v16 = vld [vmem:[#allocation84_spill] sm:$0xff]  ;;  %v11828_v36 = vld [vmem:[#allocation195_spill] sm:$0xff] }
 0x514   : > { %v8984_v32 = vsel %vm11773_vm7, %v8797_v42, 0.0  ;;  %v8990_v28 = vsel %vm3105_vm8, %v8797_v42, 0.0  ;;  %v8995_v37 = vsel %vm3181_vm4, %v8797_v42, 0.0  ;;  %v1508_v57 = vmax.f32 %v11774_v4, %v8863_v9  ;;  %v11779_v9 = vld [vmem:[#allocation82_spill] sm:$0xff]  ;;  %v11814_v58 = vld [vmem:[#allocation96_spill] sm:$0xff] }
 0x515   : > { %v1577_v2 = vmax.f32 %v7823_v8, %v8868_v0  ;;  %v1646_v51 = vmax.f32 %v7828_v5, %v8873_v46  ;;  %v1715_v31 = vmax.f32 %v11775_v6, %v8883_v62  ;;  %v1784_v27 = vmax.f32 %v11776_v33, %v8888_v23  ;;  %v11780_v8 = vld [vmem:[#allocation88_spill] sm:$0xff]  ;;  %v11781_v0 = vld [vmem:[#allocation94_spill] sm:$0xff]  ;;  %v9020_v6 = vpop.permute.xlu1 %3235  ;;  %v11784_v23 = vld [vmem:[#allocation107_spill] sm:$0xff] }
 0x516   : > { %v1853_v60 = vmax.f32 %v11777_v50, %v8893_v30  ;;  %v1922_v4 = vmax.f32 %v11779_v9, %v8898_v15  ;;  %v1991_v48 = vmax.f32 %v11780_v8, %v8904_v22  ;;  %v2073_v5 = vmax.f32 %v11781_v0, %v8909_v24  ;;  %v11782_v46 = vld [vmem:[#allocation100_spill] sm:$0xff]  ;;  %11783 = vst [vmem:[#allocation226_spill] sm:$0xff] %v9020_v6  ;;  %v11785_v50 = vld [vmem:[#allocation114_spill] sm:$0xff] }
 0x517   : > { %v2142_v62 = vmax.f32 %v11782_v46, %v8914_v29  ;;  %v2211_v33 = vmax.f32 %v7878_v10, %v8919_v19  ;;  %v2280_v30 = vmax.f32 %v11784_v23, %v8925_v13  ;;  %v2349_v15 = vmax.f32 %v11785_v50, %v8930_v20  ;;  %4130 = vperm.xlu0 %5537, %v8641_v63   ;;  %v11786_v24 = vld [vmem:[#allocation30_spill] sm:$0xff]  ;;  %v11787_v9 = vld [vmem:[#allocation36_spill] sm:$0xff]  ;;  %v11788_v29 = vld [vmem:[#allocation121_spill] sm:$0xff] }
 0x518   : > { %v2418_v22 = vmax.f32 %v7898_v54, %v8935_v61  ;;  %vm1494_vm8 = vcmp.eq.s32.totalorder %v11786_v24, 1  ;;  %vm1563_vm10 = vcmp.eq.s32.totalorder %v11787_v9, 1  ;;  %v2487_v8 = vmax.f32 %v11788_v29, %v8940_v56  ;;  %v11789_v10 = vld [vmem:[#allocation128_spill] sm:$0xff]  ;;  %v11790_v13 = vld [vmem:[#allocation135_spill] sm:$0xff]  ;;  %v11791_v20 = vld [vmem:[#allocation142_spill] sm:$0xff]  ;;  %3863 = vperm.xlu1 %5536, %v8683_v7  }
 0x519   : > { %v2556_v19 = vmax.f32 %v11789_v10, %v8947_v44  ;;  %v2634_v0 = vmax.f32 %v11790_v13, %v8952_v14  ;;  %v2703_v46 = vmax.f32 %v11791_v20, %v8957_v39  ;;  %v11792_v54 = vld [vmem:[#allocation42_spill] sm:$0xff]  ;;  %v11793_v63 = vld [vmem:[#allocation48_spill] sm:$0xff]  ;;  %v11796_v56 = vld [vmem:[#allocation149_spill] sm:$0xff]  ;;  %v9054_v13 = vpop.permute.xlu0 %3722  ;;  %vm1977_vm6 = vcmp.eq.s32.totalorder %v11802_v52, 1  ;;  %v9071_v25 = vpop.permute.xlu1 %3241 }
 0x51a   : > { %vm1632_vm4 = vcmp.eq.s32.totalorder %v11792_v54, 1  ;;  %vm1701_vm1 = vcmp.eq.s32.totalorder %v11793_v63, 1  ;;  %v11794_v61 = vld [vmem:[#allocation54_spill] sm:$0xff]  ;;  %v11795_v23 = vld [vmem:[#allocation60_spill] sm:$0xff]  ;;  %v2772_v50 = vmax.f32 %v11796_v56, %v8962_v1  ;;  %v11797_v44 = vld [vmem:[#allocation163_spill] sm:$0xff]  ;;  %11800 = vst [vmem:[#allocation227_spill] sm:$0xff] %v9054_v13 }
 0x51b   : > { %vm1770_vm2 = vcmp.eq.s32.totalorder %v11794_v61, 1  ;;  %vm1839_vm14 = vcmp.eq.s32.totalorder %v11795_v23, 1  ;;  %v2841_v29 = vmax.f32 %v11797_v44, %v8969_v17  ;;  %v11798_v14 = vld [vmem:[#allocation170_spill] sm:$0xff]  ;;  %vm2128_vm15 = vcmp.eq.s32.totalorder %v11804_v16, 1  ;;  %v11805_v1 = vld [vmem:[#allocation183_spill] sm:$0xff]  ;;  %11812 = vst [vmem:[#allocation58_spill] sm:$0xff] %v9071_v25  ;;  %4136 = vperm.xlu0 %5537, %v8688_v49  }
 0x51c   : > { %v2910_v10 = vmax.f32 %v11798_v14, %v8974_v59  ;;  %v11799_v39 = vld [vmem:[#allocation174_spill] sm:$0xff]  ;;  %v3048_v56 = vmax.f32 %v11805_v1, %v8984_v32  ;;  %v11807_v59 = vld [vmem:[#allocation39_spill] sm:$0xff]  ;;  %vm2197_vm13 = vcmp.eq.s32.totalorder %v11813_v35, 1  ;;  %vm2266_vm9 = vcmp.eq.s32.totalorder %v11814_v58, 1  ;;  %v11829_v58 = vld [vmem:[#allocation240_spill] sm:$0xff]  ;;  %3869 = vperm.xlu1 %5536, %v8723_v53  }
 0x51d   : > { %v2979_v7 = vmax.f32 %v11799_v39, %v8979_v3  ;;  %v11801_v20 = vld [vmem:[#allocation66_spill] sm:$0xff]  ;;  %v3193_v14 = vmax.f32 %v11807_v59, %v8995_v37  ;;  %v11808_v3 = vld [vmem:[#allocation229_spill] sm:$0xff]  ;;  %v11809_v39 = vld [vmem:[#allocation235_spill] sm:$0xff]  ;;  %v11830_v12 = vmax.f32 %v11828_v36, %v11829_v58 }
 0x51e   : > { %vm1908_vm3 = vcmp.eq.s32.totalorder %v11801_v20, 1  ;;  %v11803_v6 = vld [vmem:[#allocation78_spill] sm:$0xff]  ;;  %v11810_v13 = vmax.f32 %v11808_v3, %v11809_v39  ;;  %v11820_v37 = vld [vmem:[#allocation231_spill] sm:$0xff]  ;;  %v11821_v59 = vld [vmem:[#allocation237_spill] sm:$0xff] }
 0x51f   : > { %vm2059_vm12 = vcmp.eq.s32.totalorder %v11803_v6, 1  ;;  %v11806_v17 = vld [vmem:[#allocation190_spill] sm:$0xff]  ;;  %v11822_v3 = vmax.f32 %v11820_v37, %v11821_v59  ;;  %v11825_v39 = vld [vmem:[#allocation239_spill] sm:$0xff]  ;;  %v9095_v35 = vmax.f32 %v11830_v12, %v1784_v27  ;;  %v11837_v37 = vld [vmem:[#allocation241_spill] sm:$0xff]  ;;  %4142 = vperm.xlu0 %5537, %v8728_v21  }
 0x520   : > { %v3117_v44 = vmax.f32 %v11806_v17, %v8990_v28  ;;  %v9069_v26 = vmax.f32 %v11810_v13, %v1508_v57  ;;  %v11816_v32 = vld [vmem:[#allocation110_spill] sm:$0xff]  ;;  %v11818_v28 = vld [vmem:[#allocation236_spill] sm:$0xff]  ;;  %v11843_v27 = vld [vmem:[#allocation115_spill] sm:$0xff] }
 0x521   : > { %v11817_v1 = vld [vmem:[#allocation230_spill] sm:$0xff]  ;;  %v9085_v57 = vmax.f32 %v11822_v3, %v1646_v51  ;;  %v11824_v13 = vld [vmem:[#allocation232_spill] sm:$0xff]  ;;  %11831 = vst [vmem:[#allocation76_spill] sm:$0xff] %v9095_v35  ;;  %v11844_v49 = vld [vmem:[#allocation243_spill] sm:$0xff] }
 0x522   : > { %11811 = vst [vmem:[#allocation228_spill] sm:$0xff] %v9069_v26  ;;  %v11819_v17 = vmax.f32 %v11817_v1, %v11818_v28  ;;  %v11826_v25 = vmax.f32 %v11824_v13, %v11825_v39  ;;  %v11832_v1 = vld [vmem:[#allocation117_spill] sm:$0xff]  ;;  %v11834_v28 = vld [vmem:[#allocation131_spill] sm:$0xff]  ;;  %v11835_v51 = vld [vmem:[#allocation138_spill] sm:$0xff]  ;;  %v11845_v58 = vmax.f32 %v11843_v27, %v11844_v49 }
 0x523   : > { %11823 = vst [vmem:[#allocation64_spill] sm:$0xff] %v9085_v57  ;;  %v11840_v3 = vld [vmem:[#allocation242_spill] sm:$0xff]  ;;  %v11847_v39 = vld [vmem:[#allocation196_spill] sm:$0xff] }
 0x524   : > { %v9080_v40 = vmax.f32 %v11819_v17, %v1577_v2  ;;  %v9090_v26 = vmax.f32 %v11826_v25, %v1715_v31  ;;  %v11833_v2 = vld [vmem:[#allocation124_spill] sm:$0xff]  ;;  %v11836_v17 = vld [vmem:[#allocation101_spill] sm:$0xff]  ;;  %v9115_v13 = vmax.f32 %v11845_v58, %v1991_v48  ;;  %v11859_v27 = vld [vmem:[#allocation246_spill] sm:$0xff] }
 0x525   : > { %v11838_v59 = vmax.f32 %v11836_v17, %v11837_v37  ;;  %v11839_v31 = vld [vmem:[#allocation108_spill] sm:$0xff]  ;;  %v11851_v17 = vld [vmem:[#allocation145_spill] sm:$0xff]  ;;  %v11853_v37 = vld [vmem:[#allocation166_spill] sm:$0xff] }
 0x526   : > { %11827 = vst [vmem:[#allocation70_spill] sm:$0xff] %v9090_v26  ;;  %v11841_v36 = vmax.f32 %v11839_v31, %v11840_v3  ;;  %11846 = vst [vmem:[#allocation88_spill] sm:$0xff] %v9115_v13  ;;  %v11848_v35 = vld [vmem:[#allocation244_spill] sm:$0xff]  ;;  %vm2758_vm0 = vcmp.eq.s32.totalorder %v11851_v17, 1  ;;  %v11856_v31 = vld [vmem:[#allocation245_spill] sm:$0xff]  ;;  %v9146_v13 = vpop.permute.xlu0 %3728 }
 0x527   : > { %v9105_v25 = vmax.f32 %v11838_v59, %v1853_v60  ;;  %v11849_v26 = vmax.f32 %v11847_v39, %v11848_v35  ;;  %v11852_v60 = vld [vmem:[#allocation159_spill] sm:$0xff]  ;;  %v11855_v59 = vld [vmem:[#allocation122_spill] sm:$0xff]  ;;  %v11865_v39 = vld [vmem:[#allocation157_spill] sm:$0xff]  ;;  %11867 = vst [vmem:[#allocation114_spill] sm:$0xff] %v9146_v13 }
 0x528   : > { %v9110_v12 = vmax.f32 %v11841_v36, %v1922_v4  ;;  %v11854_v4 = vld [vmem:[#allocation172_spill] sm:$0xff]  ;;  %v11857_v3 = vmax.f32 %v11855_v59, %v11856_v31  ;;  %v11858_v36 = vld [vmem:[#allocation129_spill] sm:$0xff]  ;;  %v11862_v53 = vld [vmem:[#allocation206_spill] sm:$0xff] }
 0x529   : > { %v9120_v57 = vmax.f32 %v11849_v26, %v2073_v5  ;;  %v11860_v35 = vmax.f32 %v11858_v36, %v11859_v27  ;;  %v11861_v5 = vld [vmem:[#allocation136_spill] sm:$0xff]  ;;  %v11870_v59 = vld [vmem:[#allocation194_spill] sm:$0xff]  ;;  %v11871_v31 = vld [vmem:[#allocation143_spill] sm:$0xff] }
 0x52a   : > { %11842 = vst [vmem:[#allocation82_spill] sm:$0xff] %v9110_v12  ;;  %v9130_v48 = vmax.f32 %v11857_v3, %v2142_v62  ;;  %v11863_v49 = vmax.f32 %v11861_v5, %v11862_v53  ;;  %v11868_v12 = vld [vmem:[#allocation176_spill] sm:$0xff]  ;;  %v11869_v62 = vld [vmem:[#allocation186_spill] sm:$0xff]  ;;  %vm3179_vm5 = vcmp.eq.s32.totalorder %v11870_v59, 1  ;;  %v11877_v53 = vld [vmem:[#allocation169_spill] sm:$0xff] }
 0x52b   : > { %11850 = vst [vmem:[#allocation94_spill] sm:$0xff] %v9120_v57  ;;  %v9135_v26 = vmax.f32 %v11860_v35, %v2211_v33  ;;  %v9144_v57 = vmul.f32 %v8799_v55, %v11865_v39  ;;  %vm3034_vm11 = vcmp.eq.s32.totalorder %v11868_v12, 1  ;;  %vm3103_vm7 = vcmp.eq.s32.totalorder %v11869_v62, 1  ;;  %v11872_v33 = vld [vmem:[#allocation247_spill] sm:$0xff]  ;;  %v11900_v21 = vld [vmem:[#allocation50_spill] sm:$0xff] }
 0x52c   : > { %v9140_v58 = vmax.f32 %v11863_v49, %v2280_v30  ;;  %v11873_v3 = vmax.f32 %v11871_v31, %v11872_v33  ;;  %v11874_v30 = vld [vmem:[#allocation248_spill] sm:$0xff]  ;;  %v11876_v55 = vmax.f32 %v11584_v18, %v8199_v41  ;;  %v11878_v49 = vld [vmem:[#allocation207_spill] sm:$0xff]  ;;  %v11885_v18 = vld [vmem:[#allocation249_spill] sm:$0xff]  ;;  %3637 = vperm.xlu1 %5536, %v11900_v21  }
 0x52d   : > { %11866 = vst [vmem:[#allocation107_spill] sm:$0xff] %v9144_v57  ;;  %v11875_v27 = vmax.f32 %v11583_v47, %v11874_v30  ;;  %v11879_v39 = vmax.f32 %v11877_v53, %v11878_v49  ;;  %v11883_v47 = vld [vmem:[#allocation37_spill] sm:$0xff]  ;;  %v11886_v41 = vmax.f32 %v11590_v45, %v11885_v18  ;;  %v11894_v45 = vld [vmem:[#allocation35_spill] sm:$0xff]  ;;  %v1709_v24 = vsel %vm1701_vm1, %v9144_v57, 0.0 }
 0x52e   : > { %11864 = vst [vmem:[#allocation100_spill] sm:$0xff] %v9140_v58  ;;  %v9154_v36 = vmax.f32 %v11873_v3, %v2349_v15  ;;  %v9164_v5 = vmax.f32 %v11876_v55, %v2487_v8  ;;  %v9171_v58 = vpop.permute.xlu1 %3292  ;;  %v11881_v15 = vld [vmem:[#allocation31_spill] sm:$0xff]  ;;  %v9245_v9 = vsel %vm1770_vm2, %v9144_v57, 0.0  ;;  %v1916_v54 = vsel %vm1908_vm3, %v9144_v57, 0.0 }
 0x52f   : > { %v9159_v35 = vmax.f32 %v11875_v27, %v2418_v22  ;;  %v9169_v13 = vmax.f32 %v11879_v39, %v2556_v19  ;;  %11880 = vst [vmem:[#allocation30_spill] sm:$0xff] %v9171_v58  ;;  %v11882_v31 = vmax.f32 %v11588_v38, %v11881_v15  ;;  %v11884_v22 = vmax.f32 %v11589_v34, %v11883_v47  ;;  %v11888_v38 = vld [vmem:[#allocation197_spill] sm:$0xff]  ;;  %v11901_v47 = vld [vmem:[#allocation152_spill] sm:$0xff]  ;;  %v11928_v12 = vld [vmem:[#allocation63_spill] sm:$0xff] }
 0x530   : > { %v9186_v8 = vmax.f32 %v11886_v41, %v2772_v50  ;;  %v11887_v19 = vmax.f32 %v11591_v11, %v8233_v43  ;;  %v11891_v34 = vld [vmem:[#allocation29_spill] sm:$0xff]  ;;  %v11895_v50 = vld [vmem:[#allocation55_spill] sm:$0xff]  ;;  %v1985_v63 = vsel %vm1977_vm6, %v9144_v57, 0.0  ;;  %v9263_v61 = vsel %vm2059_vm12, %v9144_v57, 0.0 }
 0x531   : > { %v9176_v33 = vmax.f32 %v11882_v31, %v2634_v0  ;;  %v9181_v3 = vmax.f32 %v11884_v22, %v2703_v46  ;;  %v11889_v0 = vld [vmem:[#allocation43_spill] sm:$0xff]  ;;  %v11892_v46 = vld [vmem:[#allocation49_spill] sm:$0xff]  ;;  %v11896_v39 = vmax.f32 %v11894_v45, %v11895_v50  ;;  %v9268_v23 = vsel %vm2128_vm15, %v9144_v57, 0.0  ;;  %v11914_v45 = vld [vmem:[#allocation62_spill] sm:$0xff] }
 0x532   : > { %v9191_v30 = vmax.f32 %v11887_v19, %v2841_v29  ;;  %v11890_v27 = vmax.f32 %v11888_v38, %v11889_v0  ;;  %v11893_v53 = vmax.f32 %v11891_v34, %v11892_v46  ;;  %v11897_v11 = vld [vmem:[#allocation47_spill] sm:$0xff]  ;;  %v11898_v43 = vld [vmem:[#allocation61_spill] sm:$0xff]  ;;  %v9234_v19 = vpop.permute.xlu0 %3779  ;;  %v9250_v38 = vsel %vm1839_vm14, %v9144_v57, 0.0  ;;  %v9252_v0 = vpop.permute.xlu1 %3298  ;;  %3643 = vperm.xlu1 %5536, %v11914_v45  }
 0x533   : > { %v9207_v15 = vmax.f32 %v11896_v39, %v3048_v56  ;;  %v11899_v29 = vmax.f32 %v11897_v11, %v11898_v43  ;;  %v9228_v56 = vsel %vm1563_vm10, %v9144_v57, 0.0  ;;  %v11904_v41 = vld [vmem:[#allocation127_spill] sm:$0xff]  ;;  %11906 = vst [vmem:[#allocation121_spill] sm:$0xff] %v9234_v19  ;;  %11907 = vst [vmem:[#allocation128_spill] sm:$0xff] %v9252_v0  ;;  %v2205_v20 = vsel %vm2197_vm13, %v9144_v57, 0.0  ;;  %v11930_v45 = vld [vmem:[#allocation105_spill] sm:$0xff] }
 0x534   : > { %v9197_v55 = vmax.f32 %v11890_v27, %v2910_v10  ;;  %v9202_v49 = vmax.f32 %v11893_v53, %v2979_v7  ;;  %v11902_v10 = vld [vmem:[#allocation67_spill] sm:$0xff]  ;;  %v9223_v7 = vsel %vm1494_vm8, %v9144_v57, 0.0  ;;  %v11908_v27 = vld [vmem:[#allocation56_spill] sm:$0xff]  ;;  %v2274_v52 = vsel %vm2266_vm9, %v9144_v57, 0.0  ;;  %v11932_v19 = vld [vmem:[#allocation81_spill] sm:$0xff] }
 0x535   : > { %v9212_v31 = vmax.f32 %v11899_v29, %v3117_v44  ;;  %v11903_v22 = vmax.f32 %v11901_v47, %v11902_v10  ;;  %v9232_v44 = vpack.c.bf16 %v8797_v42, %v11904_v41  ;;  %4193 = vperm.xlu0 %5537, %v11908_v27   ;;  %v11911_v53 = vld [vmem:[#allocation103_spill] sm:$0xff]  ;;  %vm11913_vm10 = vcmp.eq.s32.totalorder %v11816_v32, 1  ;;  %v11925_v47 = vld [vmem:[#allocation68_spill] sm:$0xff]  ;;  %v11927_v27 = vld [vmem:[#allocation57_spill] sm:$0xff] }
 0x536   : > { %vm11912_vm8 = vcmp.eq.s32.totalorder %v11911_v53, 1  ;;  %v9285_v16 = vsel %vm11913_vm10, %v9144_v57, 0.0  ;;  %vm11916_vm1 = vcmp.eq.s32.totalorder %v11833_v2, 1  ;;  %vm11917_vm2 = vcmp.eq.s32.totalorder %v11834_v28, 1  ;;  %v9318_v29 = vpop.permute.xlu1 %3304  ;;  %v11926_v10 = vld [vmem:[#allocation51_spill] sm:$0xff]  ;;  %v11929_v53 = vld [vmem:[#allocation69_spill] sm:$0xff]  ;;  %3649 = vperm.xlu1 %5536, %v11930_v45  }
 0x537   : > { %v9218_v18 = vmax.f32 %v11903_v22, %v3193_v14  ;;  %11905 = vst [vmem:[#allocation36_spill] sm:$0xff] %v9232_v44  ;;  %v1640_v14 = vsel %vm1632_vm4, %v9144_v57, 0.0  ;;  %v9280_v6 = vsel %vm11912_vm8, %v9144_v57, 0.0  ;;  %vm11915_vm4 = vcmp.eq.s32.totalorder %v11832_v1, 1  ;;  %11923 = vst [vmem:[#allocation142_spill] sm:$0xff] %v9318_v29  ;;  %v11931_v59 = vld [vmem:[#allocation75_spill] sm:$0xff] }
 0x538   : > { %v2481_v50 = vsel %vm11915_vm4, %v9144_v57, 0.0  ;;  %v2550_v39 = vsel %vm11916_vm1, %v9144_v57, 0.0  ;;  %v2628_v11 = vsel %vm11917_vm2, %v9144_v57, 0.0  ;;  %vm11918_vm14 = vcmp.eq.s32.totalorder %v11835_v51, 1  ;;  %v9316_v51 = vpop.permute.xlu0 %3785  ;;  %v11944_v42 = vld [vmem:[#allocation112_spill] sm:$0xff]  ;;  %v11964_v44 = vld [vmem:[#allocation65_spill] sm:$0xff] }
 0x539   : > { %v2697_v32 = vsel %vm11918_vm14, %v9144_v57, 0.0  ;;  %v2766_v43 = vsel %vm2758_vm0, %v9144_v57, 0.0  ;;  %vm11919_vm3 = vcmp.eq.s32.totalorder %v11852_v60, 1  ;;  %vm11920_vm6 = vcmp.eq.s32.totalorder %v11853_v37, 1  ;;  %11922 = vst [vmem:[#allocation135_spill] sm:$0xff] %v9316_v51  ;;  %4199 = vperm.xlu0 %5537, %v11925_v47   ;;  %v11934_v47 = vld [vmem:[#allocation93_spill] sm:$0xff] }
 0x53a   : > { %v2835_v1 = vsel %vm11919_vm3, %v9144_v57, 0.0  ;;  %v9309_v2 = vsel %vm11920_vm6, %v9144_v57, 0.0  ;;  %vm11921_vm12 = vcmp.eq.s32.totalorder %v11854_v4, 1  ;;  %v3042_v17 = vsel %vm3034_vm11, %v9144_v57, 0.0  ;;  %v11924_v4 = vld [vmem:[#allocation45_spill] sm:$0xff]  ;;  %v9351_v45 = vpop.permute.xlu1 %3310  ;;  %v11962_v51 = vld [vmem:[#allocation111_spill] sm:$0xff] }
 0x53b   : > { %v9314_v28 = vsel %vm11921_vm12, %v9144_v57, 0.0  ;;  %v3111_v60 = vsel %vm3103_vm7, %v9144_v57, 0.0  ;;  %v3187_v37 = vsel %vm3179_vm5, %v9144_v57, 0.0  ;;  %v1506_v21 = vmax.f32 %v11924_v4, %v9223_v7  ;;  %v11933_v7 = vld [vmem:[#allocation87_spill] sm:$0xff]  ;;  %11939 = vst [vmem:[#allocation42_spill] sm:$0xff] %v9351_v45  ;;  %v12010_v57 = vld [vmem:[#allocation162_spill] sm:$0xff] }
 0x53c   : > { %v1575_v22 = vmax.f32 %v11926_v10, %v9228_v56  ;;  %v1644_v34 = vmax.f32 %v11927_v27, %v1640_v14  ;;  %v1713_v46 = vmax.f32 %v11928_v12, %v1709_v24  ;;  %v1782_v62 = vmax.f32 %v11929_v53, %v9245_v9  ;;  %v11935_v56 = vld [vmem:[#allocation99_spill] sm:$0xff]  ;;  %v11936_v10 = vld [vmem:[#allocation106_spill] sm:$0xff]  ;;  %v11937_v27 = vld [vmem:[#allocation113_spill] sm:$0xff]  ;;  %v9364_v45 = vpop.permute.xlu0 %3791 }
 0x53d   : > { %v1851_v0 = vmax.f32 %v11931_v59, %v9250_v38  ;;  %v1920_v58 = vmax.f32 %v11932_v19, %v1916_v54  ;;  %v1989_v4 = vmax.f32 %v11933_v7, %v1985_v63  ;;  %v2071_v29 = vmax.f32 %v11934_v47, %v9263_v61  ;;  %v11938_v9 = vld [vmem:[#allocation120_spill] sm:$0xff]  ;;  %v11940_v38 = vld [vmem:[#allocation201_spill] sm:$0xff]  ;;  %v11943_v61 = vld [vmem:[#allocation202_spill] sm:$0xff]  ;;  %4205 = vperm.xlu0 %5537, %v11944_v42  }
 0x53e   : > { %v2140_v14 = vmax.f32 %v11935_v56, %v9268_v23  ;;  %v2209_v24 = vmax.f32 %v11936_v10, %v2205_v20  ;;  %v2278_v12 = vmax.f32 %v11937_v27, %v2274_v52  ;;  %v2347_v53 = vmax.f32 %v11938_v9, %v9280_v6  ;;  %v11941_v54 = vld [vmem:[#allocation141_spill] sm:$0xff]  ;;  %v11942_v59 = vld [vmem:[#allocation148_spill] sm:$0xff]  ;;  %v11946_v56 = vld [vmem:[#allocation167_spill] sm:$0xff]  ;;  %11949 = vst [vmem:[#allocation48_spill] sm:$0xff] %v9364_v45 }
 0x53f   : > { %v2416_v19 = vmax.f32 %v11940_v38, %v9285_v16  ;;  %v2485_v63 = vmax.f32 %v11941_v54, %v2481_v50  ;;  %v2554_v7 = vmax.f32 %v11942_v59, %v2550_v39  ;;  %v2632_v47 = vmax.f32 %v11943_v61, %v2628_v11  ;;  %v11945_v23 = vld [vmem:[#allocation160_spill] sm:$0xff]  ;;  %v11947_v10 = vld [vmem:[#allocation179_spill] sm:$0xff]  ;;  %v11948_v6 = vld [vmem:[#allocation182_spill] sm:$0xff] }
 0x540   : > { %v2701_v20 = vmax.f32 %v11945_v23, %v2697_v32  ;;  %v2770_v52 = vmax.f32 %v11946_v56, %v2766_v43  ;;  %v2839_v27 = vmax.f32 %v11947_v10, %v2835_v1  ;;  %v2908_v9 = vmax.f32 %v11948_v6, %v9309_v2  ;;  %v11950_v16 = vld [vmem:[#allocation119_spill] sm:$0xff]  ;;  %v11951_v50 = vld [vmem:[#allocation154_spill] sm:$0xff]  ;;  %v11952_v38 = vld [vmem:[#allocation189_spill] sm:$0xff] }
 0x541   : > { %3655 = vperm.xlu1 %5536, %v11950_v16   ;;  %v2977_v39 = vmax.f32 %v11951_v50, %v9314_v28  ;;  %v3046_v11 = vmax.f32 %v11952_v38, %v3042_v17  ;;  %v11953_v54 = vld [vmem:[#allocation200_spill] sm:$0xff]  ;;  %v11955_v61 = vld [vmem:[#allocation198_spill] sm:$0xff]  ;;  %v11956_v43 = vld [vmem:[#allocation91_spill] sm:$0xff]  ;;  %v9384_v38 = vpop.permute.xlu1 %3361  ;;  %vm2001_vm15 = vcmask 1040384   ;;  %vm2003_vm13 = vcmask 1041408  }
 0x542   : > { %v3115_v42 = vmax.f32 %v11953_v54, %v3111_v60  ;;  %v11954_v59 = vld [vmem:[#allocation204_spill] sm:$0xff]  ;;  %v11957_v23 = vmax.f32 %v11955_v61, %v11956_v43  ;;  %v11958_v56 = vld [vmem:[#allocation53_spill] sm:$0xff]  ;;  %v11961_v45 = vld [vmem:[#allocation59_spill] sm:$0xff]  ;;  %11967 = vst [vmem:[#allocation54_spill] sm:$0xff] %v9384_v38  ;;  %vm2005_vm9 = vcmask 1042432   ;;  %vm12067_vm0 = vcmask 523264  }
 0x543   : > { %v3191_v32 = vmax.f32 %v11954_v59, %v3187_v37  ;;  %v11959_v10 = vld [vmem:[#allocation97_spill] sm:$0xff]  ;;  %v11963_v16 = vmax.f32 %v11961_v45, %v11962_v51  ;;  %v11965_v28 = vld [vmem:[#allocation208_spill] sm:$0xff]  ;;  %v11968_v60 = vld [vmem:[#allocation71_spill] sm:$0xff]  ;;  %vm2008_vm11 = vcmask 1044480   ;;  %vm2010_vm7 = vcmask 1045504  }
 0x544   : > { %v1509_v1 = vmax.f32 %v11957_v23, %v1506_v21  ;;  %v11960_v2 = vmax.f32 %v11958_v56, %v11959_v10  ;;  %v11966_v50 = vmax.f32 %v11964_v44, %v11965_v28  ;;  %v11969_v37 = vld [vmem:[#allocation118_spill] sm:$0xff]  ;;  %v11971_v61 = vld [vmem:[#allocation89_spill] sm:$0xff]  ;;  %v11974_v56 = vld [vmem:[#allocation95_spill] sm:$0xff]  ;;  %vm11001_vm8 = vcmask 1046528  }
 0x545   : > { %v1647_v41 = vmax.f32 %v11963_v16, %v1644_v34  ;;  %v11970_v54 = vmax.f32 %v11968_v60, %v11969_v37  ;;  %v11972_v21 = vld [vmem:[#allocation125_spill] sm:$0xff]  ;;  %v11978_v34 = vld [vmem:[#allocation139_spill] sm:$0xff]  ;;  %v11982_v28 = vld [vmem:[#allocation146_spill] sm:$0xff]  ;;  %vm12091_vm2 = vcmask 1043456  }
 0x546   : > { %v1578_v6 = vmax.f32 %v11960_v2, %v1575_v22  ;;  %v1716_v17 = vmax.f32 %v11966_v50, %v1713_v46  ;;  %v11973_v43 = vmax.f32 %v11971_v61, %v11972_v21  ;;  %v11975_v22 = vld [vmem:[#allocation132_spill] sm:$0xff]  ;;  %v11977_v51 = vld [vmem:[#allocation153_spill] sm:$0xff]  ;;  %v11980_v44 = vld [vmem:[#allocation223_spill] sm:$0xff] }
 0x547   : > { %v1785_v59 = vmax.f32 %v11970_v54, %v1782_v62  ;;  %v11976_v10 = vmax.f32 %v11974_v56, %v11975_v22  ;;  %v11979_v45 = vmax.f32 %v11977_v51, %v11978_v34  ;;  %4211 = vperm.xlu0 %5537, %v11980_v44   ;;  %v11981_v46 = vld [vmem:[#allocation102_spill] sm:$0xff]  ;;  %v11984_v60 = vld [vmem:[#allocation109_spill] sm:$0xff]  ;;  %v11987_v61 = vld [vmem:[#allocation116_spill] sm:$0xff] }
 0x548   : > { %v1854_v23 = vmax.f32 %v11973_v43, %v1851_v0  ;;  %v11983_v50 = vmax.f32 %v11981_v46, %v11982_v28  ;;  %v11985_v62 = vld [vmem:[#allocation158_spill] sm:$0xff]  ;;  %v11988_v0 = vld [vmem:[#allocation165_spill] sm:$0xff]  ;;  %v11990_v56 = vld [vmem:[#allocation123_spill] sm:$0xff] }
 0x549   : > { %v1923_v2 = vmax.f32 %v11976_v10, %v1920_v58  ;;  %v1992_v16 = vmax.f32 %v11979_v45, %v1989_v4  ;;  %v11986_v37 = vmax.f32 %v11984_v60, %v11985_v62  ;;  %v11989_v21 = vmax.f32 %v11987_v61, %v11988_v0  ;;  %v11991_v58 = vld [vmem:[#allocation177_spill] sm:$0xff]  ;;  %v11993_v51 = vld [vmem:[#allocation126_spill] sm:$0xff]  ;;  %v11994_v4 = vld [vmem:[#allocation199_spill] sm:$0xff] }
 0x54a   : > { %v2074_v38 = vmax.f32 %v11983_v50, %v2071_v29  ;;  %v11992_v22 = vmax.f32 %v11990_v56, %v11991_v58  ;;  %3920 = vperm.xlu1 %5536, %v11993_v51   ;;  %v11995_v34 = vld [vmem:[#allocation155_spill] sm:$0xff]  ;;  %v11997_v46 = vld [vmem:[#allocation130_spill] sm:$0xff]  ;;  %v11998_v29 = vld [vmem:[#allocation181_spill] sm:$0xff] }
 0x54b   : > { %v2143_v54 = vmax.f32 %v11986_v37, %v2140_v14  ;;  %v2212_v43 = vmax.f32 %v11989_v21, %v2209_v24  ;;  %v11996_v45 = vmax.f32 %v11994_v4, %v11995_v34  ;;  %v11999_v28 = vmax.f32 %v11997_v46, %v11998_v29  ;;  %v12000_v60 = vld [vmem:[#allocation137_spill] sm:$0xff]  ;;  %v12003_v61 = vld [vmem:[#allocation144_spill] sm:$0xff]  ;;  %v12006_v56 = vld [vmem:[#allocation151_spill] sm:$0xff] }
 0x54c   : > { %v2281_v10 = vmax.f32 %v11992_v22, %v2278_v12  ;;  %v12001_v14 = vld [vmem:[#allocation193_spill] sm:$0xff]  ;;  %v12007_v12 = vld [vmem:[#allocation150_spill] sm:$0xff]  ;;  %v12009_v51 = vld [vmem:[#allocation164_spill] sm:$0xff] }
 0x54d   : > { %v2350_v44 = vmax.f32 %v11996_v45, %v2347_v53  ;;  %v2419_v50 = vmax.f32 %v11999_v28, %v2416_v19  ;;  %v12002_v62 = vmax.f32 %v12000_v60, %v12001_v14  ;;  %v12004_v24 = vld [vmem:[#allocation225_spill] sm:$0xff]  ;;  %v12008_v58 = vmax.f32 %v12006_v56, %v12007_v12  ;;  %v12012_v34 = vld [vmem:[#allocation175_spill] sm:$0xff]  ;;  %v9436_v14 = vpop.permute.xlu0 %3797  ;;  %v12024_v56 = vld [vmem:[#allocation184_spill] sm:$0xff] }
 0x54e   : > { %v12005_v0 = vmax.f32 %v12003_v61, %v12004_v24  ;;  %v12011_v4 = vmax.f32 %v12009_v51, %v12010_v57  ;;  %v12013_v45 = vld [vmem:[#allocation233_spill] sm:$0xff]  ;;  %12018 = vst [vmem:[#allocation60_spill] sm:$0xff] %v9436_v14  ;;  %v12021_v61 = vld [vmem:[#allocation180_spill] sm:$0xff]  ;;  %vm12068_vm5 = vmmov %vm12067_vm0 }
 0x54f   : > { %v2488_v37 = vmax.f32 %v12002_v62, %v2485_v63  ;;  %v2635_v22 = vmax.f32 %v12008_v58, %v2632_v47  ;;  %v12014_v46 = vmax.f32 %v12012_v34, %v12013_v45  ;;  %v12015_v29 = vld [vmem:[#allocation185_spill] sm:$0xff]  ;;  %v9438_v62 = vpop.permute.xlu1 %3367  ;;  %v12026_v12 = vld [vmem:[#allocation40_spill] sm:$0xff]  ;;  %v12027_v58 = vld [vmem:[#allocation191_spill] sm:$0xff] }
 0x550   : > { %v2557_v21 = vmax.f32 %v12005_v0, %v2554_v7  ;;  %v2704_v53 = vmax.f32 %v12011_v4, %v2701_v20  ;;  %v12016_v28 = vld [vmem:[#allocation209_spill] sm:$0xff]  ;;  %12019 = vst [vmem:[#allocation149_spill] sm:$0xff] %v9438_v62  ;;  %v12020_v7 = vld [vmem:[#allocation28_spill] sm:$0xff]  ;;  %v12023_v0 = vld [vmem:[#allocation34_spill] sm:$0xff]  ;;  %v12028_v51 = vmax.f32 %v12026_v12, %v12027_v58 }
 0x551   : > { %v2773_v19 = vmax.f32 %v12014_v46, %v2770_v52  ;;  %v12017_v60 = vmax.f32 %v12015_v29, %v12016_v28  ;;  %v12022_v24 = vmax.f32 %v12020_v7, %v12021_v61  ;;  %v12025_v57 = vmax.f32 %v12023_v0, %v12024_v56  ;;  %v12029_v4 = vld [vmem:[#allocation192_spill] sm:$0xff]  ;;  %v12030_v34 = vld [vmem:[#allocation234_spill] sm:$0xff]  ;;  %vm12092_vm14 = vmmov %vm12091_vm2 }
 0x552   : > { %v3049_v52 = vmax.f32 %v12028_v51, %v3046_v11  ;;  %v12031_v45 = vmax.f32 %v12029_v4, %v12030_v34  ;;  %v12032_v46 = vld [vmem:[#allocation46_spill] sm:$0xff]  ;;  %v12035_v62 = vld [vmem:[#allocation228_spill] sm:$0xff]  ;;  %vm12093_vm3 = vmmov %vm12091_vm2 }
 0x553   : > { %v2842_v63 = vmax.f32 %v12017_v60, %v2839_v27  ;;  %v2911_v47 = vmax.f32 %v12022_v24, %v2908_v9  ;;  %v2980_v20 = vmax.f32 %v12025_v57, %v2977_v39  ;;  %v12033_v29 = vld [vmem:[#allocation210_spill] sm:$0xff]  ;;  %v1511_v14 = vmax.f32 %v1509_v1, %v12035_v62  ;;  %v12036_v7 = vld [vmem:[#allocation64_spill] sm:$0xff] }
 0x554   : > { %v3118_v27 = vmax.f32 %v12031_v45, %v3115_v42  ;;  %v12034_v28 = vmax.f32 %v12032_v46, %v12033_v29  ;;  %v1580_v9 = vmax.f32 %v1578_v6, %v9080_v40  ;;  %v1649_v61 = vmax.f32 %v1647_v41, %v12036_v7  ;;  %v12037_v24 = vld [vmem:[#allocation140_spill] sm:$0xff]  ;;  %v12038_v39 = vld [vmem:[#allocation70_spill] sm:$0xff]  ;;  %v9467_v6 = vpop.permute.xlu1 %3373 }
 0x555   : > { %3926 = vperm.xlu1 %5536, %v12037_v24   ;;  %v1718_v0 = vmax.f32 %v1716_v17, %v12038_v39  ;;  %v12039_v56 = vld [vmem:[#allocation76_spill] sm:$0xff]  ;;  %v1856_v57 = vmax.f32 %v1854_v23, %v9105_v25  ;;  %v12040_v12 = vld [vmem:[#allocation82_spill] sm:$0xff]  ;;  %v2145_v1 = vmax.f32 %v2143_v54, %v9130_v48  ;;  %v2214_v40 = vmax.f32 %v2212_v43, %v9135_v26  ;;  %v12046_v26 = vld [vmem:[#allocation147_spill] sm:$0xff] }
 0x556   : > { %v3194_v60 = vmax.f32 %v12034_v28, %v3191_v32  ;;  %v1787_v11 = vmax.f32 %v1785_v59, %v12039_v56  ;;  %v1925_v42 = vmax.f32 %v1923_v2, %v12040_v12  ;;  %v12041_v58 = vld [vmem:[#allocation88_spill] sm:$0xff]  ;;  %v12042_v4 = vld [vmem:[#allocation94_spill] sm:$0xff]  ;;  %12043 = vst [vmem:[#allocation163_spill] sm:$0xff] %v9467_v6  ;;  %v2352_v17 = vmax.f32 %v2350_v44, %v9154_v36 }
 0x557   : > { %v1994_v51 = vmax.f32 %v1992_v16, %v12041_v58  ;;  %v2076_v32 = vmax.f32 %v2074_v38, %v12042_v4  ;;  %v12044_v41 = vld [vmem:[#allocation100_spill] sm:$0xff]  ;;  %v2421_v59 = vmax.f32 %v2419_v50, %v9159_v35  ;;  %v2490_v25 = vmax.f32 %v2488_v37, %v9164_v5  ;;  %v9477_v16 = vpop.permute.xlu0 %3565 }
 0x558   : > { %v2283_v62 = vmax.f32 %v2281_v10, %v12044_v41  ;;  %v2559_v23 = vmax.f32 %v2557_v21, %v9169_v13  ;;  %v2637_v2 = vmax.f32 %v2635_v22, %v9176_v33  ;;  %v2706_v38 = vmax.f32 %v2704_v53, %v9181_v3  ;;  %12045 = vst [vmem:[#allocation170_spill] sm:$0xff] %v9477_v16  ;;  %v12052_v39 = vld [vmem:[#allocation168_spill] sm:$0xff] }
 0x559   : > { %v2775_v48 = vmax.f32 %v2773_v19, %v9186_v8  ;;  %3932 = vperm.xlu1 %5536, %v12046_v26   ;;  %v2844_v54 = vmax.f32 %v2842_v63, %v9191_v30  ;;  %v2913_v36 = vmax.f32 %v2911_v47, %v9197_v55  ;;  %v2982_v35 = vmax.f32 %v2980_v20, %v9202_v49  ;;  %v9488_v8 = vpop.permute.xlu1 %3379  ;;  %v12049_v49 = vld [vmem:[#allocation161_spill] sm:$0xff] }
 0x55a   : > { %v3051_v5 = vmax.f32 %v3049_v52, %v9207_v15  ;;  %v3120_v13 = vmax.f32 %v3118_v27, %v9212_v31  ;;  %v9486_v33 = vmax.f32 %v3194_v60, %v9218_v18  ;;  %v1512_v3 = vrot.slane %v1511_v14, 4  ;;  %12048 = vst [vmem:[#allocation66_spill] sm:$0xff] %v9488_v8 }
 0x55b   : > { %v1581_v43 = vrot.slane %v1580_v9, 4  ;;  %v1650_v10 = vrot.slane %v1649_v61, 4  ;;  %v1719_v44 = vrot.slane %v1718_v0, 4  ;;  %v1788_v50 = vrot.slane %v1787_v11, 4  ;;  %v9491_v52 = vpop.permute.xlu0 %3571 }
 0x55c   : > { %12047 = vst [vmem:[#allocation174_spill] sm:$0xff] %v9486_v33  ;;  %v1857_v37 = vrot.slane %v1856_v57, 4  ;;  %v1926_v30 = vrot.slane %v1925_v42, 4  ;;  %v1995_v21 = vrot.slane %v1994_v51, 4  ;;  %v2077_v55 = vrot.slane %v2076_v32, 4  ;;  %12050 = vst [vmem:[#allocation72_spill] sm:$0xff] %v9491_v52 }
 0x55d   : > { %v2146_v22 = vrot.slane %v2145_v1, 4  ;;  %3938 = vperm.xlu1 %5536, %v12049_v49   ;;  %v2215_v15 = vrot.slane %v2214_v40, 4  ;;  %v2284_v53 = vrot.slane %v2283_v62, 4  ;;  %v2353_v31 = vrot.slane %v2352_v17, 4  ;;  %v9493_v34 = vpop.permute.xlu1 %3430 }
 0x55e   : > { %v2422_v19 = vrot.slane %v2421_v59, 4  ;;  %v2491_v18 = vrot.slane %v2490_v25, 4  ;;  %v2560_v63 = vrot.slane %v2559_v23, 4  ;;  %v2638_v47 = vrot.slane %v2637_v2, 4  ;;  %12051 = vst [vmem:[#allocation78_spill] sm:$0xff] %v9493_v34 }
 0x55f   : > { %v2707_v20 = vrot.slane %v2706_v38, 4  ;;  %v2776_v45 = vrot.slane %v2775_v48, 4  ;;  %v2845_v27 = vrot.slane %v2844_v54, 4  ;;  %v2914_v46 = vrot.slane %v2913_v36, 4 }
 0x560   : > { %v2983_v29 = vrot.slane %v2982_v35, 4  ;;  %v3052_v28 = vrot.slane %v3051_v5, 4  ;;  %v3121_v60 = vrot.slane %v3120_v13, 4  ;;  %v1513_v7 = vmax.f32 %v1511_v14, %v1512_v3 }
 0x561   : > { %v1582_v24 = vmax.f32 %v1580_v9, %v1581_v43  ;;  %3989 = vperm.xlu1 %5536, %v12052_v39   ;;  %v1651_v56 = vmax.f32 %v1649_v61, %v1650_v10  ;;  %v1720_v12 = vmax.f32 %v1718_v0, %v1719_v44  ;;  %v1789_v58 = vmax.f32 %v1787_v11, %v1788_v50  ;;  %v9496_v6 = vpop.permute.xlu1 %3436  ;;  %v9498_v39 = vpop.permute.xlu0 %3577  ;;  %v12055_v61 = vld [vmem:[#allocation178_spill] sm:$0xff] }
 0x562   : > { %v1858_v4 = vmax.f32 %v1856_v57, %v1857_v37  ;;  %v1927_v41 = vmax.f32 %v1925_v42, %v1926_v30  ;;  %v1996_v26 = vmax.f32 %v1994_v51, %v1995_v21  ;;  %v2078_v49 = vmax.f32 %v2076_v32, %v2077_v55  ;;  %12053 = vst [vmem:[#allocation84_spill] sm:$0xff] %v9496_v6  ;;  %v12057_v37 = vld [vmem:[#allocation79_spill] sm:$0xff]  ;;  %v12077_v6 = vld [vmem:[#allocation254_spill] sm:$0xff] }
 0x563   : > { %v2147_v52 = vmax.f32 %v2145_v1, %v2146_v22  ;;  %v2216_v34 = vmax.f32 %v2214_v40, %v2215_v15  ;;  %v2285_v16 = vmax.f32 %v2283_v62, %v2284_v53  ;;  %v2354_v8 = vmax.f32 %v2352_v17, %v2353_v31  ;;  %12054 = vst [vmem:[#allocation183_spill] sm:$0xff] %v9498_v39  ;;  %v12058_v30 = vld [vmem:[#allocation107_spill] sm:$0xff] }
 0x564   : > { %v2423_v33 = vmax.f32 %v2421_v59, %v2422_v19  ;;  %v2492_v3 = vmax.f32 %v2490_v25, %v2491_v18  ;;  %v2561_v14 = vmax.f32 %v2559_v23, %v2560_v63  ;;  %v2639_v9 = vmax.f32 %v2637_v2, %v2638_v47 }
 0x565   : > { %v2708_v43 = vmax.f32 %v2706_v38, %v2707_v20  ;;  %3995 = vperm.xlu1 %5536, %v12055_v61   ;;  %v2777_v0 = vmax.f32 %v2775_v48, %v2776_v45  ;;  %v2846_v11 = vmax.f32 %v2844_v54, %v2845_v27  ;;  %v2915_v57 = vmax.f32 %v2913_v36, %v2914_v46  ;;  %v9507_v62 = vpop.permute.xlu1 %3442  ;;  %v9511_v55 = vpop.permute.xlu0 %3583 }
 0x566   : > { %v9501_v42 = vmax.f32 %v2982_v35, %v2983_v29  ;;  %v9503_v51 = vmax.f32 %v3051_v5, %v3052_v28  ;;  %v9505_v32 = vmax.f32 %v3120_v13, %v3121_v60  ;;  %v1514_v1 = vrot.slane %v1513_v7, 2  ;;  %12056 = vst [vmem:[#allocation190_spill] sm:$0xff] %v9507_v62  ;;  %12059 = vst [vmem:[#allocation39_spill] sm:$0xff] %v9511_v55 }
 0x567   : > { %v1583_v40 = vrot.slane %v1582_v24, 2  ;;  %v1652_v17 = vrot.slane %v1651_v56, 2  ;;  %v1721_v59 = vrot.slane %v1720_v12, 2  ;;  %v1790_v25 = vrot.slane %v1789_v58, 2 }
 0x568   : > { %v1859_v23 = vrot.slane %v1858_v4, 2  ;;  %v1928_v2 = vrot.slane %v1927_v41, 2  ;;  %v1997_v38 = vrot.slane %v1996_v26, 2  ;;  %v2079_v10 = vrot.slane %v2078_v49, 2 }
 0x569   : > { %v2148_v48 = vrot.slane %v2147_v52, 2  ;;  %v2217_v54 = vrot.slane %v2216_v34, 2  ;;  %v2286_v36 = vrot.slane %v2285_v16, 2  ;;  %v2355_v35 = vrot.slane %v2354_v8, 2  ;;  %v9513_v22 = vpop.permute.xlu1 %3448 }
 0x56a   : > { %v2424_v44 = vrot.slane %v2423_v33, 2  ;;  %v2493_v5 = vrot.slane %v2492_v3, 2  ;;  %v2562_v50 = vrot.slane %v2561_v14, 2  ;;  %v2640_v13 = vrot.slane %v2639_v9, 2  ;;  %12060 = vst [vmem:[#allocation229_spill] sm:$0xff] %v9513_v22  ;;  %v12076_v22 = vld [vmem:[#allocation255_spill] sm:$0xff] }
 0x56b   : > { %v1302_v21 = vpack.c.bf16 %v12058_v30, %v12057_v37  ;;  %v2709_v15 = vrot.slane %v2708_v43, 2  ;;  %v2778_v53 = vrot.slane %v2777_v0, 2  ;;  %v2847_v31 = vrot.slane %v2846_v11, 2 }
 0x56c   : > { %v2916_v19 = vrot.slane %v2915_v57, 2  ;;  %v2985_v18 = vrot.slane %v9501_v42, 2  ;;  %v3054_v63 = vrot.slane %v9503_v51, 2  ;;  %v3123_v47 = vrot.slane %v9505_v32, 2 }
 0x56d   : > { %5306 = vmatpush3.bf16.msra.mxu0 %v1302_v21  ;;  %v9518_v20 = vmax.f32 %v1513_v7, %v1514_v1  ;;  %v9520_v45 = vmax.f32 %v1582_v24, %v1583_v40  ;;  %v9522_v27 = vmax.f32 %v1651_v56, %v1652_v17  ;;  %v9524_v46 = vmax.f32 %v1720_v12, %v1721_v59  ;;  %v9536_v7 = vpop.permute.xlu1 %3499  ;;  %v12061_v1 = vld [vmem:[#allocation36_spill] sm:$0xff] }
 0x56e   : > { %v9526_v29 = vmax.f32 %v1789_v58, %v1790_v25  ;;  %5317 = vmatprep.subr.bf16.mxu1 %v1302_v21  ;;  %v9528_v28 = vmax.f32 %v1858_v4, %v1859_v23  ;;  %v9530_v60 = vmax.f32 %v1927_v41, %v1928_v2  ;;  %v9532_v61 = vmax.f32 %v1996_v26, %v1997_v38 }
 0x56f   : > { %v9534_v62 = vmax.f32 %v2078_v49, %v2079_v10  ;;  %5318 = vmatpush3.bf16.msra.mxu1 %v1302_v21  ;;  %v9538_v24 = vmax.f32 %v2147_v52, %v2148_v48  ;;  %v9540_v56 = vmax.f32 %v2216_v34, %v2217_v54  ;;  %v9542_v12 = vmax.f32 %v2285_v16, %v2286_v36  ;;  %v9556_v52 = vpop.permute.xlu0 %3848  ;;  %v4264_v21 = vld [vmem:[#allocation8 + $0x8] sm:$0xff] }
 0x570   : > { %v9544_v58 = vmax.f32 %v2354_v8, %v2355_v35  ;;  %5319 = vmatprep.subr.bf16.mxu1 %v12061_v1  ;;  %v9547_v4 = vmax.f32 %v2423_v33, %v2424_v44  ;;  %v9549_v41 = vmax.f32 %v2492_v3, %v2493_v5  ;;  %v9551_v26 = vmax.f32 %v2561_v14, %v2562_v50  ;;  %v1304_v33 = vld [vmem:[#allocation4] sm:$0xff]  ;;  %v5539_v3 = vld [vmem:[#allocation5 + $0x8] ss:$0 sps:$4 sm:$0xff]  }
 0x571   : > { %v9553_v49 = vmax.f32 %v2639_v9, %v2640_v13  ;;  %v12062_v40 = vmov 0.0   ;;  %v9558_v34 = vmax.f32 %v2708_v43, %v2709_v15  ;;  %v9560_v16 = vmax.f32 %v2777_v0, %v2778_v53  ;;  %v9581_v25 = vpop.permute.xlu1 %3505  ;;  %v12069_v5 = vld [vmem:[#allocation218_spill] sm:$0xff] }
 0x572   : > { %5307 = vmatprep.subr.bf16.mxu0 %v12062_v40  ;;  %v9562_v8 = vmax.f32 %v2846_v11, %v2847_v31  ;;  %v9564_v17 = vmax.f32 %v2915_v57, %v2916_v19  ;;  %v9568_v14 = vmax.f32 %v9501_v42, %v2985_v18  ;;  %v9571_v9 = vmax.f32 %v9503_v51, %v3054_v63  ;;  %v12063_v11 = vld [vmem:[#allocation213_spill] sm:$0xff]  ;;  %v12064_v57 = vld [vmem:[#allocation171_spill] sm:$0xff]  ;;  %v12070_v50 = vld [vmem:[#allocation214_spill] sm:$0xff] }
 0x573   : > { %5308 = vmatpush3.bf16.msra.mxu0 %v12061_v1  ;;  %v9574_v43 = vmax.f32 %v9505_v32, %v3123_v47  ;;  %v1516_v0 = vrot.slane %v9518_v20, 1  ;;  %5320 = vmatpush3.bf16.msra.mxu1 %v12061_v1  ;;  %v12065_v59 = vpack.c.bf16 %v12063_v11, %v12064_v57  ;;  %12066 = vst [vmem:[#allocation235_spill] sm:$0xff] %v9581_v25  ;;  %v1585_v42 = vrot.slane %v9520_v45, 1  ;;  %v12072_v18 = vld [vmem:[#allocation251_spill] sm:$0xff]  ;;  %v9607_v1 = vpop.permute.xlu0 %3854 }
 0x574   : > { %v1654_v23 = vrot.slane %v9522_v27, 1  ;;  %v1723_v51 = vrot.slane %v9524_v46, 1  ;;  %v1792_v32 = vrot.slane %v9526_v29, 1  ;;  %v1861_v2 = vrot.slane %v9528_v28, 1  ;;  %v12073_v63 = vld [vmem:[#allocation219_spill] sm:$0xff] }
 0x575   : > { %5340 = vmatprep.subr.bf16.mxu0 %v12065_v59  ;;  %v1930_v38 = vrot.slane %v9530_v60, 1  ;;  %v1999_v10 = vrot.slane %v9532_v61, 1  ;;  %v2081_v48 = vrot.slane %v9534_v62, 1  ;;  %v2150_v54 = vrot.slane %v9538_v24, 1  ;;  %v9613_v57 = vpop.permute.xlu1 %3511 }
 0x576   : > { %5310 = vmatmul.mubr.msk.bf16.vlgmr.msra.gmra.mrb[12].mxu0 %vm12067_vm0, %v1304_v33  ;;  %v2219_v36 = vrot.slane %v9540_v56, 1  ;;  %v2288_v35 = vrot.slane %v9542_v12, 1  ;;  %v2357_v44 = vrot.slane %v9544_v58, 1  ;;  %5322 = vmatmul.mubr.msk.bf16.vlgmr.msra.gmra.mrb[16].mxu1 %vm12068_vm5, %v5539_v3  ;;  %v12071_v13 = vpack.c.bf16 %v12069_v5, %v12070_v50  ;;  %12075 = vst [vmem:[#allocation110_spill] sm:$0xff] %v9613_v57 }
 0x577   : > { %v2426_v15 = vrot.slane %v9547_v4, 1  ;;  %v2495_v53 = vrot.slane %v9549_v41, 1  ;;  %v2564_v31 = vrot.slane %v9551_v26, 1  ;;  %v2642_v19 = vrot.slane %v9553_v49, 1  ;;  %4403 = vmatprep.mubr.f32.mxu0 %v4264_v21 }
 0x578   : > { %5342 = vmatpush3.bf16.msra.mxu0 %v12071_v13  ;;  %v12074_v47 = vpack.c.bf16 %v12072_v18, %v12073_v63  ;;  %v2711_v40 = vrot.slane %v9558_v34, 1  ;;  %v2780_v33 = vrot.slane %v9560_v16, 1  ;;  %v2849_v3 = vrot.slane %v9562_v8, 1 }
 0x579   : > { %v2918_v11 = vrot.slane %v9564_v17, 1  ;;  %v2987_v59 = vrot.slane %v9568_v14, 1  ;;  %v3056_v5 = vrot.slane %v9571_v9, 1  ;;  %v3125_v50 = vrot.slane %v9574_v43, 1 }
 0x57a   : > { %5344 = vmatprep.subr.bf16.mxu0 %v12074_v47  ;;  %v1517_v13 = vmax.f32 %v9518_v20, %v1516_v0  ;;  %v1586_v21 = vmax.f32 %v9520_v45, %v1585_v42  ;;  %v1655_v18 = vmax.f32 %v9522_v27, %v1654_v23  ;;  %v2082_v63 = vmax.f32 %v9534_v62, %v2081_v48  ;;  %v12079_v0 = vld [vmem:[#allocation257_spill] sm:$0xff]  ;;  %v12080_v45 = vld [vmem:[#allocation256_spill] sm:$0xff] }
 0x57b   : > { %v2151_v47 = vmax.f32 %v9538_v24, %v2150_v54  ;;  %v12078_v55 = vpack.c.bf16 %v12076_v22, %v12077_v6  ;;  %v1724_v39 = vmax.f32 %v9524_v46, %v1723_v51  ;;  %v1793_v57 = vmax.f32 %v9526_v29, %v1792_v32  ;;  %v12082_v27 = vld [vmem:[#allocation33_spill] sm:$0xff]  ;;  %v9638_v22 = vpop.permute.xlu1 %3517  ;;  %v12083_v46 = vld [vmem:[#allocation134_spill] sm:$0xff]  ;;  %v9646_v51 = vpop.permute.xlu0 %3860 }
 0x57c   : > { %v1862_v25 = vmax.f32 %v9528_v28, %v1861_v2  ;;  %v2220_v20 = vmax.f32 %v9540_v56, %v2219_v36  ;;  %v12081_v42 = vpack.c.bf16 %v12079_v0, %v12080_v45  ;;  %vm3318_vm10 = vcmp.eq.s32.totalorder %v12082_v27, 1  ;;  %v12084_v29 = vld [vmem:[#allocation238_spill] sm:$0xff]  ;;  %v12085_v2 = vld [vmem:[#allocation220_spill] sm:$0xff] }
 0x57d   : > { %5346 = vmatpush3.bf16.msra.mxu0 %v12078_v55  ;;  %v1931_v62 = vmax.f32 %v9530_v60, %v1930_v38  ;;  %v2643_v24 = vmax.f32 %v9553_v49, %v2642_v19  ;;  %v2712_v6 = vmax.f32 %v9558_v34, %v2711_v40  ;;  %v2781_v55 = vmax.f32 %v9560_v16, %v2780_v33  ;;  %v12086_v38 = vld [vmem:[#allocation258_spill] sm:$0xff]  ;;  %v4299_v45 = vld [vmem:[%s5905_s23 + $0xe0] sm:$0xff] }
 0x57e   : > { %5348 = vmatprep.subr.bf16.mxu0 %v12081_v42  ;;  %vm3381_vm4 = vcmp.eq.s32.totalorder %v12083_v46, 1  ;;  %vm3383_vm1 = vcmp.eq.s32.totalorder %v12084_v29, 1  ;;  %v2000_v28 = vmax.f32 %v9532_v61, %v1999_v10  ;;  %v2289_v56 = vmax.f32 %v9542_v12, %v2288_v35  ;;  %v12088_v10 = vld [vmem:[#allocation260_spill] sm:$0xff]  ;;  %v4300_v42 = vld [vmem:[%s5905_s23 + $0xe8] sm:$0xff] }
 0x57f   : > { %v2358_v23 = vmax.f32 %v9544_v58, %v2357_v44  ;;  %v2427_v60 = vmax.f32 %v9547_v4, %v2426_v15  ;;  %v2496_v49 = vmax.f32 %v9549_v41, %v2495_v53  ;;  %v2565_v34 = vmax.f32 %v9551_v26, %v2564_v31  ;;  %v12089_v41 = vld [vmem:[#allocation259_spill] sm:$0xff]  ;;  %v12115_v27 = vld [vmem:[#allocation224_spill] sm:$0xff] }
 0x580   : > { %v2002_v16 = vsel %vm2001_vm15, %v1517_v13, %v1586_v21  ;;  %v2566_v32 = vsel %vm2001_vm15, %v2082_v63, %v2151_v47  ;;  %v12087_v48 = vpack.c.bf16 %v12085_v2, %v12086_v38  ;;  %v2850_v61 = vmax.f32 %v9562_v8, %v2849_v3  ;;  %v9666_v8 = vpop.permute.xlu1 %3713  ;;  %v12094_v3 = vld [vmem:[#allocation261_spill] sm:$0xff]  ;;  %v12098_v21 = vld [vmem:[#allocation38_spill] sm:$0xff]  ;;  %v4282_v63 = vld [vmem:[%s5905_s23 + $0x58] sm:$0xff]  ;;  %v9688_v47 = vpop.permute.xlu0 %3866 }
 0x581   : > { %v3127_v12 = vsel %vm2001_vm15, %v2643_v24, %v2712_v6  ;;  %v2004_v58 = vsel %vm2003_vm13, %v2002_v16, %v1655_v18  ;;  %v2567_v4 = vsel %vm2003_vm13, %v2566_v32, %v2220_v20  ;;  %v12090_v54 = vpack.c.bf16 %v12088_v10, %v12089_v41  ;;  %v12100_v20 = vld [vmem:[#allocation250_spill] sm:$0xff]  ;;  %v12101_v24 = vld [vmem:[#allocation73_spill] sm:$0xff]  ;;  %v12107_v2 = vld [vmem:[#allocation127_spill] sm:$0xff] }
 0x582   : > { %5350 = vmatpush3.bf16.msra.mxu0 %v12087_v48  ;;  %v2919_v26 = vmax.f32 %v9564_v17, %v2918_v11  ;;  %v3128_v36 = vsel %vm2003_vm13, %v3127_v12, %v2781_v55  ;;  %v2006_v35 = vsel %vm2005_vm9, %v2004_v58, %v1724_v39  ;;  %v2568_v44 = vsel %vm2005_vm9, %v2567_v4, %v2289_v56  ;;  %v12095_v11 = vld [vmem:[#allocation221_spill] sm:$0xff]  ;;  %v12105_v16 = vld [vmem:[#allocation74_spill] sm:$0xff]  ;;  %v12111_v4 = vld [vmem:[#allocation92_spill] sm:$0xff] }
 0x583   : > { %5352 = vmatprep.subr.bf16.mxu0 %v12090_v54  ;;  %v2988_v15 = vmax.f32 %v9568_v14, %v2987_v59  ;;  %v3129_v53 = vsel %vm2005_vm9, %v3128_v36, %v2850_v61  ;;  %v2007_v31 = vsel %vm12091_vm2, %v2006_v35, %v1793_v57  ;;  %v2569_v19 = vsel %vm12092_vm14, %v2568_v44, %v2358_v23  ;;  %v12102_v23 = vld [vmem:[#allocation212_spill] sm:$0xff]  ;;  %v12108_v48 = vld [vmem:[#allocation85_spill] sm:$0xff]  ;;  %v12109_v61 = vld [vmem:[#allocation174_spill] sm:$0xff] }
 0x584   : > { %v3057_v17 = vmax.f32 %v9571_v9, %v3056_v5  ;;  %v3130_v40 = vsel %vm12093_vm3, %v3129_v53, %v2919_v26  ;;  %v2009_v39 = vsel %vm2008_vm11, %v2007_v31, %v1862_v25  ;;  %v2570_v33 = vsel %vm2008_vm11, %v2569_v19, %v2427_v60  ;;  %v12097_v5 = vld [vmem:[#allocation44_spill] sm:$0xff]  ;;  %v4281_v25 = vld [vmem:[%s5905_s23 + $0x50] sm:$0xff]  ;;  %v4284_v26 = vld [vmem:[%s5905_s23 + $0x68] sm:$0xff] }
 0x585   : > { %v12096_v13 = vpack.c.bf16 %v12094_v3, %v12095_v11  ;;  %v3126_v14 = vmax.f32 %v9574_v43, %v3125_v50  ;;  %v3131_v57 = vsel %vm2008_vm11, %v3130_v40, %v2988_v15  ;;  %v2011_v59 = vsel %vm2010_vm7, %v2009_v39, %v1931_v62  ;;  %v9696_v62 = vpop.permute.xlu1 %3719  ;;  %v12103_v60 = vld [vmem:[#allocation83_spill] sm:$0xff]  ;;  %v12110_v58 = vld [vmem:[#allocation222_spill] sm:$0xff]  ;;  %v4283_v54 = vld [vmem:[%s5905_s23 + $0x60] sm:$0xff]  ;;  %v9754_v11 = vpop.permute.xlu0 %3634 }
 0x586   : > { %v2571_v9 = vsel %vm2010_vm7, %v2570_v33, %v2496_v49  ;;  %v12099_v18 = vpack.c.bf16 %v12097_v5, %v12098_v21  ;;  %vm3385_vm6 = vcmp.eq.s32.totalorder %v12100_v20, 1  ;;  %v3132_v0 = vsel %vm2010_vm7, %v3131_v57, %v3057_v17  ;;  %v12113_v36 = vld [vmem:[#allocation252_spill] sm:$0xff]  ;;  %v12116_v53 = vld [vmem:[#allocation215_spill] sm:$0xff]  ;;  %12120 = vst [vmem:[#allocation231_spill] sm:$0xff] %v9754_v11 }
 0x587   : > { %5354 = vmatpush3.bf16.msra.mxu0 %v12096_v13  ;;  %v2013_v43 = vsel %vm11001_vm8, %v2011_v59, %v2000_v28  ;;  %v2572_v50 = vsel %vm11001_vm8, %v2571_v9, %v2565_v34  ;;  %vm3387_vm12 = vcmp.eq.s32.totalorder %v12101_v24, 1  ;;  %v3133_v6 = vsel %vm11001_vm8, %v3132_v0, %v3126_v14  ;;  %v12104_v28 = vld [vmem:[#allocation80_spill] sm:$0xff]  ;;  %v12117_v19 = vld [vmem:[#allocation187_spill] sm:$0xff]  ;;  %v12121_v13 = vld [vmem:[#allocation217_spill] sm:$0xff] }
 0x588   : > { %5356 = vmatprep.subr.bf16.mxu0 %v12099_v18  ;;  %v2573_v55 = vmax.f32 %v2013_v43, 0.0  ;;  %v2574_v56 = vmax.f32 %v2572_v50, 0.0  ;;  %vm3454_vm0 = vcmp.eq.s32.totalorder %v12102_v23, 1  ;;  %vm3456_vm5 = vcmp.eq.s32.totalorder %v12103_v60, 1  ;;  %v12114_v35 = vld [vmem:[#allocation216_spill] sm:$0xff]  ;;  %v4301_v17 = vld [vmem:[%s5905_s23 + $0xf0] sm:$0xff] }
 0x589   : > { %v4252_v49 = vmax.f32 %v3133_v6, 0.0  ;;  %v12106_v34 = vpack.c.bf16 %v12104_v28, %v12105_v16  ;;  %v5361_v32 = vpack.c.bf16 %v4282_v63, %v4281_v25  ;;  %v9708_v38 = vsel %vm3318_vm10, %v12107_v2, 0.0  ;;  %v4302_v40 = vld [vmem:[%s5905_s23 + $0xf8] sm:$0xff]  ;;  %v9732_v39 = vpop.permute.xlu1 %3725  ;;  %v4285_v5 = vld [vmem:[%s5905_s23 + $0x70] sm:$0xff]  ;;  %v4531_v0 = vld [vmem:[%s5910_s20 + $0x80] sm:$0xff] }
 0x58a   : > { %vm3450_vm2 = vcmp.eq.s32.totalorder %v12108_v48, 1  ;;  %v3197_v12 = vrot.slane %v12109_v61, 4  ;;  %4262 = vst [vmem:[#allocation8 + $0x38] sm:$0xff] %v2574_v56  ;;  %v12112_v10 = vpack.c.bf16 %v12110_v58, %v12111_v4  ;;  %v5363_v41 = vpack.c.bf16 %v4300_v42, %v4299_v45  ;;  %4478 = vmatprep.mubr.f32.mxu1 %v2573_v55  ;;  %v12123_v59 = vld [vmem:[#allocation135_spill] sm:$0xff]  ;;  %v12125_v25 = vld [vmem:[#allocation60_spill] sm:$0xff]  ;;  %v4532_v43 = vld [vmem:[%s5910_s20 + $0x88] sm:$0xff] }
 0x58b   : > { %5358 = vmatpush3.bf16.msra.mxu0 %v12106_v34  ;;  %v9722_v15 = vsel %vm3381_vm4, %v12115_v27, 0.0  ;;  %v9727_v31 = vsel %vm3383_vm1, %v12116_v53, 0.0  ;;  %vm3452_vm10 = vcmp.eq.s32.totalorder %v12117_v19, 1  ;;  %4500 = vst [vmem:[#allocation9 + $0x18] sm:$0xff] %v4252_v49  ;;  %v9737_v33 = vsel %vm3385_vm6, %v12057_v37, 0.0  ;;  %v4286_v20 = vld [vmem:[%s5905_s23 + $0x78] sm:$0xff] }
 0x58c   : > { %5360 = vmatprep.subr.bf16.mxu0 %v12112_v10  ;;  %v9742_v46 = vsel %vm3387_vm12, %v12107_v2, 0.0  ;;  %v9747_v29 = vsel %vm3454_vm0, %v12057_v37, 0.0  ;;  %v9752_v3 = vsel %vm3456_vm5, %v12107_v2, 0.0  ;;  %v9761_v57 = vsel %vm3450_vm2, %v12115_v27, 0.0  ;;  %v9784_v6 = vld [vmem:[%s5910_s20] sm:$0xff]  ;;  %v12127_v23 = vld [vmem:[#allocation58_spill] sm:$0xff] }
 0x58d   : > { %12118 = vst [vmem:[#allocation230_spill] sm:$0xff] %v9747_v29  ;;  %12119 = vst [vmem:[#allocation236_spill] sm:$0xff] %v9752_v3  ;;  %vm3804_vm4 = vcmp.eq.s32.totalorder %v12123_v59, 1  ;;  %v5365_v9 = vpack.c.bf16 %v4284_v26, %v4283_v54  ;;  %v9768_v21 = vsel %vm3452_vm10, %v12116_v53, 0.0  ;;  %v3198_v18 = vmax.f32 %v12109_v61, %v3197_v12  ;;  %v9786_v55 = vpop.permute.xlu1 %3731  ;;  %v12126_v56 = vld [vmem:[#allocation253_spill] sm:$0xff]  ;;  %v9800_v16 = vld [vmem:[%s5910_s20 + $0x90] sm:$0xff] }
 0x58e   : > { %12122 = vst [vmem:[#allocation237_spill] sm:$0xff] %v9761_v57  ;;  %12124 = vst [vmem:[#allocation232_spill] sm:$0xff] %v9768_v21  ;;  %vm3808_vm1 = vcmp.eq.s32.totalorder %v12125_v25, 1  ;;  %v5367_v63 = vpack.c.bf16 %v4302_v40, %v4301_v17  ;;  %vm3519_vm14 = vcmp.eq.s32.totalorder %v12126_v56, 1  ;;  %vm3250_vm3 = vcmp.eq.s32.totalorder %v12127_v23, 1  ;;  %v4516_v28 = vld [vmem:[%s5910_s20 + $0x8] sm:$0xff]  ;;  %v9821_v40 = vpop.permute.xlu0 %3640 }
 0x58f   : > { %5362 = vmatpush3.bf16.msra.mxu0 %v5361_v32  ;;  %v9793_v60 = vsel %vm3804_vm4, %v12116_v53, 0.0  ;;  %v9796_v49 = vsel %vm3808_vm1, %v12107_v2, 0.0  ;;  %v12130_v34 = vld [vmem:[#allocation226_spill] sm:$0xff]  ;;  %v5369_v48 = vpack.c.bf16 %v4286_v20, %v4285_v5  ;;  %v5403_v61 = vpack.c.bf16 %v4532_v43, %v4531_v0  ;;  %v4534_v12 = vld [vmem:[%s5910_s20 + $0x98] sm:$0xff]  ;;  %v9816_v19 = vld [vmem:[%s5910_s20 + $0xa0] sm:$0xff]  ;;  %12134 = vst [vmem:[#allocation240_spill] sm:$0xff] %v9821_v40 }
 0x590   : > { %5364 = vmatprep.subr.bf16.mxu0 %v5363_v41  ;;  %12128 = vst [vmem:[#allocation239_spill] sm:$0xff] %v9793_v60  ;;  %12129 = vst [vmem:[#allocation195_spill] sm:$0xff] %v9796_v49  ;;  %vm3248_vm6 = vcmp.eq.s32.totalorder %v12130_v34, 1  ;;  %v9807_v58 = vld [vmem:[%s5910_s20 + $0x10] sm:$0xff]  ;;  %v9810_v4 = vld [vmem:[%s5910_s20 + $0x18] sm:$0xff]  ;;  %v3199_v54 = vrot.slane %v3198_v18, 2  ;;  %v5405_v20 = vpack.c.bf16 %v4516_v28, %v9784_v6  ;;  %v5407_v32 = vpack.c.bf16 %v4534_v12, %v9800_v16 }
 0x591   : > { %v12131_v10 = vld [vmem:[#allocation86_spill] sm:$0xff]  ;;  %v12132_v41 = vld [vmem:[#allocation133_spill] sm:$0xff]  ;;  %v12133_v26 = vld [vmem:[#allocation188_spill] sm:$0xff]  ;;  %v9826_v59 = vsel %vm3519_vm14, %v12115_v27, 0.0  ;;  %v9833_v0 = vpop.permute.xlu1 %3782  ;;  %v3256_v56 = vsel %vm3248_vm6, %v12058_v30, 0.0  ;;  %v5409_v23 = vpack.c.bf16 %v9810_v4, %v9807_v58  ;;  %v12173_v21 = vmax.f32 %v12121_v13, %v9708_v38 }
 0x592   : > { %vm3523_vm12 = vcmp.eq.s32.totalorder %v12131_v10, 1  ;;  %vm3525_vm0 = vcmp.eq.s32.totalorder %v12132_v41, 1  ;;  %vm3246_vm5 = vcmp.eq.s32.totalorder %v12133_v26, 1  ;;  %v9819_v17 = vld [vmem:[%s5910_s20 + $0xa8] sm:$0xff]  ;;  %v12137_v43 = vld [vmem:[#allocation32_spill] sm:$0xff]  ;;  %v9849_v50 = vld [vmem:[%s5910_s20 + $0xb0] sm:$0xff]  ;;  %v9878_v14 = vmax.f32 %v3198_v18, %v3199_v54 }
 0x593   : > { %5366 = vmatpush3.bf16.msra.mxu0 %v5365_v9  ;;  %v12135_v9 = vld [vmem:[#allocation173_spill] sm:$0xff]  ;;  %v12136_v5 = vld [vmem:[#allocation98_spill] sm:$0xff]  ;;  %vm3521_vm10 = vcmp.eq.s32.totalorder %v12137_v43, 1  ;;  %v9854_v6 = vsel %vm3523_vm12, %v12057_v37, 0.0  ;;  %v9859_v28 = vsel %vm3525_vm0, %v12107_v2, 0.0  ;;  %v5411_v12 = vpack.c.bf16 %v9819_v17, %v9816_v19  ;;  %v9867_v58 = vld [vmem:[%s5910_s20 + $0xb8] sm:$0xff]  ;;  %v9897_v43 = vpop.permute.xlu0 %3646 }
 0x594   : > { %5368 = vmatprep.subr.bf16.mxu0 %v5367_v63  ;;  %vm3244_vm2 = vcmp.eq.s32.totalorder %v12135_v9, 1  ;;  %v3258_v25 = vsel %vm3250_vm3, %v12136_v5, 0.0  ;;  %v4263_v63 = vld [vmem:[#allocation8] sm:$0xff]  ;;  %v9846_v24 = vld [vmem:[%s5910_s20 + $0x28] sm:$0xff]  ;;  %v9870_v4 = vld [vmem:[%s5910_s20 + $0x30] sm:$0xff]  ;;  %12140 = vst [vmem:[#allocation117_spill] sm:$0xff] %v9878_v14 }
 0x595   : > { %v9843_v42 = vld [vmem:[%s5910_s20 + $0x20] sm:$0xff]  ;;  %v9873_v10 = vld [vmem:[%s5910_s20 + $0x38] sm:$0xff]  ;;  %v12143_v40 = vld [vmem:[#allocation114_spill] sm:$0xff]  ;;  %v9888_v11 = vpop.permute.xlu1 %3788  ;;  %12145 = vst [vmem:[#allocation124_spill] sm:$0xff] %v9897_v43  ;;  %vm3740_vm8 = vcmp.eq.s32.totalorder %v9786_v55, 1 }
 0x596   : > { %v12138_v16 = vld [vmem:[#allocation77_spill] sm:$0xff]  ;;  %v12141_v44 = vld [vmem:[#allocation227_spill] sm:$0xff]  ;;  %v12142_v19 = vld [vmem:[#allocation156_spill] sm:$0xff]  ;;  %vm3739_vm14 = vcmp.eq.s32.totalorder %v12143_v40, 1  ;;  %v5413_v54 = vpack.c.bf16 %v9846_v24, %v9843_v42 }
 0x597   : > { %v3254_v34 = vsel %vm3246_vm5, %v12138_v16, 0.0  ;;  %5370 = vmatpush3.bf16.msra.mxu0 %v5369_v48  ;;  %v12139_v45 = vld [vmem:[#allocation41_spill] sm:$0xff]  ;;  %vm3737_vm4 = vcmp.eq.s32.totalorder %v12141_v44, 1  ;;  %v9884_v48 = vsel %vm3521_vm10, %v12116_v53, 0.0  ;;  %vm3733_vm1 = vcmp.eq.s32.totalorder %v12142_v19, 1  ;;  %v12144_v9 = vld [vmem:[#allocation203_spill] sm:$0xff] }
 0x598   : > { %v3252_v41 = vsel %vm3244_vm2, %v12139_v45, 0.0  ;;  %v3262_v26 = vmax.f32 %v3254_v34, %v3258_v25  ;;  %5404 = vmatprep.subr.bf16.mxu0 %v5403_v61  ;;  %vm3735_vm3 = vcmp.eq.s32.totalorder %v12144_v9, 1  ;;  %v4268_v18 = vld [vmem:[#allocation8 + $0x28] sm:$0xff]  ;;  %v5415_v61 = vpack.c.bf16 %v9867_v58, %v9849_v50  ;;  %v4267_v42 = vld [vmem:[#allocation8 + $0x20] sm:$0xff]  ;;  %v12150_v25 = vld [vmem:[#allocation211_spill] sm:$0xff] }
 0x599   : > { %v3260_v17 = vmax.f32 %v3252_v41, %v3256_v56  ;;  %v9911_v50 = vld [vmem:[%s10604_s3 + $0x28] sm:$0xff]  ;;  %v9918_v58 = vsel %vm3733_vm1, %v12115_v27, 0.0  ;;  %v12147_v41 = vld [vmem:[#allocation104_spill] sm:$0xff]  ;;  %v9931_v56 = vsel %vm3735_vm3, %v12116_v53, 0.0  ;;  %vm3871_vm2 = vcmp.eq.s32.totalorder %v9556_v52, 1 }
 0x59a   : > { %4404 = vmatmul.mubr.f32.vlgmr.msra.gmra.mrb[2].mxu0 %v4263_v63  ;;  %v9906_v63 = vsel %vm3737_vm4, %v12057_v37, 0.0  ;;  %vm3974_vm6 = vcmp.eq.s32.totalorder %v9911_v50, 20  ;;  %v12146_v44 = vld [vmem:[#allocation205_spill] sm:$0xff]  ;;  %v12149_v24 = vld [vmem:[#allocation52_spill] sm:$0xff]  ;;  %v12152_v43 = vld [vmem:[#allocation142_spill] sm:$0xff]  ;;  %v12155_v9 = vmov 0  }
 0x59b   : > { %4408 = vmatprep.mubr.f32.mxu0 %v4268_v18  ;;  %5406 = vmatpush3.bf16.msra.mxu0 %v5405_v20  ;;  %v12148_v34 = vmax.f32 %v12146_v44, %v12147_v41  ;;  %v9926_v20 = vsel %vm3739_vm14, %v12107_v2, 0.0  ;;  %v12151_v19 = vmax.f32 %v12149_v24, %v12150_v25  ;;  %vm3317_vm12 = vcmp.eq.s32.totalorder %v12152_v43, 1  ;;  %v12153_v49 = vld [vmem:[#allocation42_spill] sm:$0xff]  ;;  %v12156_v24 = vld [vmem:[#allocation121_spill] sm:$0xff]  ;;  %v12157_v44 = vld [vmem:[#allocation128_spill] sm:$0xff] }
 0x59c   : > { %5408 = vmatprep.subr.bf16.mxu0 %v5407_v32  ;;  %vm3319_vm0 = vcmp.eq.s32.totalorder %v12153_v49, 1  ;;  %v4504_v32 = vld [vmem:[#allocation9 + $0x8] sm:$0xff]  ;;  %v3982_v25 = vsel %vm3974_vm6, 1, %v12155_v9  ;;  %vm3802_vm10 = vcmp.eq.s32.totalorder %v12156_v24, 1  ;;  %vm3315_vm4 = vcmp.eq.s32.totalorder %v12157_v44, 1  ;;  %v12158_v41 = vld [vmem:[#allocation48_spill] sm:$0xff] }
 0x59d   : > { %v3264_v18 = vmax.f32 %v12148_v34, %v3262_v26  ;;  %v3263_v14 = vmax.f32 %v12151_v19, %v3260_v17  ;;  %v9938_v26 = vpop.permute.xlu1 %3794  ;;  %v12154_v34 = vld [vmem:[#allocation30_spill] sm:$0xff]  ;;  %vm3806_vm1 = vcmp.eq.s32.totalorder %v12158_v41, 1  ;;  %v3325_v19 = vsel %vm3317_vm12, %v12058_v30, 0.0  ;;  %4001 = vperm.xlu1 %5536, %v3982_v25   ;;  %v9961_v17 = vpop.permute.xlu0 %3652  ;;  %v4539_v43 = vld [vmem:[%s5910_s20 + $0xc0] sm:$0xff] }
 0x59e   : > { %vm3313_vm5 = vcmp.eq.s32.totalorder %v12154_v34, 1  ;;  %4409 = vmatmul.mubr.f32.gmra.mrb[16].mxu0 %v4267_v42  ;;  %v3327_v40 = vsel %vm3319_vm0, %v12136_v5, 0.0  ;;  %vm3875_vm14 = vcmp.eq.s32.totalorder %v9646_v51, 1  ;;  %12159 = vst [vmem:[#allocation131_spill] sm:$0xff] %v9961_v17  ;;  %v9979_v51 = vld [vmem:[%s10604_s3 + $0x38] sm:$0xff]  ;;  %v9987_v52 = vsel %vm3802_vm10, %v12115_v27, 0.0 }
 0x59f   : > { %5410 = vmatpush3.bf16.msra.mxu0 %v5409_v23  ;;  %4647 = vmatprep.mubr.f32.mxu0 %v4504_v32  ;;  %v9952_v42 = vmax.f32 %v3263_v14, %v3264_v18  ;;  %v3321_v23 = vsel %vm3313_vm5, %v12139_v45, 0.0  ;;  %v9969_v14 = vsel %vm3871_vm2, %v12115_v27, 0.0  ;;  %v4540_v18 = vld [vmem:[%s5910_s20 + $0xc8] sm:$0xff]  ;;  %v9974_v49 = vsel %vm3875_vm14, %v12057_v37, 0.0  ;;  %v4523_v3 = vld [vmem:[%s5910_s20 + $0x40] sm:$0xff] }
 0x5a0   : > { %5412 = vmatprep.subr.bf16.mxu0 %v5411_v12  ;;  %12160 = vst [vmem:[#allocation138_spill] sm:$0xff] %v9969_v14  ;;  %12161 = vst [vmem:[#allocation101_spill] sm:$0xff] %v9974_v49  ;;  %vm3976_vm3 = vcmp.eq.s32.totalorder %v9979_v51, 20  ;;  %v3323_v34 = vsel %vm3315_vm4, %v12138_v16, 0.0  ;;  %vm3873_vm6 = vcmp.eq.s32.totalorder %v9607_v1, 1  ;;  %v3329_v25 = vmax.f32 %v3321_v23, %v3325_v19  ;;  %v12163_v29 = vld [vmem:[#allocation66_spill] sm:$0xff] }
 0x5a1   : > { %v9982_v12 = vpop.permute.xlu1 %3800  ;;  %v9998_v17 = vsel %vm3806_vm1, %v12057_v37, 0.0  ;;  %v3331_v24 = vmax.f32 %v3323_v34, %v3327_v40  ;;  %v3984_v60 = vsel %vm3976_vm3, 1, %v12155_v9  ;;  %v3266_v44 = vrot.slane %v9952_v42, 4  ;;  %v4524_v32 = vld [vmem:[%s5910_s20 + $0x48] sm:$0xff]  ;;  %v4541_v40 = vld [vmem:[%s5910_s20 + $0xd0] sm:$0xff]  ;;  %v4542_v23 = vld [vmem:[%s5910_s20 + $0xd8] sm:$0xff] }
 0x5a2   : > { %12162 = vst [vmem:[#allocation241_spill] sm:$0xff] %v9982_v12  ;;  %vm3388_vm12 = vcmp.eq.s32.totalorder %v12163_v29, 1  ;;  %v5419_v57 = vpack.c.bf16 %v4540_v18, %v4539_v43  ;;  %4007 = vperm.xlu1 %5536, %v3984_v60   ;;  %vm3877_vm0 = vcmp.eq.s32.totalorder %v9688_v47, 1  ;;  %v12164_v41 = vld [vmem:[#allocation54_spill] sm:$0xff]  ;;  %v12169_v60 = vld [vmem:[#allocation149_spill] sm:$0xff]  ;;  %v12170_v47 = vld [vmem:[#allocation163_spill] sm:$0xff]  ;;  %v10030_v18 = vpop.permute.xlu0 %3917  ;;  %v12171_v49 = vmax.f32 %v12114_v35, %v12113_v36 }
 0x5a3   : > { %5414 = vmatpush3.bf16.msra.mxu0 %v5413_v54  ;;  %vm3382_vm5 = vcmp.eq.s32.totalorder %v12164_v41, 1  ;;  %v12165_v19 = vld [vmem:[#allocation170_spill] sm:$0xff]  ;;  %v10011_v54 = vsel %vm3873_vm6, %v12116_v53, 0.0  ;;  %v10016_v34 = vsel %vm3877_vm0, %v12107_v2, 0.0  ;;  %vm3384_vm10 = vcmp.eq.s32.totalorder %v12169_v60, 1  ;;  %v10051_v29 = vld [vmem:[%s10604_s3 + $0x18] sm:$0xff] }
 0x5a4   : > { %5416 = vmatprep.subr.bf16.mxu0 %v5415_v61  ;;  %vm3588_vm2 = vcmp.eq.s32.totalorder %v12165_v19, 1  ;;  %12166 = vst [vmem:[#allocation108_spill] sm:$0xff] %v10011_v54  ;;  %12167 = vst [vmem:[#allocation242_spill] sm:$0xff] %v10016_v34  ;;  %vm3386_vm4 = vcmp.eq.s32.totalorder %v12170_v47, 1  ;;  %v10027_v1 = vld [vmem:[%s10604_s3 + $0x8] sm:$0xff]  ;;  %v3332_v14 = vmax.f32 %v12171_v49, %v3329_v25  ;;  %v12172_v43 = vpack.c.bf16 %v9873_v10, %v9870_v4  ;;  %v4525_v35 = vld [vmem:[%s5910_s20 + $0x50] sm:$0xff] }
 0x5a5   : > { %v10018_v61 = vpop.permute.xlu1 %3568  ;;  %vm4039_vm1 = vcmp.eq.s32.totalorder %v10027_v1, 21  ;;  %v5421_v34 = vpack.c.bf16 %v4524_v32, %v4523_v3  ;;  %v3333_v12 = vmax.f32 %v12173_v21, %v3331_v24  ;;  %v5423_v36 = vpack.c.bf16 %v4542_v23, %v4541_v40  ;;  %v4526_v49 = vld [vmem:[%s5910_s20 + $0x58] sm:$0xff]  ;;  %v4544_v21 = vld [vmem:[%s5910_s20 + $0xe8] sm:$0xff]  ;;  %v4527_v47 = vld [vmem:[%s5910_s20 + $0x60] sm:$0xff] }
 0x5a6   : > { %12168 = vst [vmem:[#allocation115_spill] sm:$0xff] %v10018_v61  ;;  %v3396_v61 = vsel %vm3388_vm12, %v12136_v5, 0.0  ;;  %v4047_v54 = vsel %vm4039_vm1, 1, %v12155_v9  ;;  %vm3520_vm14 = vcmp.eq.s32.totalorder %v9536_v7, 1  ;;  %vm4041_vm3 = vcmp.eq.s32.totalorder %v10051_v29, 21  ;;  %v12174_v25 = vld [vmem:[#allocation235_spill] sm:$0xff] }
 0x5a7   : > { %5418 = vmatpush3.bf16.msra.mxu0 %v12172_v43  ;;  %4058 = vperm.xlu1 %5536, %v4047_v54   ;;  %v3390_v3 = vsel %vm3382_vm5, %v12139_v45, 0.0  ;;  %v3392_v38 = vsel %vm3384_vm10, %v12138_v16, 0.0  ;;  %v3394_v13 = vsel %vm3386_vm4, %v12058_v30, 0.0  ;;  %v4049_v4 = vsel %vm4041_vm3, 1, %v12155_v9  ;;  %v12175_v24 = vld [vmem:[#allocation110_spill] sm:$0xff] }
 0x5a8   : > { %5420 = vmatprep.subr.bf16.mxu0 %v5419_v57  ;;  %v4543_v57 = vld [vmem:[%s5910_s20 + $0xe0] sm:$0xff]  ;;  %v3400_v32 = vmax.f32 %v3392_v38, %v3396_v61  ;;  %vm3522_vm6 = vcmp.eq.s32.totalorder %v12174_v25, 1  ;;  %vm3524_vm12 = vcmp.eq.s32.totalorder %v12175_v24, 1  ;;  %vm4043_vm0 = vcmp.eq.s32.totalorder %v9911_v50, 21  ;;  %v4528_v43 = vld [vmem:[%s5910_s20 + $0x68] sm:$0xff]  ;;  %v10079_v24 = vpop.permute.xlu0 %3923  ;;  %v4529_v25 = vld [vmem:[%s5910_s20 + $0x70] sm:$0xff] }
 0x5a9   : > { %v10066_v10 = vpop.permute.xlu1 %3574  ;;  %v3267_v41 = vmax.f32 %v9952_v42, %v3266_v44  ;;  %v5425_v54 = vpack.c.bf16 %v4526_v49, %v4525_v35  ;;  %v3528_v40 = vsel %vm3520_vm14, %v12139_v45, 0.0  ;;  %v3532_v23 = vsel %vm3524_vm12, %v12058_v30, 0.0  ;;  %v4545_v44 = vld [vmem:[%s5910_s20 + $0xf0] sm:$0xff] }
 0x5aa   : > { %v3398_v60 = vmax.f32 %v3390_v3, %v3394_v13  ;;  %v5427_v61 = vpack.c.bf16 %v4544_v21, %v4543_v57  ;;  %v3536_v38 = vmax.f32 %v3528_v40, %v3532_v23  ;;  %vm3526_vm5 = vcmp.eq.s32.totalorder %v9638_v22, 1  ;;  %v4530_v40 = vld [vmem:[%s5910_s20 + $0x78] sm:$0xff] }
 0x5ab   : > { %5422 = vmatpush3.bf16.msra.mxu0 %v5421_v34  ;;  %4064 = vperm.xlu1 %5536, %v4049_v4   ;;  %v10081_v42 = vmax.f32 %v3332_v14, %v3333_v12  ;;  %v4546_v34 = vld [vmem:[%s5910_s20 + $0xf8] sm:$0xff]  ;;  %v3530_v7 = vsel %vm3522_vm6, %v12138_v16, 0.0  ;;  %v3534_v35 = vsel %vm3526_vm5, %v12136_v5, 0.0  ;;  %v12176_v22 = vmax.f32 %v9727_v31, %v9742_v46 }
 0x5ac   : > { %5424 = vmatprep.subr.bf16.mxu0 %v5423_v36  ;;  %v4051_v36 = vsel %vm4043_vm0, 1, %v12155_v9  ;;  %v12177_v12 = vmax.f32 %v9826_v59, %v9854_v6  ;;  %v3538_v13 = vmax.f32 %v3530_v7, %v3534_v35  ;;  %vm4045_vm10 = vcmp.eq.s32.totalorder %v9979_v51, 21  ;;  %v12178_v4 = vld [vmem:[#allocation72_spill] sm:$0xff] }
 0x5ad   : > { %v10092_v49 = vpop.permute.xlu1 %3580  ;;  %v3402_v14 = vmax.f32 %v12176_v22, %v3400_v32  ;;  %v3818_v57 = vmax.f32 %v9987_v52, %v9998_v17  ;;  %v10106_v21 = vsel %vm3588_vm2, %v12115_v27, 0.0  ;;  %vm3590_vm4 = vcmp.eq.s32.totalorder %v12178_v4, 1  ;;  %v4503_v22 = vld [vmem:[#allocation9] sm:$0xff]  ;;  %v12193_v52 = vld [vmem:[#allocation115_spill] sm:$0xff] }
 0x5ae   : > { %v3539_v3 = vmax.f32 %v12177_v12, %v3536_v38  ;;  %v5429_v31 = vpack.c.bf16 %v4528_v43, %v4527_v47  ;;  %v3268_v46 = vrot.slane %v3267_v41, 2  ;;  %v12179_v59 = vmax.f32 %v9722_v15, %v9737_v33  ;;  %v12181_v38 = vld [vmem:[#allocation183_spill] sm:$0xff]  ;;  %v3930_v47 = vpop.permute.xlu0 %3929 }
 0x5af   : > { %5426 = vmatpush3.bf16.msra.mxu0 %v5425_v54  ;;  %v5431_v32 = vpack.c.bf16 %v4546_v34, %v4545_v44  ;;  %4070 = vperm.xlu1 %5536, %v4051_v36   ;;  %v12180_v23 = vmax.f32 %v9884_v48, %v9859_v28  ;;  %vm3592_vm2 = vcmp.eq.s32.totalorder %v12181_v38, 1  ;;  %v4053_v7 = vsel %vm4045_vm10, 1, %v12155_v9 }
 0x5b0   : > { %v3401_v6 = vmax.f32 %v12179_v59, %v3398_v60  ;;  %5428 = vmatprep.subr.bf16.mxu0 %v5427_v61  ;;  %vm3734_vm1 = vcmp.eq.s32.totalorder %v9666_v8, 1  ;;  %vm4108_vm14 = vcmp.eq.s32.totalorder %v10027_v1, 22  ;;  %v3335_v15 = vrot.slane %v10081_v42, 4  ;;  %v12182_v60 = vld [vmem:[#allocation39_spill] sm:$0xff]  ;;  %v12185_v59 = vld [vmem:[#allocation229_spill] sm:$0xff] }
 0x5b1   : > { %v3540_v19 = vmax.f32 %v12180_v23, %v3538_v13  ;;  %v10121_v54 = vpop.permute.xlu1 %3586  ;;  %vm3594_vm3 = vcmp.eq.s32.totalorder %v12182_v60, 1  ;;  %v5433_v28 = vpack.c.bf16 %v4530_v40, %v4529_v25  ;;  %vm3940_vm6 = vcmp.eq.s32.totalorder %v10030_v18, 1  ;;  %v12188_v23 = vld [vmem:[#allocation78_spill] sm:$0xff] }
 0x5b2   : > { %v3403_v33 = vmax.f32 %v3401_v6, %v3402_v14  ;;  %vm3736_vm12 = vcmp.eq.s32.totalorder %v9696_v62, 1  ;;  %vm3738_vm0 = vcmp.eq.s32.totalorder %v9732_v39, 1  ;;  %v10130_v48 = vmax.f32 %v3267_v41, %v3268_v46  ;;  %v12184_v46 = vld [vmem:[#allocation84_spill] sm:$0xff] }
 0x5b3   : > { %v10125_v61 = vmax.f32 %v3539_v3, %v3540_v19  ;;  %5430 = vmatpush3.bf16.msra.mxu0 %v5429_v31  ;;  %4076 = vperm.xlu1 %5536, %v4053_v7   ;;  %v3742_v43 = vsel %vm3734_vm1, %v12139_v45, 0.0  ;;  %v4116_v44 = vsel %vm4108_vm14, 1, %v12155_v9  ;;  %v3746_v34 = vsel %vm3738_vm0, %v12058_v30, 0.0  ;;  %v4508_v19 = vld [vmem:[#allocation9 + $0x28] sm:$0xff] }
 0x5b4   : > { %5432 = vmatprep.subr.bf16.mxu0 %v5431_v32  ;;  %vm4110_vm5 = vcmp.eq.s32.totalorder %v10051_v29, 22  ;;  %v3750_v18 = vmax.f32 %v3742_v43, %v3746_v34  ;;  %vm3944_vm10 = vcmp.eq.s32.totalorder %v3930_v47, 1  ;;  %v10144_v39 = vsel %vm3940_vm6, %v12115_v27, 0.0 }
 0x5b5   : > { %v10141_v62 = vpop.permute.xlu1 %3851  ;;  %v3744_v8 = vsel %vm3736_vm12, %v12138_v16, 0.0  ;;  %v10148_v41 = vsel %vm3944_vm10, %v12057_v37, 0.0  ;;  %v3748_v36 = vsel %vm3740_vm8, %v12136_v5, 0.0  ;;  %v3404_v35 = vrot.slane %v3403_v33, 4 }
 0x5b6   : > { %v12183_v14 = vmax.f32 %v9918_v58, %v9906_v63  ;;  %v3956_v55 = vmax.f32 %v10144_v39, %v10148_v41  ;;  %v3752_v3 = vmax.f32 %v3744_v8, %v3748_v36  ;;  %v10159_v13 = vsel %vm3590_vm4, %v12116_v53, 0.0  ;;  %v12186_v63 = vld [vmem:[#allocation190_spill] sm:$0xff] }
 0x5b7   : > { %5434 = vmatpush3.bf16.msra.mxu0 %v5433_v28  ;;  %v10164_v31 = vsel %vm3592_vm2, %v12057_v37, 0.0  ;;  %vm3453_vm8 = vcmp.eq.s32.totalorder %v12184_v46, 1  ;;  %vm3457_vm1 = vcmp.eq.s32.totalorder %v12185_v59, 1  ;;  %4127 = vperm.xlu1 %5536, %v4116_v44   ;;  %vm3455_vm14 = vcmp.eq.s32.totalorder %v12186_v63, 1 }
 0x5b8   : > { %v3753_v12 = vmax.f32 %v12183_v14, %v3750_v18  ;;  %v4118_v58 = vsel %vm4110_vm5, 1, %v12155_v9  ;;  %vm4112_vm6 = vcmp.eq.s32.totalorder %v9911_v50, 22  ;;  %v12187_v4 = vmax.f32 %v9931_v56, %v9926_v20  ;;  %v4507_v20 = vld [vmem:[#allocation9 + $0x20] sm:$0xff]  ;;  %v4512_v18 = vld [vmem:[#allocation9 + $0x48] sm:$0xff] }
 0x5b9   : > { %v10176_v32 = vpop.permute.xlu1 %3857  ;;  %v3336_v25 = vmax.f32 %v10081_v42, %v3335_v15  ;;  %v10182_v40 = vsel %vm3594_vm3, %v12107_v2, 0.0  ;;  %vm3451_vm4 = vcmp.eq.s32.totalorder %v12188_v23, 1  ;;  %vm3803_vm2 = vcmp.eq.s32.totalorder %v9833_v0, 1 }
 0x5ba   : > { %v3754_v6 = vmax.f32 %v12187_v4, %v3752_v3  ;;  %4648 = vmatmul.mubr.f32.vlgmr.msra.gmra.mrb[18].mxu0 %v4503_v22  ;;  %v3270_v38 = vrot.slane %v10130_v48, 1  ;;  %v3405_v7 = vmax.f32 %v3403_v33, %v3404_v35  ;;  %v3465_v56 = vsel %vm3457_vm1, %v12136_v5, 0.0  ;;  %v12189_v22 = vld [vmem:[#allocation241_spill] sm:$0xff] }
 0x5bb   : > { %4652 = vmatprep.mubr.f32.mxu0 %v4508_v19  ;;  %v3461_v42 = vsel %vm3453_vm8, %v12138_v16, 0.0  ;;  %v3463_v15 = vsel %vm3455_vm14, %v12058_v30, 0.0  ;;  %4133 = vperm.xlu1 %5536, %v4118_v58   ;;  %v4120_v0 = vsel %vm4112_vm6, 1, %v12155_v9  ;;  %vm3807_vm3 = vcmp.eq.s32.totalorder %v9938_v26, 1 }
 0x5bc   : > { %v3755_v47 = vmax.f32 %v3753_v12, %v3754_v6  ;;  %v3811_v60 = vsel %vm3803_vm2, %v12139_v45, 0.0  ;;  %vm3805_vm12 = vcmp.eq.s32.totalorder %v9888_v11, 1  ;;  %v3815_v28 = vsel %vm3807_vm3, %v12058_v30, 0.0  ;;  %v12191_v6 = vld [vmem:[#allocation236_spill] sm:$0xff] }
 0x5bd   : > { %v10201_v43 = vpop.permute.xlu1 %3863  ;;  %v3459_v44 = vsel %vm3451_vm4, %v12139_v45, 0.0  ;;  %v3469_v34 = vmax.f32 %v3461_v42, %v3465_v56  ;;  %vm4114_vm0 = vcmp.eq.s32.totalorder %v9979_v51, 22  ;;  %v3819_v8 = vmax.f32 %v3811_v60, %v3815_v28  ;;  %v12194_v56 = vld [vmem:[#allocation237_spill] sm:$0xff]  ;;  %v12197_v42 = vld [vmem:[#allocation239_spill] sm:$0xff] }
 0x5be   : > { %v3756_v33 = vrot.slane %v3755_v47, 4  ;;  %4653 = vmatmul.mubr.f32.gmra.mrb[20].mxu0 %v4507_v20  ;;  %v3337_v26 = vrot.slane %v3336_v25, 2  ;;  %v3406_v36 = vrot.slane %v3405_v7, 2  ;;  %v3467_v35 = vmax.f32 %v3459_v44, %v3463_v15 }
 0x5bf   : > { %4657 = vmatprep.mubr.f32.mxu0 %v4512_v18  ;;  %vm3809_vm5 = vcmp.eq.s32.totalorder %v12189_v22, 1  ;;  %v3604_v14 = vmax.f32 %v10106_v21, %v10164_v31  ;;  %4139 = vperm.xlu1 %5536, %v4120_v0   ;;  %v3813_v12 = vsel %vm3805_vm12, %v12138_v16, 0.0  ;;  %v3822_v3 = vmax.f32 %v3818_v57, %v3819_v8  ;;  %v12190_v31 = vld [vmem:[#allocation232_spill] sm:$0xff]  ;;  %v12200_v0 = vld [vmem:[#allocation231_spill] sm:$0xff] }
 0x5c0   : > { %v3817_v46 = vsel %vm3809_vm5, %v12136_v5, 0.0  ;;  %v3757_v59 = vmax.f32 %v3755_v47, %v3756_v33  ;;  %v4122_v63 = vsel %vm4114_vm0, 1, %v12155_v9  ;;  %vm4177_vm10 = vcmp.eq.s32.totalorder %v10027_v1, 23  ;;  %v12195_v1 = vld [vmem:[#allocation230_spill] sm:$0xff] }
 0x5c1   : > { %v3821_v58 = vmax.f32 %v3813_v12, %v3817_v46  ;;  %v3870_v4 = vpop.permute.xlu1 %3869  ;;  %v10220_v21 = vmax.f32 %v10130_v48, %v3270_v38  ;;  %v3606_v11 = vmax.f32 %v10159_v13, %v10182_v40  ;;  %v12192_v23 = vmax.f32 %v12190_v31, %v12191_v6  ;;  %v12198_v48 = vld [vmem:[#allocation195_spill] sm:$0xff] }
 0x5c2   : > { %vm3589_vm8 = vcmp.eq.s32.totalorder %v12193_v52, 1  ;;  %v10228_v57 = vmax.f32 %v3336_v25, %v3337_v26  ;;  %v10230_v19 = vmax.f32 %v3405_v7, %v3406_v36  ;;  %v12196_v20 = vmax.f32 %v12194_v56, %v12195_v1 }
 0x5c3   : > { %v3471_v17 = vmax.f32 %v12192_v23, %v3469_v34  ;;  %v12199_v38 = vmax.f32 %v12197_v42, %v12198_v48  ;;  %vm3657_vm1 = vcmp.eq.s32.totalorder %v12200_v0, 1  ;;  %4145 = vperm.xlu1 %5536, %v4122_v63   ;;  %v4185_v13 = vsel %vm4177_vm10, 1, %v12155_v9  ;;  %v12206_v0 = vld [vmem:[#allocation131_spill] sm:$0xff] }
 0x5c4   : > { %v3470_v47 = vmax.f32 %v12196_v20, %v3467_v35  ;;  %vm3591_vm14 = vcmp.eq.s32.totalorder %v10066_v10, 1  ;;  %vm3593_vm6 = vcmp.eq.s32.totalorder %v10092_v49, 1  ;;  %v3758_v25 = vrot.slane %v3757_v59, 2  ;;  %v12203_v20 = vld [vmem:[#allocation138_spill] sm:$0xff] }
 0x5c5   : > { %v3823_v15 = vmax.f32 %v12199_v38, %v3821_v58  ;;  %v3597_v7 = vsel %vm3589_vm8, %v12139_v45, 0.0  ;;  %v3601_v33 = vsel %vm3593_vm6, %v12058_v30, 0.0  ;;  %v10244_v60 = vpop.permute.xlu1 %3637  ;;  %vm4179_vm4 = vcmp.eq.s32.totalorder %v10051_v29, 23 }
 0x5c6   : > { %v3472_v28 = vmax.f32 %v3470_v47, %v3471_v17  ;;  %v3605_v44 = vmax.f32 %v3597_v7, %v3601_v33  ;;  %vm3595_vm2 = vcmp.eq.s32.totalorder %v10121_v54, 1  ;;  %v3339_v34 = vrot.slane %v10228_v57, 1  ;;  %v12204_v47 = vld [vmem:[#allocation101_spill] sm:$0xff]  ;;  %v12207_v7 = vld [vmem:[#allocation108_spill] sm:$0xff]  ;;  %v12208_v33 = vld [vmem:[#allocation242_spill] sm:$0xff] }
 0x5c7   : > { %v3824_v40 = vmax.f32 %v3822_v3, %v3823_v15  ;;  %v3599_v10 = vsel %vm3591_vm14, %v12138_v16, 0.0  ;;  %v3603_v49 = vsel %vm3595_vm2, %v12136_v5, 0.0  ;;  %v3408_v8 = vrot.slane %v10230_v19, 1  ;;  %4196 = vperm.xlu1 %5536, %v4185_v13   ;;  %v12201_v3 = vld [vmem:[#allocation240_spill] sm:$0xff] }
 0x5c8   : > { %v10255_v26 = vsel %vm3657_vm1, %v12115_v27, 0.0  ;;  %vm4181_vm3 = vcmp.eq.s32.totalorder %v9911_v50, 23  ;;  %v3607_v29 = vmax.f32 %v3599_v10, %v3603_v49  ;;  %v3759_v36 = vmax.f32 %v3757_v59, %v3758_v25 }
 0x5c9   : > { %v3825_v18 = vrot.slane %v3824_v40, 4  ;;  %v4187_v54 = vsel %vm4179_vm4, 1, %v12155_v9  ;;  %vm3872_vm12 = vcmp.eq.s32.totalorder %v10141_v62, 1  ;;  %v3644_v22 = vpop.permute.xlu1 %3643  ;;  %v3473_v12 = vrot.slane %v3472_v28, 4 }
 0x5ca   : > { %vm3659_vm0 = vcmp.eq.s32.totalorder %v12201_v3, 1  ;;  %v3608_v46 = vmax.f32 %v3604_v14, %v3605_v44  ;;  %v3609_v63 = vmax.f32 %v3606_v11, %v3607_v29  ;;  %v4189_v58 = vsel %vm4181_vm3, 1, %v12155_v9  ;;  %v12202_v11 = vld [vmem:[#allocation124_spill] sm:$0xff] }
 0x5cb   : > { %v3826_v35 = vmax.f32 %v3824_v40, %v3825_v18  ;;  %vm3874_vm5 = vcmp.eq.s32.totalorder %v10176_v32, 1  ;;  %vm3876_vm10 = vcmp.eq.s32.totalorder %v10201_v43, 1  ;;  %4202 = vperm.xlu1 %5536, %v4187_v54   ;;  %vm4183_vm8 = vcmp.eq.s32.totalorder %v9979_v51, 23 }
 0x5cc   : > { %v3610_v50 = vmax.f32 %v3608_v46, %v3609_v63  ;;  %v3880_v59 = vsel %vm3872_vm12, %v12139_v45, 0.0  ;;  %v3884_v62 = vsel %vm3876_vm10, %v12058_v30, 0.0  ;;  %v3760_v6 = vrot.slane %v3759_v36, 1  ;;  %v4319_v63 = vld [vmem:[%s5905_s23 + $0x180] sm:$0xff] }
 0x5cd   : > { %v3827_v31 = vrot.slane %v3826_v35, 2  ;;  %v3888_v17 = vmax.f32 %v3880_v59, %v3884_v62  ;;  %vm3878_vm1 = vcmp.eq.s32.totalorder %v3870_v4, 1  ;;  %v3650_v14 = vpop.permute.xlu1 %3649  ;;  %vm3661_vm14 = vcmp.eq.s32.totalorder %v12202_v11, 1  ;;  %v12210_v11 = vld [vmem:[#allocation117_spill] sm:$0xff] }
 0x5ce   : > { %v3542_v52 = vrot.slane %v10125_v61, 4  ;;  %v3882_v32 = vsel %vm3874_vm5, %v12138_v16, 0.0  ;;  %v3886_v43 = vsel %vm3878_vm1, %v12136_v5, 0.0  ;;  %v3611_v1 = vrot.slane %v3610_v50, 4 }
 0x5cf   : > { %v3828_v23 = vmax.f32 %v3826_v35, %v3827_v31  ;;  %v12205_v42 = vmax.f32 %v12203_v20, %v12204_v47  ;;  %v3890_v38 = vmax.f32 %v3882_v32, %v3886_v43  ;;  %v3474_v15 = vmax.f32 %v3472_v28, %v3473_v12  ;;  %4208 = vperm.xlu1 %5536, %v4189_v58   ;;  %v4320_v58 = vld [vmem:[%s5905_s23 + $0x188] sm:$0xff]  ;;  %v4303_v31 = vld [vmem:[%s5905_s23 + $0x100] sm:$0xff] }
 0x5d0   : > { %v3667_v4 = vsel %vm3659_vm0, %v12116_v53, 0.0  ;;  %vm3663_vm6 = vcmp.eq.s32.totalorder %v12206_v0, 1  ;;  %v4191_v13 = vsel %vm4183_vm8, 1, %v12155_v9  ;;  %v3761_v25 = vmax.f32 %v3759_v36, %v3760_v6 }
 0x5d1   : > { %v3829_v56 = vrot.slane %v3828_v23, 1  ;;  %v3891_v48 = vmax.f32 %v12205_v42, %v3888_v17  ;;  %v12209_v44 = vmax.f32 %v12207_v7, %v12208_v33  ;;  %vm3658_vm4 = vcmp.eq.s32.totalorder %v10244_v60, 1  ;;  %v3656_v28 = vpop.permute.xlu1 %3655  ;;  %v4321_v17 = vld [vmem:[%s5905_s23 + $0x190] sm:$0xff]  ;;  %v4323_v33 = vld [vmem:[%s5905_s23 + $0x1a0] sm:$0xff] }
 0x5d2   : > { %v3669_v10 = vsel %vm3661_vm14, %v12057_v37, 0.0  ;;  %v3543_v49 = vmax.f32 %v10125_v61, %v3542_v52  ;;  %vm3660_vm2 = vcmp.eq.s32.totalorder %v3644_v22, 1  ;;  %vm3662_vm3 = vcmp.eq.s32.totalorder %v3650_v14, 1  ;;  %v4322_v14 = vld [vmem:[%s5905_s23 + $0x198] sm:$0xff] }
 0x5d3   : > { %v3830_v40 = vmax.f32 %v3828_v23, %v3829_v56  ;;  %v3892_v18 = vmax.f32 %v12209_v44, %v3890_v38  ;;  %v3671_v9 = vsel %vm3663_vm6, %v12107_v2, 0.0  ;;  %v3612_v29 = vmax.f32 %v3610_v50, %v3611_v1  ;;  %4214 = vperm.xlu1 %5536, %v4191_v13   ;;  %v4304_v23 = vld [vmem:[%s5905_s23 + $0x108] sm:$0xff] }
 0x5d4   : > { %v3475_v60 = vrot.slane %v3474_v15, 2  ;;  %v3666_v54 = vsel %vm3658_vm4, %v12139_v45, 0.0  ;;  %v3670_v61 = vsel %vm3662_vm3, %v12058_v30, 0.0  ;;  %vm3664_vm12 = vcmp.eq.s32.totalorder %v3656_v28, 1  ;;  %v4324_v44 = vld [vmem:[%s5905_s23 + $0x1a8] sm:$0xff] }
 0x5d5   : > { %v10291_v51 = vsel %vm2001_vm15, %v3761_v25, %v3830_v40  ;;  %v3893_v36 = vmax.f32 %v3891_v48, %v3892_v18  ;;  %v3668_v22 = vsel %vm3660_vm2, %v12138_v16, 0.0  ;;  %v3674_v12 = vmax.f32 %v3666_v54, %v3670_v61  ;;  %v3921_v46 = vpop.permute.xlu1 %3920  ;;  %v4305_v25 = vld [vmem:[%s5905_s23 + $0x110] sm:$0xff]  ;;  %v4306_v40 = vld [vmem:[%s5905_s23 + $0x118] sm:$0xff]  ;;  %v4307_v54 = vld [vmem:[%s5905_s23 + $0x120] sm:$0xff] }
 0x5d6   : > { %v3672_v3 = vsel %vm3664_vm12, %v12136_v5, 0.0  ;;  %v3673_v50 = vmax.f32 %v10255_v26, %v3669_v10  ;;  %v3544_v59 = vrot.slane %v3543_v49, 2  ;;  %v3675_v62 = vmax.f32 %v3667_v4, %v3671_v9  ;;  %v4308_v61 = vld [vmem:[%s5905_s23 + $0x128] sm:$0xff] }
 0x5d7   : > { %v3894_v35 = vrot.slane %v3893_v36, 4  ;;  %v3676_v6 = vmax.f32 %v3668_v22, %v3672_v3  ;;  %v12211_v52 = vrot.slane %v12210_v11, 1  ;;  %v3340_v43 = vmax.f32 %v10228_v57, %v3339_v34  ;;  %v4325_v22 = vld [vmem:[%s5905_s23 + $0x1b0] sm:$0xff] }
 0x5d8   : > { %v3613_v56 = vrot.slane %v3612_v29, 2  ;;  %v3409_v26 = vmax.f32 %v10230_v19, %v3408_v8  ;;  %v3476_v20 = vmax.f32 %v3474_v15, %v3475_v60  ;;  %v3677_v47 = vmax.f32 %v3673_v50, %v3674_v12  ;;  %v3936_v19 = vpop.permute.xlu0 %3935  ;;  %v4326_v12 = vld [vmem:[%s5905_s23 + $0x1b8] sm:$0xff] }
 0x5d9   : > { %v3202_v32 = vmax.f32 %v12210_v11, %v12211_v52  ;;  %v3895_v1 = vmax.f32 %v3893_v36, %v3894_v35  ;;  %v3678_v42 = vmax.f32 %v3675_v62, %v3676_v6  ;;  %v3927_v38 = vpop.permute.xlu1 %3926  ;;  %v5371_v4 = vpack.c.bf16 %v4320_v58, %v4319_v63  ;;  %v4309_v11 = vld [vmem:[%s5905_s23 + $0x130] sm:$0xff]  ;;  %v4310_v52 = vld [vmem:[%s5905_s23 + $0x138] sm:$0xff] }
 0x5da   : > { %v5373_v0 = vpack.c.bf16 %v4304_v23, %v4303_v31  ;;  %v5375_v13 = vpack.c.bf16 %v4322_v14, %v4321_v17  ;;  %v3545_v34 = vmax.f32 %v3543_v49, %v3544_v59  ;;  %v3614_v8 = vmax.f32 %v3612_v29, %v3613_v56 }
 0x5db   : > { %v3896_v48 = vrot.slane %v3895_v1, 2  ;;  %v3686_v57 = vsel %vm2001_vm15, %v3202_v32, %v10220_v21  ;;  %v3679_v7 = vmax.f32 %v3677_v47, %v3678_v42  ;;  %5372 = vmatprep.subr.bf16.mxu1 %v5371_v4  ;;  %vm3941_vm0 = vcmp.eq.s32.totalorder %v3921_v46, 1 }
 0x5dc   : > { %v3687_v18 = vsel %vm2003_vm13, %v3686_v57, %v3340_v43  ;;  %5374 = vmatpush3.bf16.msra.mxu1 %v5373_v0  ;;  %v5377_v21 = vpack.c.bf16 %v4306_v40, %v4305_v25  ;;  %v3477_v49 = vrot.slane %v3476_v20, 1  ;;  %vm3942_vm15 = vcmp.eq.s32.totalorder %v10079_v24, 1  ;;  %v4311_v24 = vld [vmem:[%s5905_s23 + $0x140] sm:$0xff]  ;;  %v4329_v57 = vld [vmem:[%s5905_s23 + $0x1d0] sm:$0xff] }
 0x5dd   : > { %v3897_v15 = vmax.f32 %v3895_v1, %v3896_v48  ;;  %v3688_v28 = vsel %vm2005_vm9, %v3687_v18, %v3409_v26  ;;  %v3680_v10 = vrot.slane %v3679_v7, 4  ;;  %v3933_v36 = vpop.permute.xlu1 %3932  ;;  %5376 = vmatprep.subr.bf16.mxu1 %v5375_v13  ;;  %v5379_v60 = vpack.c.bf16 %v4324_v44, %v4323_v33  ;;  %v4327_v1 = vld [vmem:[%s5905_s23 + $0x1c0] sm:$0xff]  ;;  %v4328_v26 = vld [vmem:[%s5905_s23 + $0x1c8] sm:$0xff] }
 0x5de   : > { %v3546_v29 = vrot.slane %v3545_v34, 1  ;;  %vm3946_vm5 = vcmp.eq.s32.totalorder %v3936_v19, 1  ;;  %vm3945_vm10 = vcmp.eq.s32.totalorder %v3933_v36, 1  ;;  %v3615_v3 = vrot.slane %v3614_v8, 1  ;;  %v4312_v13 = vld [vmem:[%s5905_s23 + $0x148] sm:$0xff] }
 0x5df   : > { %v3898_v9 = vrot.slane %v3897_v15, 1  ;;  %v3681_v35 = vmax.f32 %v3679_v7, %v3680_v10  ;;  %v3949_v58 = vsel %vm3941_vm0, %v12139_v45, 0.0  ;;  %v3953_v31 = vsel %vm3945_vm10, %v12058_v30, 0.0 }
 0x5e0   : > { %vm3943_vm8 = vcmp.eq.s32.totalorder %v3927_v38, 1  ;;  %v3957_v59 = vmax.f32 %v3949_v58, %v3953_v31  ;;  %5378 = vmatpush3.bf16.msra.mxu1 %v5377_v21  ;;  %v5381_v62 = vpack.c.bf16 %v4308_v61, %v4307_v54  ;;  %v3478_v6 = vmax.f32 %v3476_v20, %v3477_v49  ;;  %v4331_v21 = vld [vmem:[%s5905_s23 + $0x1e0] sm:$0xff]  ;;  %v4332_v49 = vld [vmem:[%s5905_s23 + $0x1e8] sm:$0xff]  ;;  %v4317_v58 = vld [vmem:[%s5905_s23 + $0x170] sm:$0xff] }
 0x5e1   : > { %v3899_v63 = vmax.f32 %v3897_v15, %v3898_v9  ;;  %v3682_v50 = vrot.slane %v3681_v35, 2  ;;  %v3954_v23 = vsel %vm3946_vm5, %v12107_v2, 0.0  ;;  %v3939_v14 = vpop.permute.xlu1 %3938  ;;  %5380 = vmatprep.subr.bf16.mxu1 %v5379_v60  ;;  %v5383_v46 = vpack.c.bf16 %v4326_v12, %v4325_v22  ;;  %v4313_v15 = vld [vmem:[%s5905_s23 + $0x150] sm:$0xff]  ;;  %v4315_v54 = vld [vmem:[%s5905_s23 + $0x160] sm:$0xff]  ;;  %v4316_v61 = vld [vmem:[%s5905_s23 + $0x168] sm:$0xff] }
 0x5e2   : > { %v3547_v32 = vmax.f32 %v3545_v34, %v3546_v29  ;;  %v3960_v56 = vmax.f32 %v3956_v55, %v3957_v59  ;;  %vm3947_vm1 = vcmp.eq.s32.totalorder %v3939_v14, 1  ;;  %v3616_v20 = vmax.f32 %v3614_v8, %v3615_v3  ;;  %v4330_v34 = vld [vmem:[%s5905_s23 + $0x1d8] sm:$0xff] }
 0x5e3   : > { %v10332_v17 = vsel %vm2003_vm13, %v10291_v51, %v3899_v63  ;;  %v3683_v43 = vmax.f32 %v3681_v35, %v3682_v50  ;;  %v3950_v51 = vsel %vm3942_vm15, %v12116_v53, 0.0  ;;  %v3951_v47 = vsel %vm3943_vm8, %v12138_v16, 0.0  ;;  %v4333_v35 = vld [vmem:[%s5905_s23 + $0x1f0] sm:$0xff]  ;;  %v4334_v22 = vld [vmem:[%s5905_s23 + $0x1f8] sm:$0xff] }
 0x5e4   : > { %v3955_v42 = vsel %vm3947_vm1, %v12136_v5, 0.0  ;;  %v3958_v48 = vmax.f32 %v3950_v51, %v3954_v23  ;;  %5382 = vmatpush3.bf16.msra.mxu1 %v5381_v62  ;;  %v5385_v55 = vpack.c.bf16 %v4310_v52, %v4309_v11  ;;  %vm12212_vm13 = vcmask 1043456   ;;  %v4318_v31 = vld [vmem:[%s5905_s23 + $0x178] sm:$0xff]  ;;  %v4563_v62 = vld [vmem:[%s5910_s20 + $0x180] sm:$0xff]  ;;  %v3987_v23 = vpop.permute.xlu0 %3986 }
 0x5e5   : > { %v3684_v39 = vrot.slane %v3683_v43, 1  ;;  %v3959_v41 = vmax.f32 %v3951_v47, %v3955_v42  ;;  %v3689_v4 = vsel %vm12212_vm13, %v3688_v28, %v3478_v6  ;;  %5384 = vmatprep.subr.bf16.mxu1 %v5383_v46  ;;  %v5387_v0 = vpack.c.bf16 %v4328_v26, %v4327_v1  ;;  %v4314_v28 = vld [vmem:[%s5905_s23 + $0x158] sm:$0xff]  ;;  %v4564_v6 = vld [vmem:[%s5910_s20 + $0x188] sm:$0xff]  ;;  %v10376_v1 = vld [vmem:[%s5900_s16] sm:$0xff]  ;;  %s5731_s23 = smov 96   ;;  %v10385_v42 = vpop.permute.xlu1 %3989  ;;  %s5732_s16 = smov 32  }
 0x5e6   : > { %v3690_v38 = vsel %vm2008_vm11, %v3689_v4, %v3547_v32  ;;  %vm12213_vm14 = vcmask 1046528   ;;  %v5389_v18 = vpack.c.bf16 %v4312_v13, %v4311_v24  ;;  %v5391_v8 = vpack.c.bf16 %v4330_v34, %v4329_v57  ;;  %v4511_v50 = vld [vmem:[#allocation9 + $0x40] sm:$0xff]  ;;  %v12214_v32 = vld [vmem:[#allocation22_spill] sm:$0xff] }
 0x5e7   : > { %v3685_v25 = vmax.f32 %v3683_v43, %v3684_v39  ;;  %v3961_v40 = vmax.f32 %v3958_v48, %v3959_v41  ;;  %v3691_v7 = vsel %vm2010_vm7, %v3690_v38, %v3616_v20  ;;  %v5393_v36 = vpack.c.bf16 %v4314_v28, %v4313_v15  ;;  %4658 = vmatmul.mubr.f32.gmra.mrb[22].mxu0 %v4511_v50 }
 0x5e8   : > { %5386 = vmatpush3.bf16.msra.mxu1 %v5385_v55  ;;  %v5395_v60 = vpack.c.bf16 %v4332_v49, %v4331_v21  ;;  %v5397_v3 = vpack.c.bf16 %v4316_v61, %v4315_v54  ;;  %v5399_v63 = vpack.c.bf16 %v4334_v22, %v4333_v35  ;;  %v5401_v46 = vpack.c.bf16 %v4318_v31, %v4317_v58 }
 0x5e9   : > { %v10355_v33 = vsel %vm12213_vm14, %v3691_v7, %v3685_v25  ;;  %v3962_v44 = vmax.f32 %v3960_v56, %v3961_v40  ;;  %5388 = vmatprep.subr.bf16.mxu1 %v5387_v0  ;;  %v5435_v11 = vpack.c.bf16 %v4564_v6, %v4563_v62  ;;  %v4337_v43 = vsub.s32 2, %v12214_v32  ;;  %v3993_v56 = vpop.permute.xlu0 %3992  ;;  %v3996_v39 = vpop.permute.xlu1 %3995 }
 0x5ea   : > { %v4253_v19 = vmax.f32 %v10355_v33, 0.0  ;;  %vm4009_vm4 = vcmp.eq.s32.totalorder %v3987_v23, 1  ;;  %vm4011_vm3 = vcmp.eq.s32.totalorder %v3993_v56, 1  ;;  %vm4012_vm14 = vcmp.eq.s32.totalorder %v3996_v39, 1 }
 0x5eb   : > { %v3963_v10 = vrot.slane %v3962_v44, 4  ;;  %v10379_v26 = vrot.slane %v10376_v1, %v4337_v43  ;;  %v4019_v21 = vsel %vm4011_vm3, %v12116_v53, 0.0  ;;  %vm4010_vm3 = vcmp.eq.s32.totalorder %v10385_v42, 1 }
 0x5ec   : > { %5390 = vmatpush3.bf16.msra.mxu1 %v5389_v18  ;;  %v4018_v6 = vsel %vm4010_vm3, %v12139_v45, 0.0  ;;  %vm12220_vm3 = vcmask 1043456  }
 0x5ed   : > { %v3964_v9 = vmax.f32 %v3962_v44, %v3963_v10  ;;  %5392 = vmatprep.subr.bf16.mxu1 %v5391_v8  ;;  %4580 = vrot.lane.b32.xlu0 %v10379_v26, %s5731_s23  ;;  %v3999_v51 = vpop.permute.xlu0 %3998  ;;  %v4017_v8 = vsel %vm4009_vm4, %v12115_v27, 0.0 }
 0x5ef   : > { %v3965_v29 = vrot.slane %v3964_v9, 2 }
 0x5f0   : > { %5394 = vmatpush3.bf16.msra.mxu1 %v5393_v36 }
 0x5f1   : > { %v3966_v12 = vmax.f32 %v3964_v9, %v3965_v29  ;;  %5396 = vmatprep.subr.bf16.mxu1 %v5395_v60  ;;  %v4005_v20 = vpop.permute.xlu0 %4004 }
 0x5f2   : > { %vm4015_vm6 = vcmp.eq.s32.totalorder %v4005_v20, 1 }
 0x5f3   : > { %v3967_v59 = vrot.slane %v3966_v12, 1  ;;  %v4023_v18 = vsel %vm4015_vm6, %v12107_v2, 0.0 }
 0x5f4   : > { %5398 = vmatpush3.bf16.msra.mxu1 %v5397_v3  ;;  %v4027_v9 = vmax.f32 %v4019_v21, %v4023_v18  ;;  %v4566_v21 = vld [vmem:[%s5910_s20 + $0x198] sm:$0xff] }
 0x5f5   : > { %v3968_v14 = vmax.f32 %v3966_v12, %v3967_v59  ;;  %5400 = vmatprep.subr.bf16.mxu1 %v5399_v63  ;;  %v10383_v47 = vpop.permute.xlu0 %4055  ;;  %v4020_v63 = vsel %vm4012_vm14, %v12138_v16, 0.0 }
 0x5f6   : > { %vm4078_vm5 = vcmp.eq.s32.totalorder %v10383_v47, 1 }
 0x5f7   : > { %v10372_v52 = vsel %vm2005_vm9, %v10332_v17, %v3968_v14  ;;  %vm4013_vm9 = vcmp.eq.s32.totalorder %v3999_v51, 1 }
 0x5f8   : > { %5402 = vmatpush3.bf16.msra.mxu1 %v5401_v46  ;;  %v10390_v44 = vsel %vm4013_vm9, %v12057_v37, 0.0 }
 0x5f9   : > { %5436 = vmatprep.subr.bf16.mxu1 %v5435_v11  ;;  %v4062_v17 = vpop.permute.xlu0 %4061  ;;  %v4025_v49 = vmax.f32 %v4017_v8, %v10390_v44  ;;  %v4548_v44 = vld [vmem:[%s5910_s20 + $0x108] sm:$0xff] }
 0x5fa   : > { %vm4080_vm12 = vcmp.eq.s32.totalorder %v4062_v17, 1 }
 0x5fb   : > { %v4088_v36 = vsel %vm4080_vm12, %v12116_v53, 0.0 }
 0x5fd   : > { %v4068_v48 = vpop.permute.xlu0 %4067 }
 0x5fe   : > { %vm4082_vm0 = vcmp.eq.s32.totalorder %v4068_v48, 1  ;;  %v4086_v48 = vsel %vm4078_vm5, %v12115_v27, 0.0 }
 0x5ff   : > { %v4090_v60 = vsel %vm4082_vm0, %v12057_v37, 0.0 }
 0x601   : > { %v4074_v41 = vpop.permute.xlu0 %4073 }
 0x602   : > { %vm4084_vm2 = vcmp.eq.s32.totalorder %v4074_v41, 1 }
 0x603   : > { %v4092_v15 = vsel %vm4084_vm2, %v12107_v2, 0.0 }
 0x604   : > { %v4096_v54 = vmax.f32 %v4088_v36, %v4092_v15 }
 0x605   : > { %v10387_v4 = vpop.permute.xlu0 %4124 }
 0x606   : > { %vm4147_vm13 = vcmp.eq.s32.totalorder %v10387_v4, 1 }
 0x609   : > { %v4131_v13 = vpop.permute.xlu0 %4130 }
 0x60a   : > { %vm4149_vm15 = vcmp.eq.s32.totalorder %v4131_v13, 1  ;;  %v4094_v13 = vmax.f32 %v4086_v48, %v4090_v60 }
 0x60b   : > { %v4157_v61 = vsel %vm4149_vm15, %v12116_v53, 0.0 }
 0x60d   : > { %v4137_v25 = vpop.permute.xlu0 %4136 }
 0x60e   : > { %vm4151_vm6 = vcmp.eq.s32.totalorder %v4137_v25, 1 }
 0x60f   : > { %v4159_v51 = vsel %vm4151_vm6, %v12057_v37, 0.0 }
 0x611   : > { %v4143_v34 = vpop.permute.xlu0 %4142 }
 0x612   : > { %vm4153_vm8 = vcmp.eq.s32.totalorder %v4143_v34, 1 }
 0x613   : > { %v4161_v22 = vsel %vm4153_vm8, %v12107_v2, 0.0 }
 0x614   : > { %v4165_v39 = vmax.f32 %v4157_v61, %v4161_v22 }
 0x615   : > { %v10395_v28 = vpop.permute.xlu0 %4193 }
 0x619   : > { %v10406_v12 = vpop.permute.xlu0 %4199 }
 0x61a   : > { %vm4218_vm6 = vcmp.eq.s32.totalorder %v10406_v12, 1 }
 0x61c   : > { %v4002_v55 = vpop.permute.xlu1 %4001 }
 0x61d   : > { %vm4014_vm9 = vcmp.eq.s32.totalorder %v4002_v55, 1  ;;  %v10425_v41 = vpop.permute.xlu0 %4205 }
 0x61e   : > { %v4022_v58 = vsel %vm4014_vm9, %v12058_v30, 0.0  ;;  %vm4220_vm5 = vcmp.eq.s32.totalorder %v10425_v41, 1  ;;  %vm4216_vm9 = vcmp.eq.s32.totalorder %v10395_v28, 1 }
 0x61f   : > { %v4026_v46 = vmax.f32 %v4018_v6, %v4022_v58  ;;  %v4567_v6 = vld [vmem:[%s5910_s20 + $0x1a0] sm:$0xff] }
 0x621   : > { %v4008_v0 = vpop.permute.xlu1 %4007  ;;  %v4212_v4 = vpop.permute.xlu0 %4211 }
 0x622   : > { %vm4016_vm10 = vcmp.eq.s32.totalorder %v4008_v0, 1 }
 0x623   : > { %v4024_v35 = vsel %vm4016_vm10, %v12136_v5, 0.0 }
 0x624   : > { %v4028_v31 = vmax.f32 %v4020_v63, %v4024_v35  ;;  %v4550_v63 = vld [vmem:[%s5910_s20 + $0x118] sm:$0xff] }
 0x626   : > { %v4059_v24 = vpop.permute.xlu1 %4058  ;;  %v4030_v55 = vmax.f32 %v4027_v9, %v4028_v31  ;;  %v12216_v31 = vld [vmem:[#allocation27_spill] sm:$0xff] }
 0x627   : > { %vm4079_vm0 = vcmp.eq.s32.totalorder %v4059_v24, 1 }
 0x628   : > { %v4087_v11 = vsel %vm4079_vm0, %v12139_v45, 0.0 }
 0x62a   : > { %v4065_v38 = vpop.permute.xlu1 %4064 }
 0x62b   : > { %vm4081_vm4 = vcmp.eq.s32.totalorder %v4065_v38, 1  ;;  %v4155_v38 = vsel %vm4147_vm13, %v12115_v27, 0.0 }
 0x62c   : > { %v4089_v50 = vsel %vm4081_vm4, %v12138_v16, 0.0 }
 0x62e   : > { %v4071_v40 = vpop.permute.xlu1 %4070 }
 0x62f   : > { %vm4083_vm2 = vcmp.eq.s32.totalorder %v4071_v40, 1  ;;  %v4163_v40 = vmax.f32 %v4155_v38, %v4159_v51 }
 0x630   : > { %v4091_v59 = vsel %vm4083_vm2, %v12058_v30, 0.0 }
 0x631   : > { %v4095_v20 = vmax.f32 %v4087_v11, %v4091_v59 }
 0x632   : > { %v4077_v57 = vpop.permute.xlu1 %4076 }
 0x633   : > { %vm4085_vm1 = vcmp.eq.s32.totalorder %v4077_v57, 1  ;;  %v4029_v57 = vmax.f32 %v4025_v49, %v4026_v46  ;;  %v4098_v47 = vmax.f32 %v4094_v13, %v4095_v20  ;;  %v12215_v49 = vld [vmem:[#allocation24_spill] sm:$0xff]  ;;  %v12217_v46 = vld [vmem:[#allocation23_spill] sm:$0xff] }
 0x634   : > { %v4093_v3 = vsel %vm4085_vm1, %v12136_v5, 0.0  ;;  %vm4222_vm1 = vcmp.eq.s32.totalorder %v4212_v4, 1 }
 0x635   : > { %v4097_v23 = vmax.f32 %v4089_v50, %v4093_v3  ;;  %v4031_v18 = vmax.f32 %v4029_v57, %v4030_v55  ;;  %v4549_v3 = vld [vmem:[%s5910_s20 + $0x110] sm:$0xff] }
 0x636   : > { %v4128_v7 = vpop.permute.xlu1 %4127  ;;  %v5441_v55 = vpack.c.bf16 %v4550_v63, %v4549_v3 }
 0x637   : > { %vm4148_vm10 = vcmp.eq.s32.totalorder %v4128_v7, 1  ;;  %v4099_v25 = vmax.f32 %v4096_v54, %v4097_v23  ;;  %v4547_v7 = vld [vmem:[%s5910_s20 + $0x100] sm:$0xff]  ;;  %v4032_v58 = vrot.slane %v4031_v18, 4  ;;  %v4568_v23 = vld [vmem:[%s5910_s20 + $0x1a8] sm:$0xff] }
 0x638   : > { %v4156_v17 = vsel %vm4148_vm10, %v12139_v45, 0.0  ;;  %v5437_v54 = vpack.c.bf16 %v4548_v44, %v4547_v7  ;;  %v5443_v38 = vpack.c.bf16 %v4568_v23, %v4567_v6  ;;  %v4570_v7 = vld [vmem:[%s5910_s20 + $0x1b8] sm:$0xff]  ;;  %v4228_v44 = vsel %vm4220_vm5, %v12057_v37, 0.0 }
 0x639   : > { %v4100_v9 = vmax.f32 %v4098_v47, %v4099_v25  ;;  %v4551_v25 = vld [vmem:[%s5910_s20 + $0x120] sm:$0xff]  ;;  %v4033_v57 = vmax.f32 %v4031_v18, %v4032_v58  ;;  %v4569_v47 = vld [vmem:[%s5910_s20 + $0x1b0] sm:$0xff]  ;;  %v4230_v18 = vsel %vm4222_vm1, %v12107_v2, 0.0 }
 0x63a   : > { %v4134_v10 = vpop.permute.xlu1 %4133  ;;  %v5447_v4 = vpack.c.bf16 %v4570_v7, %v4569_v47  ;;  %v4553_v2 = vld [vmem:[%s5910_s20 + $0x130] sm:$0xff]  ;;  %v4578_v7 = vld [vmem:[%s5910_s20 + $0x1f8] sm:$0xff] }
 0x63b   : > { %vm4150_vm15 = vcmp.eq.s32.totalorder %v4134_v10, 1  ;;  %v4565_v10 = vld [vmem:[%s5910_s20 + $0x190] sm:$0xff] }
 0x63c   : > { %v4158_v43 = vsel %vm4150_vm15, %v12138_v16, 0.0  ;;  %v5439_v22 = vpack.c.bf16 %v4566_v21, %v4565_v10  ;;  %v4506_v10 = vld [vmem:[#allocation9 + $0x18] sm:$0xff] }
 0x63d   : > { %v4577_v47 = vld [vmem:[%s5910_s20 + $0x1f0] sm:$0xff] }
 0x63e   : > { %v4140_v29 = vpop.permute.xlu1 %4139 }
 0x63f   : > { %vm4152_vm12 = vcmp.eq.s32.totalorder %v4140_v29, 1 }
 0x640   : > { %v4160_v14 = vsel %vm4152_vm12, %v12058_v30, 0.0  ;;  %vm12221_vm12 = vcmask 1046528  }
 0x641   : > { %v4164_v0 = vmax.f32 %v4156_v17, %v4160_v14  ;;  %v4101_v14 = vrot.slane %v4100_v9, 4  ;;  %v4270_v17 = vld [vmem:[#allocation8 + $0x38] sm:$0xff] }
 0x642   : > { %v4146_v62 = vpop.permute.xlu1 %4145 }
 0x643   : > { %vm4154_vm8 = vcmp.eq.s32.totalorder %v4146_v62, 1  ;;  %v4167_v8 = vmax.f32 %v4163_v40, %v4164_v0  ;;  %v12219_v0 = vld [vmem:[#allocation25_spill] sm:$0xff] }
 0x644   : > { %v4162_v56 = vsel %vm4154_vm8, %v12136_v5, 0.0  ;;  %v4552_v40 = vld [vmem:[%s5910_s20 + $0x128] sm:$0xff] }
 0x645   : > { %v4166_v42 = vmax.f32 %v4158_v43, %v4162_v56  ;;  %v12218_v43 = vld [vmem:[#allocation26_spill] sm:$0xff]  ;;  %v5445_v41 = vpack.c.bf16 %v4552_v40, %v4551_v25  ;;  %v4559_v40 = vld [vmem:[%s5910_s20 + $0x160] sm:$0xff] }
 0x646   : > { %v10427_v24 = vpop.permute.xlu1 %4196 }
 0x647   : > { %v4168_v34 = vmax.f32 %v4165_v39, %v4166_v42  ;;  %vm4217_vm13 = vcmp.eq.s32.totalorder %v10427_v24, 1  ;;  %v4034_v24 = vrot.slane %v4033_v57, 2 }
 0x649   : > { %v1342_v36 = vpop.f32.mrb[12].mxu0  ;;  %v4169_v60 = vmax.f32 %v4167_v8, %v4168_v34  ;;  %v5323_v35 = vpop.f32.mrb[16].mxu1  ;;  %v4102_v8 = vmax.f32 %v4100_v9, %v4101_v14  ;;  %v4224_v9 = vsel %vm4216_vm9, %v12115_v27, 0.0  ;;  %v4571_v27 = vld [vmem:[%s5910_s20 + $0x1c0] sm:$0xff]  ;;  %v4035_v58 = vmax.f32 %v4033_v57, %v4034_v24  ;;  %v4560_v57 = vld [vmem:[%s5910_s20 + $0x168] sm:$0xff] }
 0x64a   : > { %v10434_v15 = vpop.permute.xlu1 %4202  ;;  %v1361_v61 = vmul.f32 %v12215_v49, %v1342_v36  ;;  %v5311_v29 = vpop.f32.mrb[13].mxu0  ;;  %v10442_v50 = vmul.f32 %v5323_v35, %v12216_v31  ;;  %v4572_v49 = vld [vmem:[%s5910_s20 + $0x1c8] sm:$0xff]  ;;  %v4573_v31 = vld [vmem:[%s5910_s20 + $0x1d0] sm:$0xff] }
 0x64b   : > { %v1345_v59 = vpop.f32.mrb[14].mxu0  ;;  %v1414_v62 = vpop.f32.mrb[17].mxu1  ;;  %v4170_v42 = vrot.slane %v4169_v60, 4  ;;  %vm4219_vm4 = vcmp.eq.s32.totalorder %v10434_v15, 1  ;;  %v4103_v35 = vrot.slane %v4102_v8, 2  ;;  %v4555_v15 = vld [vmem:[%s5910_s20 + $0x140] sm:$0xff] }
 0x64c   : > { %v1362_v11 = vmul.f32 %v12217_v46, %v1345_v59  ;;  %v10448_v56 = vmul.f32 %v12218_v43, %v1414_v62  ;;  %v5324_v51 = vpop.f32.mrb[18].mxu1  ;;  %v5312_v20 = vpop.f32.mrb[15].mxu0  ;;  %4479 = vmatmul.mubr.f32.vlgmr.msra.gmra.mrb[6].mxu1 %v1361_v61  ;;  %v4232_v61 = vmax.f32 %v4224_v9, %v4228_v44  ;;  %v4574_v59 = vld [vmem:[%s5910_s20 + $0x1d8] sm:$0xff]  ;;  %v4557_v43 = vld [vmem:[%s5910_s20 + $0x150] sm:$0xff] }
 0x64d   : > { %v1417_v48 = vpop.f32.mrb[19].mxu1  ;;  %5438 = vmatpush3.bf16.msra.mxu1 %v5437_v54  ;;  %4483 = vmatprep.mubr.f32.mxu1 %v4270_v17  ;;  %v4171_v21 = vmax.f32 %v4169_v60, %v4170_v42  ;;  %v4554_v60 = vld [vmem:[%s5910_s20 + $0x138] sm:$0xff]  ;;  %v4227_v54 = vsel %vm4219_vm4, %v12138_v16, 0.0  ;;  %v5451_v16 = vpack.c.bf16 %v4572_v49, %v4571_v27  ;;  %v4104_v62 = vmax.f32 %v4102_v8, %v4103_v35  ;;  %v4575_v17 = vld [vmem:[%s5910_s20 + $0x1e0] sm:$0xff]  ;;  %v4576_v42 = vld [vmem:[%s5910_s20 + $0x1e8] sm:$0xff] }
 0x64e   : > { %v4209_v39 = vpop.permute.xlu1 %4208  ;;  %v10452_v13 = vmul.f32 %v12219_v0, %v1417_v48  ;;  %5440 = vmatprep.subr.bf16.mxu1 %v5439_v22  ;;  %v4558_v51 = vld [vmem:[%s5910_s20 + $0x158] sm:$0xff]  ;;  %v4036_v20 = vrot.slane %v4035_v58, 1  ;;  %v5459_v25 = vpack.c.bf16 %v4576_v42, %v4575_v17 }
 0x64f   : > { %vm4221_vm14 = vcmp.eq.s32.totalorder %v4209_v39, 1  ;;  %v4172_v3 = vrot.slane %v4171_v21, 2  ;;  %v4105_v48 = vrot.slane %v4104_v62, 1  ;;  %v5457_v0 = vpack.c.bf16 %v4558_v51, %v4557_v43 }
 0x650   : > { %v4229_v34 = vsel %vm4221_vm14, %v12058_v30, 0.0  ;;  %4484 = vmatmul.mubr.f32.gmra.mrb[20].mxu1 %v1362_v11  ;;  %v4225_v30 = vsel %vm4217_vm13, %v12139_v45, 0.0  ;;  %v4226_v45 = vsel %vm4218_vm6, %v12116_v53, 0.0  ;;  %v5449_v53 = vpack.c.bf16 %v4554_v60, %v4553_v2 }
 0x651   : > { %5442 = vmatpush3.bf16.msra.mxu1 %v5441_v55  ;;  %4727 = vmatprep.mubr.f32.mxu1 %v4506_v10  ;;  %v4233_v36 = vmax.f32 %v4225_v30, %v4229_v34  ;;  %v4234_v29 = vmax.f32 %v4226_v45, %v4230_v18  ;;  %v4173_v23 = vmax.f32 %v4171_v21, %v4172_v3 }
 0x652   : > { %v4215_v37 = vpop.permute.xlu1 %4214  ;;  %5444 = vmatprep.subr.bf16.mxu1 %v5443_v38  ;;  %v5455_v11 = vpack.c.bf16 %v4574_v59, %v4573_v31  ;;  %v4037_v34 = vmax.f32 %v4035_v58, %v4036_v20  ;;  %v4106_v44 = vmax.f32 %v4104_v62, %v4105_v48  ;;  %v5461_v18 = vpack.c.bf16 %v4560_v57, %v4559_v40 }
 0x653   : > { %vm4223_vm2 = vcmp.eq.s32.totalorder %v4215_v37, 1  ;;  %v4236_v12 = vmax.f32 %v4232_v61, %v4233_v36  ;;  %v4174_v55 = vrot.slane %v4173_v23, 1  ;;  %v5463_v30 = vpack.c.bf16 %v4578_v7, %v4577_v47  ;;  %v4561_v37 = vld [vmem:[%s5910_s20 + $0x170] sm:$0xff] }
 0x654   : > { %v4231_v28 = vsel %vm4223_vm2, %v12136_v5, 0.0  ;;  %v4556_v5 = vld [vmem:[%s5910_s20 + $0x148] sm:$0xff]  ;;  %v4248_v9 = vsel %vm12220_vm3, %v10372_v52, %v4037_v34 }
 0x655   : > { %v4235_v22 = vmax.f32 %v4227_v54, %v4231_v28  ;;  %5446 = vmatpush3.bf16.msra.mxu1 %v5445_v41  ;;  %v5453_v14 = vpack.c.bf16 %v4556_v5, %v4555_v15  ;;  %v4175_v10 = vmax.f32 %v4173_v23, %v4174_v55  ;;  %v4562_v41 = vld [vmem:[%s5910_s20 + $0x178] sm:$0xff]  ;;  %v4249_v36 = vsel %vm2008_vm11, %v4248_v9, %v4106_v44  ;;  %s5733_s20 = smov [#allocation15]  }
 0x656   : > { %5448 = vmatprep.subr.bf16.mxu1 %v5447_v4  ;;  %v5465_v60 = vpack.c.bf16 %v4562_v41, %v4561_v37  ;;  %vm12222_vm11 = vcmask 261120  }
 0x657   : > { %v4237_v63 = vmax.f32 %v4234_v29, %v4235_v22  ;;  %v4250_v2 = vsel %vm2010_vm7, %v4249_v36, %v4175_v10  ;;  %vm12223_vm7 = vmmov %vm12222_vm11 }
 0x658   : > { %vm12224_vm0 = vmmov %vm12223_vm7 }
 0x659   : > { %v4238_v6 = vmax.f32 %v4236_v12, %v4237_v63  ;;  %5450 = vmatpush3.bf16.msra.mxu1 %v5449_v53  ;;  %vm12225_vm15 = vmmov %vm12224_vm0 }
 0x65a   : > { %5452 = vmatprep.subr.bf16.mxu1 %v5451_v16  ;;  %vm12226_vm10 = vmmov %vm12224_vm0 }
 0x65b   : > { %v4239_v46 = vrot.slane %v4238_v6, 4  ;;  %vm12227_vm8 = vmmov %vm12224_vm0 }
 0x65c   : > { %vm12228_vm5 = vmmov %vm12224_vm0 }
 0x65d   : > { %v4240_v39 = vmax.f32 %v4238_v6, %v4239_v46  ;;  %5454 = vmatpush3.bf16.msra.mxu1 %v5453_v14  ;;  %vm12229_vm1 = vmmov %vm12224_vm0 }
 0x65e   : > { %5456 = vmatprep.subr.bf16.mxu1 %v5455_v11  ;;  %vm12230_vm13 = vmmov %vm12224_vm0 }
 0x65f   : > { %v4241_v38 = vrot.slane %v4240_v39, 2  ;;  %v4581_v11 = vpop.permute.xlu0 %4580  ;;  %vm12231_vm14 = vmmov %vm12224_vm0 }
 0x660   : > { %vm12232_vm9 = vmmov %vm12224_vm0 }
 0x661   : > { %v4242_v8 = vmax.f32 %v4240_v39, %v4241_v38  ;;  %5458 = vmatpush3.bf16.msra.mxu1 %v5457_v0  ;;  %vm12233_vm6 = vmmov %vm12224_vm0 }
 0x662   : > { %5460 = vmatprep.subr.bf16.mxu1 %v5459_v25 }
 0x663   : > { %v4243_v21 = vrot.slane %v4242_v8, 1 }
 0x665   : > { %v4244_v4 = vmax.f32 %v4242_v8, %v4243_v21  ;;  %5462 = vmatpush3.bf16.msra.mxu1 %v5461_v18 }
 0x666   : > { %5464 = vmatprep.subr.bf16.mxu1 %v5463_v30 }
 0x667   : > { %v4251_v45 = vsel %vm12221_vm12, %v4250_v2, %v4244_v4 }
 0x668   : > { %v4254_v24 = vmax.f32 %v4251_v45, 0.0 }
 0x669   : > { %5466 = vmatpush3.bf16.msra.mxu1 %v5465_v60 }
 0x66c   : > { %4728 = vmatmul.mubr.f32.vlgmr.msra.gmra.mrb[22].mxu1 %v10448_v56 }
 0x66d   : > { %v5125_v54 = vpop.f32.mrb[2].mxu0  ;;  %4732 = vmatprep.mubr.f32.mxu1 %v4253_v19 }
 0x66e   : > { %v5126_v28 = vpop.f32.mrb[3].mxu0 }
 0x66f   : > { %v5127_v27 = vadd.f32 %v5126_v28, %v5125_v54 }
 0x670   : > { %4733 = vmatmul.mubr.f32.gmra.mrb[24].mxu1 %v10452_v13 }
 0x671   : > { %4737 = vmatprep.mubr.f32.mxu1 %v4254_v24  ;;  %v5128_v52 = vpop.f32.mrb[16].mxu0  ;;  %v4406_v33 = vadd.f32 %v5127_v27, %v10379_v26 }
 0x672   : > { %v5129_v49 = vpop.f32.mrb[17].mxu0 }
 0x673   : > { %v5130_v61 = vadd.f32 %v5129_v49, %v5128_v52 }
 0x674   : > { %4738 = vmatmul.mubr.f32.gmra.mrb[26].mxu1 %v10442_v50 }
 0x675   : > { %v4411_v50 = vadd.f32 %v5130_v61, %v10379_v26 }
 0x68d   : > { %v5201_v29 = vpop.f32.mrb[18].mxu0 }
 0x68e   : > { %v5202_v35 = vpop.f32.mrb[19].mxu0 }
 0x68f   : > { %v5203_v22 = vadd.f32 %v5202_v35, %v5201_v29 }
 0x691   : > { %v5204_v3 = vpop.f32.mrb[20].mxu0  ;;  %v4650_v51 = vadd.f32 %v5203_v22, %v4581_v11 }
 0x692   : > { %v5205_v53 = vpop.f32.mrb[21].mxu0 }
 0x693   : > { %v5206_v12 = vadd.f32 %v5205_v53, %v5204_v3 }
 0x695   : > { %v4655_v0 = vadd.f32 %v5206_v12, %v4581_v11 }
 0x6ba   : > { %v5207_v63 = vpop.f32.mrb[22].mxu0 }
 0x6bb   : > { %v5208_v16 = vpop.f32.mrb[23].mxu0 }
 0x6bc   : > { %v5209_v56 = vadd.f32 %v5208_v16, %v5207_v63 }
 0x6be   : > { %v4660_v47 = vadd.f32 %v5209_v56, %v4581_v11 }
 0x71f   : > { %v5163_v19 = vpop.f32.mrb[6].mxu1 }
 0x720   : > { %v5164_v15 = vpop.f32.mrb[7].mxu1 }
 0x721   : > { %v5165_v13 = vadd.f32 %v5164_v15, %v5163_v19 }
 0x723   : > { %v4481_v5 = vadd.f32 %v5165_v13, %v4406_v33  ;;  %v5166_v58 = vpop.f32.mrb[20].mxu1  ;;  %v4780_v33 = vsub.s32 3, %v12214_v32 }
 0x724   : > { %v5167_v31 = vpop.f32.mrb[21].mxu1 }
 0x725   : > { %v4489_v59 = vmax.f32 %v4481_v5, 0.0  ;;  %v5168_v62 = vadd.f32 %v5167_v31, %v5166_v58  ;;  %v4781_v19 = vrot.slane %v10376_v1, %v4780_v33 }
 0x727   : > { %v4486_v6 = vadd.f32 %v5168_v62, %v4411_v50  ;;  %v4746_v23 = vsel %vm12222_vm11, %v4489_v59, 0.0 }
 0x728   : > { %4747 = vadd.xlane.f32.xlu1 %v4746_v23 }
 0x729   : > { %v4490_v14 = vmax.f32 %v4486_v6, 0.0 }
 0x72b   : > { %v4749_v46 = vsel %vm12223_vm7, %v4490_v14, 0.0 }
 0x72c   : > { %4750 = vadd.xlane.f32.xlu0 %v4749_v46 }
 0x73f   : > { %v5242_v43 = vpop.f32.mrb[22].mxu1 }
 0x740   : > { %v5243_v20 = vpop.f32.mrb[23].mxu1 }
 0x741   : > { %v5244_v17 = vadd.f32 %v5243_v20, %v5242_v43 }
 0x743   : > { %v4730_v42 = vadd.f32 %v5244_v17, %v4650_v51  ;;  %v5245_v48 = vpop.f32.mrb[24].mxu1 }
 0x744   : > { %v5246_v39 = vpop.f32.mrb[25].mxu1 }
 0x745   : > { %v4743_v55 = vmax.f32 %v4730_v42, 0.0  ;;  %v5247_v38 = vadd.f32 %v5246_v39, %v5245_v48 }
 0x747   : > { %v4735_v25 = vadd.f32 %v5247_v38, %v4655_v0  ;;  %v5248_v40 = vpop.f32.mrb[26].mxu1  ;;  %v4786_v57 = vsel %vm12224_vm0, %v4743_v55, 0.0 }
 0x748   : > { %4787 = vadd.xlane.f32.xlu0 %v4786_v57  ;;  %v5249_v34 = vpop.f32.mrb[27].mxu1 }
 0x749   : > { %v4744_v7 = vmax.f32 %v4735_v25, 0.0  ;;  %v5250_v44 = vadd.f32 %v5249_v34, %v5248_v40 }
 0x74b   : > { %v4740_v8 = vadd.f32 %v5250_v44, %v4660_v47  ;;  %v4789_v10 = vsel %vm12225_vm15, %v4744_v7, 0.0 }
 0x74c   : > { %4790 = vadd.xlane.f32.xlu1 %v4789_v10 }
 0x74d   : > { %v4745_v18 = vmax.f32 %v4740_v8, 0.0 }
 0x74f   : > { %v4792_v21 = vsel %vm12226_vm10, %v4745_v18, 0.0 }
 0x750   : > { %4793 = vadd.xlane.f32.xlu0 %v4792_v21 }
 0x7b5   : > { %v4748_v30 = vpop.xlane.xlu1 %4747 }
 0x7b6   : > { %v4753_v37 = vmul.f32 0.03125, %v4748_v30 }
 0x7b8   : > { %v4755_v41 = vsub.f32 %v4489_v59, %v4753_v37 }
 0x7b9   : > { %v4751_v9 = vpop.xlane.xlu0 %4750 }
 0x7ba   : > { %v4754_v36 = vmul.f32 0.03125, %v4751_v9  ;;  %v4757_v4 = vmul.f32 %v4755_v41, %v4755_v41 }
 0x7bc   : > { %v4756_v2 = vsub.f32 %v4490_v14, %v4754_v36  ;;  %v4759_v60 = vsel %vm12227_vm8, %v4757_v4, 0.0 }
 0x7bd   : > { %4760 = vadd.xlane.f32.xlu1 %v4759_v60 }
 0x7be   : > { %v4758_v45 = vmul.f32 %v4756_v2, %v4756_v2 }
 0x7c0   : > { %v4762_v24 = vsel %vm12228_vm5, %v4758_v45, 0.0 }
 0x7c1   : > { %4763 = vadd.xlane.f32.xlu0 %v4762_v24 }
 0x7d5   : > { %v4788_v54 = vpop.xlane.xlu0 %4787 }
 0x7d6   : > { %v4795_v28 = vmul.f32 0.03125, %v4788_v54 }
 0x7d8   : > { %v10518_v27 = vsub.f32 %v4743_v55, %v4795_v28 }
 0x7d9   : > { %v4791_v52 = vpop.xlane.xlu1 %4790 }
 0x7da   : > { %v4796_v49 = vmul.f32 0.03125, %v4791_v52  ;;  %v4801_v61 = vmul.f32 %v10518_v27, %v10518_v27 }
 0x7dc   : > { %v10522_v29 = vsub.f32 %v4744_v7, %v4796_v49  ;;  %v4804_v35 = vsel %vm12229_vm1, %v4801_v61, 0.0 }
 0x7dd   : > { %4805 = vadd.xlane.f32.xlu1 %v4804_v35  ;;  %v4794_v53 = vpop.xlane.xlu0 %4793 }
 0x7de   : > { %v4802_v22 = vmul.f32 %v10522_v29, %v10522_v29  ;;  %v4797_v12 = vmul.f32 0.03125, %v4794_v53 }
 0x7e0   : > { %v4807_v3 = vsel %vm12230_vm13, %v4802_v22, 0.0  ;;  %v10531_v63 = vsub.f32 %v4745_v18, %v4797_v12 }
 0x7e1   : > { %4808 = vadd.xlane.f32.xlu0 %v4807_v3 }
 0x7e2   : > { %v4803_v16 = vmul.f32 %v10531_v63, %v10531_v63 }
 0x7e4   : > { %v4810_v56 = vsel %vm12231_vm14, %v4803_v16, 0.0 }
 0x7ee   : > { %4825 = vrot.lane.b32.xlu1 %v10379_v26, %s5732_s16 }
 0x7f7   : > { %4773 = vrot.lane.b32.xlu0 %v10379_v26, %s5730_s15  ;;  %s4847_s15 = sshll.u32 %s5733_s20, 4  ;;  %s4848_s15 = int_to_ptr.vmem [resolvable:$true] %s4847_s15 }
 0x7f8   : > { %s5644_s14 = scalar_lea.vmem %s4848_s15, 256  ;;  %p5651_p0 = scmp.lt.s32.totalorder %s4848_s15, %s4848_s15 }
 0x7f9   : > { %p5645_p11 = scmp.ne.s32.totalorder %s4848_s15, %s5644_s14  ;;  %p5652_p1 = scmp.lt.s32.totalorder %s5644_s14, %s5644_s14 }
 0x7fb   : > { %p5646_p12 = pnand %p5645_p11, %p5495_p10  ;;  %p5653_p5 = por %p5652_p1, %p5651_p0 }
 0x7fd   : > { %p5647_p13 = pneg %p5646_p12 }
 0x7ff   : > { %p5654_p7 = pnand %p5653_p5, %p5647_p13 }
 0x812   : > { %4811 = vadd.xlane.f32.xlu1 %v4810_v56 }
 0x823   : > { %4832 = vrot.lane.b32.xlu1 %v4781_v19, %s5731_s23 }
 0x84a   : > { %v4761_v15 = vpop.xlane.xlu1 %4760 }
 0x84b   : > { %v4765_v5 = vmul.f32 0.03125, %v4761_v15 }
 0x84d   : > { %v4767_v50 = vadd.f32 1e-05, %v4765_v5 }
 0x84e   : > { %v4764_v13 = vpop.xlane.xlu0 %4763 }
 0x84f   : > { %v4766_v26 = vmul.f32 0.03125, %v4764_v13  ;;  %5556 = vrsqrt.f32 %v4767_v50 }
 0x851   : > { %v4768_v58 = vadd.f32 1e-05, %v4766_v26 }
 0x853   : > { %5558 = vrsqrt.f32 %v4768_v58 }
 0x859   : > { %v5557_v31 = vpop.eup %5556 }
 0x85a   : > { %v4771_v23 = vmul.f32 %v5557_v31, %v4755_v41 }
 0x85d   : > { %v5559_v59 = vpop.eup %5558 }
 0x85e   : > { %v4772_v6 = vmul.f32 %v5559_v59, %v4756_v2 }
 0x86e   : > { %v4809_v62 = vpop.xlane.xlu0 %4808 }
 0x872   : > { %v4774_v32 = vpop.permute.xlu0 %4773 }
 0x873   : > { %v4776_v1 = vmul.f32 %v4774_v32, %v4771_v23  ;;  %v4777_v14 = vmul.f32 %v4774_v32, %v4772_v6 }
 0x875   : > { %v4782_v46 = vadd.f32 %v4781_v19, %v4776_v1  ;;  %v4783_v11 = vadd.f32 %v4781_v19, %v4777_v14 }
 0x877   : > { %4784 = vst.msk [vmem:[#allocation15] sm:$0xff] %vm12232_vm9, %v4782_v46 }
 0x878   : > { %4785 = vst.msk [vmem:[#allocation15 + $0x8] sm:$0xff] %vm12233_vm6, %v4783_v11 }
 0x879   : > { %5657 = shalt.err (!%p5654_p7)
}
 0x87a   : > { %s5658_s18 = scalar_lea.hbm %s10612_s11, 256 }
 0x87b   : > { %p5659_p2 = scmp.ne.s32.totalorder %s10612_s11, %s5658_s18  ;;  %p5664_p4 = scmp.lt.u32.totalorder %s5658_s18, %s10612_s11 }
 0x87d   : > { %p5660_p8 = pnand %p5659_p2, %p5495_p10 }
 0x87f   : > { %p5661_p3 = pneg %p5660_p8 }
 0x881   : > { %p5666_p9 = pnand %p5664_p4, %p5661_p3 }
 0x883   : > { %5669 = shalt.err (!%p5666_p9)
}
 0x884   : > { %s5734_s0 = smov 128   ;;  %s5735_s26 = smov 8   ;;  %v4806_v43 = vpop.xlane.xlu1 %4805  ;;  %v4814_v20 = vmul.f32 0.03125, %v4809_v62  ;;  %vm12234_vm4 = vmmov %vm12224_vm0 }
 0x885   : > { %5477 = dma.vmem_to_hbm [thread:$0]  (%p5495_p10), %s4848_s15, 256, %s10612_s11, [#allocation12], %s5734_s0, %s5734_s0, %s5735_s26   ;;  %v4813_v51 = vmul.f32 0.03125, %v4806_v43  ;;  %vm12235_vm2 = vmmov %vm12224_vm0 }
 0x886   : > { %v4817_v42 = vadd.f32 1e-05, %v4814_v20  ;;  %s5736_s30 = smov [#allocation16]   ;;  %vm12236_vm3 = vmmov %vm12224_vm0 }
 0x887   : > { %v4816_v17 = vadd.f32 1e-05, %v4813_v51  ;;  %s4860_s23 = sshll.u32 %s5736_s30, 4  ;;  %s4861_s23 = int_to_ptr.vmem [resolvable:$true] %s4860_s23 }
 0x888   : > { %v4826_v55 = vpop.permute.xlu1 %4825  ;;  %s5670_s16 = scalar_lea.vmem %s4861_s23, 384  ;;  %p5677_p13 = scmp.lt.s32.totalorder %s4861_s23, %s4861_s23 }
 0x889   : > { %5560 = vrsqrt.f32 %v4816_v17  ;;  %p5671_p6 = scmp.ne.s32.totalorder %s4861_s23, %s5670_s16  ;;  %p5678_p0 = scmp.lt.s32.totalorder %s5670_s16, %s5670_s16 }
 0x88a   : > { %5562 = vrsqrt.f32 %v4817_v42 }
 0x88b   : > { %p5672_p11 = pnand %p5671_p6, %p5495_p10  ;;  %p5679_p1 = por %p5678_p0, %p5677_p13 }
 0x88d   : > { %p5673_p12 = pneg %p5672_p11 }
 0x88f   : > { %p5680_p5 = pnand %p5679_p1, %p5673_p12 }
 0x893   : > { %v5561_v48 = vpop.eup %5560 }
 0x894   : > { %v5563_v39 = vpop.eup %5562  ;;  %v4822_v0 = vmul.f32 %v5561_v48, %v10518_v27 }
 0x895   : > { %v4823_v38 = vmul.f32 %v5563_v39, %v10522_v29 }
 0x896   : > { %v4828_v57 = vmul.f32 %v4826_v55, %v4822_v0 }
 0x897   : > { %v4829_v34 = vmul.f32 %v4826_v55, %v4823_v38 }
 0x89f   : > { %v4812_v25 = vpop.xlane.xlu1 %4811 }
 0x8a0   : > { %v4815_v40 = vmul.f32 0.03125, %v4812_v25 }
 0x8a2   : > { %v4818_v47 = vadd.f32 1e-05, %v4815_v40 }
 0x8a3   : > { %v4833_v7 = vpop.permute.xlu1 %4832 }
 0x8a4   : > { %5564 = vrsqrt.f32 %v4818_v47  ;;  %v4835_v44 = vadd.f32 %v4833_v7, %v4828_v57  ;;  %v4836_v8 = vadd.f32 %v4833_v7, %v4829_v34 }
 0x8a6   : > { %4838 = vst.msk [vmem:[#allocation16] sm:$0xff] %vm12234_vm4, %v4835_v44 }
 0x8a7   : > { %4839 = vst.msk [vmem:[#allocation16 + $0x8] sm:$0xff] %vm12235_vm2, %v4836_v8 }
 0x8ae   : > { %v5565_v10 = vpop.eup %5564 }
 0x8af   : > { %v4824_v18 = vmul.f32 %v5565_v10, %v10531_v63 }
 0x8b1   : > { %v4830_v21 = vmul.f32 %v4826_v55, %v4824_v18 }
 0x8b3   : > { %v4837_v30 = vadd.f32 %v4833_v7, %v4830_v21 }
 0x8b5   : > { %4840 = vst.msk [vmem:[#allocation16 + $0x10] sm:$0xff] %vm12236_vm3, %v4837_v30 }
 0x8b6   : > { %5683 = shalt.err (!%p5680_p5)
}
 0x8b7   : > { %s5684_s14 = scalar_lea.hbm %s10613_s12, 384 }
 0x8b8   : > { %p5685_p7 = scmp.ne.s32.totalorder %s10613_s12, %s5684_s14  ;;  %p5690_p3 = scmp.lt.u32.totalorder %s5684_s14, %s10613_s12 }
 0x8ba   : > { %p5686_p2 = pnand %p5685_p7, %p5495_p10 }
 0x8bc   : > { %p5687_p8 = pneg %p5686_p2 }
 0x8be   : > { %p5692_p4 = pnand %p5690_p3, %p5687_p8 }
 0x8c0   : > { %5695 = shalt.err (!%p5692_p4)
}
 0x8c1   : > { %5479 = dma.vmem_to_hbm [thread:$0]  (%p5495_p10), %s4861_s23, 384, %s10613_s12, [#allocation17], %s5734_s0, %s5734_s0, %s5735_s26  }
 0x8c2   : > { %5709 = dma.done.wait (%p5495_p10), [#allocation12], 256  }
 0x8c3   : > { %5711 = vsyncadd (%p5495_p10), [#allocation12], 4294967040 }
 0x8c4   : > { %5713 = dma.done.wait (%p5495_p10), [#allocation17], 384  }
 0x8c5   : > { %5715 = vsyncadd (%p5495_p10), [#allocation17], 4294966912 }
 0x8c6 PF: > { %s27_s21 = sadd.s32 1, %s5718_s21  }
 0x8c7   : > { %p24_p9 = scmp.ge.s32.totalorder %s27_s21, 5  }
 0x8c9   :  { %26 = sbr.rel (!%p24_p9) target bundleno = 6 (0x6), region = 124 }
 0x8d0   :  { %4880 = vsyncpa [#allocation11], 1 }
 0x8d1   :  { %4882 = vsyncpa [#allocation11 + $0x1], 1 }
 0x8d2   :  { %4883 = vsyncpa [#allocation14], 1 }
 0x8d3   :  { %4884 = vsyncpa [#allocation12], 1 }
 0x8d4   :  { %4886 = vsyncpa [#allocation12 + $0x1], 1 }
 0x8d5   :  { %4887 = vsyncpa [#allocation17], 1 }

</bundles_post_ra>
